<compile_context>
chip_gen: v6e
topology: v6e:2x2x1
jax: 0.10.0
libtpu: 0.0.40
codegen_flags: <defaults>
</compile_context>

<pallas_src>
import functools

import jax
import jax.numpy as jnp
import numpy as np
from jax.experimental import pallas as pl
from jax.experimental.pallas import tpu as pltpu

LRELU_SLOPE = 0.1  # modules.LRELU_SLOPE

# Small-but-representative Generator config for the demo run.
CONFIG = dict(
    initial_channel=32,
    resblock="1",
    resblock_kernel_sizes=(3, 5),
    resblock_dilation_sizes=((1, 3), (1, 3)),
    upsample_rates=(4, 4),
    upsample_initial_channel=128,
    upsample_kernel_sizes=(8, 8),
    gin_channels=0,
)


def _get_padding(kernel_size, dilation=1):
    return (kernel_size * dilation - dilation) // 2


def _round_up(x, m):
    return ((x + m - 1) // m) * m


# --------------------------------------------------------------------------
# Pallas kernel: stride-1 (possibly dilated) Conv1d, tap-by-tap matmuls.
# --------------------------------------------------------------------------
def _conv1d_tap_kernel(x_ref, w_ref, b_ref, o_ref, *, dilation, t_tile, n_taps,
                       pre_slope):
    """One (time-tile, tap) step.

    x_ref: (B, T_in_pad, Cin)  whole padded input (VMEM resident, one DMA)
    w_ref: (K, Cin, Cout)      whole per-layer weight stack (one DMA)
    b_ref: (1, Cout)           bias
    o_ref: (B, t_tile, Cout)   f32 output tile -- doubles as the accumulator
    """
    t = pl.program_id(0)
    k = pl.program_id(1)

    @pl.when(k == 0)
    def _():
        o_ref[...] = jnp.zeros_like(o_ref)

    start = t * t_tile + k * dilation
    xs = x_ref[:, pl.ds(start, t_tile), :]            # (B, t_tile, Cin)
    if pre_slope is not None:                         # fused pre-activation
        xs = jnp.where(xs >= 0, xs, pre_slope * xs)

    # (B, t_tile, Cin) x (Cin, Cout) -> (B, t_tile, Cout) on the MXU,
    # accumulated directly into the (resident) output block.
    o_ref[...] += jax.lax.dot_general(
        xs, w_ref[k],
        dimension_numbers=(((2,), (0,)), ((), ())),
        preferred_element_type=jnp.float32)

    @pl.when(k == n_taps - 1)
    def _():
        o_ref[...] = o_ref[...] + b_ref[0]


def conv1d_pallas(x_btc, w_oik, bias, *, padding, dilation=1, pre_slope=None,
                  t_tile_max=512):
    """Stride-1 dilated Conv1d (+ optional fused pre-leaky-relu), channels-last.

    x_btc : (B, T, Cin) f32
    w_oik : (Cout, Cin, K)  -- PyTorch Conv1d weight layout
    bias  : (Cout,)
    returns (B, T_out, Cout) f32, T_out = T + 2*padding - dilation*(K-1)
    """
    B, T, Cin = x_btc.shape
    Cout, Cin_w, K = w_oik.shape
    assert Cin_w == Cin and bias is not None
    T_out = T + 2 * padding - dilation * (K - 1)
    assert T_out > 0

    # Time tiling of the output (parallel grid axis, lane-dense over Cout).
    if T_out <= t_tile_max:
        t_tile = _round_up(T_out, 8)
        n_tiles = 1
    else:
        t_tile = t_tile_max
        n_tiles = -(-T_out // t_tile)
    T_out_pad = n_tiles * t_tile

    # Single padded input; taps are sliced in-kernel (no im2col in HBM).
    T_in_need = T_out_pad + dilation * (K - 1)
    right = T_in_need - T - padding
    xp = jnp.pad(x_btc, ((0, 0), (padding, right), (0, 0)))

    w_kic = jnp.transpose(w_oik, (2, 1, 0))            # (K, Cin, Cout)
    b2 = bias.reshape(1, Cout)

    kernel = functools.partial(_conv1d_tap_kernel, dilation=dilation,
                               t_tile=t_tile, n_taps=K, pre_slope=pre_slope)

    out = pl.pallas_call(
        kernel,
        out_shape=jax.ShapeDtypeStruct((B, T_out_pad, Cout), jnp.float32),
        grid_spec=pltpu.PrefetchScalarGridSpec(
            num_scalar_prefetch=0,
            grid=(n_tiles, K),                          # K innermost = reduction
            in_specs=[
                # whole padded input: constant block index -> single DMA
                pl.BlockSpec((B, T_in_need, Cin), lambda t, k: (0, 0, 0)),
                # whole weight stack preloaded once
                pl.BlockSpec((K, Cin, Cout), lambda t, k: (0, 0, 0)),
                pl.BlockSpec((1, Cout), lambda t, k: (0, 0)),
            ],
            out_specs=pl.BlockSpec((B, t_tile, Cout), lambda t, k: (0, t, 0)),
        ),
        compiler_params=pltpu.CompilerParams(
            dimension_semantics=("parallel", "arbitrary"),
            vmem_limit_bytes=32 * 1024 * 1024),
    )(xp, w_kic, b2)

    if T_out_pad != T_out:
        out = out[:, :T_out, :]
    return out


def conv_transpose1d_pallas(x_btc, w_iok, bias, *, stride, padding,
                            pre_slope=None):
    """ConvTranspose1d (PyTorch semantics, output_padding=0), channels-last.

    Implemented as time zero-stuffing + the stride-1 Pallas conv with the
    kernel flipped/transposed; exact because lrelu(0) = 0.
    """
    B, T, Cin = x_btc.shape
    Cin_w, Cout, K = w_iok.shape
    assert Cin_w == Cin
    if stride > 1:
        xz = jnp.zeros((B, T, stride, Cin), x_btc.dtype)
        xz = xz.at[:, :, 0, :].set(x_btc)
        xz = xz.reshape(B, T * stride, Cin)[:, : (T - 1) * stride + 1, :]
    else:
        xz = x_btc
    # TODO(synk): a stride-phase decomposition would avoid the (stride-1)/stride
    #             zero-MACs of the stuffed input; zero-stuffing keeps a single
    #             kernel and is numerically exact.
    w_conv = jnp.flip(jnp.transpose(w_iok, (1, 0, 2)), axis=2)  # (Cout, Cin, K)
    return conv1d_pallas(xz, w_conv, bias, padding=K - 1 - padding,
                         dilation=1, pre_slope=pre_slope)


# --------------------------------------------------------------------------
# Module forward
# --------------------------------------------------------------------------
def _resblock1_forward(rb, x, kernel_size, dilations):
    for (w1, b1), (w2, b2), d in zip(rb["convs1"], rb["convs2"], dilations):
        xt = conv1d_pallas(x, w1, b1, padding=_get_padding(kernel_size, d),
                           dilation=d, pre_slope=LRELU_SLOPE)
        xt = conv1d_pallas(xt, w2, b2, padding=_get_padding(kernel_size, 1),
                           dilation=1, pre_slope=LRELU_SLOPE)
        x = xt + x
    return x


def _conv_post_tanh(x_btc, w_post):
    """leaky_relu(0.01) + Conv1d(ch->1, K=7, pad=3, no bias) + tanh, plain JAX.

    Kept out of Pallas per perf review: a 1-lane-wide output block would be
    fully masked stores and the FLOPs are negligible.
    """
    B, T, C = x_btc.shape
    K = w_post.shape[-1]
    pad = (K - 1) // 2
    xa = jnp.where(x_btc >= 0, x_btc, 0.01 * x_btc)     # F.leaky_relu default
    xp = jnp.pad(xa, ((0, 0), (pad, pad), (0, 0)))
    y = jnp.zeros((B, T), jnp.float32)
    for k in range(K):
        y = y + jnp.einsum("btc,c->bt", xp[:, k:k + T, :], w_post[0, :, k])
    return jnp.tanh(y)[:, None, :]                       # (B, 1, T) NCT


def generator_forward(params, x_nct, g=None, cfg=CONFIG):
    """x_nct: (B, initial_channel, T) f32  ->  (B, 1, T * prod(upsample_rates))."""
    # TODO(synk): gin_channels>0 conditioning (self.cond 1x1 conv) not wired;
    #             demo config uses gin_channels=0 and g=None.
    assert g is None
    # TODO(synk): ResBlock2 (resblock='2') variant not wired; config uses ResBlock1.
    nk = len(cfg["resblock_kernel_sizes"])

    x = jnp.transpose(x_nct, (0, 2, 1))                  # NCT -> NTC
    w, b = params["conv_pre"]
    x = conv1d_pallas(x, w, b, padding=3)                # conv_pre (no pre-act)

    for i, (u, ku) in enumerate(zip(cfg["upsample_rates"],
                                    cfg["upsample_kernel_sizes"])):
        wu, bu = params["ups"][i]
        # F.leaky_relu(x, LRELU_SLOPE) before ups[i] is fused as pre_slope.
        x = conv_transpose1d_pallas(x, wu, bu, stride=u,
                                    padding=(ku - u) // 2,
                                    pre_slope=LRELU_SLOPE)
        xs = None
        for j in range(nk):
            rb = params["resblocks"][i * nk + j]
            r = _resblock1_forward(rb, x, cfg["resblock_kernel_sizes"][j],
                                   cfg["resblock_dilation_sizes"][j])
            xs = r if xs is None else xs + r
        x = xs / float(nk)

    return _conv_post_tanh(x, params["conv_post"])       # (B, 1, T_out) NCT


# --------------------------------------------------------------------------
# Synthetic parameter init (weight_norm is a reparameterization; the effective
# conv weight is just the tensor below).
# --------------------------------------------------------------------------
def _conv_init(key, cout, cin, k, bias=True):
    kw, kb = jax.random.split(key)
    w = jax.random.normal(kw, (cout, cin, k), jnp.float32) / np.sqrt(cin * k)
    b = 0.01 * jax.random.normal(kb, (cout,), jnp.float32) if bias else None
    return w, b


def _convt_init(key, cin, cout, k):
    kw, kb = jax.random.split(key)
    w = jax.random.normal(kw, (cin, cout, k), jnp.float32) / np.sqrt(cin * k)
    b = 0.01 * jax.random.normal(kb, (cout,), jnp.float32)
    return w, b


def init_params(key, cfg=CONFIG):
    n_up = len(cfg["upsample_rates"])
    nk = len(cfg["resblock_kernel_sizes"])
    uic = cfg["upsample_initial_channel"]
    keys = iter(jax.random.split(key, 2 + n_up + n_up * nk))

    params = {}
    params["conv_pre"] = _conv_init(next(keys), uic, cfg["initial_channel"], 7)

    params["ups"] = []
    for i, (u, k) in enumerate(zip(cfg["upsample_rates"],
                                   cfg["upsample_kernel_sizes"])):
        params["ups"].append(_convt_init(next(keys), uic // (2 ** i),
                                         uic // (2 ** (i + 1)), k))

    params["resblocks"] = []
    for i in range(n_up):
        ch = uic // (2 ** (i + 1))
        for ksz, ds in zip(cfg["resblock_kernel_sizes"],
                           cfg["resblock_dilation_sizes"]):
            rk = jax.random.split(next(keys), 2 * len(ds))
            convs1 = [_conv_init(rk[m], ch, ch, ksz) for m in range(len(ds))]
            convs2 = [_conv_init(rk[len(ds) + m], ch, ch, ksz)
                      for m in range(len(ds))]
            params["resblocks"].append({"convs1": convs1, "convs2": convs2})

    ch = uic // (2 ** n_up)
    w_post, _ = _conv_init(next(keys), 1, ch, 7, bias=False)
    params["conv_post"] = w_post
    return params


# --------------------------------------------------------------------------
# Pure-JAX reference (lax.conv) used only to validate the Pallas path.
# --------------------------------------------------------------------------
def reference_forward(params, x_nct, cfg=CONFIG):
    P = jax.lax.Precision.HIGHEST

    def conv(x, w, b, pad, dil=1):
        y = jax.lax.conv_general_dilated(
            x, w, window_strides=(1,), padding=[(pad, pad)], rhs_dilation=(dil,),
            dimension_numbers=("NCH", "OIH", "NCH"), precision=P)
        return y if b is None else y + b[None, :, None]

    def conv_t(x, w_iok, b, stride, pad):
        K = w_iok.shape[-1]
        w = jnp.flip(jnp.transpose(w_iok, (1, 0, 2)), axis=2)
        y = jax.lax.conv_general_dilated(
            x, w, window_strides=(1,), padding=[(K - 1 - pad, K - 1 - pad)],
            lhs_dilation=(stride,), dimension_numbers=("NCH", "OIH", "NCH"),
            precision=P)
        return y + b[None, :, None]

    def lrelu(x, s):
        return jnp.where(x >= 0, x, s * x)

    nk = len(cfg["resblock_kernel_sizes"])
    w, b = params["conv_pre"]
    x = conv(x_nct, w, b, pad=3)
    for i, (u, ku) in enumerate(zip(cfg["upsample_rates"],
                                    cfg["upsample_kernel_sizes"])):
        x = lrelu(x, LRELU_SLOPE)
        wu, bu = params["ups"][i]
        x = conv_t(x, wu, bu, u, (ku - u) // 2)
        xs = None
        for j in range(nk):
            rb = params["resblocks"][i * nk + j]
            ksz = cfg["resblock_kernel_sizes"][j]
            r = x
            for (w1, b1), (w2, b2), d in zip(rb["convs1"], rb["convs2"],
                                             cfg["resblock_dilation_sizes"][j]):
                xt = lrelu(r, LRELU_SLOPE)
                xt = conv(xt, w1, b1, pad=_get_padding(ksz, d), dil=d)
                xt = lrelu(xt, LRELU_SLOPE)
                xt = conv(xt, w2, b2, pad=_get_padding(ksz, 1), dil=1)
                r = xt + r
            xs = r if xs is None else xs + r
        x = xs / float(nk)
    x = lrelu(x, 0.01)                                  # F.leaky_relu default
    x = conv(x, params["conv_post"], None, pad=3)
    return jnp.tanh(x)


if __name__ == "__main__":
    key = jax.random.PRNGKey(0)
    kp, kx = jax.random.split(key)
    params = init_params(kp)

    # Small input consistent with the module: (B=2, initial_channel=32, T=16);
    # two 4x upsample stages -> output (2, 1, 256).
    x = jax.random.normal(kx, (2, CONFIG["initial_channel"], 16),
                          dtype=jnp.float32)

    y = jax.jit(generator_forward)(params, x)
    y = jax.block_until_ready(y)
    assert y.shape == (2, 1, 16 * 4 * 4)

    y_ref = jax.block_until_ready(reference_forward(params, x))
    np.testing.assert_allclose(np.asarray(y), np.asarray(y_ref),
                               rtol=2e-2, atol=2e-2)

    print("KERNEL_OK")
</pallas_src>

<mosaic_0001>
module attributes {stable_mosaic.version = 11 : i64} {
  func.func @_conv1d_tap_kernel(%arg0: i32, %arg1: i32, %arg2: memref<2x22x32xf32, #tpu.memory_space<vmem>>, %arg3: memref<7x32x128xf32, #tpu.memory_space<vmem>>, %arg4: memref<1x128xf32, #tpu.memory_space<vmem>>, %arg5: memref<2x16x128xf32, #tpu.memory_space<vmem>>) attributes {dimension_semantics = [#tpu.dimension_semantics<parallel>, #tpu.dimension_semantics<arbitrary>], iteration_bounds = array<i64: 1, 7>, scalar_prefetch = 0 : i64, scratch_operands = 0 : i64, tpu.core_type = #tpu.core_type<tc>, window_params = [{pipeline_mode = #tpu.pipeline_mode<synchronous>, transform_indices = @transform_0, window_bounds = array<i64: 2, 22, 32>}, {pipeline_mode = #tpu.pipeline_mode<synchronous>, transform_indices = @transform_1, window_bounds = array<i64: 7, 32, 128>}, {pipeline_mode = #tpu.pipeline_mode<synchronous>, transform_indices = @transform_2, window_bounds = array<i64: 1, 128>}, {transform_indices = @transform_3, window_bounds = array<i64: 2, 16, 128>}]} {
    %c0_i32 = arith.constant 0 : i32
    %0 = arith.cmpi eq, %arg1, %c0_i32 : i32
    %1 = arith.extui %0 : i1 to i32
    %c0_i32_0 = arith.constant 0 : i32
    %2 = arith.cmpi ne, %1, %c0_i32_0 : i32
    scf.if %2 {
      %cst_11 = arith.constant 0.000000e+00 : f32
      %18 = vector.broadcast %cst_11 : f32 to vector<2x16x128xf32>
      %c0_12 = arith.constant 0 : index
      %c0_13 = arith.constant 0 : index
      %c0_14 = arith.constant 0 : index
      %19 = vector.load %arg5[%c0_12, %c0_13, %c0_14] : memref<2x16x128xf32, #tpu.memory_space<vmem>>, vector<2x16x128xf32>
      tpu.vector_store %arg5[%c0_12, %c0_13, %c0_14], %18 {strides = array<i32>} : memref<2x16x128xf32, #tpu.memory_space<vmem>>, vector<2x16x128xf32>,
    } else {
    }
    %c16_i32 = arith.constant 16 : i32
    %3 = arith.muli %arg0, %c16_i32 : i32
    %c1_i32 = arith.constant 1 : i32
    %4 = arith.muli %arg1, %c1_i32 : i32
    %5 = arith.addi %3, %4 : i32
    %c0 = arith.constant 0 : index
    %6 = arith.index_cast %5 : i32 to index
    %c0_1 = arith.constant 0 : index
    %7 = vector.load %arg2[%c0, %6, %c0_1] : memref<2x22x32xf32, #tpu.memory_space<vmem>>, vector<2x16x32xf32>
    %c0_2 = arith.constant 0 : index
    %c0_3 = arith.constant 0 : index
    %c0_4 = arith.constant 0 : index
    %8 = vector.load %arg5[%c0_2, %c0_3, %c0_4] : memref<2x16x128xf32, #tpu.memory_space<vmem>>, vector<2x16x128xf32>
    %9 = arith.index_cast %arg1 : i32 to index
    %c0_5 = arith.constant 0 : index
    %c0_6 = arith.constant 0 : index
    %10 = vector.load %arg3[%9, %c0_5, %c0_6] : memref<7x32x128xf32, #tpu.memory_space<vmem>>, vector<1x32x128xf32>
    %11 = vector.shape_cast %10 : vector<1x32x128xf32> to vector<32x128xf32>
    %cst = arith.constant dense<0.000000e+00> : vector<2x16x128xf32>
    %12 = tpu.matmul %7, %11, %cst {dimension_numbers = #tpu.dot_dimension_numbers<[2], [0], [0, 1], [1], [0, 0, 0, 1, 1, 1], [], []>} : vector<2x16x32xf32>, vector<32x128xf32>, vector<2x16x128xf32> -> vector<2x16x128xf32>
    %13 = arith.addf %8, %12 : vector<2x16x128xf32>
    %c0_7 = arith.constant 0 : index
    %c0_8 = arith.constant 0 : index
    %c0_9 = arith.constant 0 : index
    %14 = vector.load %arg5[%c0_7, %c0_8, %c0_9] : memref<2x16x128xf32, #tpu.memory_space<vmem>>, vector<2x16x128xf32>
    tpu.vector_store %arg5[%c0_7, %c0_8, %c0_9], %13 {strides = array<i32>} : memref<2x16x128xf32, #tpu.memory_space<vmem>>, vector<2x16x128xf32>,
    %c6_i32 = arith.constant 6 : i32
    %15 = arith.cmpi eq, %arg1, %c6_i32 : i32
    %16 = arith.extui %15 : i1 to i32
    %c0_i32_10 = arith.constant 0 : i32
    %17 = arith.cmpi ne, %16, %c0_i32_10 : i32
    scf.if %17 {
      %c0_11 = arith.constant 0 : index
      %c0_12 = arith.constant 0 : index
      %c0_13 = arith.constant 0 : index
      %18 = vector.load %arg5[%c0_11, %c0_12, %c0_13] : memref<2x16x128xf32, #tpu.memory_space<vmem>>, vector<2x16x128xf32>
      %c0_14 = arith.constant 0 : index
      %c0_15 = arith.constant 0 : index
      %19 = vector.load %arg4[%c0_14, %c0_15] : memref<1x128xf32, #tpu.memory_space<vmem>>, vector<1x128xf32>
      %20 = vector.shape_cast %19 : vector<1x128xf32> to vector<128xf32>
      %21 = vector.shape_cast %20 : vector<128xf32> to vector<1x1x128xf32>
      %22 = vector.broadcast %21 : vector<1x1x128xf32> to vector<2x16x128xf32>
      %23 = arith.addf %18, %22 : vector<2x16x128xf32>
      %c0_16 = arith.constant 0 : index
      %c0_17 = arith.constant 0 : index
      %c0_18 = arith.constant 0 : index
      %24 = vector.load %arg5[%c0_16, %c0_17, %c0_18] : memref<2x16x128xf32, #tpu.memory_space<vmem>>, vector<2x16x128xf32>
      tpu.vector_store %arg5[%c0_16, %c0_17, %c0_18], %23 {strides = array<i32>} : memref<2x16x128xf32, #tpu.memory_space<vmem>>, vector<2x16x128xf32>,
    } else {
    }
    return
  }
  func.func @transform_0(%arg0: i32, %arg1: i32) -> (i32, i32, i32) {
    %c0_i32 = arith.constant 0 : i32
    %c0_i32_0 = arith.constant 0 : i32
    %c0_i32_1 = arith.constant 0 : i32
    %c0_i32_2 = arith.constant 0 : i32
    return %c0_i32, %c0_i32_0, %c0_i32_1 : i32, i32, i32
  }
  func.func @transform_1(%arg0: i32, %arg1: i32) -> (i32, i32, i32) {
    %c0_i32 = arith.constant 0 : i32
    %c0_i32_0 = arith.constant 0 : i32
    %c0_i32_1 = arith.constant 0 : i32
    %c0_i32_2 = arith.constant 0 : i32
    return %c0_i32, %c0_i32_0, %c0_i32_1 : i32, i32, i32
  }
  func.func @transform_2(%arg0: i32, %arg1: i32) -> (i32, i32) {
    %c0_i32 = arith.constant 0 : i32
    %c0_i32_0 = arith.constant 0 : i32
    %c0_i32_1 = arith.constant 0 : i32
    return %c0_i32, %c0_i32_0 : i32, i32
  }
  func.func @transform_3(%arg0: i32, %arg1: i32) -> (i32, i32, i32) {
    %c0_i32 = arith.constant 0 : i32
    %c0_i32_0 = arith.constant 0 : i32
    %c0_i32_1 = arith.constant 0 : i32
    return %c0_i32, %arg0, %c0_i32_0 : i32, i32, i32
  }
}

module attributes {stable_mosaic.version = 11 : i64} {
  func.func @_conv1d_tap_kernel(%arg0: i32, %arg1: i32, %arg2: memref<2x71x128xf32, #tpu.memory_space<vmem>>, %arg3: memref<8x128x64xf32, #tpu.memory_space<vmem>>, %arg4: memref<1x64xf32, #tpu.memory_space<vmem>>, %arg5: memref<2x64x64xf32, #tpu.memory_space<vmem>>) attributes {dimension_semantics = [#tpu.dimension_semantics<parallel>, #tpu.dimension_semantics<arbitrary>], iteration_bounds = array<i64: 1, 8>, scalar_prefetch = 0 : i64, scratch_operands = 0 : i64, tpu.core_type = #tpu.core_type<tc>, window_params = [{pipeline_mode = #tpu.pipeline_mode<synchronous>, transform_indices = @transform_0, window_bounds = array<i64: 2, 71, 128>}, {pipeline_mode = #tpu.pipeline_mode<synchronous>, transform_indices = @transform_1, window_bounds = array<i64: 8, 128, 64>}, {pipeline_mode = #tpu.pipeline_mode<synchronous>, transform_indices = @transform_2, window_bounds = array<i64: 1, 64>}, {transform_indices = @transform_3, window_bounds = array<i64: 2, 64, 64>}]} {
    %c0_i32 = arith.constant 0 : i32
    %0 = arith.cmpi eq, %arg1, %c0_i32 : i32
    %1 = arith.extui %0 : i1 to i32
    %c0_i32_0 = arith.constant 0 : i32
    %2 = arith.cmpi ne, %1, %c0_i32_0 : i32
    scf.if %2 {
      %cst_13 = arith.constant 0.000000e+00 : f32
      %23 = vector.broadcast %cst_13 : f32 to vector<2x64x64xf32>
      %c0_14 = arith.constant 0 : index
      %c0_15 = arith.constant 0 : index
      %c0_16 = arith.constant 0 : index
      %24 = vector.load %arg5[%c0_14, %c0_15, %c0_16] : memref<2x64x64xf32, #tpu.memory_space<vmem>>, vector<2x64x64xf32>
      tpu.vector_store %arg5[%c0_14, %c0_15, %c0_16], %23 {strides = array<i32>} : memref<2x64x64xf32, #tpu.memory_space<vmem>>, vector<2x64x64xf32>,
    } else {
    }
    %c64_i32 = arith.constant 64 : i32
    %3 = arith.muli %arg0, %c64_i32 : i32
    %c1_i32 = arith.constant 1 : i32
    %4 = arith.muli %arg1, %c1_i32 : i32
    %5 = arith.addi %3, %4 : i32
    %c0 = arith.constant 0 : index
    %6 = arith.index_cast %5 : i32 to index
    %c0_1 = arith.constant 0 : index
    %7 = vector.load %arg2[%c0, %6, %c0_1] : memref<2x71x128xf32, #tpu.memory_space<vmem>>, vector<2x64x128xf32>
    %cst = arith.constant 0.000000e+00 : f32
    %8 = vector.broadcast %cst : f32 to vector<2x64x128xf32>
    %9 = arith.cmpf oge, %7, %8 : vector<2x64x128xf32>
    %cst_2 = arith.constant 1.000000e-01 : f32
    %10 = vector.broadcast %cst_2 : f32 to vector<2x64x128xf32>
    %11 = arith.mulf %10, %7 : vector<2x64x128xf32>
    %12 = arith.select %9, %7, %11 : vector<2x64x128xi1>, vector<2x64x128xf32>
    %c0_3 = arith.constant 0 : index
    %c0_4 = arith.constant 0 : index
    %c0_5 = arith.constant 0 : index
    %13 = vector.load %arg5[%c0_3, %c0_4, %c0_5] : memref<2x64x64xf32, #tpu.memory_space<vmem>>, vector<2x64x64xf32>
    %14 = arith.index_cast %arg1 : i32 to index
    %c0_6 = arith.constant 0 : index
    %c0_7 = arith.constant 0 : index
    %15 = vector.load %arg3[%14, %c0_6, %c0_7] : memref<8x128x64xf32, #tpu.memory_space<vmem>>, vector<1x128x64xf32>
    %16 = vector.shape_cast %15 : vector<1x128x64xf32> to vector<128x64xf32>
    %cst_8 = arith.constant dense<0.000000e+00> : vector<2x64x64xf32>
    %17 = tpu.matmul %12, %16, %cst_8 {dimension_numbers = #tpu.dot_dimension_numbers<[2], [0], [0, 1], [1], [0, 0, 0, 1, 1, 1], [], []>} : vector<2x64x128xf32>, vector<128x64xf32>, vector<2x64x64xf32> -> vector<2x64x64xf32>
    %18 = arith.addf %13, %17 : vector<2x64x64xf32>
    %c0_9 = arith.constant 0 : index
    %c0_10 = arith.constant 0 : index
    %c0_11 = arith.constant 0 : index
    %19 = vector.load %arg5[%c0_9, %c0_10, %c0_11] : memref<2x64x64xf32, #tpu.memory_space<vmem>>, vector<2x64x64xf32>
    tpu.vector_store %arg5[%c0_9, %c0_10, %c0_11], %18 {strides = array<i32>} : memref<2x64x64xf32, #tpu.memory_space<vmem>>, vector<2x64x64xf32>,
    %c7_i32 = arith.constant 7 : i32
    %20 = arith.cmpi eq, %arg1, %c7_i32 : i32
    %21 = arith.extui %20 : i1 to i32
    %c0_i32_12 = arith.constant 0 : i32
    %22 = arith.cmpi ne, %21, %c0_i32_12 : i32
    scf.if %22 {
      %c0_13 = arith.constant 0 : index
      %c0_14 = arith.constant 0 : index
      %c0_15 = arith.constant 0 : index
      %23 = vector.load %arg5[%c0_13, %c0_14, %c0_15] : memref<2x64x64xf32, #tpu.memory_space<vmem>>, vector<2x64x64xf32>
      %c0_16 = arith.constant 0 : index
      %c0_17 = arith.constant 0 : index
      %24 = vector.load %arg4[%c0_16, %c0_17] : memref<1x64xf32, #tpu.memory_space<vmem>>, vector<1x64xf32>
      %25 = vector.shape_cast %24 : vector<1x64xf32> to vector<64xf32>
      %26 = vector.shape_cast %25 : vector<64xf32> to vector<1x1x64xf32>
      %27 = vector.broadcast %26 : vector<1x1x64xf32> to vector<2x64x64xf32>
      %28 = arith.addf %23, %27 : vector<2x64x64xf32>
      %c0_18 = arith.constant 0 : index
      %c0_19 = arith.constant 0 : index
      %c0_20 = arith.constant 0 : index
      %29 = vector.load %arg5[%c0_18, %c0_19, %c0_20] : memref<2x64x64xf32, #tpu.memory_space<vmem>>, vector<2x64x64xf32>
      tpu.vector_store %arg5[%c0_18, %c0_19, %c0_20], %28 {strides = array<i32>} : memref<2x64x64xf32, #tpu.memory_space<vmem>>, vector<2x64x64xf32>,
    } else {
    }
    return
  }
  func.func @transform_0(%arg0: i32, %arg1: i32) -> (i32, i32, i32) {
    %c0_i32 = arith.constant 0 : i32
    %c0_i32_0 = arith.constant 0 : i32
    %c0_i32_1 = arith.constant 0 : i32
    %c0_i32_2 = arith.constant 0 : i32
    return %c0_i32, %c0_i32_0, %c0_i32_1 : i32, i32, i32
  }
  func.func @transform_1(%arg0: i32, %arg1: i32) -> (i32, i32, i32) {
    %c0_i32 = arith.constant 0 : i32
    %c0_i32_0 = arith.constant 0 : i32
    %c0_i32_1 = arith.constant 0 : i32
    %c0_i32_2 = arith.constant 0 : i32
    return %c0_i32, %c0_i32_0, %c0_i32_1 : i32, i32, i32
  }
  func.func @transform_2(%arg0: i32, %arg1: i32) -> (i32, i32) {
    %c0_i32 = arith.constant 0 : i32
    %c0_i32_0 = arith.constant 0 : i32
    %c0_i32_1 = arith.constant 0 : i32
    return %c0_i32, %c0_i32_0 : i32, i32
  }
  func.func @transform_3(%arg0: i32, %arg1: i32) -> (i32, i32, i32) {
    %c0_i32 = arith.constant 0 : i32
    %c0_i32_0 = arith.constant 0 : i32
    %c0_i32_1 = arith.constant 0 : i32
    return %c0_i32, %arg0, %c0_i32_0 : i32, i32, i32
  }
}

module attributes {stable_mosaic.version = 11 : i64} {
  func.func @_conv1d_tap_kernel(%arg0: i32, %arg1: i32, %arg2: memref<2x68x64xf32, #tpu.memory_space<vmem>>, %arg3: memref<5x64x64xf32, #tpu.memory_space<vmem>>, %arg4: memref<1x64xf32, #tpu.memory_space<vmem>>, %arg5: memref<2x64x64xf32, #tpu.memory_space<vmem>>) attributes {dimension_semantics = [#tpu.dimension_semantics<parallel>, #tpu.dimension_semantics<arbitrary>], iteration_bounds = array<i64: 1, 5>, scalar_prefetch = 0 : i64, scratch_operands = 0 : i64, tpu.core_type = #tpu.core_type<tc>, window_params = [{pipeline_mode = #tpu.pipeline_mode<synchronous>, transform_indices = @transform_0, window_bounds = array<i64: 2, 68, 64>}, {pipeline_mode = #tpu.pipeline_mode<synchronous>, transform_indices = @transform_1, window_bounds = array<i64: 5, 64, 64>}, {pipeline_mode = #tpu.pipeline_mode<synchronous>, transform_indices = @transform_2, window_bounds = array<i64: 1, 64>}, {transform_indices = @transform_3, window_bounds = array<i64: 2, 64, 64>}]} {
    %c0_i32 = arith.constant 0 : i32
    %0 = arith.cmpi eq, %arg1, %c0_i32 : i32
    %1 = arith.extui %0 : i1 to i32
    %c0_i32_0 = arith.constant 0 : i32
    %2 = arith.cmpi ne, %1, %c0_i32_0 : i32
    scf.if %2 {
      %cst_13 = arith.constant 0.000000e+00 : f32
      %23 = vector.broadcast %cst_13 : f32 to vector<2x64x64xf32>
      %c0_14 = arith.constant 0 : index
      %c0_15 = arith.constant 0 : index
      %c0_16 = arith.constant 0 : index
      %24 = vector.load %arg5[%c0_14, %c0_15, %c0_16] : memref<2x64x64xf32, #tpu.memory_space<vmem>>, vector<2x64x64xf32>
      tpu.vector_store %arg5[%c0_14, %c0_15, %c0_16], %23 {strides = array<i32>} : memref<2x64x64xf32, #tpu.memory_space<vmem>>, vector<2x64x64xf32>,
    } else {
    }
    %c64_i32 = arith.constant 64 : i32
    %3 = arith.muli %arg0, %c64_i32 : i32
    %c1_i32 = arith.constant 1 : i32
    %4 = arith.muli %arg1, %c1_i32 : i32
    %5 = arith.addi %3, %4 : i32
    %c0 = arith.constant 0 : index
    %6 = arith.index_cast %5 : i32 to index
    %c0_1 = arith.constant 0 : index
    %7 = vector.load %arg2[%c0, %6, %c0_1] : memref<2x68x64xf32, #tpu.memory_space<vmem>>, vector<2x64x64xf32>
    %cst = arith.constant 0.000000e+00 : f32
    %8 = vector.broadcast %cst : f32 to vector<2x64x64xf32>
    %9 = arith.cmpf oge, %7, %8 : vector<2x64x64xf32>
    %cst_2 = arith.constant 1.000000e-01 : f32
    %10 = vector.broadcast %cst_2 : f32 to vector<2x64x64xf32>
    %11 = arith.mulf %10, %7 : vector<2x64x64xf32>
    %12 = arith.select %9, %7, %11 : vector<2x64x64xi1>, vector<2x64x64xf32>
    %c0_3 = arith.constant 0 : index
    %c0_4 = arith.constant 0 : index
    %c0_5 = arith.constant 0 : index
    %13 = vector.load %arg5[%c0_3, %c0_4, %c0_5] : memref<2x64x64xf32, #tpu.memory_space<vmem>>, vector<2x64x64xf32>
    %14 = arith.index_cast %arg1 : i32 to index
    %c0_6 = arith.constant 0 : index
    %c0_7 = arith.constant 0 : index
    %15 = vector.load %arg3[%14, %c0_6, %c0_7] : memref<5x64x64xf32, #tpu.memory_space<vmem>>, vector<1x64x64xf32>
    %16 = vector.shape_cast %15 : vector<1x64x64xf32> to vector<64x64xf32>
    %cst_8 = arith.constant dense<0.000000e+00> : vector<2x64x64xf32>
    %17 = tpu.matmul %12, %16, %cst_8 {dimension_numbers = #tpu.dot_dimension_numbers<[2], [0], [0, 1], [1], [0, 0, 0, 1, 1, 1], [], []>} : vector<2x64x64xf32>, vector<64x64xf32>, vector<2x64x64xf32> -> vector<2x64x64xf32>
    %18 = arith.addf %13, %17 : vector<2x64x64xf32>
    %c0_9 = arith.constant 0 : index
    %c0_10 = arith.constant 0 : index
    %c0_11 = arith.constant 0 : index
    %19 = vector.load %arg5[%c0_9, %c0_10, %c0_11] : memref<2x64x64xf32, #tpu.memory_space<vmem>>, vector<2x64x64xf32>
    tpu.vector_store %arg5[%c0_9, %c0_10, %c0_11], %18 {strides = array<i32>} : memref<2x64x64xf32, #tpu.memory_space<vmem>>, vector<2x64x64xf32>,
    %c4_i32 = arith.constant 4 : i32
    %20 = arith.cmpi eq, %arg1, %c4_i32 : i32
    %21 = arith.extui %20 : i1 to i32
    %c0_i32_12 = arith.constant 0 : i32
    %22 = arith.cmpi ne, %21, %c0_i32_12 : i32
    scf.if %22 {
      %c0_13 = arith.constant 0 : index
      %c0_14 = arith.constant 0 : index
      %c0_15 = arith.constant 0 : index
      %23 = vector.load %arg5[%c0_13, %c0_14, %c0_15] : memref<2x64x64xf32, #tpu.memory_space<vmem>>, vector<2x64x64xf32>
      %c0_16 = arith.constant 0 : index
      %c0_17 = arith.constant 0 : index
      %24 = vector.load %arg4[%c0_16, %c0_17] : memref<1x64xf32, #tpu.memory_space<vmem>>, vector<1x64xf32>
      %25 = vector.shape_cast %24 : vector<1x64xf32> to vector<64xf32>
      %26 = vector.shape_cast %25 : vector<64xf32> to vector<1x1x64xf32>
      %27 = vector.broadcast %26 : vector<1x1x64xf32> to vector<2x64x64xf32>
      %28 = arith.addf %23, %27 : vector<2x64x64xf32>
      %c0_18 = arith.constant 0 : index
      %c0_19 = arith.constant 0 : index
      %c0_20 = arith.constant 0 : index
      %29 = vector.load %arg5[%c0_18, %c0_19, %c0_20] : memref<2x64x64xf32, #tpu.memory_space<vmem>>, vector<2x64x64xf32>
      tpu.vector_store %arg5[%c0_18, %c0_19, %c0_20], %28 {strides = array<i32>} : memref<2x64x64xf32, #tpu.memory_space<vmem>>, vector<2x64x64xf32>,
    } else {
    }
    return
  }
  func.func @transform_0(%arg0: i32, %arg1: i32) -> (i32, i32, i32) {
    %c0_i32 = arith.constant 0 : i32
    %c0_i32_0 = arith.constant 0 : i32
    %c0_i32_1 = arith.constant 0 : i32
    %c0_i32_2 = arith.constant 0 : i32
    return %c0_i32, %c0_i32_0, %c0_i32_1 : i32, i32, i32
  }
  func.func @transform_1(%arg0: i32, %arg1: i32) -> (i32, i32, i32) {
    %c0_i32 = arith.constant 0 : i32
    %c0_i32_0 = arith.constant 0 : i32
    %c0_i32_1 = arith.constant 0 : i32
    %c0_i32_2 = arith.constant 0 : i32
    return %c0_i32, %c0_i32_0, %c0_i32_1 : i32, i32, i32
  }
  func.func @transform_2(%arg0: i32, %arg1: i32) -> (i32, i32) {
    %c0_i32 = arith.constant 0 : i32
    %c0_i32_0 = arith.constant 0 : i32
    %c0_i32_1 = arith.constant 0 : i32
    return %c0_i32, %c0_i32_0 : i32, i32
  }
  func.func @transform_3(%arg0: i32, %arg1: i32) -> (i32, i32, i32) {
    %c0_i32 = arith.constant 0 : i32
    %c0_i32_0 = arith.constant 0 : i32
    %c0_i32_1 = arith.constant 0 : i32
    return %c0_i32, %arg0, %c0_i32_0 : i32, i32, i32
  }
}

module attributes {stable_mosaic.version = 11 : i64} {
  func.func @_conv1d_tap_kernel(%arg0: i32, %arg1: i32, %arg2: memref<2x66x64xf32, #tpu.memory_space<vmem>>, %arg3: memref<3x64x64xf32, #tpu.memory_space<vmem>>, %arg4: memref<1x64xf32, #tpu.memory_space<vmem>>, %arg5: memref<2x64x64xf32, #tpu.memory_space<vmem>>) attributes {dimension_semantics = [#tpu.dimension_semantics<parallel>, #tpu.dimension_semantics<arbitrary>], iteration_bounds = array<i64: 1, 3>, scalar_prefetch = 0 : i64, scratch_operands = 0 : i64, tpu.core_type = #tpu.core_type<tc>, window_params = [{pipeline_mode = #tpu.pipeline_mode<synchronous>, transform_indices = @transform_0, window_bounds = array<i64: 2, 66, 64>}, {pipeline_mode = #tpu.pipeline_mode<synchronous>, transform_indices = @transform_1, window_bounds = array<i64: 3, 64, 64>}, {pipeline_mode = #tpu.pipeline_mode<synchronous>, transform_indices = @transform_2, window_bounds = array<i64: 1, 64>}, {transform_indices = @transform_3, window_bounds = array<i64: 2, 64, 64>}]} {
    %c0_i32 = arith.constant 0 : i32
    %0 = arith.cmpi eq, %arg1, %c0_i32 : i32
    %1 = arith.extui %0 : i1 to i32
    %c0_i32_0 = arith.constant 0 : i32
    %2 = arith.cmpi ne, %1, %c0_i32_0 : i32
    scf.if %2 {
      %cst_13 = arith.constant 0.000000e+00 : f32
      %23 = vector.broadcast %cst_13 : f32 to vector<2x64x64xf32>
      %c0_14 = arith.constant 0 : index
      %c0_15 = arith.constant 0 : index
      %c0_16 = arith.constant 0 : index
      %24 = vector.load %arg5[%c0_14, %c0_15, %c0_16] : memref<2x64x64xf32, #tpu.memory_space<vmem>>, vector<2x64x64xf32>
      tpu.vector_store %arg5[%c0_14, %c0_15, %c0_16], %23 {strides = array<i32>} : memref<2x64x64xf32, #tpu.memory_space<vmem>>, vector<2x64x64xf32>,
    } else {
    }
    %c64_i32 = arith.constant 64 : i32
    %3 = arith.muli %arg0, %c64_i32 : i32
    %c1_i32 = arith.constant 1 : i32
    %4 = arith.muli %arg1, %c1_i32 : i32
    %5 = arith.addi %3, %4 : i32
    %c0 = arith.constant 0 : index
    %6 = arith.index_cast %5 : i32 to index
    %c0_1 = arith.constant 0 : index
    %7 = vector.load %arg2[%c0, %6, %c0_1] : memref<2x66x64xf32, #tpu.memory_space<vmem>>, vector<2x64x64xf32>
    %cst = arith.constant 0.000000e+00 : f32
    %8 = vector.broadcast %cst : f32 to vector<2x64x64xf32>
    %9 = arith.cmpf oge, %7, %8 : vector<2x64x64xf32>
    %cst_2 = arith.constant 1.000000e-01 : f32
    %10 = vector.broadcast %cst_2 : f32 to vector<2x64x64xf32>
    %11 = arith.mulf %10, %7 : vector<2x64x64xf32>
    %12 = arith.select %9, %7, %11 : vector<2x64x64xi1>, vector<2x64x64xf32>
    %c0_3 = arith.constant 0 : index
    %c0_4 = arith.constant 0 : index
    %c0_5 = arith.constant 0 : index
    %13 = vector.load %arg5[%c0_3, %c0_4, %c0_5] : memref<2x64x64xf32, #tpu.memory_space<vmem>>, vector<2x64x64xf32>
    %14 = arith.index_cast %arg1 : i32 to index
    %c0_6 = arith.constant 0 : index
    %c0_7 = arith.constant 0 : index
    %15 = vector.load %arg3[%14, %c0_6, %c0_7] : memref<3x64x64xf32, #tpu.memory_space<vmem>>, vector<1x64x64xf32>
    %16 = vector.shape_cast %15 : vector<1x64x64xf32> to vector<64x64xf32>
    %cst_8 = arith.constant dense<0.000000e+00> : vector<2x64x64xf32>
    %17 = tpu.matmul %12, %16, %cst_8 {dimension_numbers = #tpu.dot_dimension_numbers<[2], [0], [0, 1], [1], [0, 0, 0, 1, 1, 1], [], []>} : vector<2x64x64xf32>, vector<64x64xf32>, vector<2x64x64xf32> -> vector<2x64x64xf32>
    %18 = arith.addf %13, %17 : vector<2x64x64xf32>
    %c0_9 = arith.constant 0 : index
    %c0_10 = arith.constant 0 : index
    %c0_11 = arith.constant 0 : index
    %19 = vector.load %arg5[%c0_9, %c0_10, %c0_11] : memref<2x64x64xf32, #tpu.memory_space<vmem>>, vector<2x64x64xf32>
    tpu.vector_store %arg5[%c0_9, %c0_10, %c0_11], %18 {strides = array<i32>} : memref<2x64x64xf32, #tpu.memory_space<vmem>>, vector<2x64x64xf32>,
    %c2_i32 = arith.constant 2 : i32
    %20 = arith.cmpi eq, %arg1, %c2_i32 : i32
    %21 = arith.extui %20 : i1 to i32
    %c0_i32_12 = arith.constant 0 : i32
    %22 = arith.cmpi ne, %21, %c0_i32_12 : i32
    scf.if %22 {
      %c0_13 = arith.constant 0 : index
      %c0_14 = arith.constant 0 : index
      %c0_15 = arith.constant 0 : index
      %23 = vector.load %arg5[%c0_13, %c0_14, %c0_15] : memref<2x64x64xf32, #tpu.memory_space<vmem>>, vector<2x64x64xf32>
      %c0_16 = arith.constant 0 : index
      %c0_17 = arith.constant 0 : index
      %24 = vector.load %arg4[%c0_16, %c0_17] : memref<1x64xf32, #tpu.memory_space<vmem>>, vector<1x64xf32>
      %25 = vector.shape_cast %24 : vector<1x64xf32> to vector<64xf32>
      %26 = vector.shape_cast %25 : vector<64xf32> to vector<1x1x64xf32>
      %27 = vector.broadcast %26 : vector<1x1x64xf32> to vector<2x64x64xf32>
      %28 = arith.addf %23, %27 : vector<2x64x64xf32>
      %c0_18 = arith.constant 0 : index
      %c0_19 = arith.constant 0 : index
      %c0_20 = arith.constant 0 : index
      %29 = vector.load %arg5[%c0_18, %c0_19, %c0_20] : memref<2x64x64xf32, #tpu.memory_space<vmem>>, vector<2x64x64xf32>
      tpu.vector_store %arg5[%c0_18, %c0_19, %c0_20], %28 {strides = array<i32>} : memref<2x64x64xf32, #tpu.memory_space<vmem>>, vector<2x64x64xf32>,
    } else {
    }
    return
  }
  func.func @transform_0(%arg0: i32, %arg1: i32) -> (i32, i32, i32) {
    %c0_i32 = arith.constant 0 : i32
    %c0_i32_0 = arith.constant 0 : i32
    %c0_i32_1 = arith.constant 0 : i32
    %c0_i32_2 = arith.constant 0 : i32
    return %c0_i32, %c0_i32_0, %c0_i32_1 : i32, i32, i32
  }
  func.func @transform_1(%arg0: i32, %arg1: i32) -> (i32, i32, i32) {
    %c0_i32 = arith.constant 0 : i32
    %c0_i32_0 = arith.constant 0 : i32
    %c0_i32_1 = arith.constant 0 : i32
    %c0_i32_2 = arith.constant 0 : i32
    return %c0_i32, %c0_i32_0, %c0_i32_1 : i32, i32, i32
  }
  func.func @transform_2(%arg0: i32, %arg1: i32) -> (i32, i32) {
    %c0_i32 = arith.constant 0 : i32
    %c0_i32_0 = arith.constant 0 : i32
    %c0_i32_1 = arith.constant 0 : i32
    return %c0_i32, %c0_i32_0 : i32, i32
  }
  func.func @transform_3(%arg0: i32, %arg1: i32) -> (i32, i32, i32) {
    %c0_i32 = arith.constant 0 : i32
    %c0_i32_0 = arith.constant 0 : i32
    %c0_i32_1 = arith.constant 0 : i32
    return %c0_i32, %arg0, %c0_i32_0 : i32, i32, i32
  }
}

module attributes {stable_mosaic.version = 11 : i64} {
  func.func @_conv1d_tap_kernel(%arg0: i32, %arg1: i32, %arg2: memref<2x76x64xf32, #tpu.memory_space<vmem>>, %arg3: memref<5x64x64xf32, #tpu.memory_space<vmem>>, %arg4: memref<1x64xf32, #tpu.memory_space<vmem>>, %arg5: memref<2x64x64xf32, #tpu.memory_space<vmem>>) attributes {dimension_semantics = [#tpu.dimension_semantics<parallel>, #tpu.dimension_semantics<arbitrary>], iteration_bounds = array<i64: 1, 5>, scalar_prefetch = 0 : i64, scratch_operands = 0 : i64, tpu.core_type = #tpu.core_type<tc>, window_params = [{pipeline_mode = #tpu.pipeline_mode<synchronous>, transform_indices = @transform_0, window_bounds = array<i64: 2, 76, 64>}, {pipeline_mode = #tpu.pipeline_mode<synchronous>, transform_indices = @transform_1, window_bounds = array<i64: 5, 64, 64>}, {pipeline_mode = #tpu.pipeline_mode<synchronous>, transform_indices = @transform_2, window_bounds = array<i64: 1, 64>}, {transform_indices = @transform_3, window_bounds = array<i64: 2, 64, 64>}]} {
    %c0_i32 = arith.constant 0 : i32
    %0 = arith.cmpi eq, %arg1, %c0_i32 : i32
    %1 = arith.extui %0 : i1 to i32
    %c0_i32_0 = arith.constant 0 : i32
    %2 = arith.cmpi ne, %1, %c0_i32_0 : i32
    scf.if %2 {
      %cst_13 = arith.constant 0.000000e+00 : f32
      %23 = vector.broadcast %cst_13 : f32 to vector<2x64x64xf32>
      %c0_14 = arith.constant 0 : index
      %c0_15 = arith.constant 0 : index
      %c0_16 = arith.constant 0 : index
      %24 = vector.load %arg5[%c0_14, %c0_15, %c0_16] : memref<2x64x64xf32, #tpu.memory_space<vmem>>, vector<2x64x64xf32>
      tpu.vector_store %arg5[%c0_14, %c0_15, %c0_16], %23 {strides = array<i32>} : memref<2x64x64xf32, #tpu.memory_space<vmem>>, vector<2x64x64xf32>,
    } else {
    }
    %c64_i32 = arith.constant 64 : i32
    %3 = arith.muli %arg0, %c64_i32 : i32
    %c3_i32 = arith.constant 3 : i32
    %4 = arith.muli %arg1, %c3_i32 : i32
    %5 = arith.addi %3, %4 : i32
    %c0 = arith.constant 0 : index
    %6 = arith.index_cast %5 : i32 to index
    %c0_1 = arith.constant 0 : index
    %7 = vector.load %arg2[%c0, %6, %c0_1] : memref<2x76x64xf32, #tpu.memory_space<vmem>>, vector<2x64x64xf32>
    %cst = arith.constant 0.000000e+00 : f32
    %8 = vector.broadcast %cst : f32 to vector<2x64x64xf32>
    %9 = arith.cmpf oge, %7, %8 : vector<2x64x64xf32>
    %cst_2 = arith.constant 1.000000e-01 : f32
    %10 = vector.broadcast %cst_2 : f32 to vector<2x64x64xf32>
    %11 = arith.mulf %10, %7 : vector<2x64x64xf32>
    %12 = arith.select %9, %7, %11 : vector<2x64x64xi1>, vector<2x64x64xf32>
    %c0_3 = arith.constant 0 : index
    %c0_4 = arith.constant 0 : index
    %c0_5 = arith.constant 0 : index
    %13 = vector.load %arg5[%c0_3, %c0_4, %c0_5] : memref<2x64x64xf32, #tpu.memory_space<vmem>>, vector<2x64x64xf32>
    %14 = arith.index_cast %arg1 : i32 to index
    %c0_6 = arith.constant 0 : index
    %c0_7 = arith.constant 0 : index
    %15 = vector.load %arg3[%14, %c0_6, %c0_7] : memref<5x64x64xf32, #tpu.memory_space<vmem>>, vector<1x64x64xf32>
    %16 = vector.shape_cast %15 : vector<1x64x64xf32> to vector<64x64xf32>
    %cst_8 = arith.constant dense<0.000000e+00> : vector<2x64x64xf32>
    %17 = tpu.matmul %12, %16, %cst_8 {dimension_numbers = #tpu.dot_dimension_numbers<[2], [0], [0, 1], [1], [0, 0, 0, 1, 1, 1], [], []>} : vector<2x64x64xf32>, vector<64x64xf32>, vector<2x64x64xf32> -> vector<2x64x64xf32>
    %18 = arith.addf %13, %17 : vector<2x64x64xf32>
    %c0_9 = arith.constant 0 : index
    %c0_10 = arith.constant 0 : index
    %c0_11 = arith.constant 0 : index
    %19 = vector.load %arg5[%c0_9, %c0_10, %c0_11] : memref<2x64x64xf32, #tpu.memory_space<vmem>>, vector<2x64x64xf32>
    tpu.vector_store %arg5[%c0_9, %c0_10, %c0_11], %18 {strides = array<i32>} : memref<2x64x64xf32, #tpu.memory_space<vmem>>, vector<2x64x64xf32>,
    %c4_i32 = arith.constant 4 : i32
    %20 = arith.cmpi eq, %arg1, %c4_i32 : i32
    %21 = arith.extui %20 : i1 to i32
    %c0_i32_12 = arith.constant 0 : i32
    %22 = arith.cmpi ne, %21, %c0_i32_12 : i32
    scf.if %22 {
      %c0_13 = arith.constant 0 : index
      %c0_14 = arith.constant 0 : index
      %c0_15 = arith.constant 0 : index
      %23 = vector.load %arg5[%c0_13, %c0_14, %c0_15] : memref<2x64x64xf32, #tpu.memory_space<vmem>>, vector<2x64x64xf32>
      %c0_16 = arith.constant 0 : index
      %c0_17 = arith.constant 0 : index
      %24 = vector.load %arg4[%c0_16, %c0_17] : memref<1x64xf32, #tpu.memory_space<vmem>>, vector<1x64xf32>
      %25 = vector.shape_cast %24 : vector<1x64xf32> to vector<64xf32>
      %26 = vector.shape_cast %25 : vector<64xf32> to vector<1x1x64xf32>
      %27 = vector.broadcast %26 : vector<1x1x64xf32> to vector<2x64x64xf32>
      %28 = arith.addf %23, %27 : vector<2x64x64xf32>
      %c0_18 = arith.constant 0 : index
      %c0_19 = arith.constant 0 : index
      %c0_20 = arith.constant 0 : index
      %29 = vector.load %arg5[%c0_18, %c0_19, %c0_20] : memref<2x64x64xf32, #tpu.memory_space<vmem>>, vector<2x64x64xf32>
      tpu.vector_store %arg5[%c0_18, %c0_19, %c0_20], %28 {strides = array<i32>} : memref<2x64x64xf32, #tpu.memory_space<vmem>>, vector<2x64x64xf32>,
    } else {
    }
    return
  }
  func.func @transform_0(%arg0: i32, %arg1: i32) -> (i32, i32, i32) {
    %c0_i32 = arith.constant 0 : i32
    %c0_i32_0 = arith.constant 0 : i32
    %c0_i32_1 = arith.constant 0 : i32
    %c0_i32_2 = arith.constant 0 : i32
    return %c0_i32, %c0_i32_0, %c0_i32_1 : i32, i32, i32
  }
  func.func @transform_1(%arg0: i32, %arg1: i32) -> (i32, i32, i32) {
    %c0_i32 = arith.constant 0 : i32
    %c0_i32_0 = arith.constant 0 : i32
    %c0_i32_1 = arith.constant 0 : i32
    %c0_i32_2 = arith.constant 0 : i32
    return %c0_i32, %c0_i32_0, %c0_i32_1 : i32, i32, i32
  }
  func.func @transform_2(%arg0: i32, %arg1: i32) -> (i32, i32) {
    %c0_i32 = arith.constant 0 : i32
    %c0_i32_0 = arith.constant 0 : i32
    %c0_i32_1 = arith.constant 0 : i32
    return %c0_i32, %c0_i32_0 : i32, i32
  }
  func.func @transform_3(%arg0: i32, %arg1: i32) -> (i32, i32, i32) {
    %c0_i32 = arith.constant 0 : i32
    %c0_i32_0 = arith.constant 0 : i32
    %c0_i32_1 = arith.constant 0 : i32
    return %c0_i32, %arg0, %c0_i32_0 : i32, i32, i32
  }
}

module attributes {stable_mosaic.version = 11 : i64} {
  func.func @_conv1d_tap_kernel(%arg0: i32, %arg1: i32, %arg2: memref<2x70x64xf32, #tpu.memory_space<vmem>>, %arg3: memref<3x64x64xf32, #tpu.memory_space<vmem>>, %arg4: memref<1x64xf32, #tpu.memory_space<vmem>>, %arg5: memref<2x64x64xf32, #tpu.memory_space<vmem>>) attributes {dimension_semantics = [#tpu.dimension_semantics<parallel>, #tpu.dimension_semantics<arbitrary>], iteration_bounds = array<i64: 1, 3>, scalar_prefetch = 0 : i64, scratch_operands = 0 : i64, tpu.core_type = #tpu.core_type<tc>, window_params = [{pipeline_mode = #tpu.pipeline_mode<synchronous>, transform_indices = @transform_0, window_bounds = array<i64: 2, 70, 64>}, {pipeline_mode = #tpu.pipeline_mode<synchronous>, transform_indices = @transform_1, window_bounds = array<i64: 3, 64, 64>}, {pipeline_mode = #tpu.pipeline_mode<synchronous>, transform_indices = @transform_2, window_bounds = array<i64: 1, 64>}, {transform_indices = @transform_3, window_bounds = array<i64: 2, 64, 64>}]} {
    %c0_i32 = arith.constant 0 : i32
    %0 = arith.cmpi eq, %arg1, %c0_i32 : i32
    %1 = arith.extui %0 : i1 to i32
    %c0_i32_0 = arith.constant 0 : i32
    %2 = arith.cmpi ne, %1, %c0_i32_0 : i32
    scf.if %2 {
      %cst_13 = arith.constant 0.000000e+00 : f32
      %23 = vector.broadcast %cst_13 : f32 to vector<2x64x64xf32>
      %c0_14 = arith.constant 0 : index
      %c0_15 = arith.constant 0 : index
      %c0_16 = arith.constant 0 : index
      %24 = vector.load %arg5[%c0_14, %c0_15, %c0_16] : memref<2x64x64xf32, #tpu.memory_space<vmem>>, vector<2x64x64xf32>
      tpu.vector_store %arg5[%c0_14, %c0_15, %c0_16], %23 {strides = array<i32>} : memref<2x64x64xf32, #tpu.memory_space<vmem>>, vector<2x64x64xf32>,
    } else {
    }
    %c64_i32 = arith.constant 64 : i32
    %3 = arith.muli %arg0, %c64_i32 : i32
    %c3_i32 = arith.constant 3 : i32
    %4 = arith.muli %arg1, %c3_i32 : i32
    %5 = arith.addi %3, %4 : i32
    %c0 = arith.constant 0 : index
    %6 = arith.index_cast %5 : i32 to index
    %c0_1 = arith.constant 0 : index
    %7 = vector.load %arg2[%c0, %6, %c0_1] : memref<2x70x64xf32, #tpu.memory_space<vmem>>, vector<2x64x64xf32>
    %cst = arith.constant 0.000000e+00 : f32
    %8 = vector.broadcast %cst : f32 to vector<2x64x64xf32>
    %9 = arith.cmpf oge, %7, %8 : vector<2x64x64xf32>
    %cst_2 = arith.constant 1.000000e-01 : f32
    %10 = vector.broadcast %cst_2 : f32 to vector<2x64x64xf32>
    %11 = arith.mulf %10, %7 : vector<2x64x64xf32>
    %12 = arith.select %9, %7, %11 : vector<2x64x64xi1>, vector<2x64x64xf32>
    %c0_3 = arith.constant 0 : index
    %c0_4 = arith.constant 0 : index
    %c0_5 = arith.constant 0 : index
    %13 = vector.load %arg5[%c0_3, %c0_4, %c0_5] : memref<2x64x64xf32, #tpu.memory_space<vmem>>, vector<2x64x64xf32>
    %14 = arith.index_cast %arg1 : i32 to index
    %c0_6 = arith.constant 0 : index
    %c0_7 = arith.constant 0 : index
    %15 = vector.load %arg3[%14, %c0_6, %c0_7] : memref<3x64x64xf32, #tpu.memory_space<vmem>>, vector<1x64x64xf32>
    %16 = vector.shape_cast %15 : vector<1x64x64xf32> to vector<64x64xf32>
    %cst_8 = arith.constant dense<0.000000e+00> : vector<2x64x64xf32>
    %17 = tpu.matmul %12, %16, %cst_8 {dimension_numbers = #tpu.dot_dimension_numbers<[2], [0], [0, 1], [1], [0, 0, 0, 1, 1, 1], [], []>} : vector<2x64x64xf32>, vector<64x64xf32>, vector<2x64x64xf32> -> vector<2x64x64xf32>
    %18 = arith.addf %13, %17 : vector<2x64x64xf32>
    %c0_9 = arith.constant 0 : index
    %c0_10 = arith.constant 0 : index
    %c0_11 = arith.constant 0 : index
    %19 = vector.load %arg5[%c0_9, %c0_10, %c0_11] : memref<2x64x64xf32, #tpu.memory_space<vmem>>, vector<2x64x64xf32>
    tpu.vector_store %arg5[%c0_9, %c0_10, %c0_11], %18 {strides = array<i32>} : memref<2x64x64xf32, #tpu.memory_space<vmem>>, vector<2x64x64xf32>,
    %c2_i32 = arith.constant 2 : i32
    %20 = arith.cmpi eq, %arg1, %c2_i32 : i32
    %21 = arith.extui %20 : i1 to i32
    %c0_i32_12 = arith.constant 0 : i32
    %22 = arith.cmpi ne, %21, %c0_i32_12 : i32
    scf.if %22 {
      %c0_13 = arith.constant 0 : index
      %c0_14 = arith.constant 0 : index
      %c0_15 = arith.constant 0 : index
      %23 = vector.load %arg5[%c0_13, %c0_14, %c0_15] : memref<2x64x64xf32, #tpu.memory_space<vmem>>, vector<2x64x64xf32>
      %c0_16 = arith.constant 0 : index
      %c0_17 = arith.constant 0 : index
      %24 = vector.load %arg4[%c0_16, %c0_17] : memref<1x64xf32, #tpu.memory_space<vmem>>, vector<1x64xf32>
      %25 = vector.shape_cast %24 : vector<1x64xf32> to vector<64xf32>
      %26 = vector.shape_cast %25 : vector<64xf32> to vector<1x1x64xf32>
      %27 = vector.broadcast %26 : vector<1x1x64xf32> to vector<2x64x64xf32>
      %28 = arith.addf %23, %27 : vector<2x64x64xf32>
      %c0_18 = arith.constant 0 : index
      %c0_19 = arith.constant 0 : index
      %c0_20 = arith.constant 0 : index
      %29 = vector.load %arg5[%c0_18, %c0_19, %c0_20] : memref<2x64x64xf32, #tpu.memory_space<vmem>>, vector<2x64x64xf32>
      tpu.vector_store %arg5[%c0_18, %c0_19, %c0_20], %28 {strides = array<i32>} : memref<2x64x64xf32, #tpu.memory_space<vmem>>, vector<2x64x64xf32>,
    } else {
    }
    return
  }
  func.func @transform_0(%arg0: i32, %arg1: i32) -> (i32, i32, i32) {
    %c0_i32 = arith.constant 0 : i32
    %c0_i32_0 = arith.constant 0 : i32
    %c0_i32_1 = arith.constant 0 : i32
    %c0_i32_2 = arith.constant 0 : i32
    return %c0_i32, %c0_i32_0, %c0_i32_1 : i32, i32, i32
  }
  func.func @transform_1(%arg0: i32, %arg1: i32) -> (i32, i32, i32) {
    %c0_i32 = arith.constant 0 : i32
    %c0_i32_0 = arith.constant 0 : i32
    %c0_i32_1 = arith.constant 0 : i32
    %c0_i32_2 = arith.constant 0 : i32
    return %c0_i32, %c0_i32_0, %c0_i32_1 : i32, i32, i32
  }
  func.func @transform_2(%arg0: i32, %arg1: i32) -> (i32, i32) {
    %c0_i32 = arith.constant 0 : i32
    %c0_i32_0 = arith.constant 0 : i32
    %c0_i32_1 = arith.constant 0 : i32
    return %c0_i32, %c0_i32_0 : i32, i32
  }
  func.func @transform_3(%arg0: i32, %arg1: i32) -> (i32, i32, i32) {
    %c0_i32 = arith.constant 0 : i32
    %c0_i32_0 = arith.constant 0 : i32
    %c0_i32_1 = arith.constant 0 : i32
    return %c0_i32, %arg0, %c0_i32_0 : i32, i32, i32
  }
}

module attributes {stable_mosaic.version = 11 : i64} {
  func.func @_conv1d_tap_kernel(%arg0: i32, %arg1: i32, %arg2: memref<2x263x64xf32, #tpu.memory_space<vmem>>, %arg3: memref<8x64x32xf32, #tpu.memory_space<vmem>>, %arg4: memref<1x32xf32, #tpu.memory_space<vmem>>, %arg5: memref<2x256x32xf32, #tpu.memory_space<vmem>>) attributes {dimension_semantics = [#tpu.dimension_semantics<parallel>, #tpu.dimension_semantics<arbitrary>], iteration_bounds = array<i64: 1, 8>, scalar_prefetch = 0 : i64, scratch_operands = 0 : i64, tpu.core_type = #tpu.core_type<tc>, window_params = [{pipeline_mode = #tpu.pipeline_mode<synchronous>, transform_indices = @transform_0, window_bounds = array<i64: 2, 263, 64>}, {pipeline_mode = #tpu.pipeline_mode<synchronous>, transform_indices = @transform_1, window_bounds = array<i64: 8, 64, 32>}, {pipeline_mode = #tpu.pipeline_mode<synchronous>, transform_indices = @transform_2, window_bounds = array<i64: 1, 32>}, {transform_indices = @transform_3, window_bounds = array<i64: 2, 256, 32>}]} {
    %c0_i32 = arith.constant 0 : i32
    %0 = arith.cmpi eq, %arg1, %c0_i32 : i32
    %1 = arith.extui %0 : i1 to i32
    %c0_i32_0 = arith.constant 0 : i32
    %2 = arith.cmpi ne, %1, %c0_i32_0 : i32
    scf.if %2 {
      %cst_13 = arith.constant 0.000000e+00 : f32
      %23 = vector.broadcast %cst_13 : f32 to vector<2x256x32xf32>
      %c0_14 = arith.constant 0 : index
      %c0_15 = arith.constant 0 : index
      %c0_16 = arith.constant 0 : index
      %24 = vector.load %arg5[%c0_14, %c0_15, %c0_16] : memref<2x256x32xf32, #tpu.memory_space<vmem>>, vector<2x256x32xf32>
      tpu.vector_store %arg5[%c0_14, %c0_15, %c0_16], %23 {strides = array<i32>} : memref<2x256x32xf32, #tpu.memory_space<vmem>>, vector<2x256x32xf32>,
    } else {
    }
    %c256_i32 = arith.constant 256 : i32
    %3 = arith.muli %arg0, %c256_i32 : i32
    %c1_i32 = arith.constant 1 : i32
    %4 = arith.muli %arg1, %c1_i32 : i32
    %5 = arith.addi %3, %4 : i32
    %c0 = arith.constant 0 : index
    %6 = arith.index_cast %5 : i32 to index
    %c0_1 = arith.constant 0 : index
    %7 = vector.load %arg2[%c0, %6, %c0_1] : memref<2x263x64xf32, #tpu.memory_space<vmem>>, vector<2x256x64xf32>
    %cst = arith.constant 0.000000e+00 : f32
    %8 = vector.broadcast %cst : f32 to vector<2x256x64xf32>
    %9 = arith.cmpf oge, %7, %8 : vector<2x256x64xf32>
    %cst_2 = arith.constant 1.000000e-01 : f32
    %10 = vector.broadcast %cst_2 : f32 to vector<2x256x64xf32>
    %11 = arith.mulf %10, %7 : vector<2x256x64xf32>
    %12 = arith.select %9, %7, %11 : vector<2x256x64xi1>, vector<2x256x64xf32>
    %c0_3 = arith.constant 0 : index
    %c0_4 = arith.constant 0 : index
    %c0_5 = arith.constant 0 : index
    %13 = vector.load %arg5[%c0_3, %c0_4, %c0_5] : memref<2x256x32xf32, #tpu.memory_space<vmem>>, vector<2x256x32xf32>
    %14 = arith.index_cast %arg1 : i32 to index
    %c0_6 = arith.constant 0 : index
    %c0_7 = arith.constant 0 : index
    %15 = vector.load %arg3[%14, %c0_6, %c0_7] : memref<8x64x32xf32, #tpu.memory_space<vmem>>, vector<1x64x32xf32>
    %16 = vector.shape_cast %15 : vector<1x64x32xf32> to vector<64x32xf32>
    %cst_8 = arith.constant dense<0.000000e+00> : vector<2x256x32xf32>
    %17 = tpu.matmul %12, %16, %cst_8 {dimension_numbers = #tpu.dot_dimension_numbers<[2], [0], [0, 1], [1], [0, 0, 0, 1, 1, 1], [], []>} : vector<2x256x64xf32>, vector<64x32xf32>, vector<2x256x32xf32> -> vector<2x256x32xf32>
    %18 = arith.addf %13, %17 : vector<2x256x32xf32>
    %c0_9 = arith.constant 0 : index
    %c0_10 = arith.constant 0 : index
    %c0_11 = arith.constant 0 : index
    %19 = vector.load %arg5[%c0_9, %c0_10, %c0_11] : memref<2x256x32xf32, #tpu.memory_space<vmem>>, vector<2x256x32xf32>
    tpu.vector_store %arg5[%c0_9, %c0_10, %c0_11], %18 {strides = array<i32>} : memref<2x256x32xf32, #tpu.memory_space<vmem>>, vector<2x256x32xf32>,
    %c7_i32 = arith.constant 7 : i32
    %20 = arith.cmpi eq, %arg1, %c7_i32 : i32
    %21 = arith.extui %20 : i1 to i32
    %c0_i32_12 = arith.constant 0 : i32
    %22 = arith.cmpi ne, %21, %c0_i32_12 : i32
    scf.if %22 {
      %c0_13 = arith.constant 0 : index
      %c0_14 = arith.constant 0 : index
      %c0_15 = arith.constant 0 : index
      %23 = vector.load %arg5[%c0_13, %c0_14, %c0_15] : memref<2x256x32xf32, #tpu.memory_space<vmem>>, vector<2x256x32xf32>
      %c0_16 = arith.constant 0 : index
      %c0_17 = arith.constant 0 : index
      %24 = vector.load %arg4[%c0_16, %c0_17] : memref<1x32xf32, #tpu.memory_space<vmem>>, vector<1x32xf32>
      %25 = vector.shape_cast %24 : vector<1x32xf32> to vector<32xf32>
      %26 = vector.shape_cast %25 : vector<32xf32> to vector<1x1x32xf32>
      %27 = vector.broadcast %26 : vector<1x1x32xf32> to vector<2x256x32xf32>
      %28 = arith.addf %23, %27 : vector<2x256x32xf32>
      %c0_18 = arith.constant 0 : index
      %c0_19 = arith.constant 0 : index
      %c0_20 = arith.constant 0 : index
      %29 = vector.load %arg5[%c0_18, %c0_19, %c0_20] : memref<2x256x32xf32, #tpu.memory_space<vmem>>, vector<2x256x32xf32>
      tpu.vector_store %arg5[%c0_18, %c0_19, %c0_20], %28 {strides = array<i32>} : memref<2x256x32xf32, #tpu.memory_space<vmem>>, vector<2x256x32xf32>,
    } else {
    }
    return
  }
  func.func @transform_0(%arg0: i32, %arg1: i32) -> (i32, i32, i32) {
    %c0_i32 = arith.constant 0 : i32
    %c0_i32_0 = arith.constant 0 : i32
    %c0_i32_1 = arith.constant 0 : i32
    %c0_i32_2 = arith.constant 0 : i32
    return %c0_i32, %c0_i32_0, %c0_i32_1 : i32, i32, i32
  }
  func.func @transform_1(%arg0: i32, %arg1: i32) -> (i32, i32, i32) {
    %c0_i32 = arith.constant 0 : i32
    %c0_i32_0 = arith.constant 0 : i32
    %c0_i32_1 = arith.constant 0 : i32
    %c0_i32_2 = arith.constant 0 : i32
    return %c0_i32, %c0_i32_0, %c0_i32_1 : i32, i32, i32
  }
  func.func @transform_2(%arg0: i32, %arg1: i32) -> (i32, i32) {
    %c0_i32 = arith.constant 0 : i32
    %c0_i32_0 = arith.constant 0 : i32
    %c0_i32_1 = arith.constant 0 : i32
    return %c0_i32, %c0_i32_0 : i32, i32
  }
  func.func @transform_3(%arg0: i32, %arg1: i32) -> (i32, i32, i32) {
    %c0_i32 = arith.constant 0 : i32
    %c0_i32_0 = arith.constant 0 : i32
    %c0_i32_1 = arith.constant 0 : i32
    return %c0_i32, %arg0, %c0_i32_0 : i32, i32, i32
  }
}

module attributes {stable_mosaic.version = 11 : i64} {
  func.func @_conv1d_tap_kernel(%arg0: i32, %arg1: i32, %arg2: memref<2x260x32xf32, #tpu.memory_space<vmem>>, %arg3: memref<5x32x32xf32, #tpu.memory_space<vmem>>, %arg4: memref<1x32xf32, #tpu.memory_space<vmem>>, %arg5: memref<2x256x32xf32, #tpu.memory_space<vmem>>) attributes {dimension_semantics = [#tpu.dimension_semantics<parallel>, #tpu.dimension_semantics<arbitrary>], iteration_bounds = array<i64: 1, 5>, scalar_prefetch = 0 : i64, scratch_operands = 0 : i64, tpu.core_type = #tpu.core_type<tc>, window_params = [{pipeline_mode = #tpu.pipeline_mode<synchronous>, transform_indices = @transform_0, window_bounds = array<i64: 2, 260, 32>}, {pipeline_mode = #tpu.pipeline_mode<synchronous>, transform_indices = @transform_1, window_bounds = array<i64: 5, 32, 32>}, {pipeline_mode = #tpu.pipeline_mode<synchronous>, transform_indices = @transform_2, window_bounds = array<i64: 1, 32>}, {transform_indices = @transform_3, window_bounds = array<i64: 2, 256, 32>}]} {
    %c0_i32 = arith.constant 0 : i32
    %0 = arith.cmpi eq, %arg1, %c0_i32 : i32
    %1 = arith.extui %0 : i1 to i32
    %c0_i32_0 = arith.constant 0 : i32
    %2 = arith.cmpi ne, %1, %c0_i32_0 : i32
    scf.if %2 {
      %cst_13 = arith.constant 0.000000e+00 : f32
      %23 = vector.broadcast %cst_13 : f32 to vector<2x256x32xf32>
      %c0_14 = arith.constant 0 : index
      %c0_15 = arith.constant 0 : index
      %c0_16 = arith.constant 0 : index
      %24 = vector.load %arg5[%c0_14, %c0_15, %c0_16] : memref<2x256x32xf32, #tpu.memory_space<vmem>>, vector<2x256x32xf32>
      tpu.vector_store %arg5[%c0_14, %c0_15, %c0_16], %23 {strides = array<i32>} : memref<2x256x32xf32, #tpu.memory_space<vmem>>, vector<2x256x32xf32>,
    } else {
    }
    %c256_i32 = arith.constant 256 : i32
    %3 = arith.muli %arg0, %c256_i32 : i32
    %c1_i32 = arith.constant 1 : i32
    %4 = arith.muli %arg1, %c1_i32 : i32
    %5 = arith.addi %3, %4 : i32
    %c0 = arith.constant 0 : index
    %6 = arith.index_cast %5 : i32 to index
    %c0_1 = arith.constant 0 : index
    %7 = vector.load %arg2[%c0, %6, %c0_1] : memref<2x260x32xf32, #tpu.memory_space<vmem>>, vector<2x256x32xf32>
    %cst = arith.constant 0.000000e+00 : f32
    %8 = vector.broadcast %cst : f32 to vector<2x256x32xf32>
    %9 = arith.cmpf oge, %7, %8 : vector<2x256x32xf32>
    %cst_2 = arith.constant 1.000000e-01 : f32
    %10 = vector.broadcast %cst_2 : f32 to vector<2x256x32xf32>
    %11 = arith.mulf %10, %7 : vector<2x256x32xf32>
    %12 = arith.select %9, %7, %11 : vector<2x256x32xi1>, vector<2x256x32xf32>
    %c0_3 = arith.constant 0 : index
    %c0_4 = arith.constant 0 : index
    %c0_5 = arith.constant 0 : index
    %13 = vector.load %arg5[%c0_3, %c0_4, %c0_5] : memref<2x256x32xf32, #tpu.memory_space<vmem>>, vector<2x256x32xf32>
    %14 = arith.index_cast %arg1 : i32 to index
    %c0_6 = arith.constant 0 : index
    %c0_7 = arith.constant 0 : index
    %15 = vector.load %arg3[%14, %c0_6, %c0_7] : memref<5x32x32xf32, #tpu.memory_space<vmem>>, vector<1x32x32xf32>
    %16 = vector.shape_cast %15 : vector<1x32x32xf32> to vector<32x32xf32>
    %cst_8 = arith.constant dense<0.000000e+00> : vector<2x256x32xf32>
    %17 = tpu.matmul %12, %16, %cst_8 {dimension_numbers = #tpu.dot_dimension_numbers<[2], [0], [0, 1], [1], [0, 0, 0, 1, 1, 1], [], []>} : vector<2x256x32xf32>, vector<32x32xf32>, vector<2x256x32xf32> -> vector<2x256x32xf32>
    %18 = arith.addf %13, %17 : vector<2x256x32xf32>
    %c0_9 = arith.constant 0 : index
    %c0_10 = arith.constant 0 : index
    %c0_11 = arith.constant 0 : index
    %19 = vector.load %arg5[%c0_9, %c0_10, %c0_11] : memref<2x256x32xf32, #tpu.memory_space<vmem>>, vector<2x256x32xf32>
    tpu.vector_store %arg5[%c0_9, %c0_10, %c0_11], %18 {strides = array<i32>} : memref<2x256x32xf32, #tpu.memory_space<vmem>>, vector<2x256x32xf32>,
    %c4_i32 = arith.constant 4 : i32
    %20 = arith.cmpi eq, %arg1, %c4_i32 : i32
    %21 = arith.extui %20 : i1 to i32
    %c0_i32_12 = arith.constant 0 : i32
    %22 = arith.cmpi ne, %21, %c0_i32_12 : i32
    scf.if %22 {
      %c0_13 = arith.constant 0 : index
      %c0_14 = arith.constant 0 : index
      %c0_15 = arith.constant 0 : index
      %23 = vector.load %arg5[%c0_13, %c0_14, %c0_15] : memref<2x256x32xf32, #tpu.memory_space<vmem>>, vector<2x256x32xf32>
      %c0_16 = arith.constant 0 : index
      %c0_17 = arith.constant 0 : index
      %24 = vector.load %arg4[%c0_16, %c0_17] : memref<1x32xf32, #tpu.memory_space<vmem>>, vector<1x32xf32>
      %25 = vector.shape_cast %24 : vector<1x32xf32> to vector<32xf32>
      %26 = vector.shape_cast %25 : vector<32xf32> to vector<1x1x32xf32>
      %27 = vector.broadcast %26 : vector<1x1x32xf32> to vector<2x256x32xf32>
      %28 = arith.addf %23, %27 : vector<2x256x32xf32>
      %c0_18 = arith.constant 0 : index
      %c0_19 = arith.constant 0 : index
      %c0_20 = arith.constant 0 : index
      %29 = vector.load %arg5[%c0_18, %c0_19, %c0_20] : memref<2x256x32xf32, #tpu.memory_space<vmem>>, vector<2x256x32xf32>
      tpu.vector_store %arg5[%c0_18, %c0_19, %c0_20], %28 {strides = array<i32>} : memref<2x256x32xf32, #tpu.memory_space<vmem>>, vector<2x256x32xf32>,
    } else {
    }
    return
  }
  func.func @transform_0(%arg0: i32, %arg1: i32) -> (i32, i32, i32) {
    %c0_i32 = arith.constant 0 : i32
    %c0_i32_0 = arith.constant 0 : i32
    %c0_i32_1 = arith.constant 0 : i32
    %c0_i32_2 = arith.constant 0 : i32
    return %c0_i32, %c0_i32_0, %c0_i32_1 : i32, i32, i32
  }
  func.func @transform_1(%arg0: i32, %arg1: i32) -> (i32, i32, i32) {
    %c0_i32 = arith.constant 0 : i32
    %c0_i32_0 = arith.constant 0 : i32
    %c0_i32_1 = arith.constant 0 : i32
    %c0_i32_2 = arith.constant 0 : i32
    return %c0_i32, %c0_i32_0, %c0_i32_1 : i32, i32, i32
  }
  func.func @transform_2(%arg0: i32, %arg1: i32) -> (i32, i32) {
    %c0_i32 = arith.constant 0 : i32
    %c0_i32_0 = arith.constant 0 : i32
    %c0_i32_1 = arith.constant 0 : i32
    return %c0_i32, %c0_i32_0 : i32, i32
  }
  func.func @transform_3(%arg0: i32, %arg1: i32) -> (i32, i32, i32) {
    %c0_i32 = arith.constant 0 : i32
    %c0_i32_0 = arith.constant 0 : i32
    %c0_i32_1 = arith.constant 0 : i32
    return %c0_i32, %arg0, %c0_i32_0 : i32, i32, i32
  }
}

module attributes {stable_mosaic.version = 11 : i64} {
  func.func @_conv1d_tap_kernel(%arg0: i32, %arg1: i32, %arg2: memref<2x258x32xf32, #tpu.memory_space<vmem>>, %arg3: memref<3x32x32xf32, #tpu.memory_space<vmem>>, %arg4: memref<1x32xf32, #tpu.memory_space<vmem>>, %arg5: memref<2x256x32xf32, #tpu.memory_space<vmem>>) attributes {dimension_semantics = [#tpu.dimension_semantics<parallel>, #tpu.dimension_semantics<arbitrary>], iteration_bounds = array<i64: 1, 3>, scalar_prefetch = 0 : i64, scratch_operands = 0 : i64, tpu.core_type = #tpu.core_type<tc>, window_params = [{pipeline_mode = #tpu.pipeline_mode<synchronous>, transform_indices = @transform_0, window_bounds = array<i64: 2, 258, 32>}, {pipeline_mode = #tpu.pipeline_mode<synchronous>, transform_indices = @transform_1, window_bounds = array<i64: 3, 32, 32>}, {pipeline_mode = #tpu.pipeline_mode<synchronous>, transform_indices = @transform_2, window_bounds = array<i64: 1, 32>}, {transform_indices = @transform_3, window_bounds = array<i64: 2, 256, 32>}]} {
    %c0_i32 = arith.constant 0 : i32
    %0 = arith.cmpi eq, %arg1, %c0_i32 : i32
    %1 = arith.extui %0 : i1 to i32
    %c0_i32_0 = arith.constant 0 : i32
    %2 = arith.cmpi ne, %1, %c0_i32_0 : i32
    scf.if %2 {
      %cst_13 = arith.constant 0.000000e+00 : f32
      %23 = vector.broadcast %cst_13 : f32 to vector<2x256x32xf32>
      %c0_14 = arith.constant 0 : index
      %c0_15 = arith.constant 0 : index
      %c0_16 = arith.constant 0 : index
      %24 = vector.load %arg5[%c0_14, %c0_15, %c0_16] : memref<2x256x32xf32, #tpu.memory_space<vmem>>, vector<2x256x32xf32>
      tpu.vector_store %arg5[%c0_14, %c0_15, %c0_16], %23 {strides = array<i32>} : memref<2x256x32xf32, #tpu.memory_space<vmem>>, vector<2x256x32xf32>,
    } else {
    }
    %c256_i32 = arith.constant 256 : i32
    %3 = arith.muli %arg0, %c256_i32 : i32
    %c1_i32 = arith.constant 1 : i32
    %4 = arith.muli %arg1, %c1_i32 : i32
    %5 = arith.addi %3, %4 : i32
    %c0 = arith.constant 0 : index
    %6 = arith.index_cast %5 : i32 to index
    %c0_1 = arith.constant 0 : index
    %7 = vector.load %arg2[%c0, %6, %c0_1] : memref<2x258x32xf32, #tpu.memory_space<vmem>>, vector<2x256x32xf32>
    %cst = arith.constant 0.000000e+00 : f32
    %8 = vector.broadcast %cst : f32 to vector<2x256x32xf32>
    %9 = arith.cmpf oge, %7, %8 : vector<2x256x32xf32>
    %cst_2 = arith.constant 1.000000e-01 : f32
    %10 = vector.broadcast %cst_2 : f32 to vector<2x256x32xf32>
    %11 = arith.mulf %10, %7 : vector<2x256x32xf32>
    %12 = arith.select %9, %7, %11 : vector<2x256x32xi1>, vector<2x256x32xf32>
    %c0_3 = arith.constant 0 : index
    %c0_4 = arith.constant 0 : index
    %c0_5 = arith.constant 0 : index
    %13 = vector.load %arg5[%c0_3, %c0_4, %c0_5] : memref<2x256x32xf32, #tpu.memory_space<vmem>>, vector<2x256x32xf32>
    %14 = arith.index_cast %arg1 : i32 to index
    %c0_6 = arith.constant 0 : index
    %c0_7 = arith.constant 0 : index
    %15 = vector.load %arg3[%14, %c0_6, %c0_7] : memref<3x32x32xf32, #tpu.memory_space<vmem>>, vector<1x32x32xf32>
    %16 = vector.shape_cast %15 : vector<1x32x32xf32> to vector<32x32xf32>
    %cst_8 = arith.constant dense<0.000000e+00> : vector<2x256x32xf32>
    %17 = tpu.matmul %12, %16, %cst_8 {dimension_numbers = #tpu.dot_dimension_numbers<[2], [0], [0, 1], [1], [0, 0, 0, 1, 1, 1], [], []>} : vector<2x256x32xf32>, vector<32x32xf32>, vector<2x256x32xf32> -> vector<2x256x32xf32>
    %18 = arith.addf %13, %17 : vector<2x256x32xf32>
    %c0_9 = arith.constant 0 : index
    %c0_10 = arith.constant 0 : index
    %c0_11 = arith.constant 0 : index
    %19 = vector.load %arg5[%c0_9, %c0_10, %c0_11] : memref<2x256x32xf32, #tpu.memory_space<vmem>>, vector<2x256x32xf32>
    tpu.vector_store %arg5[%c0_9, %c0_10, %c0_11], %18 {strides = array<i32>} : memref<2x256x32xf32, #tpu.memory_space<vmem>>, vector<2x256x32xf32>,
    %c2_i32 = arith.constant 2 : i32
    %20 = arith.cmpi eq, %arg1, %c2_i32 : i32
    %21 = arith.extui %20 : i1 to i32
    %c0_i32_12 = arith.constant 0 : i32
    %22 = arith.cmpi ne, %21, %c0_i32_12 : i32
    scf.if %22 {
      %c0_13 = arith.constant 0 : index
      %c0_14 = arith.constant 0 : index
      %c0_15 = arith.constant 0 : index
      %23 = vector.load %arg5[%c0_13, %c0_14, %c0_15] : memref<2x256x32xf32, #tpu.memory_space<vmem>>, vector<2x256x32xf32>
      %c0_16 = arith.constant 0 : index
      %c0_17 = arith.constant 0 : index
      %24 = vector.load %arg4[%c0_16, %c0_17] : memref<1x32xf32, #tpu.memory_space<vmem>>, vector<1x32xf32>
      %25 = vector.shape_cast %24 : vector<1x32xf32> to vector<32xf32>
      %26 = vector.shape_cast %25 : vector<32xf32> to vector<1x1x32xf32>
      %27 = vector.broadcast %26 : vector<1x1x32xf32> to vector<2x256x32xf32>
      %28 = arith.addf %23, %27 : vector<2x256x32xf32>
      %c0_18 = arith.constant 0 : index
      %c0_19 = arith.constant 0 : index
      %c0_20 = arith.constant 0 : index
      %29 = vector.load %arg5[%c0_18, %c0_19, %c0_20] : memref<2x256x32xf32, #tpu.memory_space<vmem>>, vector<2x256x32xf32>
      tpu.vector_store %arg5[%c0_18, %c0_19, %c0_20], %28 {strides = array<i32>} : memref<2x256x32xf32, #tpu.memory_space<vmem>>, vector<2x256x32xf32>,
    } else {
    }
    return
  }
  func.func @transform_0(%arg0: i32, %arg1: i32) -> (i32, i32, i32) {
    %c0_i32 = arith.constant 0 : i32
    %c0_i32_0 = arith.constant 0 : i32
    %c0_i32_1 = arith.constant 0 : i32
    %c0_i32_2 = arith.constant 0 : i32
    return %c0_i32, %c0_i32_0, %c0_i32_1 : i32, i32, i32
  }
  func.func @transform_1(%arg0: i32, %arg1: i32) -> (i32, i32, i32) {
    %c0_i32 = arith.constant 0 : i32
    %c0_i32_0 = arith.constant 0 : i32
    %c0_i32_1 = arith.constant 0 : i32
    %c0_i32_2 = arith.constant 0 : i32
    return %c0_i32, %c0_i32_0, %c0_i32_1 : i32, i32, i32
  }
  func.func @transform_2(%arg0: i32, %arg1: i32) -> (i32, i32) {
    %c0_i32 = arith.constant 0 : i32
    %c0_i32_0 = arith.constant 0 : i32
    %c0_i32_1 = arith.constant 0 : i32
    return %c0_i32, %c0_i32_0 : i32, i32
  }
  func.func @transform_3(%arg0: i32, %arg1: i32) -> (i32, i32, i32) {
    %c0_i32 = arith.constant 0 : i32
    %c0_i32_0 = arith.constant 0 : i32
    %c0_i32_1 = arith.constant 0 : i32
    return %c0_i32, %arg0, %c0_i32_0 : i32, i32, i32
  }
}

module attributes {stable_mosaic.version = 11 : i64} {
  func.func @_conv1d_tap_kernel(%arg0: i32, %arg1: i32, %arg2: memref<2x268x32xf32, #tpu.memory_space<vmem>>, %arg3: memref<5x32x32xf32, #tpu.memory_space<vmem>>, %arg4: memref<1x32xf32, #tpu.memory_space<vmem>>, %arg5: memref<2x256x32xf32, #tpu.memory_space<vmem>>) attributes {dimension_semantics = [#tpu.dimension_semantics<parallel>, #tpu.dimension_semantics<arbitrary>], iteration_bounds = array<i64: 1, 5>, scalar_prefetch = 0 : i64, scratch_operands = 0 : i64, tpu.core_type = #tpu.core_type<tc>, window_params = [{pipeline_mode = #tpu.pipeline_mode<synchronous>, transform_indices = @transform_0, window_bounds = array<i64: 2, 268, 32>}, {pipeline_mode = #tpu.pipeline_mode<synchronous>, transform_indices = @transform_1, window_bounds = array<i64: 5, 32, 32>}, {pipeline_mode = #tpu.pipeline_mode<synchronous>, transform_indices = @transform_2, window_bounds = array<i64: 1, 32>}, {transform_indices = @transform_3, window_bounds = array<i64: 2, 256, 32>}]} {
    %c0_i32 = arith.constant 0 : i32
    %0 = arith.cmpi eq, %arg1, %c0_i32 : i32
    %1 = arith.extui %0 : i1 to i32
    %c0_i32_0 = arith.constant 0 : i32
    %2 = arith.cmpi ne, %1, %c0_i32_0 : i32
    scf.if %2 {
      %cst_13 = arith.constant 0.000000e+00 : f32
      %23 = vector.broadcast %cst_13 : f32 to vector<2x256x32xf32>
      %c0_14 = arith.constant 0 : index
      %c0_15 = arith.constant 0 : index
      %c0_16 = arith.constant 0 : index
      %24 = vector.load %arg5[%c0_14, %c0_15, %c0_16] : memref<2x256x32xf32, #tpu.memory_space<vmem>>, vector<2x256x32xf32>
      tpu.vector_store %arg5[%c0_14, %c0_15, %c0_16], %23 {strides = array<i32>} : memref<2x256x32xf32, #tpu.memory_space<vmem>>, vector<2x256x32xf32>,
    } else {
    }
    %c256_i32 = arith.constant 256 : i32
    %3 = arith.muli %arg0, %c256_i32 : i32
    %c3_i32 = arith.constant 3 : i32
    %4 = arith.muli %arg1, %c3_i32 : i32
    %5 = arith.addi %3, %4 : i32
    %c0 = arith.constant 0 : index
    %6 = arith.index_cast %5 : i32 to index
    %c0_1 = arith.constant 0 : index
    %7 = vector.load %arg2[%c0, %6, %c0_1] : memref<2x268x32xf32, #tpu.memory_space<vmem>>, vector<2x256x32xf32>
    %cst = arith.constant 0.000000e+00 : f32
    %8 = vector.broadcast %cst : f32 to vector<2x256x32xf32>
    %9 = arith.cmpf oge, %7, %8 : vector<2x256x32xf32>
    %cst_2 = arith.constant 1.000000e-01 : f32
    %10 = vector.broadcast %cst_2 : f32 to vector<2x256x32xf32>
    %11 = arith.mulf %10, %7 : vector<2x256x32xf32>
    %12 = arith.select %9, %7, %11 : vector<2x256x32xi1>, vector<2x256x32xf32>
    %c0_3 = arith.constant 0 : index
    %c0_4 = arith.constant 0 : index
    %c0_5 = arith.constant 0 : index
    %13 = vector.load %arg5[%c0_3, %c0_4, %c0_5] : memref<2x256x32xf32, #tpu.memory_space<vmem>>, vector<2x256x32xf32>
    %14 = arith.index_cast %arg1 : i32 to index
    %c0_6 = arith.constant 0 : index
    %c0_7 = arith.constant 0 : index
    %15 = vector.load %arg3[%14, %c0_6, %c0_7] : memref<5x32x32xf32, #tpu.memory_space<vmem>>, vector<1x32x32xf32>
    %16 = vector.shape_cast %15 : vector<1x32x32xf32> to vector<32x32xf32>
    %cst_8 = arith.constant dense<0.000000e+00> : vector<2x256x32xf32>
    %17 = tpu.matmul %12, %16, %cst_8 {dimension_numbers = #tpu.dot_dimension_numbers<[2], [0], [0, 1], [1], [0, 0, 0, 1, 1, 1], [], []>} : vector<2x256x32xf32>, vector<32x32xf32>, vector<2x256x32xf32> -> vector<2x256x32xf32>
    %18 = arith.addf %13, %17 : vector<2x256x32xf32>
    %c0_9 = arith.constant 0 : index
    %c0_10 = arith.constant 0 : index
    %c0_11 = arith.constant 0 : index
    %19 = vector.load %arg5[%c0_9, %c0_10, %c0_11] : memref<2x256x32xf32, #tpu.memory_space<vmem>>, vector<2x256x32xf32>
    tpu.vector_store %arg5[%c0_9, %c0_10, %c0_11], %18 {strides = array<i32>} : memref<2x256x32xf32, #tpu.memory_space<vmem>>, vector<2x256x32xf32>,
    %c4_i32 = arith.constant 4 : i32
    %20 = arith.cmpi eq, %arg1, %c4_i32 : i32
    %21 = arith.extui %20 : i1 to i32
    %c0_i32_12 = arith.constant 0 : i32
    %22 = arith.cmpi ne, %21, %c0_i32_12 : i32
    scf.if %22 {
      %c0_13 = arith.constant 0 : index
      %c0_14 = arith.constant 0 : index
      %c0_15 = arith.constant 0 : index
      %23 = vector.load %arg5[%c0_13, %c0_14, %c0_15] : memref<2x256x32xf32, #tpu.memory_space<vmem>>, vector<2x256x32xf32>
      %c0_16 = arith.constant 0 : index
      %c0_17 = arith.constant 0 : index
      %24 = vector.load %arg4[%c0_16, %c0_17] : memref<1x32xf32, #tpu.memory_space<vmem>>, vector<1x32xf32>
      %25 = vector.shape_cast %24 : vector<1x32xf32> to vector<32xf32>
      %26 = vector.shape_cast %25 : vector<32xf32> to vector<1x1x32xf32>
      %27 = vector.broadcast %26 : vector<1x1x32xf32> to vector<2x256x32xf32>
      %28 = arith.addf %23, %27 : vector<2x256x32xf32>
      %c0_18 = arith.constant 0 : index
      %c0_19 = arith.constant 0 : index
      %c0_20 = arith.constant 0 : index
      %29 = vector.load %arg5[%c0_18, %c0_19, %c0_20] : memref<2x256x32xf32, #tpu.memory_space<vmem>>, vector<2x256x32xf32>
      tpu.vector_store %arg5[%c0_18, %c0_19, %c0_20], %28 {strides = array<i32>} : memref<2x256x32xf32, #tpu.memory_space<vmem>>, vector<2x256x32xf32>,
    } else {
    }
    return
  }
  func.func @transform_0(%arg0: i32, %arg1: i32) -> (i32, i32, i32) {
    %c0_i32 = arith.constant 0 : i32
    %c0_i32_0 = arith.constant 0 : i32
    %c0_i32_1 = arith.constant 0 : i32
    %c0_i32_2 = arith.constant 0 : i32
    return %c0_i32, %c0_i32_0, %c0_i32_1 : i32, i32, i32
  }
  func.func @transform_1(%arg0: i32, %arg1: i32) -> (i32, i32, i32) {
    %c0_i32 = arith.constant 0 : i32
    %c0_i32_0 = arith.constant 0 : i32
    %c0_i32_1 = arith.constant 0 : i32
    %c0_i32_2 = arith.constant 0 : i32
    return %c0_i32, %c0_i32_0, %c0_i32_1 : i32, i32, i32
  }
  func.func @transform_2(%arg0: i32, %arg1: i32) -> (i32, i32) {
    %c0_i32 = arith.constant 0 : i32
    %c0_i32_0 = arith.constant 0 : i32
    %c0_i32_1 = arith.constant 0 : i32
    return %c0_i32, %c0_i32_0 : i32, i32
  }
  func.func @transform_3(%arg0: i32, %arg1: i32) -> (i32, i32, i32) {
    %c0_i32 = arith.constant 0 : i32
    %c0_i32_0 = arith.constant 0 : i32
    %c0_i32_1 = arith.constant 0 : i32
    return %c0_i32, %arg0, %c0_i32_0 : i32, i32, i32
  }
}

module attributes {stable_mosaic.version = 11 : i64} {
  func.func @_conv1d_tap_kernel(%arg0: i32, %arg1: i32, %arg2: memref<2x262x32xf32, #tpu.memory_space<vmem>>, %arg3: memref<3x32x32xf32, #tpu.memory_space<vmem>>, %arg4: memref<1x32xf32, #tpu.memory_space<vmem>>, %arg5: memref<2x256x32xf32, #tpu.memory_space<vmem>>) attributes {dimension_semantics = [#tpu.dimension_semantics<parallel>, #tpu.dimension_semantics<arbitrary>], iteration_bounds = array<i64: 1, 3>, scalar_prefetch = 0 : i64, scratch_operands = 0 : i64, tpu.core_type = #tpu.core_type<tc>, window_params = [{pipeline_mode = #tpu.pipeline_mode<synchronous>, transform_indices = @transform_0, window_bounds = array<i64: 2, 262, 32>}, {pipeline_mode = #tpu.pipeline_mode<synchronous>, transform_indices = @transform_1, window_bounds = array<i64: 3, 32, 32>}, {pipeline_mode = #tpu.pipeline_mode<synchronous>, transform_indices = @transform_2, window_bounds = array<i64: 1, 32>}, {transform_indices = @transform_3, window_bounds = array<i64: 2, 256, 32>}]} {
    %c0_i32 = arith.constant 0 : i32
    %0 = arith.cmpi eq, %arg1, %c0_i32 : i32
    %1 = arith.extui %0 : i1 to i32
    %c0_i32_0 = arith.constant 0 : i32
    %2 = arith.cmpi ne, %1, %c0_i32_0 : i32
    scf.if %2 {
      %cst_13 = arith.constant 0.000000e+00 : f32
      %23 = vector.broadcast %cst_13 : f32 to vector<2x256x32xf32>
      %c0_14 = arith.constant 0 : index
      %c0_15 = arith.constant 0 : index
      %c0_16 = arith.constant 0 : index
      %24 = vector.load %arg5[%c0_14, %c0_15, %c0_16] : memref<2x256x32xf32, #tpu.memory_space<vmem>>, vector<2x256x32xf32>
      tpu.vector_store %arg5[%c0_14, %c0_15, %c0_16], %23 {strides = array<i32>} : memref<2x256x32xf32, #tpu.memory_space<vmem>>, vector<2x256x32xf32>,
    } else {
    }
    %c256_i32 = arith.constant 256 : i32
    %3 = arith.muli %arg0, %c256_i32 : i32
    %c3_i32 = arith.constant 3 : i32
    %4 = arith.muli %arg1, %c3_i32 : i32
    %5 = arith.addi %3, %4 : i32
    %c0 = arith.constant 0 : index
    %6 = arith.index_cast %5 : i32 to index
    %c0_1 = arith.constant 0 : index
    %7 = vector.load %arg2[%c0, %6, %c0_1] : memref<2x262x32xf32, #tpu.memory_space<vmem>>, vector<2x256x32xf32>
    %cst = arith.constant 0.000000e+00 : f32
    %8 = vector.broadcast %cst : f32 to vector<2x256x32xf32>
    %9 = arith.cmpf oge, %7, %8 : vector<2x256x32xf32>
    %cst_2 = arith.constant 1.000000e-01 : f32
    %10 = vector.broadcast %cst_2 : f32 to vector<2x256x32xf32>
    %11 = arith.mulf %10, %7 : vector<2x256x32xf32>
    %12 = arith.select %9, %7, %11 : vector<2x256x32xi1>, vector<2x256x32xf32>
    %c0_3 = arith.constant 0 : index
    %c0_4 = arith.constant 0 : index
    %c0_5 = arith.constant 0 : index
    %13 = vector.load %arg5[%c0_3, %c0_4, %c0_5] : memref<2x256x32xf32, #tpu.memory_space<vmem>>, vector<2x256x32xf32>
    %14 = arith.index_cast %arg1 : i32 to index
    %c0_6 = arith.constant 0 : index
    %c0_7 = arith.constant 0 : index
    %15 = vector.load %arg3[%14, %c0_6, %c0_7] : memref<3x32x32xf32, #tpu.memory_space<vmem>>, vector<1x32x32xf32>
    %16 = vector.shape_cast %15 : vector<1x32x32xf32> to vector<32x32xf32>
    %cst_8 = arith.constant dense<0.000000e+00> : vector<2x256x32xf32>
    %17 = tpu.matmul %12, %16, %cst_8 {dimension_numbers = #tpu.dot_dimension_numbers<[2], [0], [0, 1], [1], [0, 0, 0, 1, 1, 1], [], []>} : vector<2x256x32xf32>, vector<32x32xf32>, vector<2x256x32xf32> -> vector<2x256x32xf32>
    %18 = arith.addf %13, %17 : vector<2x256x32xf32>
    %c0_9 = arith.constant 0 : index
    %c0_10 = arith.constant 0 : index
    %c0_11 = arith.constant 0 : index
    %19 = vector.load %arg5[%c0_9, %c0_10, %c0_11] : memref<2x256x32xf32, #tpu.memory_space<vmem>>, vector<2x256x32xf32>
    tpu.vector_store %arg5[%c0_9, %c0_10, %c0_11], %18 {strides = array<i32>} : memref<2x256x32xf32, #tpu.memory_space<vmem>>, vector<2x256x32xf32>,
    %c2_i32 = arith.constant 2 : i32
    %20 = arith.cmpi eq, %arg1, %c2_i32 : i32
    %21 = arith.extui %20 : i1 to i32
    %c0_i32_12 = arith.constant 0 : i32
    %22 = arith.cmpi ne, %21, %c0_i32_12 : i32
    scf.if %22 {
      %c0_13 = arith.constant 0 : index
      %c0_14 = arith.constant 0 : index
      %c0_15 = arith.constant 0 : index
      %23 = vector.load %arg5[%c0_13, %c0_14, %c0_15] : memref<2x256x32xf32, #tpu.memory_space<vmem>>, vector<2x256x32xf32>
      %c0_16 = arith.constant 0 : index
      %c0_17 = arith.constant 0 : index
      %24 = vector.load %arg4[%c0_16, %c0_17] : memref<1x32xf32, #tpu.memory_space<vmem>>, vector<1x32xf32>
      %25 = vector.shape_cast %24 : vector<1x32xf32> to vector<32xf32>
      %26 = vector.shape_cast %25 : vector<32xf32> to vector<1x1x32xf32>
      %27 = vector.broadcast %26 : vector<1x1x32xf32> to vector<2x256x32xf32>
      %28 = arith.addf %23, %27 : vector<2x256x32xf32>
      %c0_18 = arith.constant 0 : index
      %c0_19 = arith.constant 0 : index
      %c0_20 = arith.constant 0 : index
      %29 = vector.load %arg5[%c0_18, %c0_19, %c0_20] : memref<2x256x32xf32, #tpu.memory_space<vmem>>, vector<2x256x32xf32>
      tpu.vector_store %arg5[%c0_18, %c0_19, %c0_20], %28 {strides = array<i32>} : memref<2x256x32xf32, #tpu.memory_space<vmem>>, vector<2x256x32xf32>,
    } else {
    }
    return
  }
  func.func @transform_0(%arg0: i32, %arg1: i32) -> (i32, i32, i32) {
    %c0_i32 = arith.constant 0 : i32
    %c0_i32_0 = arith.constant 0 : i32
    %c0_i32_1 = arith.constant 0 : i32
    %c0_i32_2 = arith.constant 0 : i32
    return %c0_i32, %c0_i32_0, %c0_i32_1 : i32, i32, i32
  }
  func.func @transform_1(%arg0: i32, %arg1: i32) -> (i32, i32, i32) {
    %c0_i32 = arith.constant 0 : i32
    %c0_i32_0 = arith.constant 0 : i32
    %c0_i32_1 = arith.constant 0 : i32
    %c0_i32_2 = arith.constant 0 : i32
    return %c0_i32, %c0_i32_0, %c0_i32_1 : i32, i32, i32
  }
  func.func @transform_2(%arg0: i32, %arg1: i32) -> (i32, i32) {
    %c0_i32 = arith.constant 0 : i32
    %c0_i32_0 = arith.constant 0 : i32
    %c0_i32_1 = arith.constant 0 : i32
    return %c0_i32, %c0_i32_0 : i32, i32
  }
  func.func @transform_3(%arg0: i32, %arg1: i32) -> (i32, i32, i32) {
    %c0_i32 = arith.constant 0 : i32
    %c0_i32_0 = arith.constant 0 : i32
    %c0_i32_1 = arith.constant 0 : i32
    return %c0_i32, %arg0, %c0_i32_0 : i32, i32, i32
  }
}

</mosaic_0001>

<bundles_post_ra>
// kernel: generator_forward.19
= control target key start
LH: loop header
LB: loop body
LE: loop exit
PB: predicated region body
PF: predicated region fallthrough
CT: control target
= control target key end

     0   :  { %s488_s12 = smov 0   ;;  %s490_s13 = smov 0   ;;  %s594_s0 = inlined_call_operand.vmem [shape: f32[2,22,32], index: 0, kind: input, shape index: {}]   ;;  %s595_s1 = inlined_call_operand.vmem [shape: f32[7,32,128], index: 1, kind: input, shape index: {}]   ;;  %s596_s2 = inlined_call_operand.vmem [shape: f32[1,128], index: 2, kind: input, shape index: {}]   ;;  %s597_s3 = inlined_call_operand.vmem [shape: f32[2,16,128], index: 3, kind: output, shape index: {}]  }
   0x1   :  { %s492_s14 = smov 0  }
   0x2 LB: > { %s22_s15 = sadd.s32 1, %s461_s13  ;;  %p375_p0 = scmp.ge.s32.totalorder %s465_s14, 1  ;;  %s465_s14 = sphi %s492_s14, %s13_s14   ;;  %s461_s13 = sphi %s490_s13, %s599_s13   ;;  %s457_s12 = sphi %s488_s12, %s598_s12  }
   0x3   : > { %p23_p1 = scmp.ge.s32.totalorder %s22_s15, 7  ;;  %p139_p2 = scmp.lt.s32.totalorder %s465_s14, 8 }
   0x5   : > { %s601_s15 = smov (%p23_p1, %s22_s15), 0  ;;  %p140_p3 = pnand %p375_p0, %p139_p2 }
   0x6   : > { %p376_p4 = scmp.ne.s32.totalorder (!%p140_p3), %s457_s12, 0 }
   0x7   : > { %143 = sbr.rel (%p140_p3) target bundleno = 239 (0xef), region = 32 }
   0xc   : > { %167 = sbr.rel (%p376_p4) target bundleno = 20 (0x14), region = 36 }
  0x11   : > { %v467_v0 = vmov 0.0  }
  0x12   : > { %168 = vst [vmem:[%s597_s3] sm:$0xff] %v467_v0  ;;  %169 = vst [vmem:[%s597_s3 + $0x8] sm:$0xff] %v467_v0 }
  0x13   : > { %170 = vst [vmem:[%s597_s3 + $0x10] sm:$0xff] %v467_v0  ;;  %171 = vst [vmem:[%s597_s3 + $0x18] sm:$0xff] %v467_v0 }
  0x14 PF: > { %s377_s24 = sshll.u32 %s457_s12, 5  ;;  %s174_s27 = scalar_lea.vmem %s594_s0, %s457_s12  ;;  %vm189_vm0 = vcmask 261120  }
  0x15   : > { %s184_s30 = scalar_lea.vmem %s595_s1, %s377_s24  ;;  %v175_v1 = vld [vmem:[%s174_s27] sm:$0xff]  ;;  %v177_v2 = vld [vmem:[%s174_s27 + $0x18] sm:$0xff]  ;;  %v176_v7 = vld [vmem:[%s174_s27 + $0x8] sm:$0xff]  ;;  %p382_p5 = scmp.ne.s32.totalorder %s457_s12, 6 }
  0x16   : > { %v188_v3 = vld [vmem:[%s184_s30 + $0x18] sm:$0xff]  ;;  %v187_v4 = vld [vmem:[%s184_s30 + $0x10] sm:$0xff]  ;;  %404 = vmatprep.mubr.msk.f32.mxu0 %vm189_vm0, %v175_v1  ;;  %407 = vmatprep.mubr.msk.f32.mxu1 %vm189_vm0, %v177_v2  ;;  %v186_v5 = vld [vmem:[%s184_s30 + $0x8] sm:$0xff] }
  0x17   : > { %396 = vmatprep.subr.mxu0 %v188_v3  ;;  %410 = vmatprep.subr.mxu1 %v188_v3  ;;  %v185_v6 = vld [vmem:[%s184_s30] sm:$0xff] }
  0x18   : > { %397 = vmatpush3.msra.mxu0 %v188_v3  ;;  %414 = vmatpush3.msra.mxu1 %v188_v3  ;;  %v178_v8 = vld [vmem:[%s174_s27 + $0x20] sm:$0xff] }
  0x19   : > { %398 = vmatprep.subr.mxu0 %v187_v4  ;;  %411 = vmatprep.subr.mxu1 %v187_v4  ;;  %v180_v9 = vld [vmem:[%s597_s3 + $0x8] sm:$0xff]  ;;  %v179_v13 = vld [vmem:[%s597_s3] sm:$0xff] }
  0x1a   : > { %399 = vmatpush3.msra.mxu0 %v187_v4  ;;  %415 = vmatpush3.msra.mxu1 %v187_v4  ;;  %v182_v10 = vld [vmem:[%s597_s3 + $0x18] sm:$0xff]  ;;  %v181_v14 = vld [vmem:[%s597_s3 + $0x10] sm:$0xff] }
  0x1b   : > { %400 = vmatprep.subr.mxu0 %v186_v5  ;;  %412 = vmatprep.subr.mxu1 %v186_v5 }
  0x1c   : > { %401 = vmatpush3.msra.mxu0 %v186_v5  ;;  %416 = vmatpush3.msra.mxu1 %v186_v5 }
  0x1d   : > { %402 = vmatprep.subr.mxu0 %v185_v6  ;;  %413 = vmatprep.subr.mxu1 %v185_v6 }
  0x1e   : > { %403 = vmatpush3.msra.mxu0 %v185_v6  ;;  %417 = vmatpush3.msra.mxu1 %v185_v6 }
  0x1f   : > { %405 = vmatmul.mubr.msk.f32.vlgmr.msra.gmra.mxu0 %vm189_vm0, %v176_v7  ;;  %408 = vmatmul.mubr.msk.f32.vlgmr.msra.gmra.mxu1 %vm189_vm0, %v178_v8 }
  0xdf   : > { %v406_v11 = vpop.f32.mrf.mxu0  ;;  %v409_v12 = vpop.f32.mrf.mxu1 }
  0xe0   : > { %v288_v15 = vadd.f32 %v406_v11, %v180_v9  ;;  %v290_v16 = vadd.f32 %v409_v12, %v182_v10  ;;  %298 = sbr.rel (%p382_p5) target bundleno = 239 (0xef), region = 40 }
  0xe1   : > { %v268_v17 = vpop.f32.mrf.mxu0  ;;  %v278_v18 = vpop.f32.mrf.mxu1 }
  0xe2   : > { %292 = vst [vmem:[%s597_s3 + $0x8] sm:$0xff] %v288_v15  ;;  %294 = vst [vmem:[%s597_s3 + $0x18] sm:$0xff] %v290_v16  ;;  %v287_v19 = vadd.f32 %v268_v17, %v179_v13  ;;  %v289_v20 = vadd.f32 %v278_v18, %v181_v14 }
  0xe4   : > { %291 = vst [vmem:[%s597_s3] sm:$0xff] %v287_v19  ;;  %293 = vst [vmem:[%s597_s3 + $0x10] sm:$0xff] %v289_v20 }
  0xe5   : > { %v383_v22 = vld [vmem:[%s596_s2] ss:$0 sm:$0xff] }
  0xe9   : > { %v300_v23 = vld [vmem:[%s597_s3 + $0x8] sm:$0xff]  ;;  %v302_v27 = vld [vmem:[%s597_s3 + $0x18] sm:$0xff] }
  0xea   : > { %v311_v25 = vadd.f32 %v383_v22, %v300_v23  ;;  %v313_v29 = vadd.f32 %v383_v22, %v302_v27 }
  0xeb   : > { %v299_v21 = vld [vmem:[%s597_s3] sm:$0xff]  ;;  %v301_v26 = vld [vmem:[%s597_s3 + $0x10] sm:$0xff] }
  0xec   : > { %v310_v24 = vadd.f32 %v383_v22, %v299_v21  ;;  %v312_v28 = vadd.f32 %v383_v22, %v301_v26  ;;  %315 = vst [vmem:[%s597_s3 + $0x8] sm:$0xff] %v311_v25  ;;  %317 = vst [vmem:[%s597_s3 + $0x18] sm:$0xff] %v313_v29 }
  0xee   : > { %314 = vst [vmem:[%s597_s3] sm:$0xff] %v310_v24  ;;  %316 = vst [vmem:[%s597_s3 + $0x10] sm:$0xff] %v312_v28 }
  0xef PF: > { %s13_s14 = sadd.s32 1, %s465_s14   ;;  %s598_s12 = smov %s461_s13 }
  0xf0   : > { %p10_p6 = scmp.ge.s32.totalorder %s13_s14, 9   ;;  %s599_s13 = smov %s601_s15 }
  0xf2   :  { %12 = sbr.rel (!%p10_p6) target bundleno = 2 (0x2), region = 69 }

// kernel: generator_forward.20
= control target key start
LH: loop header
LB: loop body
LE: loop exit
PB: predicated region body
PF: predicated region fallthrough
CT: control target
= control target key end

     0   :  { %s779_s12 = smov 0   ;;  %s781_s13 = smov 0   ;;  %s1153_s0 = inlined_call_operand.vmem [shape: f32[2,71,128], index: 0, kind: input, shape index: {}]   ;;  %s1154_s1 = inlined_call_operand.vmem [shape: f32[8,128,64], index: 1, kind: input, shape index: {}]   ;;  %s1155_s2 = inlined_call_operand.vmem [shape: f32[1,64], index: 2, kind: input, shape index: {}]   ;;  %s1156_s3 = inlined_call_operand.vmem [shape: f32[2,64,64], index: 3, kind: output, shape index: {}]  }
   0x1   :  { %s783_s14 = smov 0  }
   0x2 LB: > { %s22_s15 = sadd.s32 1, %s752_s13  ;;  %p580_p0 = scmp.ge.s32.totalorder %s756_s14, 1  ;;  %s756_s14 = sphi %s783_s14, %s13_s14   ;;  %s752_s13 = sphi %s781_s13, %s1158_s13   ;;  %s748_s12 = sphi %s779_s12, %s1157_s12  }
   0x3   : > { %p23_p1 = scmp.ge.s32.totalorder %s22_s15, 8  ;;  %p139_p2 = scmp.lt.s32.totalorder %s756_s14, 9 }
   0x5   : > { %s1160_s15 = smov (%p23_p1, %s22_s15), 0  ;;  %p140_p3 = pnand %p580_p0, %p139_p2 }
   0x6   : > { %p581_p4 = scmp.ne.s32.totalorder (!%p140_p3), %s748_s12, 0 }
   0x7   : > { %143 = sbr.rel (%p140_p3) target bundleno = 284 (0x11c), region = 32 }
   0xc   : > { %167 = sbr.rel (%p581_p4) target bundleno = 26 (0x1a), region = 36 }
  0x11   : > { %vm168_vm0 = vcmask 523264   ;;  %v758_v0 = vmov 0.0  }
  0x12   : > { %169 = vst.msk [vmem:[%s1156_s3] sm:$0xff] %vm168_vm0, %v758_v0  ;;  %170 = vst.msk [vmem:[%s1156_s3 + $0x8] sm:$0xff] %vm168_vm0, %v758_v0 }
  0x13   : > { %171 = vst.msk [vmem:[%s1156_s3 + $0x10] sm:$0xff] %vm168_vm0, %v758_v0  ;;  %172 = vst.msk [vmem:[%s1156_s3 + $0x18] sm:$0xff] %vm168_vm0, %v758_v0 }
  0x14   : > { %173 = vst.msk [vmem:[%s1156_s3 + $0x20] sm:$0xff] %vm168_vm0, %v758_v0  ;;  %174 = vst.msk [vmem:[%s1156_s3 + $0x28] sm:$0xff] %vm168_vm0, %v758_v0 }
  0x15   : > { %175 = vst.msk [vmem:[%s1156_s3 + $0x30] sm:$0xff] %vm168_vm0, %v758_v0  ;;  %176 = vst.msk [vmem:[%s1156_s3 + $0x38] sm:$0xff] %vm168_vm0, %v758_v0 }
  0x16   : > { %177 = vst.msk [vmem:[%s1156_s3 + $0x40] sm:$0xff] %vm168_vm0, %v758_v0  ;;  %178 = vst.msk [vmem:[%s1156_s3 + $0x48] sm:$0xff] %vm168_vm0, %v758_v0 }
  0x17   : > { %179 = vst.msk [vmem:[%s1156_s3 + $0x50] sm:$0xff] %vm168_vm0, %v758_v0  ;;  %180 = vst.msk [vmem:[%s1156_s3 + $0x58] sm:$0xff] %vm168_vm0, %v758_v0 }
  0x18   : > { %181 = vst.msk [vmem:[%s1156_s3 + $0x60] sm:$0xff] %vm168_vm0, %v758_v0  ;;  %182 = vst.msk [vmem:[%s1156_s3 + $0x68] sm:$0xff] %vm168_vm0, %v758_v0 }
  0x19   : > { %183 = vst.msk [vmem:[%s1156_s3 + $0x70] sm:$0xff] %vm168_vm0, %v758_v0  ;;  %184 = vst.msk [vmem:[%s1156_s3 + $0x78] sm:$0xff] %vm168_vm0, %v758_v0 }
  0x1a PF: > { %s582_s25 = sshll.u32 %s748_s12, 7  ;;  %s885_s4 = scalar_lea.vmem %s1153_s0, %s748_s12 }
  0x1b   : > { %s868_s28 = scalar_lea.vmem %s1154_s1, %s582_s25  ;;  %v188_v14 = vld [vmem:[%s885_s4] sm:$0xff]  ;;  %v196_v15 = vld [vmem:[%s885_s4 + $0x48] sm:$0xff]  ;;  %v197_v18 = vld [vmem:[%s885_s4 + $0x50] sm:$0xff]  ;;  %p583_p5 = scmp.ne.s32.totalorder %s748_s12, 7 }
  0x1c   : > { %v285_v1 = vld [vmem:[%s868_s28 + $0x78] sm:$0xff]  ;;  %v284_v2 = vld [vmem:[%s868_s28 + $0x70] sm:$0xff]  ;;  %v283_v3 = vld [vmem:[%s868_s28 + $0x68] sm:$0xff]  ;;  %vm204_vm1 = vcmp.ge.f32.partialorder %v188_v14, 0.0  ;;  %v220_v19 = vmul.f32 0.1, %v188_v14 }
  0x1d   : > { %621 = vmatprep.subr.mxu0 %v285_v1  ;;  %677 = vmatprep.subr.mxu1 %v285_v1  ;;  %v282_v4 = vld [vmem:[%s868_s28 + $0x60] sm:$0xff]  ;;  %v281_v5 = vld [vmem:[%s868_s28 + $0x58] sm:$0xff]  ;;  %v280_v6 = vld [vmem:[%s868_s28 + $0x50] sm:$0xff]  ;;  %vm212_vm2 = vcmp.ge.f32.partialorder %v196_v15, 0.0  ;;  %v228_v23 = vmul.f32 0.1, %v196_v15 }
  0x1e   : > { %622 = vmatpush3.msra.mxu0 %v285_v1  ;;  %693 = vmatpush3.msra.mxu1 %v285_v1  ;;  %v279_v7 = vld [vmem:[%s868_s28 + $0x48] sm:$0xff]  ;;  %v278_v8 = vld [vmem:[%s868_s28 + $0x40] sm:$0xff]  ;;  %v277_v9 = vld [vmem:[%s868_s28 + $0x38] sm:$0xff]  ;;  %v229_v26 = vmul.f32 0.1, %v197_v18  ;;  %vm213_vm4 = vcmp.ge.f32.partialorder %v197_v18, 0.0  ;;  %v236_v32 = vsel %vm204_vm1, %v188_v14, %v220_v19 }
  0x1f   : > { %623 = vmatprep.subr.mxu0 %v284_v2  ;;  %678 = vmatprep.subr.mxu1 %v284_v2  ;;  %v276_v10 = vld [vmem:[%s868_s28 + $0x30] sm:$0xff]  ;;  %v275_v11 = vld [vmem:[%s868_s28 + $0x28] sm:$0xff]  ;;  %v274_v12 = vld [vmem:[%s868_s28 + $0x20] sm:$0xff]  ;;  %v244_v34 = vsel %vm212_vm2, %v196_v15, %v228_v23  ;;  %vm447_vm1 = vcmask 523264  }
  0x20   : > { %624 = vmatpush3.msra.mxu0 %v284_v2  ;;  %694 = vmatpush3.msra.mxu1 %v284_v2  ;;  %v273_v13 = vld [vmem:[%s868_s28 + $0x18] sm:$0xff]  ;;  %v189_v16 = vld [vmem:[%s885_s4 + $0x8] sm:$0xff]  ;;  %v272_v17 = vld [vmem:[%s868_s28 + $0x10] sm:$0xff]  ;;  %v245_v38 = vsel %vm213_vm4, %v197_v18, %v229_v26 }
  0x21   : > { %625 = vmatprep.subr.mxu0 %v283_v3  ;;  %679 = vmatprep.subr.mxu1 %v283_v3  ;;  %v190_v20 = vld [vmem:[%s885_s4 + $0x10] sm:$0xff]  ;;  %v198_v21 = vld [vmem:[%s885_s4 + $0x58] sm:$0xff]  ;;  %v271_v22 = vld [vmem:[%s868_s28 + $0x8] sm:$0xff]  ;;  %v221_v24 = vmul.f32 0.1, %v189_v16  ;;  %vm205_vm3 = vcmp.ge.f32.partialorder %v189_v16, 0.0 }
  0x22   : > { %626 = vmatpush3.msra.mxu0 %v283_v3  ;;  %695 = vmatpush3.msra.mxu1 %v283_v3  ;;  %v270_v25 = vld [vmem:[%s868_s28] sm:$0xff]  ;;  %v191_v27 = vld [vmem:[%s885_s4 + $0x18] sm:$0xff]  ;;  %v222_v29 = vmul.f32 0.1, %v190_v20  ;;  %v230_v30 = vmul.f32 0.1, %v198_v21 }
  0x23   : > { %627 = vmatprep.subr.mxu0 %v282_v4  ;;  %680 = vmatprep.subr.mxu1 %v282_v4  ;;  %v199_v28 = vld [vmem:[%s885_s4 + $0x60] sm:$0xff]  ;;  %vm206_vm5 = vcmp.ge.f32.partialorder %v190_v20, 0.0  ;;  %vm214_vm6 = vcmp.ge.f32.partialorder %v198_v21, 0.0  ;;  %v200_v33 = vld [vmem:[%s885_s4 + $0x68] sm:$0xff]  ;;  %v237_v35 = vsel %vm205_vm3, %v189_v16, %v221_v24  ;;  %v223_v36 = vmul.f32 0.1, %v191_v27 }
  0x24   : > { %628 = vmatpush3.msra.mxu0 %v282_v4  ;;  %696 = vmatpush3.msra.mxu1 %v282_v4  ;;  %v192_v31 = vld [vmem:[%s885_s4 + $0x20] sm:$0xff]  ;;  %v231_v37 = vmul.f32 0.1, %v199_v28  ;;  %vm207_vm7 = vcmp.ge.f32.partialorder %v191_v27, 0.0  ;;  %vm215_vm8 = vcmp.ge.f32.partialorder %v199_v28, 0.0  ;;  %v238_v40 = vsel %vm206_vm5, %v190_v20, %v222_v29  ;;  %v193_v43 = vld [vmem:[%s885_s4 + $0x28] sm:$0xff] }
  0x25   : > { %629 = vmatprep.subr.mxu0 %v281_v5  ;;  %681 = vmatprep.subr.mxu1 %v281_v5  ;;  %v224_v39 = vmul.f32 0.1, %v192_v31  ;;  %v246_v41 = vsel %vm214_vm6, %v198_v21, %v230_v30  ;;  %vm208_vm9 = vcmp.ge.f32.partialorder %v192_v31, 0.0  ;;  %v232_v42 = vmul.f32 0.1, %v200_v33  ;;  %v201_v44 = vld [vmem:[%s885_s4 + $0x70] sm:$0xff] }
  0x26   : > { %630 = vmatpush3.msra.mxu0 %v281_v5  ;;  %697 = vmatpush3.msra.mxu1 %v281_v5  ;;  %vm216_vm10 = vcmp.ge.f32.partialorder %v200_v33, 0.0  ;;  %v194_v45 = vld [vmem:[%s885_s4 + $0x30] sm:$0xff]  ;;  %v202_v46 = vld [vmem:[%s885_s4 + $0x78] sm:$0xff]  ;;  %v239_v47 = vsel %vm207_vm7, %v191_v27, %v223_v36  ;;  %v247_v48 = vsel %vm215_vm8, %v199_v28, %v231_v37  ;;  %vm209_vm11 = vcmp.ge.f32.partialorder %v193_v43, 0.0  ;;  %v203_v56 = vld [vmem:[%s885_s4 + $0x80] sm:$0xff] }
  0x27   : > { %631 = vmatprep.subr.mxu0 %v280_v6  ;;  %682 = vmatprep.subr.mxu1 %v280_v6  ;;  %v240_v49 = vsel %vm208_vm9, %v192_v31, %v224_v39  ;;  %v225_v50 = vmul.f32 0.1, %v193_v43  ;;  %v233_v51 = vmul.f32 0.1, %v201_v44  ;;  %v195_v52 = vld [vmem:[%s885_s4 + $0x38] sm:$0xff]  ;;  %v248_v53 = vsel %vm216_vm10, %v200_v33, %v232_v42  ;;  %v253_v1 = vld [vmem:[%s1156_s3 + $0x8] sm:$0xff] }
  0x28   : > { %632 = vmatpush3.msra.mxu0 %v280_v6  ;;  %698 = vmatpush3.msra.mxu1 %v280_v6  ;;  %vm217_vm12 = vcmp.ge.f32.partialorder %v201_v44, 0.0  ;;  %v226_v54 = vmul.f32 0.1, %v194_v45  ;;  %v234_v55 = vmul.f32 0.1, %v202_v46  ;;  %vm210_vm13 = vcmp.ge.f32.partialorder %v194_v45, 0.0 }
  0x29   : > { %633 = vmatprep.subr.mxu0 %v279_v7  ;;  %683 = vmatprep.subr.mxu1 %v279_v7  ;;  %vm218_vm14 = vcmp.ge.f32.partialorder %v202_v46, 0.0  ;;  %v241_v57 = vsel %vm209_vm11, %v193_v43, %v225_v50  ;;  %v249_v58 = vsel %vm217_vm12, %v201_v44, %v233_v51  ;;  %v227_v59 = vmul.f32 0.1, %v195_v52  ;;  %v261_v2 = vld [vmem:[%s1156_s3 + $0x48] sm:$0xff]  ;;  %v252_v5 = vld [vmem:[%s1156_s3] sm:$0xff]  ;;  %v262_v18 = vld [vmem:[%s1156_s3 + $0x50] sm:$0xff] }
  0x2a   : > { %634 = vmatpush3.msra.mxu0 %v279_v7  ;;  %699 = vmatpush3.msra.mxu1 %v279_v7  ;;  %v235_v60 = vmul.f32 0.1, %v203_v56  ;;  %v242_v61 = vsel %vm210_vm13, %v194_v45, %v226_v54  ;;  %v250_v62 = vsel %vm218_vm14, %v202_v46, %v234_v55  ;;  %vm211_vm15 = vcmp.ge.f32.partialorder %v195_v52, 0.0  ;;  %v260_v6 = vld [vmem:[%s1156_s3 + $0x40] sm:$0xff]  ;;  %v257_v23 = vld [vmem:[%s1156_s3 + $0x28] sm:$0xff]  ;;  %v267_v36 = vld [vmem:[%s1156_s3 + $0x78] sm:$0xff] }
  0x2b   : > { %635 = vmatprep.subr.mxu0 %v278_v8  ;;  %684 = vmatprep.subr.mxu1 %v278_v8  ;;  %vm219_vm0 = vcmp.ge.f32.partialorder %v203_v56, 0.0  ;;  %v243_v63 = vsel %vm211_vm15, %v195_v52, %v227_v59  ;;  %v265_v24 = vld [vmem:[%s1156_s3 + $0x68] sm:$0xff]  ;;  %v256_v29 = vld [vmem:[%s1156_s3 + $0x20] sm:$0xff]  ;;  %v266_v42 = vld [vmem:[%s1156_s3 + $0x70] sm:$0xff] }
  0x2c   : > { %636 = vmatpush3.msra.mxu0 %v278_v8  ;;  %700 = vmatpush3.msra.mxu1 %v278_v8  ;;  %v251_v0 = vsel %vm219_vm0, %v203_v56, %v235_v60  ;;  %v264_v30 = vld [vmem:[%s1156_s3 + $0x60] sm:$0xff] }
  0x2d   : > { %637 = vmatprep.subr.mxu0 %v277_v9  ;;  %685 = vmatprep.subr.mxu1 %v277_v9 }
  0x2e   : > { %638 = vmatpush3.msra.mxu0 %v277_v9  ;;  %701 = vmatpush3.msra.mxu1 %v277_v9 }
  0x2f   : > { %639 = vmatprep.subr.mxu0 %v276_v10  ;;  %686 = vmatprep.subr.mxu1 %v276_v10 }
  0x30   : > { %640 = vmatpush3.msra.mxu0 %v276_v10  ;;  %702 = vmatpush3.msra.mxu1 %v276_v10 }
  0x31   : > { %641 = vmatprep.subr.mxu0 %v275_v11  ;;  %687 = vmatprep.subr.mxu1 %v275_v11 }
  0x32   : > { %642 = vmatpush3.msra.mxu0 %v275_v11  ;;  %703 = vmatpush3.msra.mxu1 %v275_v11  ;;  %v255_v11 = vld [vmem:[%s1156_s3 + $0x18] sm:$0xff] }
  0x33   : > { %643 = vmatprep.subr.mxu0 %v274_v12  ;;  %688 = vmatprep.subr.mxu1 %v274_v12 }
  0x34   : > { %644 = vmatpush3.msra.mxu0 %v274_v12  ;;  %704 = vmatpush3.msra.mxu1 %v274_v12  ;;  %v263_v12 = vld [vmem:[%s1156_s3 + $0x58] sm:$0xff] }
  0x35   : > { %645 = vmatprep.subr.mxu0 %v273_v13  ;;  %689 = vmatprep.subr.mxu1 %v273_v13 }
  0x36   : > { %646 = vmatpush3.msra.mxu0 %v273_v13  ;;  %705 = vmatpush3.msra.mxu1 %v273_v13 }
  0x37   : > { %647 = vmatprep.subr.mxu0 %v272_v17  ;;  %690 = vmatprep.subr.mxu1 %v272_v17 }
  0x38   : > { %648 = vmatpush3.msra.mxu0 %v272_v17  ;;  %706 = vmatpush3.msra.mxu1 %v272_v17  ;;  %v254_v17 = vld [vmem:[%s1156_s3 + $0x10] sm:$0xff] }
  0x39   : > { %649 = vmatprep.subr.mxu0 %v271_v22  ;;  %691 = vmatprep.subr.mxu1 %v271_v22 }
  0x3a   : > { %650 = vmatpush3.msra.mxu0 %v271_v22  ;;  %707 = vmatpush3.msra.mxu1 %v271_v22 }
  0x3b   : > { %651 = vmatprep.subr.mxu0 %v270_v25  ;;  %692 = vmatprep.subr.mxu1 %v270_v25 }
  0x3c   : > { %652 = vmatpush3.msra.mxu0 %v270_v25  ;;  %708 = vmatpush3.msra.mxu1 %v270_v25 }
  0x3d   : > { %653 = vmatprep.mubr.f32.mxu0 %v236_v32  ;;  %665 = vmatprep.mubr.f32.mxu1 %v244_v34 }
  0x3e   : > { %654 = vmatmul.mubr.f32.vlgmr.msra.gmra.mxu0 %v237_v35  ;;  %666 = vmatmul.mubr.f32.vlgmr.msra.gmra.mxu1 %v245_v38  ;;  %v259_v35 = vld [vmem:[%s1156_s3 + $0x38] sm:$0xff] }
  0x3f   : > { %656 = vmatprep.mubr.f32.mxu0 %v238_v40  ;;  %668 = vmatprep.mubr.f32.mxu1 %v246_v41  ;;  %v258_v41 = vld [vmem:[%s1156_s3 + $0x30] sm:$0xff] }
  0x42   : > { %657 = vmatmul.mubr.f32.gmra.mxu0 %v239_v47  ;;  %669 = vmatmul.mubr.f32.gmra.mxu1 %v247_v48 }
  0x43   : > { %659 = vmatprep.mubr.f32.mxu0 %v240_v49  ;;  %671 = vmatprep.mubr.f32.mxu1 %v248_v53 }
  0x46   : > { %660 = vmatmul.mubr.f32.gmra.mxu0 %v241_v57  ;;  %672 = vmatmul.mubr.f32.gmra.mxu1 %v249_v58 }
  0x47   : > { %662 = vmatprep.mubr.f32.mxu0 %v242_v61  ;;  %674 = vmatprep.mubr.f32.mxu1 %v250_v62 }
  0x4a   : > { %663 = vmatmul.mubr.f32.gmra.mxu0 %v243_v63  ;;  %675 = vmatmul.mubr.f32.gmra.mxu1 %v251_v0 }
  0xfe   : > { %v655_v3 = vpop.f32.mrf.mxu0  ;;  %v667_v4 = vpop.f32.mrf.mxu1 }
  0xff   : > { %v432_v7 = vadd.f32 %v655_v3, %v253_v1  ;;  %v440_v8 = vadd.f32 %v667_v4, %v261_v2 }
 0x100   : > { %v352_v9 = vpop.f32.mrf.mxu0  ;;  %v392_v10 = vpop.f32.mrf.mxu1 }
 0x101   : > { %449 = vst.msk [vmem:[%s1156_s3 + $0x8] sm:$0xff] %vm447_vm1, %v432_v7  ;;  %457 = vst.msk [vmem:[%s1156_s3 + $0x48] sm:$0xff] %vm447_vm1, %v440_v8  ;;  %v431_v13 = vadd.f32 %v352_v9, %v252_v5  ;;  %v439_v14 = vadd.f32 %v392_v10, %v260_v6 }
 0x102   : > { %v658_v15 = vpop.f32.mrf.mxu0  ;;  %v670_v16 = vpop.f32.mrf.mxu1 }
 0x103   : > { %448 = vst.msk [vmem:[%s1156_s3] sm:$0xff] %vm447_vm1, %v431_v13  ;;  %456 = vst.msk [vmem:[%s1156_s3 + $0x40] sm:$0xff] %vm447_vm1, %v439_v14  ;;  %v434_v19 = vadd.f32 %v658_v15, %v255_v11  ;;  %v442_v20 = vadd.f32 %v670_v16, %v263_v12 }
 0x104   : > { %v362_v21 = vpop.f32.mrf.mxu0  ;;  %v402_v22 = vpop.f32.mrf.mxu1 }
 0x105   : > { %451 = vst.msk [vmem:[%s1156_s3 + $0x18] sm:$0xff] %vm447_vm1, %v434_v19  ;;  %459 = vst.msk [vmem:[%s1156_s3 + $0x58] sm:$0xff] %vm447_vm1, %v442_v20  ;;  %v433_v25 = vadd.f32 %v362_v21, %v254_v17  ;;  %v441_v26 = vadd.f32 %v402_v22, %v262_v18 }
 0x106   : > { %v661_v27 = vpop.f32.mrf.mxu0  ;;  %v673_v28 = vpop.f32.mrf.mxu1 }
 0x107   : > { %450 = vst.msk [vmem:[%s1156_s3 + $0x10] sm:$0xff] %vm447_vm1, %v433_v25  ;;  %458 = vst.msk [vmem:[%s1156_s3 + $0x50] sm:$0xff] %vm447_vm1, %v441_v26  ;;  %v436_v31 = vadd.f32 %v661_v27, %v257_v23  ;;  %v444_v32 = vadd.f32 %v673_v28, %v265_v24 }
 0x108   : > { %v372_v33 = vpop.f32.mrf.mxu0  ;;  %v412_v34 = vpop.f32.mrf.mxu1 }
 0x109   : > { %453 = vst.msk [vmem:[%s1156_s3 + $0x28] sm:$0xff] %vm447_vm1, %v436_v31  ;;  %461 = vst.msk [vmem:[%s1156_s3 + $0x68] sm:$0xff] %vm447_vm1, %v444_v32  ;;  %v435_v37 = vadd.f32 %v372_v33, %v256_v29  ;;  %v443_v38 = vadd.f32 %v412_v34, %v264_v30 }
 0x10a   : > { %v664_v39 = vpop.f32.mrf.mxu0  ;;  %v676_v40 = vpop.f32.mrf.mxu1 }
 0x10b   : > { %452 = vst.msk [vmem:[%s1156_s3 + $0x20] sm:$0xff] %vm447_vm1, %v435_v37  ;;  %460 = vst.msk [vmem:[%s1156_s3 + $0x60] sm:$0xff] %vm447_vm1, %v443_v38  ;;  %v438_v43 = vadd.f32 %v664_v39, %v259_v35  ;;  %v446_v44 = vadd.f32 %v676_v40, %v267_v36  ;;  %467 = sbr.rel (%p583_p5) target bundleno = 284 (0x11c), region = 40 }
 0x10c   : > { %v382_v45 = vpop.f32.mrf.mxu0  ;;  %v422_v46 = vpop.f32.mrf.mxu1 }
 0x10d   : > { %455 = vst.msk [vmem:[%s1156_s3 + $0x38] sm:$0xff] %vm447_vm1, %v438_v43  ;;  %463 = vst.msk [vmem:[%s1156_s3 + $0x78] sm:$0xff] %vm447_vm1, %v446_v44  ;;  %v437_v47 = vadd.f32 %v382_v45, %v258_v41  ;;  %v445_v48 = vadd.f32 %v422_v46, %v266_v42 }
 0x10f   : > { %454 = vst.msk [vmem:[%s1156_s3 + $0x30] sm:$0xff] %vm447_vm1, %v437_v47  ;;  %462 = vst.msk [vmem:[%s1156_s3 + $0x70] sm:$0xff] %vm447_vm1, %v445_v48 }
 0x110   : > { %v468_v49 = vld [vmem:[%s1156_s3] sm:$0xff]  ;;  %v469_v51 = vld [vmem:[%s1156_s3 + $0x8] sm:$0xff]  ;;  %v470_v54 = vld [vmem:[%s1156_s3 + $0x10] sm:$0xff] }
 0x111   : > { %v584_v50 = vld [vmem:[%s1155_s2] ss:$0 sm:$0xff]  ;;  %v471_v55 = vld [vmem:[%s1156_s3 + $0x18] sm:$0xff]  ;;  %v473_v60 = vld [vmem:[%s1156_s3 + $0x28] sm:$0xff] }
 0x112   : > { %v491_v52 = vadd.f32 %v584_v50, %v468_v49  ;;  %v492_v53 = vadd.f32 %v584_v50, %v469_v51  ;;  %v472_v56 = vld [vmem:[%s1156_s3 + $0x20] sm:$0xff]  ;;  %v493_v57 = vadd.f32 %v584_v50, %v470_v54  ;;  %v494_v58 = vadd.f32 %v584_v50, %v471_v55  ;;  %v477_v3 = vld [vmem:[%s1156_s3 + $0x48] sm:$0xff]  ;;  %v478_v4 = vld [vmem:[%s1156_s3 + $0x50] sm:$0xff] }
 0x113   : > { %v495_v59 = vadd.f32 %v584_v50, %v472_v56  ;;  %v496_v63 = vadd.f32 %v584_v50, %v473_v60  ;;  %v476_v2 = vld [vmem:[%s1156_s3 + $0x40] sm:$0xff]  ;;  %v500_v6 = vadd.f32 %v584_v50, %v477_v3  ;;  %v501_v7 = vadd.f32 %v584_v50, %v478_v4  ;;  %v479_v8 = vld [vmem:[%s1156_s3 + $0x58] sm:$0xff]  ;;  %v481_v10 = vld [vmem:[%s1156_s3 + $0x68] sm:$0xff] }
 0x114   : > { %v475_v62 = vld [vmem:[%s1156_s3 + $0x38] sm:$0xff]  ;;  %507 = vst.msk [vmem:[%s1156_s3] sm:$0xff] %vm447_vm1, %v491_v52  ;;  %508 = vst.msk [vmem:[%s1156_s3 + $0x8] sm:$0xff] %vm447_vm1, %v492_v53  ;;  %v499_v5 = vadd.f32 %v584_v50, %v476_v2  ;;  %v480_v9 = vld [vmem:[%s1156_s3 + $0x60] sm:$0xff]  ;;  %v502_v11 = vadd.f32 %v584_v50, %v479_v8  ;;  %v504_v13 = vadd.f32 %v584_v50, %v481_v10 }
 0x115   : > { %v498_v1 = vadd.f32 %v584_v50, %v475_v62  ;;  %509 = vst.msk [vmem:[%s1156_s3 + $0x10] sm:$0xff] %vm447_vm1, %v493_v57  ;;  %510 = vst.msk [vmem:[%s1156_s3 + $0x18] sm:$0xff] %vm447_vm1, %v494_v58  ;;  %v503_v12 = vadd.f32 %v584_v50, %v480_v9  ;;  %v483_v15 = vld [vmem:[%s1156_s3 + $0x78] sm:$0xff] }
 0x116   : > { %v474_v61 = vld [vmem:[%s1156_s3 + $0x30] sm:$0xff]  ;;  %511 = vst.msk [vmem:[%s1156_s3 + $0x20] sm:$0xff] %vm447_vm1, %v495_v59  ;;  %512 = vst.msk [vmem:[%s1156_s3 + $0x28] sm:$0xff] %vm447_vm1, %v496_v63  ;;  %v506_v17 = vadd.f32 %v584_v50, %v483_v15 }
 0x117   : > { %v497_v0 = vadd.f32 %v584_v50, %v474_v61  ;;  %514 = vst.msk [vmem:[%s1156_s3 + $0x38] sm:$0xff] %vm447_vm1, %v498_v1  ;;  %v482_v14 = vld [vmem:[%s1156_s3 + $0x70] sm:$0xff]  ;;  %515 = vst.msk [vmem:[%s1156_s3 + $0x40] sm:$0xff] %vm447_vm1, %v499_v5 }
 0x118   : > { %516 = vst.msk [vmem:[%s1156_s3 + $0x48] sm:$0xff] %vm447_vm1, %v500_v6  ;;  %517 = vst.msk [vmem:[%s1156_s3 + $0x50] sm:$0xff] %vm447_vm1, %v501_v7  ;;  %v505_v16 = vadd.f32 %v584_v50, %v482_v14 }
 0x119   : > { %513 = vst.msk [vmem:[%s1156_s3 + $0x30] sm:$0xff] %vm447_vm1, %v497_v0  ;;  %518 = vst.msk [vmem:[%s1156_s3 + $0x58] sm:$0xff] %vm447_vm1, %v502_v11 }
 0x11a   : > { %519 = vst.msk [vmem:[%s1156_s3 + $0x60] sm:$0xff] %vm447_vm1, %v503_v12  ;;  %520 = vst.msk [vmem:[%s1156_s3 + $0x68] sm:$0xff] %vm447_vm1, %v504_v13 }
 0x11b   : > { %521 = vst.msk [vmem:[%s1156_s3 + $0x70] sm:$0xff] %vm447_vm1, %v505_v16  ;;  %522 = vst.msk [vmem:[%s1156_s3 + $0x78] sm:$0xff] %vm447_vm1, %v506_v17 }
 0x11c PF: > { %s13_s14 = sadd.s32 1, %s756_s14   ;;  %s1157_s12 = smov %s752_s13 }
 0x11d   : > { %p10_p6 = scmp.ge.s32.totalorder %s13_s14, 10   ;;  %s1158_s13 = smov %s1160_s15 }
 0x11f   :  { %12 = sbr.rel (!%p10_p6) target bundleno = 2 (0x2), region = 69 }

// kernel: generator_forward.25
= control target key start
LH: loop header
LB: loop body
LE: loop exit
PB: predicated region body
PF: predicated region fallthrough
CT: control target
= control target key end

     0   :  { %s795_s12 = smov 0   ;;  %s797_s13 = smov 0   ;;  %s1177_s0 = inlined_call_operand.vmem [shape: f32[2,68,64], index: 0, kind: input, shape index: {}]   ;;  %s1178_s1 = inlined_call_operand.vmem [shape: f32[5,64,64], index: 1, kind: input, shape index: {}]   ;;  %s1179_s2 = inlined_call_operand.vmem [shape: f32[1,64], index: 2, kind: input, shape index: {}]   ;;  %s1180_s3 = inlined_call_operand.vmem [shape: f32[2,64,64], index: 3, kind: output, shape index: {}]  }
   0x1   :  { %s799_s14 = smov 0  }
   0x2 LB: > { %s22_s15 = sadd.s32 1, %s768_s13  ;;  %p620_p0 = scmp.ge.s32.totalorder %s772_s14, 1  ;;  %s772_s14 = sphi %s799_s14, %s13_s14   ;;  %s768_s13 = sphi %s797_s13, %s1182_s13   ;;  %s764_s12 = sphi %s795_s12, %s1181_s12  }
   0x3   : > { %p23_p1 = scmp.ge.s32.totalorder %s22_s15, 5  ;;  %p139_p2 = scmp.lt.s32.totalorder %s772_s14, 6 }
   0x5   : > { %s1184_s15 = smov (%p23_p1, %s22_s15), 0  ;;  %p140_p3 = pnand %p620_p0, %p139_p2 }
   0x6   : > { %p621_p4 = scmp.ne.s32.totalorder (!%p140_p3), %s764_s12, 0 }
   0x7   : > { %143 = sbr.rel (%p140_p3) target bundleno = 268 (0x10c), region = 32 }
   0xc   : > { %167 = sbr.rel (%p621_p4) target bundleno = 26 (0x1a), region = 36 }
  0x11   : > { %vm168_vm0 = vcmask 523264   ;;  %v774_v0 = vmov 0.0  }
  0x12   : > { %169 = vst.msk [vmem:[%s1180_s3] sm:$0xff] %vm168_vm0, %v774_v0  ;;  %170 = vst.msk [vmem:[%s1180_s3 + $0x8] sm:$0xff] %vm168_vm0, %v774_v0 }
  0x13   : > { %171 = vst.msk [vmem:[%s1180_s3 + $0x10] sm:$0xff] %vm168_vm0, %v774_v0  ;;  %172 = vst.msk [vmem:[%s1180_s3 + $0x18] sm:$0xff] %vm168_vm0, %v774_v0 }
  0x14   : > { %173 = vst.msk [vmem:[%s1180_s3 + $0x20] sm:$0xff] %vm168_vm0, %v774_v0  ;;  %174 = vst.msk [vmem:[%s1180_s3 + $0x28] sm:$0xff] %vm168_vm0, %v774_v0 }
  0x15   : > { %175 = vst.msk [vmem:[%s1180_s3 + $0x30] sm:$0xff] %vm168_vm0, %v774_v0  ;;  %176 = vst.msk [vmem:[%s1180_s3 + $0x38] sm:$0xff] %vm168_vm0, %v774_v0 }
  0x16   : > { %177 = vst.msk [vmem:[%s1180_s3 + $0x40] sm:$0xff] %vm168_vm0, %v774_v0  ;;  %178 = vst.msk [vmem:[%s1180_s3 + $0x48] sm:$0xff] %vm168_vm0, %v774_v0 }
  0x17   : > { %179 = vst.msk [vmem:[%s1180_s3 + $0x50] sm:$0xff] %vm168_vm0, %v774_v0  ;;  %180 = vst.msk [vmem:[%s1180_s3 + $0x58] sm:$0xff] %vm168_vm0, %v774_v0 }
  0x18   : > { %181 = vst.msk [vmem:[%s1180_s3 + $0x60] sm:$0xff] %vm168_vm0, %v774_v0  ;;  %182 = vst.msk [vmem:[%s1180_s3 + $0x68] sm:$0xff] %vm168_vm0, %v774_v0 }
  0x19   : > { %183 = vst.msk [vmem:[%s1180_s3 + $0x70] sm:$0xff] %vm168_vm0, %v774_v0  ;;  %184 = vst.msk [vmem:[%s1180_s3 + $0x78] sm:$0xff] %vm168_vm0, %v774_v0 }
  0x1a PF: > { %s622_s25 = sshll.u32 %s764_s12, 6  ;;  %s893_s4 = scalar_lea.vmem %s1177_s0, %s764_s12  ;;  %vm278_vm5 = vcmask 523264   ;;  %v253_v57 = vld [vmem:[%s1180_s3 + $0x8] sm:$0xff]  ;;  %v252_v61 = vld [vmem:[%s1180_s3] sm:$0xff] }
  0x1b   : > { %s884_s28 = scalar_lea.vmem %s1178_s1, %s622_s25  ;;  %v188_v6 = vld [vmem:[%s893_s4] sm:$0xff]  ;;  %v196_v7 = vld [vmem:[%s893_s4 + $0x48] sm:$0xff]  ;;  %v197_v10 = vld [vmem:[%s893_s4 + $0x50] sm:$0xff]  ;;  %p639_p5 = scmp.ne.s32.totalorder %s764_s12, 4 }
  0x1c   : > { %v277_v1 = vld [vmem:[%s884_s28 + $0x38] sm:$0xff]  ;;  %v276_v2 = vld [vmem:[%s884_s28 + $0x30] sm:$0xff]  ;;  %v275_v3 = vld [vmem:[%s884_s28 + $0x28] sm:$0xff]  ;;  %vm204_vm1 = vcmp.ge.f32.partialorder %v188_v6, 0.0  ;;  %v220_v11 = vmul.f32 0.1, %v188_v6 }
  0x1d   : > { %669 = vmatprep.subr.mxu0 %v277_v1  ;;  %709 = vmatprep.subr.mxu1 %v277_v1  ;;  %v274_v4 = vld [vmem:[%s884_s28 + $0x20] sm:$0xff]  ;;  %v273_v5 = vld [vmem:[%s884_s28 + $0x18] sm:$0xff]  ;;  %v189_v8 = vld [vmem:[%s893_s4 + $0x8] sm:$0xff]  ;;  %vm212_vm2 = vcmp.ge.f32.partialorder %v196_v7, 0.0  ;;  %v228_v15 = vmul.f32 0.1, %v196_v7 }
  0x1e   : > { %670 = vmatpush3.msra.mxu0 %v277_v1  ;;  %717 = vmatpush3.msra.mxu1 %v277_v1  ;;  %v272_v9 = vld [vmem:[%s884_s28 + $0x10] sm:$0xff]  ;;  %v198_v13 = vld [vmem:[%s893_s4 + $0x58] sm:$0xff]  ;;  %v271_v14 = vld [vmem:[%s884_s28 + $0x8] sm:$0xff]  ;;  %v221_v16 = vmul.f32 0.1, %v189_v8  ;;  %vm205_vm3 = vcmp.ge.f32.partialorder %v189_v8, 0.0  ;;  %v236_v24 = vsel %vm204_vm1, %v188_v6, %v220_v11 }
  0x1f   : > { %671 = vmatprep.subr.mxu0 %v276_v2  ;;  %710 = vmatprep.subr.mxu1 %v276_v2  ;;  %v190_v12 = vld [vmem:[%s893_s4 + $0x10] sm:$0xff]  ;;  %v270_v17 = vld [vmem:[%s884_s28] sm:$0xff]  ;;  %v229_v18 = vmul.f32 0.1, %v197_v10  ;;  %v191_v19 = vld [vmem:[%s893_s4 + $0x18] sm:$0xff]  ;;  %vm213_vm4 = vcmp.ge.f32.partialorder %v197_v10, 0.0  ;;  %v244_v26 = vsel %vm212_vm2, %v196_v7, %v228_v15 }
  0x20   : > { %672 = vmatpush3.msra.mxu0 %v276_v2  ;;  %718 = vmatpush3.msra.mxu1 %v276_v2  ;;  %v199_v20 = vld [vmem:[%s893_s4 + $0x60] sm:$0xff]  ;;  %v222_v21 = vmul.f32 0.1, %v190_v12  ;;  %v230_v22 = vmul.f32 0.1, %v198_v13  ;;  %vm206_vm6 = vcmp.ge.f32.partialorder %v190_v12, 0.0  ;;  %v237_v27 = vsel %vm205_vm3, %v189_v8, %v221_v16 }
  0x21   : > { %673 = vmatprep.subr.mxu0 %v275_v3  ;;  %711 = vmatprep.subr.mxu1 %v275_v3  ;;  %v192_v23 = vld [vmem:[%s893_s4 + $0x20] sm:$0xff]  ;;  %vm214_vm7 = vcmp.ge.f32.partialorder %v198_v13, 0.0  ;;  %v200_v25 = vld [vmem:[%s893_s4 + $0x68] sm:$0xff]  ;;  %v223_v28 = vmul.f32 0.1, %v191_v19  ;;  %v245_v30 = vsel %vm213_vm4, %v197_v10, %v229_v18  ;;  %vm207_vm8 = vcmp.ge.f32.partialorder %v191_v19, 0.0 }
  0x22   : > { %674 = vmatpush3.msra.mxu0 %v275_v3  ;;  %719 = vmatpush3.msra.mxu1 %v275_v3  ;;  %v231_v29 = vmul.f32 0.1, %v199_v20  ;;  %vm215_vm9 = vcmp.ge.f32.partialorder %v199_v20, 0.0  ;;  %v224_v31 = vmul.f32 0.1, %v192_v23  ;;  %v238_v32 = vsel %vm206_vm6, %v190_v12, %v222_v21  ;;  %v193_v35 = vld [vmem:[%s893_s4 + $0x28] sm:$0xff] }
  0x23   : > { %675 = vmatprep.subr.mxu0 %v274_v4  ;;  %712 = vmatprep.subr.mxu1 %v274_v4  ;;  %v246_v33 = vsel %vm214_vm7, %v198_v13, %v230_v22  ;;  %vm208_vm10 = vcmp.ge.f32.partialorder %v192_v23, 0.0  ;;  %v232_v34 = vmul.f32 0.1, %v200_v25  ;;  %v201_v36 = vld [vmem:[%s893_s4 + $0x70] sm:$0xff]  ;;  %vm216_vm11 = vcmp.ge.f32.partialorder %v200_v25, 0.0  ;;  %v202_v38 = vld [vmem:[%s893_s4 + $0x78] sm:$0xff] }
  0x24   : > { %676 = vmatpush3.msra.mxu0 %v274_v4  ;;  %720 = vmatpush3.msra.mxu1 %v274_v4  ;;  %v194_v37 = vld [vmem:[%s893_s4 + $0x30] sm:$0xff]  ;;  %v239_v39 = vsel %vm207_vm8, %v191_v19, %v223_v28  ;;  %v247_v40 = vsel %vm215_vm9, %v199_v20, %v231_v29  ;;  %v240_v41 = vsel %vm208_vm10, %v192_v23, %v224_v31  ;;  %vm209_vm12 = vcmp.ge.f32.partialorder %v193_v35, 0.0  ;;  %v195_v44 = vld [vmem:[%s893_s4 + $0x38] sm:$0xff]  ;;  %v203_v48 = vld [vmem:[%s893_s4 + $0x80] sm:$0xff] }
  0x25   : > { %677 = vmatprep.subr.mxu0 %v273_v5  ;;  %713 = vmatprep.subr.mxu1 %v273_v5  ;;  %v225_v42 = vmul.f32 0.1, %v193_v35  ;;  %v233_v43 = vmul.f32 0.1, %v201_v36  ;;  %v248_v45 = vsel %vm216_vm11, %v200_v25, %v232_v34  ;;  %vm217_vm13 = vcmp.ge.f32.partialorder %v201_v36, 0.0  ;;  %v261_v58 = vld [vmem:[%s1180_s3 + $0x48] sm:$0xff] }
  0x26   : > { %678 = vmatpush3.msra.mxu0 %v273_v5  ;;  %721 = vmatpush3.msra.mxu1 %v273_v5  ;;  %v226_v46 = vmul.f32 0.1, %v194_v37  ;;  %v234_v47 = vmul.f32 0.1, %v202_v38  ;;  %vm210_vm14 = vcmp.ge.f32.partialorder %v194_v37, 0.0  ;;  %vm218_vm15 = vcmp.ge.f32.partialorder %v202_v38, 0.0 }
  0x27   : > { %679 = vmatprep.subr.mxu0 %v272_v9  ;;  %714 = vmatprep.subr.mxu1 %v272_v9  ;;  %v241_v49 = vsel %vm209_vm12, %v193_v35, %v225_v42  ;;  %v249_v50 = vsel %vm217_vm13, %v201_v36, %v233_v43  ;;  %v227_v51 = vmul.f32 0.1, %v195_v44  ;;  %v235_v52 = vmul.f32 0.1, %v203_v48  ;;  %v260_v62 = vld [vmem:[%s1180_s3 + $0x40] sm:$0xff]  ;;  %v255_v3 = vld [vmem:[%s1180_s3 + $0x18] sm:$0xff] }
  0x28   : > { %680 = vmatpush3.msra.mxu0 %v272_v9  ;;  %722 = vmatpush3.msra.mxu1 %v272_v9  ;;  %v242_v53 = vsel %vm210_vm14, %v194_v37, %v226_v46  ;;  %v250_v54 = vsel %vm218_vm15, %v202_v38, %v234_v47  ;;  %vm211_vm0 = vcmp.ge.f32.partialorder %v195_v44, 0.0  ;;  %vm219_vm1 = vcmp.ge.f32.partialorder %v203_v48, 0.0  ;;  %v263_v4 = vld [vmem:[%s1180_s3 + $0x58] sm:$0xff]  ;;  %v254_v9 = vld [vmem:[%s1180_s3 + $0x10] sm:$0xff]  ;;  %v257_v15 = vld [vmem:[%s1180_s3 + $0x28] sm:$0xff] }
  0x29   : > { %681 = vmatprep.subr.mxu0 %v271_v14  ;;  %715 = vmatprep.subr.mxu1 %v271_v14  ;;  %v243_v55 = vsel %vm211_vm0, %v195_v44, %v227_v51  ;;  %v251_v56 = vsel %vm219_vm1, %v203_v48, %v235_v52  ;;  %v262_v10 = vld [vmem:[%s1180_s3 + $0x50] sm:$0xff]  ;;  %v265_v16 = vld [vmem:[%s1180_s3 + $0x68] sm:$0xff]  ;;  %v256_v21 = vld [vmem:[%s1180_s3 + $0x20] sm:$0xff] }
  0x2a   : > { %682 = vmatpush3.msra.mxu0 %v271_v14  ;;  %723 = vmatpush3.msra.mxu1 %v271_v14  ;;  %v264_v22 = vld [vmem:[%s1180_s3 + $0x60] sm:$0xff]  ;;  %v267_v28 = vld [vmem:[%s1180_s3 + $0x78] sm:$0xff]  ;;  %v266_v34 = vld [vmem:[%s1180_s3 + $0x70] sm:$0xff] }
  0x2b   : > { %683 = vmatprep.subr.mxu0 %v270_v17  ;;  %716 = vmatprep.subr.mxu1 %v270_v17 }
  0x2c   : > { %684 = vmatpush3.msra.mxu0 %v270_v17  ;;  %724 = vmatpush3.msra.mxu1 %v270_v17 }
  0x2d   : > { %685 = vmatprep.mubr.msk.f32.mxu0 %vm278_vm5, %v236_v24  ;;  %697 = vmatprep.mubr.msk.f32.mxu1 %vm278_vm5, %v244_v26 }
  0x2e   : > { %686 = vmatmul.mubr.msk.f32.vlgmr.msra.gmra.mxu0 %vm278_vm5, %v237_v27  ;;  %698 = vmatmul.mubr.msk.f32.vlgmr.msra.gmra.mxu1 %vm278_vm5, %v245_v30  ;;  %v259_v27 = vld [vmem:[%s1180_s3 + $0x38] sm:$0xff] }
  0x2f   : > { %688 = vmatprep.mubr.msk.f32.mxu0 %vm278_vm5, %v238_v32  ;;  %700 = vmatprep.mubr.msk.f32.mxu1 %vm278_vm5, %v246_v33  ;;  %v258_v33 = vld [vmem:[%s1180_s3 + $0x30] sm:$0xff] }
  0x32   : > { %689 = vmatmul.mubr.msk.f32.gmra.mxu0 %vm278_vm5, %v239_v39  ;;  %701 = vmatmul.mubr.msk.f32.gmra.mxu1 %vm278_vm5, %v247_v40 }
  0x33   : > { %691 = vmatprep.mubr.msk.f32.mxu0 %vm278_vm5, %v240_v41  ;;  %703 = vmatprep.mubr.msk.f32.mxu1 %vm278_vm5, %v248_v45 }
  0x36   : > { %692 = vmatmul.mubr.msk.f32.gmra.mxu0 %vm278_vm5, %v241_v49  ;;  %704 = vmatmul.mubr.msk.f32.gmra.mxu1 %vm278_vm5, %v249_v50 }
  0x37   : > { %694 = vmatprep.mubr.msk.f32.mxu0 %vm278_vm5, %v242_v53  ;;  %706 = vmatprep.mubr.msk.f32.mxu1 %vm278_vm5, %v250_v54 }
  0x3a   : > { %695 = vmatmul.mubr.msk.f32.gmra.mxu0 %vm278_vm5, %v243_v55  ;;  %707 = vmatmul.mubr.msk.f32.gmra.mxu1 %vm278_vm5, %v251_v56 }
  0xee   : > { %v687_v59 = vpop.f32.mrf.mxu0  ;;  %v699_v60 = vpop.f32.mrf.mxu1 }
  0xef   : > { %v473_v63 = vadd.f32 %v687_v59, %v253_v57  ;;  %v481_v0 = vadd.f32 %v699_v60, %v261_v58 }
  0xf0   : > { %v393_v1 = vpop.f32.mrf.mxu0  ;;  %v433_v2 = vpop.f32.mrf.mxu1 }
  0xf1   : > { %489 = vst.msk [vmem:[%s1180_s3 + $0x8] sm:$0xff] %vm278_vm5, %v473_v63  ;;  %497 = vst.msk [vmem:[%s1180_s3 + $0x48] sm:$0xff] %vm278_vm5, %v481_v0  ;;  %v472_v5 = vadd.f32 %v393_v1, %v252_v61  ;;  %v480_v6 = vadd.f32 %v433_v2, %v260_v62 }
  0xf2   : > { %v690_v7 = vpop.f32.mrf.mxu0  ;;  %v702_v8 = vpop.f32.mrf.mxu1 }
  0xf3   : > { %488 = vst.msk [vmem:[%s1180_s3] sm:$0xff] %vm278_vm5, %v472_v5  ;;  %496 = vst.msk [vmem:[%s1180_s3 + $0x40] sm:$0xff] %vm278_vm5, %v480_v6  ;;  %v475_v11 = vadd.f32 %v690_v7, %v255_v3  ;;  %v483_v12 = vadd.f32 %v702_v8, %v263_v4 }
  0xf4   : > { %v403_v13 = vpop.f32.mrf.mxu0  ;;  %v443_v14 = vpop.f32.mrf.mxu1 }
  0xf5   : > { %491 = vst.msk [vmem:[%s1180_s3 + $0x18] sm:$0xff] %vm278_vm5, %v475_v11  ;;  %499 = vst.msk [vmem:[%s1180_s3 + $0x58] sm:$0xff] %vm278_vm5, %v483_v12  ;;  %v474_v17 = vadd.f32 %v403_v13, %v254_v9  ;;  %v482_v18 = vadd.f32 %v443_v14, %v262_v10 }
  0xf6   : > { %v693_v19 = vpop.f32.mrf.mxu0  ;;  %v705_v20 = vpop.f32.mrf.mxu1 }
  0xf7   : > { %490 = vst.msk [vmem:[%s1180_s3 + $0x10] sm:$0xff] %vm278_vm5, %v474_v17  ;;  %498 = vst.msk [vmem:[%s1180_s3 + $0x50] sm:$0xff] %vm278_vm5, %v482_v18  ;;  %v477_v23 = vadd.f32 %v693_v19, %v257_v15  ;;  %v485_v24 = vadd.f32 %v705_v20, %v265_v16 }
  0xf8   : > { %v413_v25 = vpop.f32.mrf.mxu0  ;;  %v453_v26 = vpop.f32.mrf.mxu1 }
  0xf9   : > { %493 = vst.msk [vmem:[%s1180_s3 + $0x28] sm:$0xff] %vm278_vm5, %v477_v23  ;;  %501 = vst.msk [vmem:[%s1180_s3 + $0x68] sm:$0xff] %vm278_vm5, %v485_v24  ;;  %v476_v29 = vadd.f32 %v413_v25, %v256_v21  ;;  %v484_v30 = vadd.f32 %v453_v26, %v264_v22 }
  0xfa   : > { %v696_v31 = vpop.f32.mrf.mxu0  ;;  %v708_v32 = vpop.f32.mrf.mxu1 }
  0xfb   : > { %492 = vst.msk [vmem:[%s1180_s3 + $0x20] sm:$0xff] %vm278_vm5, %v476_v29  ;;  %500 = vst.msk [vmem:[%s1180_s3 + $0x60] sm:$0xff] %vm278_vm5, %v484_v30  ;;  %v479_v35 = vadd.f32 %v696_v31, %v259_v27  ;;  %v487_v36 = vadd.f32 %v708_v32, %v267_v28  ;;  %507 = sbr.rel (%p639_p5) target bundleno = 268 (0x10c), region = 40 }
  0xfc   : > { %v423_v37 = vpop.f32.mrf.mxu0  ;;  %v463_v38 = vpop.f32.mrf.mxu1 }
  0xfd   : > { %495 = vst.msk [vmem:[%s1180_s3 + $0x38] sm:$0xff] %vm278_vm5, %v479_v35  ;;  %503 = vst.msk [vmem:[%s1180_s3 + $0x78] sm:$0xff] %vm278_vm5, %v487_v36  ;;  %v478_v39 = vadd.f32 %v423_v37, %v258_v33  ;;  %v486_v40 = vadd.f32 %v463_v38, %v266_v34 }
  0xff   : > { %494 = vst.msk [vmem:[%s1180_s3 + $0x30] sm:$0xff] %vm278_vm5, %v478_v39  ;;  %502 = vst.msk [vmem:[%s1180_s3 + $0x70] sm:$0xff] %vm278_vm5, %v486_v40 }
 0x100   : > { %v508_v41 = vld [vmem:[%s1180_s3] sm:$0xff]  ;;  %v509_v43 = vld [vmem:[%s1180_s3 + $0x8] sm:$0xff]  ;;  %v510_v46 = vld [vmem:[%s1180_s3 + $0x10] sm:$0xff] }
 0x101   : > { %v640_v42 = vld [vmem:[%s1179_s2] ss:$0 sm:$0xff]  ;;  %v511_v47 = vld [vmem:[%s1180_s3 + $0x18] sm:$0xff]  ;;  %v513_v52 = vld [vmem:[%s1180_s3 + $0x28] sm:$0xff] }
 0x102   : > { %v531_v44 = vadd.f32 %v640_v42, %v508_v41  ;;  %v532_v45 = vadd.f32 %v640_v42, %v509_v43  ;;  %v512_v48 = vld [vmem:[%s1180_s3 + $0x20] sm:$0xff]  ;;  %v533_v49 = vadd.f32 %v640_v42, %v510_v46  ;;  %v534_v50 = vadd.f32 %v640_v42, %v511_v47  ;;  %v517_v59 = vld [vmem:[%s1180_s3 + $0x48] sm:$0xff]  ;;  %v518_v60 = vld [vmem:[%s1180_s3 + $0x50] sm:$0xff] }
 0x103   : > { %v535_v51 = vadd.f32 %v640_v42, %v512_v48  ;;  %v536_v55 = vadd.f32 %v640_v42, %v513_v52  ;;  %v516_v58 = vld [vmem:[%s1180_s3 + $0x40] sm:$0xff]  ;;  %v540_v62 = vadd.f32 %v640_v42, %v517_v59  ;;  %v541_v63 = vadd.f32 %v640_v42, %v518_v60  ;;  %v519_v0 = vld [vmem:[%s1180_s3 + $0x58] sm:$0xff]  ;;  %v521_v2 = vld [vmem:[%s1180_s3 + $0x68] sm:$0xff] }
 0x104   : > { %v515_v54 = vld [vmem:[%s1180_s3 + $0x38] sm:$0xff]  ;;  %547 = vst.msk [vmem:[%s1180_s3] sm:$0xff] %vm278_vm5, %v531_v44  ;;  %548 = vst.msk [vmem:[%s1180_s3 + $0x8] sm:$0xff] %vm278_vm5, %v532_v45  ;;  %v539_v61 = vadd.f32 %v640_v42, %v516_v58  ;;  %v520_v1 = vld [vmem:[%s1180_s3 + $0x60] sm:$0xff]  ;;  %v542_v3 = vadd.f32 %v640_v42, %v519_v0  ;;  %v544_v5 = vadd.f32 %v640_v42, %v521_v2 }
 0x105   : > { %v538_v57 = vadd.f32 %v640_v42, %v515_v54  ;;  %549 = vst.msk [vmem:[%s1180_s3 + $0x10] sm:$0xff] %vm278_vm5, %v533_v49  ;;  %550 = vst.msk [vmem:[%s1180_s3 + $0x18] sm:$0xff] %vm278_vm5, %v534_v50  ;;  %v543_v4 = vadd.f32 %v640_v42, %v520_v1  ;;  %v523_v7 = vld [vmem:[%s1180_s3 + $0x78] sm:$0xff] }
 0x106   : > { %v514_v53 = vld [vmem:[%s1180_s3 + $0x30] sm:$0xff]  ;;  %551 = vst.msk [vmem:[%s1180_s3 + $0x20] sm:$0xff] %vm278_vm5, %v535_v51  ;;  %552 = vst.msk [vmem:[%s1180_s3 + $0x28] sm:$0xff] %vm278_vm5, %v536_v55  ;;  %v546_v9 = vadd.f32 %v640_v42, %v523_v7 }
 0x107   : > { %v537_v56 = vadd.f32 %v640_v42, %v514_v53  ;;  %554 = vst.msk [vmem:[%s1180_s3 + $0x38] sm:$0xff] %vm278_vm5, %v538_v57  ;;  %v522_v6 = vld [vmem:[%s1180_s3 + $0x70] sm:$0xff]  ;;  %555 = vst.msk [vmem:[%s1180_s3 + $0x40] sm:$0xff] %vm278_vm5, %v539_v61 }
 0x108   : > { %556 = vst.msk [vmem:[%s1180_s3 + $0x48] sm:$0xff] %vm278_vm5, %v540_v62  ;;  %557 = vst.msk [vmem:[%s1180_s3 + $0x50] sm:$0xff] %vm278_vm5, %v541_v63  ;;  %v545_v8 = vadd.f32 %v640_v42, %v522_v6 }
 0x109   : > { %553 = vst.msk [vmem:[%s1180_s3 + $0x30] sm:$0xff] %vm278_vm5, %v537_v56  ;;  %558 = vst.msk [vmem:[%s1180_s3 + $0x58] sm:$0xff] %vm278_vm5, %v542_v3 }
 0x10a   : > { %559 = vst.msk [vmem:[%s1180_s3 + $0x60] sm:$0xff] %vm278_vm5, %v543_v4  ;;  %560 = vst.msk [vmem:[%s1180_s3 + $0x68] sm:$0xff] %vm278_vm5, %v544_v5 }
 0x10b   : > { %561 = vst.msk [vmem:[%s1180_s3 + $0x70] sm:$0xff] %vm278_vm5, %v545_v8  ;;  %562 = vst.msk [vmem:[%s1180_s3 + $0x78] sm:$0xff] %vm278_vm5, %v546_v9 }
 0x10c PF: > { %s13_s14 = sadd.s32 1, %s772_s14   ;;  %s1181_s12 = smov %s768_s13 }
 0x10d   : > { %p10_p6 = scmp.ge.s32.totalorder %s13_s14, 7   ;;  %s1182_s13 = smov %s1184_s15 }
 0x10f   :  { %12 = sbr.rel (!%p10_p6) target bundleno = 2 (0x2), region = 69 }

// kernel: generator_forward.21
= control target key start
LH: loop header
LB: loop body
LE: loop exit
PB: predicated region body
PF: predicated region fallthrough
CT: control target
= control target key end

     0   :  { %s795_s12 = smov 0   ;;  %s797_s13 = smov 0   ;;  %s1177_s0 = inlined_call_operand.vmem [shape: f32[2,66,64], index: 0, kind: input, shape index: {}]   ;;  %s1178_s1 = inlined_call_operand.vmem [shape: f32[3,64,64], index: 1, kind: input, shape index: {}]   ;;  %s1179_s2 = inlined_call_operand.vmem [shape: f32[1,64], index: 2, kind: input, shape index: {}]   ;;  %s1180_s3 = inlined_call_operand.vmem [shape: f32[2,64,64], index: 3, kind: output, shape index: {}]  }
   0x1   :  { %s799_s14 = smov 0  }
   0x2 LB: > { %s22_s15 = sadd.s32 1, %s768_s13  ;;  %p620_p0 = scmp.ge.s32.totalorder %s772_s14, 1  ;;  %s772_s14 = sphi %s799_s14, %s13_s14   ;;  %s768_s13 = sphi %s797_s13, %s1182_s13   ;;  %s764_s12 = sphi %s795_s12, %s1181_s12  }
   0x3   : > { %p23_p1 = scmp.ge.s32.totalorder %s22_s15, 3  ;;  %p139_p2 = scmp.lt.s32.totalorder %s772_s14, 4 }
   0x5   : > { %s1184_s15 = smov (%p23_p1, %s22_s15), 0  ;;  %p140_p3 = pnand %p620_p0, %p139_p2 }
   0x6   : > { %p621_p4 = scmp.ne.s32.totalorder (!%p140_p3), %s764_s12, 0 }
   0x7   : > { %143 = sbr.rel (%p140_p3) target bundleno = 268 (0x10c), region = 32 }
   0xc   : > { %167 = sbr.rel (%p621_p4) target bundleno = 26 (0x1a), region = 36 }
  0x11   : > { %vm168_vm0 = vcmask 523264   ;;  %v774_v0 = vmov 0.0  }
  0x12   : > { %169 = vst.msk [vmem:[%s1180_s3] sm:$0xff] %vm168_vm0, %v774_v0  ;;  %170 = vst.msk [vmem:[%s1180_s3 + $0x8] sm:$0xff] %vm168_vm0, %v774_v0 }
  0x13   : > { %171 = vst.msk [vmem:[%s1180_s3 + $0x10] sm:$0xff] %vm168_vm0, %v774_v0  ;;  %172 = vst.msk [vmem:[%s1180_s3 + $0x18] sm:$0xff] %vm168_vm0, %v774_v0 }
  0x14   : > { %173 = vst.msk [vmem:[%s1180_s3 + $0x20] sm:$0xff] %vm168_vm0, %v774_v0  ;;  %174 = vst.msk [vmem:[%s1180_s3 + $0x28] sm:$0xff] %vm168_vm0, %v774_v0 }
  0x15   : > { %175 = vst.msk [vmem:[%s1180_s3 + $0x30] sm:$0xff] %vm168_vm0, %v774_v0  ;;  %176 = vst.msk [vmem:[%s1180_s3 + $0x38] sm:$0xff] %vm168_vm0, %v774_v0 }
  0x16   : > { %177 = vst.msk [vmem:[%s1180_s3 + $0x40] sm:$0xff] %vm168_vm0, %v774_v0  ;;  %178 = vst.msk [vmem:[%s1180_s3 + $0x48] sm:$0xff] %vm168_vm0, %v774_v0 }
  0x17   : > { %179 = vst.msk [vmem:[%s1180_s3 + $0x50] sm:$0xff] %vm168_vm0, %v774_v0  ;;  %180 = vst.msk [vmem:[%s1180_s3 + $0x58] sm:$0xff] %vm168_vm0, %v774_v0 }
  0x18   : > { %181 = vst.msk [vmem:[%s1180_s3 + $0x60] sm:$0xff] %vm168_vm0, %v774_v0  ;;  %182 = vst.msk [vmem:[%s1180_s3 + $0x68] sm:$0xff] %vm168_vm0, %v774_v0 }
  0x19   : > { %183 = vst.msk [vmem:[%s1180_s3 + $0x70] sm:$0xff] %vm168_vm0, %v774_v0  ;;  %184 = vst.msk [vmem:[%s1180_s3 + $0x78] sm:$0xff] %vm168_vm0, %v774_v0 }
  0x1a PF: > { %s622_s25 = sshll.u32 %s764_s12, 6  ;;  %s893_s4 = scalar_lea.vmem %s1177_s0, %s764_s12  ;;  %vm278_vm5 = vcmask 523264   ;;  %v253_v57 = vld [vmem:[%s1180_s3 + $0x8] sm:$0xff]  ;;  %v252_v61 = vld [vmem:[%s1180_s3] sm:$0xff] }
  0x1b   : > { %s884_s28 = scalar_lea.vmem %s1178_s1, %s622_s25  ;;  %v188_v6 = vld [vmem:[%s893_s4] sm:$0xff]  ;;  %v196_v7 = vld [vmem:[%s893_s4 + $0x48] sm:$0xff]  ;;  %v197_v10 = vld [vmem:[%s893_s4 + $0x50] sm:$0xff]  ;;  %p639_p5 = scmp.ne.s32.totalorder %s764_s12, 2 }
  0x1c   : > { %v277_v1 = vld [vmem:[%s884_s28 + $0x38] sm:$0xff]  ;;  %v276_v2 = vld [vmem:[%s884_s28 + $0x30] sm:$0xff]  ;;  %v275_v3 = vld [vmem:[%s884_s28 + $0x28] sm:$0xff]  ;;  %vm204_vm1 = vcmp.ge.f32.partialorder %v188_v6, 0.0  ;;  %v220_v11 = vmul.f32 0.1, %v188_v6 }
  0x1d   : > { %669 = vmatprep.subr.mxu0 %v277_v1  ;;  %709 = vmatprep.subr.mxu1 %v277_v1  ;;  %v274_v4 = vld [vmem:[%s884_s28 + $0x20] sm:$0xff]  ;;  %v273_v5 = vld [vmem:[%s884_s28 + $0x18] sm:$0xff]  ;;  %v189_v8 = vld [vmem:[%s893_s4 + $0x8] sm:$0xff]  ;;  %vm212_vm2 = vcmp.ge.f32.partialorder %v196_v7, 0.0  ;;  %v228_v15 = vmul.f32 0.1, %v196_v7 }
  0x1e   : > { %670 = vmatpush3.msra.mxu0 %v277_v1  ;;  %717 = vmatpush3.msra.mxu1 %v277_v1  ;;  %v272_v9 = vld [vmem:[%s884_s28 + $0x10] sm:$0xff]  ;;  %v198_v13 = vld [vmem:[%s893_s4 + $0x58] sm:$0xff]  ;;  %v271_v14 = vld [vmem:[%s884_s28 + $0x8] sm:$0xff]  ;;  %v221_v16 = vmul.f32 0.1, %v189_v8  ;;  %vm205_vm3 = vcmp.ge.f32.partialorder %v189_v8, 0.0  ;;  %v236_v24 = vsel %vm204_vm1, %v188_v6, %v220_v11 }
  0x1f   : > { %671 = vmatprep.subr.mxu0 %v276_v2  ;;  %710 = vmatprep.subr.mxu1 %v276_v2  ;;  %v190_v12 = vld [vmem:[%s893_s4 + $0x10] sm:$0xff]  ;;  %v270_v17 = vld [vmem:[%s884_s28] sm:$0xff]  ;;  %v229_v18 = vmul.f32 0.1, %v197_v10  ;;  %v191_v19 = vld [vmem:[%s893_s4 + $0x18] sm:$0xff]  ;;  %vm213_vm4 = vcmp.ge.f32.partialorder %v197_v10, 0.0  ;;  %v244_v26 = vsel %vm212_vm2, %v196_v7, %v228_v15 }
  0x20   : > { %672 = vmatpush3.msra.mxu0 %v276_v2  ;;  %718 = vmatpush3.msra.mxu1 %v276_v2  ;;  %v199_v20 = vld [vmem:[%s893_s4 + $0x60] sm:$0xff]  ;;  %v222_v21 = vmul.f32 0.1, %v190_v12  ;;  %v230_v22 = vmul.f32 0.1, %v198_v13  ;;  %vm206_vm6 = vcmp.ge.f32.partialorder %v190_v12, 0.0  ;;  %v237_v27 = vsel %vm205_vm3, %v189_v8, %v221_v16 }
  0x21   : > { %673 = vmatprep.subr.mxu0 %v275_v3  ;;  %711 = vmatprep.subr.mxu1 %v275_v3  ;;  %v192_v23 = vld [vmem:[%s893_s4 + $0x20] sm:$0xff]  ;;  %vm214_vm7 = vcmp.ge.f32.partialorder %v198_v13, 0.0  ;;  %v200_v25 = vld [vmem:[%s893_s4 + $0x68] sm:$0xff]  ;;  %v223_v28 = vmul.f32 0.1, %v191_v19  ;;  %v245_v30 = vsel %vm213_vm4, %v197_v10, %v229_v18  ;;  %vm207_vm8 = vcmp.ge.f32.partialorder %v191_v19, 0.0 }
  0x22   : > { %674 = vmatpush3.msra.mxu0 %v275_v3  ;;  %719 = vmatpush3.msra.mxu1 %v275_v3  ;;  %v231_v29 = vmul.f32 0.1, %v199_v20  ;;  %vm215_vm9 = vcmp.ge.f32.partialorder %v199_v20, 0.0  ;;  %v224_v31 = vmul.f32 0.1, %v192_v23  ;;  %v238_v32 = vsel %vm206_vm6, %v190_v12, %v222_v21  ;;  %v193_v35 = vld [vmem:[%s893_s4 + $0x28] sm:$0xff] }
  0x23   : > { %675 = vmatprep.subr.mxu0 %v274_v4  ;;  %712 = vmatprep.subr.mxu1 %v274_v4  ;;  %v246_v33 = vsel %vm214_vm7, %v198_v13, %v230_v22  ;;  %vm208_vm10 = vcmp.ge.f32.partialorder %v192_v23, 0.0  ;;  %v232_v34 = vmul.f32 0.1, %v200_v25  ;;  %v201_v36 = vld [vmem:[%s893_s4 + $0x70] sm:$0xff]  ;;  %vm216_vm11 = vcmp.ge.f32.partialorder %v200_v25, 0.0  ;;  %v202_v38 = vld [vmem:[%s893_s4 + $0x78] sm:$0xff] }
  0x24   : > { %676 = vmatpush3.msra.mxu0 %v274_v4  ;;  %720 = vmatpush3.msra.mxu1 %v274_v4  ;;  %v194_v37 = vld [vmem:[%s893_s4 + $0x30] sm:$0xff]  ;;  %v239_v39 = vsel %vm207_vm8, %v191_v19, %v223_v28  ;;  %v247_v40 = vsel %vm215_vm9, %v199_v20, %v231_v29  ;;  %v240_v41 = vsel %vm208_vm10, %v192_v23, %v224_v31  ;;  %vm209_vm12 = vcmp.ge.f32.partialorder %v193_v35, 0.0  ;;  %v195_v44 = vld [vmem:[%s893_s4 + $0x38] sm:$0xff]  ;;  %v203_v48 = vld [vmem:[%s893_s4 + $0x80] sm:$0xff] }
  0x25   : > { %677 = vmatprep.subr.mxu0 %v273_v5  ;;  %713 = vmatprep.subr.mxu1 %v273_v5  ;;  %v225_v42 = vmul.f32 0.1, %v193_v35  ;;  %v233_v43 = vmul.f32 0.1, %v201_v36  ;;  %v248_v45 = vsel %vm216_vm11, %v200_v25, %v232_v34  ;;  %vm217_vm13 = vcmp.ge.f32.partialorder %v201_v36, 0.0  ;;  %v261_v58 = vld [vmem:[%s1180_s3 + $0x48] sm:$0xff] }
  0x26   : > { %678 = vmatpush3.msra.mxu0 %v273_v5  ;;  %721 = vmatpush3.msra.mxu1 %v273_v5  ;;  %v226_v46 = vmul.f32 0.1, %v194_v37  ;;  %v234_v47 = vmul.f32 0.1, %v202_v38  ;;  %vm210_vm14 = vcmp.ge.f32.partialorder %v194_v37, 0.0  ;;  %vm218_vm15 = vcmp.ge.f32.partialorder %v202_v38, 0.0 }
  0x27   : > { %679 = vmatprep.subr.mxu0 %v272_v9  ;;  %714 = vmatprep.subr.mxu1 %v272_v9  ;;  %v241_v49 = vsel %vm209_vm12, %v193_v35, %v225_v42  ;;  %v249_v50 = vsel %vm217_vm13, %v201_v36, %v233_v43  ;;  %v227_v51 = vmul.f32 0.1, %v195_v44  ;;  %v235_v52 = vmul.f32 0.1, %v203_v48  ;;  %v260_v62 = vld [vmem:[%s1180_s3 + $0x40] sm:$0xff]  ;;  %v255_v3 = vld [vmem:[%s1180_s3 + $0x18] sm:$0xff] }
  0x28   : > { %680 = vmatpush3.msra.mxu0 %v272_v9  ;;  %722 = vmatpush3.msra.mxu1 %v272_v9  ;;  %v242_v53 = vsel %vm210_vm14, %v194_v37, %v226_v46  ;;  %v250_v54 = vsel %vm218_vm15, %v202_v38, %v234_v47  ;;  %vm211_vm0 = vcmp.ge.f32.partialorder %v195_v44, 0.0  ;;  %vm219_vm1 = vcmp.ge.f32.partialorder %v203_v48, 0.0  ;;  %v263_v4 = vld [vmem:[%s1180_s3 + $0x58] sm:$0xff]  ;;  %v254_v9 = vld [vmem:[%s1180_s3 + $0x10] sm:$0xff]  ;;  %v257_v15 = vld [vmem:[%s1180_s3 + $0x28] sm:$0xff] }
  0x29   : > { %681 = vmatprep.subr.mxu0 %v271_v14  ;;  %715 = vmatprep.subr.mxu1 %v271_v14  ;;  %v243_v55 = vsel %vm211_vm0, %v195_v44, %v227_v51  ;;  %v251_v56 = vsel %vm219_vm1, %v203_v48, %v235_v52  ;;  %v262_v10 = vld [vmem:[%s1180_s3 + $0x50] sm:$0xff]  ;;  %v265_v16 = vld [vmem:[%s1180_s3 + $0x68] sm:$0xff]  ;;  %v256_v21 = vld [vmem:[%s1180_s3 + $0x20] sm:$0xff] }
  0x2a   : > { %682 = vmatpush3.msra.mxu0 %v271_v14  ;;  %723 = vmatpush3.msra.mxu1 %v271_v14  ;;  %v264_v22 = vld [vmem:[%s1180_s3 + $0x60] sm:$0xff]  ;;  %v267_v28 = vld [vmem:[%s1180_s3 + $0x78] sm:$0xff]  ;;  %v266_v34 = vld [vmem:[%s1180_s3 + $0x70] sm:$0xff] }
  0x2b   : > { %683 = vmatprep.subr.mxu0 %v270_v17  ;;  %716 = vmatprep.subr.mxu1 %v270_v17 }
  0x2c   : > { %684 = vmatpush3.msra.mxu0 %v270_v17  ;;  %724 = vmatpush3.msra.mxu1 %v270_v17 }
  0x2d   : > { %685 = vmatprep.mubr.msk.f32.mxu0 %vm278_vm5, %v236_v24  ;;  %697 = vmatprep.mubr.msk.f32.mxu1 %vm278_vm5, %v244_v26 }
  0x2e   : > { %686 = vmatmul.mubr.msk.f32.vlgmr.msra.gmra.mxu0 %vm278_vm5, %v237_v27  ;;  %698 = vmatmul.mubr.msk.f32.vlgmr.msra.gmra.mxu1 %vm278_vm5, %v245_v30  ;;  %v259_v27 = vld [vmem:[%s1180_s3 + $0x38] sm:$0xff] }
  0x2f   : > { %688 = vmatprep.mubr.msk.f32.mxu0 %vm278_vm5, %v238_v32  ;;  %700 = vmatprep.mubr.msk.f32.mxu1 %vm278_vm5, %v246_v33  ;;  %v258_v33 = vld [vmem:[%s1180_s3 + $0x30] sm:$0xff] }
  0x32   : > { %689 = vmatmul.mubr.msk.f32.gmra.mxu0 %vm278_vm5, %v239_v39  ;;  %701 = vmatmul.mubr.msk.f32.gmra.mxu1 %vm278_vm5, %v247_v40 }
  0x33   : > { %691 = vmatprep.mubr.msk.f32.mxu0 %vm278_vm5, %v240_v41  ;;  %703 = vmatprep.mubr.msk.f32.mxu1 %vm278_vm5, %v248_v45 }
  0x36   : > { %692 = vmatmul.mubr.msk.f32.gmra.mxu0 %vm278_vm5, %v241_v49  ;;  %704 = vmatmul.mubr.msk.f32.gmra.mxu1 %vm278_vm5, %v249_v50 }
  0x37   : > { %694 = vmatprep.mubr.msk.f32.mxu0 %vm278_vm5, %v242_v53  ;;  %706 = vmatprep.mubr.msk.f32.mxu1 %vm278_vm5, %v250_v54 }
  0x3a   : > { %695 = vmatmul.mubr.msk.f32.gmra.mxu0 %vm278_vm5, %v243_v55  ;;  %707 = vmatmul.mubr.msk.f32.gmra.mxu1 %vm278_vm5, %v251_v56 }
  0xee   : > { %v687_v59 = vpop.f32.mrf.mxu0  ;;  %v699_v60 = vpop.f32.mrf.mxu1 }
  0xef   : > { %v473_v63 = vadd.f32 %v687_v59, %v253_v57  ;;  %v481_v0 = vadd.f32 %v699_v60, %v261_v58 }
  0xf0   : > { %v393_v1 = vpop.f32.mrf.mxu0  ;;  %v433_v2 = vpop.f32.mrf.mxu1 }
  0xf1   : > { %489 = vst.msk [vmem:[%s1180_s3 + $0x8] sm:$0xff] %vm278_vm5, %v473_v63  ;;  %497 = vst.msk [vmem:[%s1180_s3 + $0x48] sm:$0xff] %vm278_vm5, %v481_v0  ;;  %v472_v5 = vadd.f32 %v393_v1, %v252_v61  ;;  %v480_v6 = vadd.f32 %v433_v2, %v260_v62 }
  0xf2   : > { %v690_v7 = vpop.f32.mrf.mxu0  ;;  %v702_v8 = vpop.f32.mrf.mxu1 }
  0xf3   : > { %488 = vst.msk [vmem:[%s1180_s3] sm:$0xff] %vm278_vm5, %v472_v5  ;;  %496 = vst.msk [vmem:[%s1180_s3 + $0x40] sm:$0xff] %vm278_vm5, %v480_v6  ;;  %v475_v11 = vadd.f32 %v690_v7, %v255_v3  ;;  %v483_v12 = vadd.f32 %v702_v8, %v263_v4 }
  0xf4   : > { %v403_v13 = vpop.f32.mrf.mxu0  ;;  %v443_v14 = vpop.f32.mrf.mxu1 }
  0xf5   : > { %491 = vst.msk [vmem:[%s1180_s3 + $0x18] sm:$0xff] %vm278_vm5, %v475_v11  ;;  %499 = vst.msk [vmem:[%s1180_s3 + $0x58] sm:$0xff] %vm278_vm5, %v483_v12  ;;  %v474_v17 = vadd.f32 %v403_v13, %v254_v9  ;;  %v482_v18 = vadd.f32 %v443_v14, %v262_v10 }
  0xf6   : > { %v693_v19 = vpop.f32.mrf.mxu0  ;;  %v705_v20 = vpop.f32.mrf.mxu1 }
  0xf7   : > { %490 = vst.msk [vmem:[%s1180_s3 + $0x10] sm:$0xff] %vm278_vm5, %v474_v17  ;;  %498 = vst.msk [vmem:[%s1180_s3 + $0x50] sm:$0xff] %vm278_vm5, %v482_v18  ;;  %v477_v23 = vadd.f32 %v693_v19, %v257_v15  ;;  %v485_v24 = vadd.f32 %v705_v20, %v265_v16 }
  0xf8   : > { %v413_v25 = vpop.f32.mrf.mxu0  ;;  %v453_v26 = vpop.f32.mrf.mxu1 }
  0xf9   : > { %493 = vst.msk [vmem:[%s1180_s3 + $0x28] sm:$0xff] %vm278_vm5, %v477_v23  ;;  %501 = vst.msk [vmem:[%s1180_s3 + $0x68] sm:$0xff] %vm278_vm5, %v485_v24  ;;  %v476_v29 = vadd.f32 %v413_v25, %v256_v21  ;;  %v484_v30 = vadd.f32 %v453_v26, %v264_v22 }
  0xfa   : > { %v696_v31 = vpop.f32.mrf.mxu0  ;;  %v708_v32 = vpop.f32.mrf.mxu1 }
  0xfb   : > { %492 = vst.msk [vmem:[%s1180_s3 + $0x20] sm:$0xff] %vm278_vm5, %v476_v29  ;;  %500 = vst.msk [vmem:[%s1180_s3 + $0x60] sm:$0xff] %vm278_vm5, %v484_v30  ;;  %v479_v35 = vadd.f32 %v696_v31, %v259_v27  ;;  %v487_v36 = vadd.f32 %v708_v32, %v267_v28  ;;  %507 = sbr.rel (%p639_p5) target bundleno = 268 (0x10c), region = 40 }
  0xfc   : > { %v423_v37 = vpop.f32.mrf.mxu0  ;;  %v463_v38 = vpop.f32.mrf.mxu1 }
  0xfd   : > { %495 = vst.msk [vmem:[%s1180_s3 + $0x38] sm:$0xff] %vm278_vm5, %v479_v35  ;;  %503 = vst.msk [vmem:[%s1180_s3 + $0x78] sm:$0xff] %vm278_vm5, %v487_v36  ;;  %v478_v39 = vadd.f32 %v423_v37, %v258_v33  ;;  %v486_v40 = vadd.f32 %v463_v38, %v266_v34 }
  0xff   : > { %494 = vst.msk [vmem:[%s1180_s3 + $0x30] sm:$0xff] %vm278_vm5, %v478_v39  ;;  %502 = vst.msk [vmem:[%s1180_s3 + $0x70] sm:$0xff] %vm278_vm5, %v486_v40 }
 0x100   : > { %v508_v41 = vld [vmem:[%s1180_s3] sm:$0xff]  ;;  %v509_v43 = vld [vmem:[%s1180_s3 + $0x8] sm:$0xff]  ;;  %v510_v46 = vld [vmem:[%s1180_s3 + $0x10] sm:$0xff] }
 0x101   : > { %v640_v42 = vld [vmem:[%s1179_s2] ss:$0 sm:$0xff]  ;;  %v511_v47 = vld [vmem:[%s1180_s3 + $0x18] sm:$0xff]  ;;  %v513_v52 = vld [vmem:[%s1180_s3 + $0x28] sm:$0xff] }
 0x102   : > { %v531_v44 = vadd.f32 %v640_v42, %v508_v41  ;;  %v532_v45 = vadd.f32 %v640_v42, %v509_v43  ;;  %v512_v48 = vld [vmem:[%s1180_s3 + $0x20] sm:$0xff]  ;;  %v533_v49 = vadd.f32 %v640_v42, %v510_v46  ;;  %v534_v50 = vadd.f32 %v640_v42, %v511_v47  ;;  %v517_v59 = vld [vmem:[%s1180_s3 + $0x48] sm:$0xff]  ;;  %v518_v60 = vld [vmem:[%s1180_s3 + $0x50] sm:$0xff] }
 0x103   : > { %v535_v51 = vadd.f32 %v640_v42, %v512_v48  ;;  %v536_v55 = vadd.f32 %v640_v42, %v513_v52  ;;  %v516_v58 = vld [vmem:[%s1180_s3 + $0x40] sm:$0xff]  ;;  %v540_v62 = vadd.f32 %v640_v42, %v517_v59  ;;  %v541_v63 = vadd.f32 %v640_v42, %v518_v60  ;;  %v519_v0 = vld [vmem:[%s1180_s3 + $0x58] sm:$0xff]  ;;  %v521_v2 = vld [vmem:[%s1180_s3 + $0x68] sm:$0xff] }
 0x104   : > { %v515_v54 = vld [vmem:[%s1180_s3 + $0x38] sm:$0xff]  ;;  %547 = vst.msk [vmem:[%s1180_s3] sm:$0xff] %vm278_vm5, %v531_v44  ;;  %548 = vst.msk [vmem:[%s1180_s3 + $0x8] sm:$0xff] %vm278_vm5, %v532_v45  ;;  %v539_v61 = vadd.f32 %v640_v42, %v516_v58  ;;  %v520_v1 = vld [vmem:[%s1180_s3 + $0x60] sm:$0xff]  ;;  %v542_v3 = vadd.f32 %v640_v42, %v519_v0  ;;  %v544_v5 = vadd.f32 %v640_v42, %v521_v2 }
 0x105   : > { %v538_v57 = vadd.f32 %v640_v42, %v515_v54  ;;  %549 = vst.msk [vmem:[%s1180_s3 + $0x10] sm:$0xff] %vm278_vm5, %v533_v49  ;;  %550 = vst.msk [vmem:[%s1180_s3 + $0x18] sm:$0xff] %vm278_vm5, %v534_v50  ;;  %v543_v4 = vadd.f32 %v640_v42, %v520_v1  ;;  %v523_v7 = vld [vmem:[%s1180_s3 + $0x78] sm:$0xff] }
 0x106   : > { %v514_v53 = vld [vmem:[%s1180_s3 + $0x30] sm:$0xff]  ;;  %551 = vst.msk [vmem:[%s1180_s3 + $0x20] sm:$0xff] %vm278_vm5, %v535_v51  ;;  %552 = vst.msk [vmem:[%s1180_s3 + $0x28] sm:$0xff] %vm278_vm5, %v536_v55  ;;  %v546_v9 = vadd.f32 %v640_v42, %v523_v7 }
 0x107   : > { %v537_v56 = vadd.f32 %v640_v42, %v514_v53  ;;  %554 = vst.msk [vmem:[%s1180_s3 + $0x38] sm:$0xff] %vm278_vm5, %v538_v57  ;;  %v522_v6 = vld [vmem:[%s1180_s3 + $0x70] sm:$0xff]  ;;  %555 = vst.msk [vmem:[%s1180_s3 + $0x40] sm:$0xff] %vm278_vm5, %v539_v61 }
 0x108   : > { %556 = vst.msk [vmem:[%s1180_s3 + $0x48] sm:$0xff] %vm278_vm5, %v540_v62  ;;  %557 = vst.msk [vmem:[%s1180_s3 + $0x50] sm:$0xff] %vm278_vm5, %v541_v63  ;;  %v545_v8 = vadd.f32 %v640_v42, %v522_v6 }
 0x109   : > { %553 = vst.msk [vmem:[%s1180_s3 + $0x30] sm:$0xff] %vm278_vm5, %v537_v56  ;;  %558 = vst.msk [vmem:[%s1180_s3 + $0x58] sm:$0xff] %vm278_vm5, %v542_v3 }
 0x10a   : > { %559 = vst.msk [vmem:[%s1180_s3 + $0x60] sm:$0xff] %vm278_vm5, %v543_v4  ;;  %560 = vst.msk [vmem:[%s1180_s3 + $0x68] sm:$0xff] %vm278_vm5, %v544_v5 }
 0x10b   : > { %561 = vst.msk [vmem:[%s1180_s3 + $0x70] sm:$0xff] %vm278_vm5, %v545_v8  ;;  %562 = vst.msk [vmem:[%s1180_s3 + $0x78] sm:$0xff] %vm278_vm5, %v546_v9 }
 0x10c PF: > { %s13_s14 = sadd.s32 1, %s772_s14   ;;  %s1181_s12 = smov %s768_s13 }
 0x10d   : > { %p10_p6 = scmp.ge.s32.totalorder %s13_s14, 5   ;;  %s1182_s13 = smov %s1184_s15 }
 0x10f   :  { %12 = sbr.rel (!%p10_p6) target bundleno = 2 (0x2), region = 69 }

// kernel: generator_forward.27
= control target key start
LH: loop header
LB: loop body
LE: loop exit
PB: predicated region body
PF: predicated region fallthrough
CT: control target
= control target key end

     0   :  { %s797_s12 = smov 0   ;;  %s799_s13 = smov 0   ;;  %s1179_s0 = inlined_call_operand.vmem [shape: f32[2,76,64], index: 0, kind: input, shape index: {}]   ;;  %s1180_s1 = inlined_call_operand.vmem [shape: f32[5,64,64], index: 1, kind: input, shape index: {}]   ;;  %s1181_s2 = inlined_call_operand.vmem [shape: f32[1,64], index: 2, kind: input, shape index: {}]   ;;  %s1182_s3 = inlined_call_operand.vmem [shape: f32[2,64,64], index: 3, kind: output, shape index: {}]  }
   0x1   :  { %s801_s14 = smov 0  }
   0x2 LB: > { %s22_s15 = sadd.s32 1, %s770_s13  ;;  %p622_p0 = scmp.ge.s32.totalorder %s774_s14, 1  ;;  %s774_s14 = sphi %s801_s14, %s13_s14   ;;  %s770_s13 = sphi %s799_s13, %s1184_s13   ;;  %s766_s12 = sphi %s797_s12, %s1183_s12  }
   0x3   : > { %p23_p1 = scmp.ge.s32.totalorder %s22_s15, 5  ;;  %p139_p2 = scmp.lt.s32.totalorder %s774_s14, 6 }
   0x5   : > { %s1186_s15 = smov (%p23_p1, %s22_s15), 0  ;;  %p140_p3 = pnand %p622_p0, %p139_p2 }
   0x6   : > { %p623_p4 = scmp.ne.s32.totalorder (!%p140_p3), %s766_s12, 0 }
   0x7   : > { %143 = sbr.rel (%p140_p3) target bundleno = 268 (0x10c), region = 32 }
   0xc   : > { %167 = sbr.rel (%p623_p4) target bundleno = 26 (0x1a), region = 36 }
  0x11   : > { %vm168_vm0 = vcmask 523264   ;;  %v776_v0 = vmov 0.0  }
  0x12   : > { %169 = vst.msk [vmem:[%s1182_s3] sm:$0xff] %vm168_vm0, %v776_v0  ;;  %170 = vst.msk [vmem:[%s1182_s3 + $0x8] sm:$0xff] %vm168_vm0, %v776_v0 }
  0x13   : > { %171 = vst.msk [vmem:[%s1182_s3 + $0x10] sm:$0xff] %vm168_vm0, %v776_v0  ;;  %172 = vst.msk [vmem:[%s1182_s3 + $0x18] sm:$0xff] %vm168_vm0, %v776_v0 }
  0x14   : > { %173 = vst.msk [vmem:[%s1182_s3 + $0x20] sm:$0xff] %vm168_vm0, %v776_v0  ;;  %174 = vst.msk [vmem:[%s1182_s3 + $0x28] sm:$0xff] %vm168_vm0, %v776_v0 }
  0x15   : > { %175 = vst.msk [vmem:[%s1182_s3 + $0x30] sm:$0xff] %vm168_vm0, %v776_v0  ;;  %176 = vst.msk [vmem:[%s1182_s3 + $0x38] sm:$0xff] %vm168_vm0, %v776_v0 }
  0x16   : > { %177 = vst.msk [vmem:[%s1182_s3 + $0x40] sm:$0xff] %vm168_vm0, %v776_v0  ;;  %178 = vst.msk [vmem:[%s1182_s3 + $0x48] sm:$0xff] %vm168_vm0, %v776_v0 }
  0x17   : > { %179 = vst.msk [vmem:[%s1182_s3 + $0x50] sm:$0xff] %vm168_vm0, %v776_v0  ;;  %180 = vst.msk [vmem:[%s1182_s3 + $0x58] sm:$0xff] %vm168_vm0, %v776_v0 }
  0x18   : > { %181 = vst.msk [vmem:[%s1182_s3 + $0x60] sm:$0xff] %vm168_vm0, %v776_v0  ;;  %182 = vst.msk [vmem:[%s1182_s3 + $0x68] sm:$0xff] %vm168_vm0, %v776_v0 }
  0x19   : > { %183 = vst.msk [vmem:[%s1182_s3 + $0x70] sm:$0xff] %vm168_vm0, %v776_v0  ;;  %184 = vst.msk [vmem:[%s1182_s3 + $0x78] sm:$0xff] %vm168_vm0, %v776_v0 }
  0x1a PF: > { %s624_s25 = sshll.u32 %s766_s12, 6  ;;  %s186_s29 = smul.u32 3, %s766_s12  ;;  %vm279_vm5 = vcmask 523264   ;;  %v254_v57 = vld [vmem:[%s1182_s3 + $0x8] sm:$0xff]  ;;  %v253_v61 = vld [vmem:[%s1182_s3] sm:$0xff] }
  0x1b   : > { %s886_s28 = scalar_lea.vmem %s1180_s1, %s624_s25  ;;  %p641_p5 = scmp.ne.s32.totalorder %s766_s12, 4 }
  0x1c   : > { %v278_v1 = vld [vmem:[%s886_s28 + $0x38] sm:$0xff]  ;;  %v277_v2 = vld [vmem:[%s886_s28 + $0x30] sm:$0xff]  ;;  %v276_v3 = vld [vmem:[%s886_s28 + $0x28] sm:$0xff]  ;;  %s895_s5 = scalar_lea.vmem %s1179_s0, %s186_s29 }
  0x1d   : > { %671 = vmatprep.subr.mxu0 %v278_v1  ;;  %711 = vmatprep.subr.mxu1 %v278_v1  ;;  %v275_v4 = vld [vmem:[%s886_s28 + $0x20] sm:$0xff]  ;;  %v274_v5 = vld [vmem:[%s886_s28 + $0x18] sm:$0xff]  ;;  %v197_v7 = vld [vmem:[%s895_s5 + $0x50] sm:$0xff] }
  0x1e   : > { %672 = vmatpush3.msra.mxu0 %v278_v1  ;;  %719 = vmatpush3.msra.mxu1 %v278_v1  ;;  %v189_v6 = vld [vmem:[%s895_s5] sm:$0xff]  ;;  %v190_v8 = vld [vmem:[%s895_s5 + $0x8] sm:$0xff]  ;;  %v273_v9 = vld [vmem:[%s886_s28 + $0x10] sm:$0xff]  ;;  %v229_v16 = vmul.f32 0.1, %v197_v7  ;;  %vm213_vm2 = vcmp.ge.f32.partialorder %v197_v7, 0.0 }
  0x1f   : > { %673 = vmatprep.subr.mxu0 %v277_v2  ;;  %712 = vmatprep.subr.mxu1 %v277_v2  ;;  %v198_v10 = vld [vmem:[%s895_s5 + $0x58] sm:$0xff]  ;;  %v272_v11 = vld [vmem:[%s886_s28 + $0x8] sm:$0xff]  ;;  %v221_v12 = vmul.f32 0.1, %v189_v6  ;;  %v191_v13 = vld [vmem:[%s895_s5 + $0x10] sm:$0xff]  ;;  %vm205_vm1 = vcmp.ge.f32.partialorder %v189_v6, 0.0 }
  0x20   : > { %674 = vmatpush3.msra.mxu0 %v277_v2  ;;  %720 = vmatpush3.msra.mxu1 %v277_v2  ;;  %v199_v14 = vld [vmem:[%s895_s5 + $0x60] sm:$0xff]  ;;  %v222_v17 = vmul.f32 0.1, %v190_v8  ;;  %vm206_vm3 = vcmp.ge.f32.partialorder %v190_v8, 0.0  ;;  %v230_v18 = vmul.f32 0.1, %v198_v10  ;;  %v245_v26 = vsel %vm213_vm2, %v197_v7, %v229_v16 }
  0x21   : > { %675 = vmatprep.subr.mxu0 %v276_v3  ;;  %713 = vmatprep.subr.mxu1 %v276_v3  ;;  %v271_v15 = vld [vmem:[%s886_s28] sm:$0xff]  ;;  %v192_v19 = vld [vmem:[%s895_s5 + $0x18] sm:$0xff]  ;;  %v200_v20 = vld [vmem:[%s895_s5 + $0x68] sm:$0xff]  ;;  %vm214_vm4 = vcmp.ge.f32.partialorder %v198_v10, 0.0  ;;  %v223_v21 = vmul.f32 0.1, %v191_v13  ;;  %v237_v24 = vsel %vm205_vm1, %v189_v6, %v221_v12 }
  0x22   : > { %676 = vmatpush3.msra.mxu0 %v276_v3  ;;  %721 = vmatpush3.msra.mxu1 %v276_v3  ;;  %v231_v22 = vmul.f32 0.1, %v199_v14  ;;  %v193_v23 = vld [vmem:[%s895_s5 + $0x20] sm:$0xff]  ;;  %vm207_vm6 = vcmp.ge.f32.partialorder %v191_v13, 0.0  ;;  %vm215_vm7 = vcmp.ge.f32.partialorder %v199_v14, 0.0  ;;  %v201_v25 = vld [vmem:[%s895_s5 + $0x70] sm:$0xff]  ;;  %v238_v27 = vsel %vm206_vm3, %v190_v8, %v222_v17 }
  0x23   : > { %677 = vmatprep.subr.mxu0 %v275_v4  ;;  %714 = vmatprep.subr.mxu1 %v275_v4  ;;  %v224_v28 = vmul.f32 0.1, %v192_v19  ;;  %v232_v29 = vmul.f32 0.1, %v200_v20  ;;  %v246_v30 = vsel %vm214_vm4, %v198_v10, %v230_v18  ;;  %vm208_vm8 = vcmp.ge.f32.partialorder %v192_v19, 0.0  ;;  %v194_v35 = vld [vmem:[%s895_s5 + $0x28] sm:$0xff] }
  0x24   : > { %678 = vmatpush3.msra.mxu0 %v275_v4  ;;  %722 = vmatpush3.msra.mxu1 %v275_v4  ;;  %vm216_vm9 = vcmp.ge.f32.partialorder %v200_v20, 0.0  ;;  %v225_v31 = vmul.f32 0.1, %v193_v23  ;;  %v239_v32 = vsel %vm207_vm6, %v191_v13, %v223_v21  ;;  %v247_v33 = vsel %vm215_vm7, %v199_v14, %v231_v22  ;;  %v202_v36 = vld [vmem:[%s895_s5 + $0x78] sm:$0xff]  ;;  %v195_v37 = vld [vmem:[%s895_s5 + $0x30] sm:$0xff]  ;;  %v203_v38 = vld [vmem:[%s895_s5 + $0x80] sm:$0xff] }
  0x25   : > { %679 = vmatprep.subr.mxu0 %v274_v5  ;;  %715 = vmatprep.subr.mxu1 %v274_v5  ;;  %vm209_vm10 = vcmp.ge.f32.partialorder %v193_v23, 0.0  ;;  %v233_v34 = vmul.f32 0.1, %v201_v25  ;;  %vm217_vm11 = vcmp.ge.f32.partialorder %v201_v25, 0.0  ;;  %v240_v39 = vsel %vm208_vm8, %v192_v19, %v224_v28  ;;  %v196_v44 = vld [vmem:[%s895_s5 + $0x38] sm:$0xff]  ;;  %v204_v48 = vld [vmem:[%s895_s5 + $0x88] sm:$0xff] }
  0x26   : > { %680 = vmatpush3.msra.mxu0 %v274_v5  ;;  %723 = vmatpush3.msra.mxu1 %v274_v5  ;;  %v248_v40 = vsel %vm216_vm9, %v200_v20, %v232_v29  ;;  %v241_v41 = vsel %vm209_vm10, %v193_v23, %v225_v31  ;;  %vm210_vm12 = vcmp.ge.f32.partialorder %v194_v35, 0.0  ;;  %v226_v42 = vmul.f32 0.1, %v194_v35  ;;  %v262_v58 = vld [vmem:[%s1182_s3 + $0x48] sm:$0xff]  ;;  %v261_v62 = vld [vmem:[%s1182_s3 + $0x40] sm:$0xff]  ;;  %v256_v3 = vld [vmem:[%s1182_s3 + $0x18] sm:$0xff] }
  0x27   : > { %681 = vmatprep.subr.mxu0 %v273_v9  ;;  %716 = vmatprep.subr.mxu1 %v273_v9  ;;  %v234_v43 = vmul.f32 0.1, %v202_v36  ;;  %v249_v45 = vsel %vm217_vm11, %v201_v25, %v233_v34  ;;  %vm218_vm13 = vcmp.ge.f32.partialorder %v202_v36, 0.0  ;;  %v227_v46 = vmul.f32 0.1, %v195_v37  ;;  %v264_v4 = vld [vmem:[%s1182_s3 + $0x58] sm:$0xff] }
  0x28   : > { %682 = vmatpush3.msra.mxu0 %v273_v9  ;;  %724 = vmatpush3.msra.mxu1 %v273_v9  ;;  %v235_v47 = vmul.f32 0.1, %v203_v38  ;;  %vm211_vm14 = vcmp.ge.f32.partialorder %v195_v37, 0.0  ;;  %vm219_vm15 = vcmp.ge.f32.partialorder %v203_v38, 0.0  ;;  %v242_v49 = vsel %vm210_vm12, %v194_v35, %v226_v42  ;;  %v255_v9 = vld [vmem:[%s1182_s3 + $0x10] sm:$0xff]  ;;  %v266_v16 = vld [vmem:[%s1182_s3 + $0x68] sm:$0xff] }
  0x29   : > { %683 = vmatprep.subr.mxu0 %v272_v11  ;;  %717 = vmatprep.subr.mxu1 %v272_v11  ;;  %v250_v50 = vsel %vm218_vm13, %v202_v36, %v234_v43  ;;  %v228_v51 = vmul.f32 0.1, %v196_v44  ;;  %v236_v52 = vmul.f32 0.1, %v204_v48  ;;  %v243_v53 = vsel %vm211_vm14, %v195_v37, %v227_v46  ;;  %v263_v10 = vld [vmem:[%s1182_s3 + $0x50] sm:$0xff]  ;;  %v257_v21 = vld [vmem:[%s1182_s3 + $0x20] sm:$0xff] }
  0x2a   : > { %684 = vmatpush3.msra.mxu0 %v272_v11  ;;  %725 = vmatpush3.msra.mxu1 %v272_v11  ;;  %v251_v54 = vsel %vm219_vm15, %v203_v38, %v235_v47  ;;  %vm212_vm0 = vcmp.ge.f32.partialorder %v196_v44, 0.0  ;;  %vm220_vm1 = vcmp.ge.f32.partialorder %v204_v48, 0.0  ;;  %v265_v22 = vld [vmem:[%s1182_s3 + $0x60] sm:$0xff]  ;;  %v268_v28 = vld [vmem:[%s1182_s3 + $0x78] sm:$0xff]  ;;  %v267_v34 = vld [vmem:[%s1182_s3 + $0x70] sm:$0xff] }
  0x2b   : > { %685 = vmatprep.subr.mxu0 %v271_v15  ;;  %718 = vmatprep.subr.mxu1 %v271_v15  ;;  %v244_v55 = vsel %vm212_vm0, %v196_v44, %v228_v51  ;;  %v252_v56 = vsel %vm220_vm1, %v204_v48, %v236_v52 }
  0x2c   : > { %686 = vmatpush3.msra.mxu0 %v271_v15  ;;  %726 = vmatpush3.msra.mxu1 %v271_v15  ;;  %v258_v15 = vld [vmem:[%s1182_s3 + $0x28] sm:$0xff] }
  0x2d   : > { %687 = vmatprep.mubr.msk.f32.mxu0 %vm279_vm5, %v237_v24  ;;  %699 = vmatprep.mubr.msk.f32.mxu1 %vm279_vm5, %v245_v26 }
  0x2e   : > { %688 = vmatmul.mubr.msk.f32.vlgmr.msra.gmra.mxu0 %vm279_vm5, %v238_v27  ;;  %700 = vmatmul.mubr.msk.f32.vlgmr.msra.gmra.mxu1 %vm279_vm5, %v246_v30  ;;  %v260_v27 = vld [vmem:[%s1182_s3 + $0x38] sm:$0xff] }
  0x2f   : > { %690 = vmatprep.mubr.msk.f32.mxu0 %vm279_vm5, %v239_v32  ;;  %702 = vmatprep.mubr.msk.f32.mxu1 %vm279_vm5, %v247_v33  ;;  %v259_v33 = vld [vmem:[%s1182_s3 + $0x30] sm:$0xff] }
  0x32   : > { %691 = vmatmul.mubr.msk.f32.gmra.mxu0 %vm279_vm5, %v240_v39  ;;  %703 = vmatmul.mubr.msk.f32.gmra.mxu1 %vm279_vm5, %v248_v40 }
  0x33   : > { %693 = vmatprep.mubr.msk.f32.mxu0 %vm279_vm5, %v241_v41  ;;  %705 = vmatprep.mubr.msk.f32.mxu1 %vm279_vm5, %v249_v45 }
  0x36   : > { %694 = vmatmul.mubr.msk.f32.gmra.mxu0 %vm279_vm5, %v242_v49  ;;  %706 = vmatmul.mubr.msk.f32.gmra.mxu1 %vm279_vm5, %v250_v50 }
  0x37   : > { %696 = vmatprep.mubr.msk.f32.mxu0 %vm279_vm5, %v243_v53  ;;  %708 = vmatprep.mubr.msk.f32.mxu1 %vm279_vm5, %v251_v54 }
  0x3a   : > { %697 = vmatmul.mubr.msk.f32.gmra.mxu0 %vm279_vm5, %v244_v55  ;;  %709 = vmatmul.mubr.msk.f32.gmra.mxu1 %vm279_vm5, %v252_v56 }
  0xee   : > { %v689_v59 = vpop.f32.mrf.mxu0  ;;  %v701_v60 = vpop.f32.mrf.mxu1 }
  0xef   : > { %v474_v63 = vadd.f32 %v689_v59, %v254_v57  ;;  %v482_v0 = vadd.f32 %v701_v60, %v262_v58 }
  0xf0   : > { %v394_v1 = vpop.f32.mrf.mxu0  ;;  %v434_v2 = vpop.f32.mrf.mxu1 }
  0xf1   : > { %490 = vst.msk [vmem:[%s1182_s3 + $0x8] sm:$0xff] %vm279_vm5, %v474_v63  ;;  %498 = vst.msk [vmem:[%s1182_s3 + $0x48] sm:$0xff] %vm279_vm5, %v482_v0  ;;  %v473_v5 = vadd.f32 %v394_v1, %v253_v61  ;;  %v481_v6 = vadd.f32 %v434_v2, %v261_v62 }
  0xf2   : > { %v692_v7 = vpop.f32.mrf.mxu0  ;;  %v704_v8 = vpop.f32.mrf.mxu1 }
  0xf3   : > { %489 = vst.msk [vmem:[%s1182_s3] sm:$0xff] %vm279_vm5, %v473_v5  ;;  %497 = vst.msk [vmem:[%s1182_s3 + $0x40] sm:$0xff] %vm279_vm5, %v481_v6  ;;  %v476_v11 = vadd.f32 %v692_v7, %v256_v3  ;;  %v484_v12 = vadd.f32 %v704_v8, %v264_v4 }
  0xf4   : > { %v404_v13 = vpop.f32.mrf.mxu0  ;;  %v444_v14 = vpop.f32.mrf.mxu1 }
  0xf5   : > { %492 = vst.msk [vmem:[%s1182_s3 + $0x18] sm:$0xff] %vm279_vm5, %v476_v11  ;;  %500 = vst.msk [vmem:[%s1182_s3 + $0x58] sm:$0xff] %vm279_vm5, %v484_v12  ;;  %v475_v17 = vadd.f32 %v404_v13, %v255_v9  ;;  %v483_v18 = vadd.f32 %v444_v14, %v263_v10 }
  0xf6   : > { %v695_v19 = vpop.f32.mrf.mxu0  ;;  %v707_v20 = vpop.f32.mrf.mxu1 }
  0xf7   : > { %491 = vst.msk [vmem:[%s1182_s3 + $0x10] sm:$0xff] %vm279_vm5, %v475_v17  ;;  %499 = vst.msk [vmem:[%s1182_s3 + $0x50] sm:$0xff] %vm279_vm5, %v483_v18  ;;  %v478_v23 = vadd.f32 %v695_v19, %v258_v15  ;;  %v486_v24 = vadd.f32 %v707_v20, %v266_v16 }
  0xf8   : > { %v414_v25 = vpop.f32.mrf.mxu0  ;;  %v454_v26 = vpop.f32.mrf.mxu1 }
  0xf9   : > { %494 = vst.msk [vmem:[%s1182_s3 + $0x28] sm:$0xff] %vm279_vm5, %v478_v23  ;;  %502 = vst.msk [vmem:[%s1182_s3 + $0x68] sm:$0xff] %vm279_vm5, %v486_v24  ;;  %v477_v29 = vadd.f32 %v414_v25, %v257_v21  ;;  %v485_v30 = vadd.f32 %v454_v26, %v265_v22 }
  0xfa   : > { %v698_v31 = vpop.f32.mrf.mxu0  ;;  %v710_v32 = vpop.f32.mrf.mxu1 }
  0xfb   : > { %493 = vst.msk [vmem:[%s1182_s3 + $0x20] sm:$0xff] %vm279_vm5, %v477_v29  ;;  %501 = vst.msk [vmem:[%s1182_s3 + $0x60] sm:$0xff] %vm279_vm5, %v485_v30  ;;  %v480_v35 = vadd.f32 %v698_v31, %v260_v27  ;;  %v488_v36 = vadd.f32 %v710_v32, %v268_v28  ;;  %508 = sbr.rel (%p641_p5) target bundleno = 268 (0x10c), region = 40 }
  0xfc   : > { %v424_v37 = vpop.f32.mrf.mxu0  ;;  %v464_v38 = vpop.f32.mrf.mxu1 }
  0xfd   : > { %496 = vst.msk [vmem:[%s1182_s3 + $0x38] sm:$0xff] %vm279_vm5, %v480_v35  ;;  %504 = vst.msk [vmem:[%s1182_s3 + $0x78] sm:$0xff] %vm279_vm5, %v488_v36  ;;  %v479_v39 = vadd.f32 %v424_v37, %v259_v33  ;;  %v487_v40 = vadd.f32 %v464_v38, %v267_v34 }
  0xff   : > { %495 = vst.msk [vmem:[%s1182_s3 + $0x30] sm:$0xff] %vm279_vm5, %v479_v39  ;;  %503 = vst.msk [vmem:[%s1182_s3 + $0x70] sm:$0xff] %vm279_vm5, %v487_v40 }
 0x100   : > { %v509_v41 = vld [vmem:[%s1182_s3] sm:$0xff]  ;;  %v510_v43 = vld [vmem:[%s1182_s3 + $0x8] sm:$0xff]  ;;  %v511_v46 = vld [vmem:[%s1182_s3 + $0x10] sm:$0xff] }
 0x101   : > { %v642_v42 = vld [vmem:[%s1181_s2] ss:$0 sm:$0xff]  ;;  %v512_v47 = vld [vmem:[%s1182_s3 + $0x18] sm:$0xff]  ;;  %v514_v52 = vld [vmem:[%s1182_s3 + $0x28] sm:$0xff] }
 0x102   : > { %v532_v44 = vadd.f32 %v642_v42, %v509_v41  ;;  %v533_v45 = vadd.f32 %v642_v42, %v510_v43  ;;  %v513_v48 = vld [vmem:[%s1182_s3 + $0x20] sm:$0xff]  ;;  %v534_v49 = vadd.f32 %v642_v42, %v511_v46  ;;  %v535_v50 = vadd.f32 %v642_v42, %v512_v47  ;;  %v518_v59 = vld [vmem:[%s1182_s3 + $0x48] sm:$0xff]  ;;  %v519_v60 = vld [vmem:[%s1182_s3 + $0x50] sm:$0xff] }
 0x103   : > { %v536_v51 = vadd.f32 %v642_v42, %v513_v48  ;;  %v537_v55 = vadd.f32 %v642_v42, %v514_v52  ;;  %v517_v58 = vld [vmem:[%s1182_s3 + $0x40] sm:$0xff]  ;;  %v541_v62 = vadd.f32 %v642_v42, %v518_v59  ;;  %v542_v63 = vadd.f32 %v642_v42, %v519_v60  ;;  %v520_v0 = vld [vmem:[%s1182_s3 + $0x58] sm:$0xff]  ;;  %v522_v2 = vld [vmem:[%s1182_s3 + $0x68] sm:$0xff] }
 0x104   : > { %v516_v54 = vld [vmem:[%s1182_s3 + $0x38] sm:$0xff]  ;;  %548 = vst.msk [vmem:[%s1182_s3] sm:$0xff] %vm279_vm5, %v532_v44  ;;  %549 = vst.msk [vmem:[%s1182_s3 + $0x8] sm:$0xff] %vm279_vm5, %v533_v45  ;;  %v540_v61 = vadd.f32 %v642_v42, %v517_v58  ;;  %v521_v1 = vld [vmem:[%s1182_s3 + $0x60] sm:$0xff]  ;;  %v543_v3 = vadd.f32 %v642_v42, %v520_v0  ;;  %v545_v5 = vadd.f32 %v642_v42, %v522_v2 }
 0x105   : > { %v539_v57 = vadd.f32 %v642_v42, %v516_v54  ;;  %550 = vst.msk [vmem:[%s1182_s3 + $0x10] sm:$0xff] %vm279_vm5, %v534_v49  ;;  %551 = vst.msk [vmem:[%s1182_s3 + $0x18] sm:$0xff] %vm279_vm5, %v535_v50  ;;  %v544_v4 = vadd.f32 %v642_v42, %v521_v1  ;;  %v524_v7 = vld [vmem:[%s1182_s3 + $0x78] sm:$0xff] }
 0x106   : > { %v515_v53 = vld [vmem:[%s1182_s3 + $0x30] sm:$0xff]  ;;  %552 = vst.msk [vmem:[%s1182_s3 + $0x20] sm:$0xff] %vm279_vm5, %v536_v51  ;;  %553 = vst.msk [vmem:[%s1182_s3 + $0x28] sm:$0xff] %vm279_vm5, %v537_v55  ;;  %v547_v9 = vadd.f32 %v642_v42, %v524_v7 }
 0x107   : > { %v538_v56 = vadd.f32 %v642_v42, %v515_v53  ;;  %555 = vst.msk [vmem:[%s1182_s3 + $0x38] sm:$0xff] %vm279_vm5, %v539_v57  ;;  %v523_v6 = vld [vmem:[%s1182_s3 + $0x70] sm:$0xff]  ;;  %556 = vst.msk [vmem:[%s1182_s3 + $0x40] sm:$0xff] %vm279_vm5, %v540_v61 }
 0x108   : > { %557 = vst.msk [vmem:[%s1182_s3 + $0x48] sm:$0xff] %vm279_vm5, %v541_v62  ;;  %558 = vst.msk [vmem:[%s1182_s3 + $0x50] sm:$0xff] %vm279_vm5, %v542_v63  ;;  %v546_v8 = vadd.f32 %v642_v42, %v523_v6 }
 0x109   : > { %554 = vst.msk [vmem:[%s1182_s3 + $0x30] sm:$0xff] %vm279_vm5, %v538_v56  ;;  %559 = vst.msk [vmem:[%s1182_s3 + $0x58] sm:$0xff] %vm279_vm5, %v543_v3 }
 0x10a   : > { %560 = vst.msk [vmem:[%s1182_s3 + $0x60] sm:$0xff] %vm279_vm5, %v544_v4  ;;  %561 = vst.msk [vmem:[%s1182_s3 + $0x68] sm:$0xff] %vm279_vm5, %v545_v5 }
 0x10b   : > { %562 = vst.msk [vmem:[%s1182_s3 + $0x70] sm:$0xff] %vm279_vm5, %v546_v8  ;;  %563 = vst.msk [vmem:[%s1182_s3 + $0x78] sm:$0xff] %vm279_vm5, %v547_v9 }
 0x10c PF: > { %s13_s14 = sadd.s32 1, %s774_s14   ;;  %s1183_s12 = smov %s770_s13 }
 0x10d   : > { %p10_p6 = scmp.ge.s32.totalorder %s13_s14, 7   ;;  %s1184_s13 = smov %s1186_s15 }
 0x10f   :  { %12 = sbr.rel (!%p10_p6) target bundleno = 2 (0x2), region = 69 }

// kernel: generator_forward.23
= control target key start
LH: loop header
LB: loop body
LE: loop exit
PB: predicated region body
PF: predicated region fallthrough
CT: control target
= control target key end

     0   :  { %s797_s12 = smov 0   ;;  %s799_s13 = smov 0   ;;  %s1179_s0 = inlined_call_operand.vmem [shape: f32[2,70,64], index: 0, kind: input, shape index: {}]   ;;  %s1180_s1 = inlined_call_operand.vmem [shape: f32[3,64,64], index: 1, kind: input, shape index: {}]   ;;  %s1181_s2 = inlined_call_operand.vmem [shape: f32[1,64], index: 2, kind: input, shape index: {}]   ;;  %s1182_s3 = inlined_call_operand.vmem [shape: f32[2,64,64], index: 3, kind: output, shape index: {}]  }
   0x1   :  { %s801_s14 = smov 0  }
   0x2 LB: > { %s22_s15 = sadd.s32 1, %s770_s13  ;;  %p622_p0 = scmp.ge.s32.totalorder %s774_s14, 1  ;;  %s774_s14 = sphi %s801_s14, %s13_s14   ;;  %s770_s13 = sphi %s799_s13, %s1184_s13   ;;  %s766_s12 = sphi %s797_s12, %s1183_s12  }
   0x3   : > { %p23_p1 = scmp.ge.s32.totalorder %s22_s15, 3  ;;  %p139_p2 = scmp.lt.s32.totalorder %s774_s14, 4 }
   0x5   : > { %s1186_s15 = smov (%p23_p1, %s22_s15), 0  ;;  %p140_p3 = pnand %p622_p0, %p139_p2 }
   0x6   : > { %p623_p4 = scmp.ne.s32.totalorder (!%p140_p3), %s766_s12, 0 }
   0x7   : > { %143 = sbr.rel (%p140_p3) target bundleno = 268 (0x10c), region = 32 }
   0xc   : > { %167 = sbr.rel (%p623_p4) target bundleno = 26 (0x1a), region = 36 }
  0x11   : > { %vm168_vm0 = vcmask 523264   ;;  %v776_v0 = vmov 0.0  }
  0x12   : > { %169 = vst.msk [vmem:[%s1182_s3] sm:$0xff] %vm168_vm0, %v776_v0  ;;  %170 = vst.msk [vmem:[%s1182_s3 + $0x8] sm:$0xff] %vm168_vm0, %v776_v0 }
  0x13   : > { %171 = vst.msk [vmem:[%s1182_s3 + $0x10] sm:$0xff] %vm168_vm0, %v776_v0  ;;  %172 = vst.msk [vmem:[%s1182_s3 + $0x18] sm:$0xff] %vm168_vm0, %v776_v0 }
  0x14   : > { %173 = vst.msk [vmem:[%s1182_s3 + $0x20] sm:$0xff] %vm168_vm0, %v776_v0  ;;  %174 = vst.msk [vmem:[%s1182_s3 + $0x28] sm:$0xff] %vm168_vm0, %v776_v0 }
  0x15   : > { %175 = vst.msk [vmem:[%s1182_s3 + $0x30] sm:$0xff] %vm168_vm0, %v776_v0  ;;  %176 = vst.msk [vmem:[%s1182_s3 + $0x38] sm:$0xff] %vm168_vm0, %v776_v0 }
  0x16   : > { %177 = vst.msk [vmem:[%s1182_s3 + $0x40] sm:$0xff] %vm168_vm0, %v776_v0  ;;  %178 = vst.msk [vmem:[%s1182_s3 + $0x48] sm:$0xff] %vm168_vm0, %v776_v0 }
  0x17   : > { %179 = vst.msk [vmem:[%s1182_s3 + $0x50] sm:$0xff] %vm168_vm0, %v776_v0  ;;  %180 = vst.msk [vmem:[%s1182_s3 + $0x58] sm:$0xff] %vm168_vm0, %v776_v0 }
  0x18   : > { %181 = vst.msk [vmem:[%s1182_s3 + $0x60] sm:$0xff] %vm168_vm0, %v776_v0  ;;  %182 = vst.msk [vmem:[%s1182_s3 + $0x68] sm:$0xff] %vm168_vm0, %v776_v0 }
  0x19   : > { %183 = vst.msk [vmem:[%s1182_s3 + $0x70] sm:$0xff] %vm168_vm0, %v776_v0  ;;  %184 = vst.msk [vmem:[%s1182_s3 + $0x78] sm:$0xff] %vm168_vm0, %v776_v0 }
  0x1a PF: > { %s624_s25 = sshll.u32 %s766_s12, 6  ;;  %s186_s29 = smul.u32 3, %s766_s12  ;;  %vm279_vm5 = vcmask 523264   ;;  %v254_v57 = vld [vmem:[%s1182_s3 + $0x8] sm:$0xff]  ;;  %v253_v61 = vld [vmem:[%s1182_s3] sm:$0xff] }
  0x1b   : > { %s886_s28 = scalar_lea.vmem %s1180_s1, %s624_s25  ;;  %p641_p5 = scmp.ne.s32.totalorder %s766_s12, 2 }
  0x1c   : > { %v278_v1 = vld [vmem:[%s886_s28 + $0x38] sm:$0xff]  ;;  %v277_v2 = vld [vmem:[%s886_s28 + $0x30] sm:$0xff]  ;;  %v276_v3 = vld [vmem:[%s886_s28 + $0x28] sm:$0xff]  ;;  %s895_s5 = scalar_lea.vmem %s1179_s0, %s186_s29 }
  0x1d   : > { %671 = vmatprep.subr.mxu0 %v278_v1  ;;  %711 = vmatprep.subr.mxu1 %v278_v1  ;;  %v275_v4 = vld [vmem:[%s886_s28 + $0x20] sm:$0xff]  ;;  %v274_v5 = vld [vmem:[%s886_s28 + $0x18] sm:$0xff]  ;;  %v197_v7 = vld [vmem:[%s895_s5 + $0x48] sm:$0xff] }
  0x1e   : > { %672 = vmatpush3.msra.mxu0 %v278_v1  ;;  %719 = vmatpush3.msra.mxu1 %v278_v1  ;;  %v189_v6 = vld [vmem:[%s895_s5] sm:$0xff]  ;;  %v190_v8 = vld [vmem:[%s895_s5 + $0x8] sm:$0xff]  ;;  %v273_v9 = vld [vmem:[%s886_s28 + $0x10] sm:$0xff]  ;;  %v229_v16 = vmul.f32 0.1, %v197_v7  ;;  %vm213_vm2 = vcmp.ge.f32.partialorder %v197_v7, 0.0 }
  0x1f   : > { %673 = vmatprep.subr.mxu0 %v277_v2  ;;  %712 = vmatprep.subr.mxu1 %v277_v2  ;;  %v198_v10 = vld [vmem:[%s895_s5 + $0x50] sm:$0xff]  ;;  %v272_v11 = vld [vmem:[%s886_s28 + $0x8] sm:$0xff]  ;;  %v221_v12 = vmul.f32 0.1, %v189_v6  ;;  %v199_v14 = vld [vmem:[%s895_s5 + $0x58] sm:$0xff]  ;;  %vm205_vm1 = vcmp.ge.f32.partialorder %v189_v6, 0.0 }
  0x20   : > { %674 = vmatpush3.msra.mxu0 %v277_v2  ;;  %720 = vmatpush3.msra.mxu1 %v277_v2  ;;  %v191_v13 = vld [vmem:[%s895_s5 + $0x10] sm:$0xff]  ;;  %v271_v15 = vld [vmem:[%s886_s28] sm:$0xff]  ;;  %v222_v17 = vmul.f32 0.1, %v190_v8  ;;  %vm206_vm3 = vcmp.ge.f32.partialorder %v190_v8, 0.0  ;;  %v192_v19 = vld [vmem:[%s895_s5 + $0x18] sm:$0xff]  ;;  %v245_v26 = vsel %vm213_vm2, %v197_v7, %v229_v16 }
  0x21   : > { %675 = vmatprep.subr.mxu0 %v276_v3  ;;  %713 = vmatprep.subr.mxu1 %v276_v3  ;;  %v230_v18 = vmul.f32 0.1, %v198_v10  ;;  %v200_v20 = vld [vmem:[%s895_s5 + $0x60] sm:$0xff]  ;;  %vm214_vm4 = vcmp.ge.f32.partialorder %v198_v10, 0.0  ;;  %v223_v21 = vmul.f32 0.1, %v191_v13  ;;  %v237_v24 = vsel %vm205_vm1, %v189_v6, %v221_v12 }
  0x22   : > { %676 = vmatpush3.msra.mxu0 %v276_v3  ;;  %721 = vmatpush3.msra.mxu1 %v276_v3  ;;  %v231_v22 = vmul.f32 0.1, %v199_v14  ;;  %v193_v23 = vld [vmem:[%s895_s5 + $0x20] sm:$0xff]  ;;  %vm207_vm6 = vcmp.ge.f32.partialorder %v191_v13, 0.0  ;;  %vm215_vm7 = vcmp.ge.f32.partialorder %v199_v14, 0.0  ;;  %v201_v25 = vld [vmem:[%s895_s5 + $0x68] sm:$0xff]  ;;  %v238_v27 = vsel %vm206_vm3, %v190_v8, %v222_v17 }
  0x23   : > { %677 = vmatprep.subr.mxu0 %v275_v4  ;;  %714 = vmatprep.subr.mxu1 %v275_v4  ;;  %v224_v28 = vmul.f32 0.1, %v192_v19  ;;  %v232_v29 = vmul.f32 0.1, %v200_v20  ;;  %v246_v30 = vsel %vm214_vm4, %v198_v10, %v230_v18  ;;  %vm208_vm8 = vcmp.ge.f32.partialorder %v192_v19, 0.0  ;;  %v194_v35 = vld [vmem:[%s895_s5 + $0x28] sm:$0xff] }
  0x24   : > { %678 = vmatpush3.msra.mxu0 %v275_v4  ;;  %722 = vmatpush3.msra.mxu1 %v275_v4  ;;  %vm216_vm9 = vcmp.ge.f32.partialorder %v200_v20, 0.0  ;;  %v225_v31 = vmul.f32 0.1, %v193_v23  ;;  %v239_v32 = vsel %vm207_vm6, %v191_v13, %v223_v21  ;;  %v247_v33 = vsel %vm215_vm7, %v199_v14, %v231_v22  ;;  %v202_v36 = vld [vmem:[%s895_s5 + $0x70] sm:$0xff]  ;;  %v203_v38 = vld [vmem:[%s895_s5 + $0x78] sm:$0xff]  ;;  %v204_v48 = vld [vmem:[%s895_s5 + $0x80] sm:$0xff] }
  0x25   : > { %679 = vmatprep.subr.mxu0 %v274_v5  ;;  %715 = vmatprep.subr.mxu1 %v274_v5  ;;  %vm209_vm10 = vcmp.ge.f32.partialorder %v193_v23, 0.0  ;;  %v233_v34 = vmul.f32 0.1, %v201_v25  ;;  %vm217_vm11 = vcmp.ge.f32.partialorder %v201_v25, 0.0  ;;  %v195_v37 = vld [vmem:[%s895_s5 + $0x30] sm:$0xff]  ;;  %v240_v39 = vsel %vm208_vm8, %v192_v19, %v224_v28  ;;  %v196_v44 = vld [vmem:[%s895_s5 + $0x38] sm:$0xff] }
  0x26   : > { %680 = vmatpush3.msra.mxu0 %v274_v5  ;;  %723 = vmatpush3.msra.mxu1 %v274_v5  ;;  %v248_v40 = vsel %vm216_vm9, %v200_v20, %v232_v29  ;;  %v241_v41 = vsel %vm209_vm10, %v193_v23, %v225_v31  ;;  %vm210_vm12 = vcmp.ge.f32.partialorder %v194_v35, 0.0  ;;  %v226_v42 = vmul.f32 0.1, %v194_v35  ;;  %v262_v58 = vld [vmem:[%s1182_s3 + $0x48] sm:$0xff]  ;;  %v261_v62 = vld [vmem:[%s1182_s3 + $0x40] sm:$0xff]  ;;  %v256_v3 = vld [vmem:[%s1182_s3 + $0x18] sm:$0xff] }
  0x27   : > { %681 = vmatprep.subr.mxu0 %v273_v9  ;;  %716 = vmatprep.subr.mxu1 %v273_v9  ;;  %v234_v43 = vmul.f32 0.1, %v202_v36  ;;  %v249_v45 = vsel %vm217_vm11, %v201_v25, %v233_v34  ;;  %vm218_vm13 = vcmp.ge.f32.partialorder %v202_v36, 0.0  ;;  %v227_v46 = vmul.f32 0.1, %v195_v37  ;;  %v264_v4 = vld [vmem:[%s1182_s3 + $0x58] sm:$0xff] }
  0x28   : > { %682 = vmatpush3.msra.mxu0 %v273_v9  ;;  %724 = vmatpush3.msra.mxu1 %v273_v9  ;;  %v235_v47 = vmul.f32 0.1, %v203_v38  ;;  %vm211_vm14 = vcmp.ge.f32.partialorder %v195_v37, 0.0  ;;  %vm219_vm15 = vcmp.ge.f32.partialorder %v203_v38, 0.0  ;;  %v242_v49 = vsel %vm210_vm12, %v194_v35, %v226_v42  ;;  %v255_v9 = vld [vmem:[%s1182_s3 + $0x10] sm:$0xff]  ;;  %v266_v16 = vld [vmem:[%s1182_s3 + $0x68] sm:$0xff] }
  0x29   : > { %683 = vmatprep.subr.mxu0 %v272_v11  ;;  %717 = vmatprep.subr.mxu1 %v272_v11  ;;  %v250_v50 = vsel %vm218_vm13, %v202_v36, %v234_v43  ;;  %v228_v51 = vmul.f32 0.1, %v196_v44  ;;  %v236_v52 = vmul.f32 0.1, %v204_v48  ;;  %v243_v53 = vsel %vm211_vm14, %v195_v37, %v227_v46  ;;  %v263_v10 = vld [vmem:[%s1182_s3 + $0x50] sm:$0xff]  ;;  %v257_v21 = vld [vmem:[%s1182_s3 + $0x20] sm:$0xff] }
  0x2a   : > { %684 = vmatpush3.msra.mxu0 %v272_v11  ;;  %725 = vmatpush3.msra.mxu1 %v272_v11  ;;  %v251_v54 = vsel %vm219_vm15, %v203_v38, %v235_v47  ;;  %vm212_vm0 = vcmp.ge.f32.partialorder %v196_v44, 0.0  ;;  %vm220_vm1 = vcmp.ge.f32.partialorder %v204_v48, 0.0  ;;  %v265_v22 = vld [vmem:[%s1182_s3 + $0x60] sm:$0xff]  ;;  %v268_v28 = vld [vmem:[%s1182_s3 + $0x78] sm:$0xff]  ;;  %v267_v34 = vld [vmem:[%s1182_s3 + $0x70] sm:$0xff] }
  0x2b   : > { %685 = vmatprep.subr.mxu0 %v271_v15  ;;  %718 = vmatprep.subr.mxu1 %v271_v15  ;;  %v244_v55 = vsel %vm212_vm0, %v196_v44, %v228_v51  ;;  %v252_v56 = vsel %vm220_vm1, %v204_v48, %v236_v52 }
  0x2c   : > { %686 = vmatpush3.msra.mxu0 %v271_v15  ;;  %726 = vmatpush3.msra.mxu1 %v271_v15  ;;  %v258_v15 = vld [vmem:[%s1182_s3 + $0x28] sm:$0xff] }
  0x2d   : > { %687 = vmatprep.mubr.msk.f32.mxu0 %vm279_vm5, %v237_v24  ;;  %699 = vmatprep.mubr.msk.f32.mxu1 %vm279_vm5, %v245_v26 }
  0x2e   : > { %688 = vmatmul.mubr.msk.f32.vlgmr.msra.gmra.mxu0 %vm279_vm5, %v238_v27  ;;  %700 = vmatmul.mubr.msk.f32.vlgmr.msra.gmra.mxu1 %vm279_vm5, %v246_v30  ;;  %v260_v27 = vld [vmem:[%s1182_s3 + $0x38] sm:$0xff] }
  0x2f   : > { %690 = vmatprep.mubr.msk.f32.mxu0 %vm279_vm5, %v239_v32  ;;  %702 = vmatprep.mubr.msk.f32.mxu1 %vm279_vm5, %v247_v33  ;;  %v259_v33 = vld [vmem:[%s1182_s3 + $0x30] sm:$0xff] }
  0x32   : > { %691 = vmatmul.mubr.msk.f32.gmra.mxu0 %vm279_vm5, %v240_v39  ;;  %703 = vmatmul.mubr.msk.f32.gmra.mxu1 %vm279_vm5, %v248_v40 }
  0x33   : > { %693 = vmatprep.mubr.msk.f32.mxu0 %vm279_vm5, %v241_v41  ;;  %705 = vmatprep.mubr.msk.f32.mxu1 %vm279_vm5, %v249_v45 }
  0x36   : > { %694 = vmatmul.mubr.msk.f32.gmra.mxu0 %vm279_vm5, %v242_v49  ;;  %706 = vmatmul.mubr.msk.f32.gmra.mxu1 %vm279_vm5, %v250_v50 }
  0x37   : > { %696 = vmatprep.mubr.msk.f32.mxu0 %vm279_vm5, %v243_v53  ;;  %708 = vmatprep.mubr.msk.f32.mxu1 %vm279_vm5, %v251_v54 }
  0x3a   : > { %697 = vmatmul.mubr.msk.f32.gmra.mxu0 %vm279_vm5, %v244_v55  ;;  %709 = vmatmul.mubr.msk.f32.gmra.mxu1 %vm279_vm5, %v252_v56 }
  0xee   : > { %v689_v59 = vpop.f32.mrf.mxu0  ;;  %v701_v60 = vpop.f32.mrf.mxu1 }
  0xef   : > { %v474_v63 = vadd.f32 %v689_v59, %v254_v57  ;;  %v482_v0 = vadd.f32 %v701_v60, %v262_v58 }
  0xf0   : > { %v394_v1 = vpop.f32.mrf.mxu0  ;;  %v434_v2 = vpop.f32.mrf.mxu1 }
  0xf1   : > { %490 = vst.msk [vmem:[%s1182_s3 + $0x8] sm:$0xff] %vm279_vm5, %v474_v63  ;;  %498 = vst.msk [vmem:[%s1182_s3 + $0x48] sm:$0xff] %vm279_vm5, %v482_v0  ;;  %v473_v5 = vadd.f32 %v394_v1, %v253_v61  ;;  %v481_v6 = vadd.f32 %v434_v2, %v261_v62 }
  0xf2   : > { %v692_v7 = vpop.f32.mrf.mxu0  ;;  %v704_v8 = vpop.f32.mrf.mxu1 }
  0xf3   : > { %489 = vst.msk [vmem:[%s1182_s3] sm:$0xff] %vm279_vm5, %v473_v5  ;;  %497 = vst.msk [vmem:[%s1182_s3 + $0x40] sm:$0xff] %vm279_vm5, %v481_v6  ;;  %v476_v11 = vadd.f32 %v692_v7, %v256_v3  ;;  %v484_v12 = vadd.f32 %v704_v8, %v264_v4 }
  0xf4   : > { %v404_v13 = vpop.f32.mrf.mxu0  ;;  %v444_v14 = vpop.f32.mrf.mxu1 }
  0xf5   : > { %492 = vst.msk [vmem:[%s1182_s3 + $0x18] sm:$0xff] %vm279_vm5, %v476_v11  ;;  %500 = vst.msk [vmem:[%s1182_s3 + $0x58] sm:$0xff] %vm279_vm5, %v484_v12  ;;  %v475_v17 = vadd.f32 %v404_v13, %v255_v9  ;;  %v483_v18 = vadd.f32 %v444_v14, %v263_v10 }
  0xf6   : > { %v695_v19 = vpop.f32.mrf.mxu0  ;;  %v707_v20 = vpop.f32.mrf.mxu1 }
  0xf7   : > { %491 = vst.msk [vmem:[%s1182_s3 + $0x10] sm:$0xff] %vm279_vm5, %v475_v17  ;;  %499 = vst.msk [vmem:[%s1182_s3 + $0x50] sm:$0xff] %vm279_vm5, %v483_v18  ;;  %v478_v23 = vadd.f32 %v695_v19, %v258_v15  ;;  %v486_v24 = vadd.f32 %v707_v20, %v266_v16 }
  0xf8   : > { %v414_v25 = vpop.f32.mrf.mxu0  ;;  %v454_v26 = vpop.f32.mrf.mxu1 }
  0xf9   : > { %494 = vst.msk [vmem:[%s1182_s3 + $0x28] sm:$0xff] %vm279_vm5, %v478_v23  ;;  %502 = vst.msk [vmem:[%s1182_s3 + $0x68] sm:$0xff] %vm279_vm5, %v486_v24  ;;  %v477_v29 = vadd.f32 %v414_v25, %v257_v21  ;;  %v485_v30 = vadd.f32 %v454_v26, %v265_v22 }
  0xfa   : > { %v698_v31 = vpop.f32.mrf.mxu0  ;;  %v710_v32 = vpop.f32.mrf.mxu1 }
  0xfb   : > { %493 = vst.msk [vmem:[%s1182_s3 + $0x20] sm:$0xff] %vm279_vm5, %v477_v29  ;;  %501 = vst.msk [vmem:[%s1182_s3 + $0x60] sm:$0xff] %vm279_vm5, %v485_v30  ;;  %v480_v35 = vadd.f32 %v698_v31, %v260_v27  ;;  %v488_v36 = vadd.f32 %v710_v32, %v268_v28  ;;  %508 = sbr.rel (%p641_p5) target bundleno = 268 (0x10c), region = 40 }
  0xfc   : > { %v424_v37 = vpop.f32.mrf.mxu0  ;;  %v464_v38 = vpop.f32.mrf.mxu1 }
  0xfd   : > { %496 = vst.msk [vmem:[%s1182_s3 + $0x38] sm:$0xff] %vm279_vm5, %v480_v35  ;;  %504 = vst.msk [vmem:[%s1182_s3 + $0x78] sm:$0xff] %vm279_vm5, %v488_v36  ;;  %v479_v39 = vadd.f32 %v424_v37, %v259_v33  ;;  %v487_v40 = vadd.f32 %v464_v38, %v267_v34 }
  0xff   : > { %495 = vst.msk [vmem:[%s1182_s3 + $0x30] sm:$0xff] %vm279_vm5, %v479_v39  ;;  %503 = vst.msk [vmem:[%s1182_s3 + $0x70] sm:$0xff] %vm279_vm5, %v487_v40 }
 0x100   : > { %v509_v41 = vld [vmem:[%s1182_s3] sm:$0xff]  ;;  %v510_v43 = vld [vmem:[%s1182_s3 + $0x8] sm:$0xff]  ;;  %v511_v46 = vld [vmem:[%s1182_s3 + $0x10] sm:$0xff] }
 0x101   : > { %v642_v42 = vld [vmem:[%s1181_s2] ss:$0 sm:$0xff]  ;;  %v512_v47 = vld [vmem:[%s1182_s3 + $0x18] sm:$0xff]  ;;  %v514_v52 = vld [vmem:[%s1182_s3 + $0x28] sm:$0xff] }
 0x102   : > { %v532_v44 = vadd.f32 %v642_v42, %v509_v41  ;;  %v533_v45 = vadd.f32 %v642_v42, %v510_v43  ;;  %v513_v48 = vld [vmem:[%s1182_s3 + $0x20] sm:$0xff]  ;;  %v534_v49 = vadd.f32 %v642_v42, %v511_v46  ;;  %v535_v50 = vadd.f32 %v642_v42, %v512_v47  ;;  %v518_v59 = vld [vmem:[%s1182_s3 + $0x48] sm:$0xff]  ;;  %v519_v60 = vld [vmem:[%s1182_s3 + $0x50] sm:$0xff] }
 0x103   : > { %v536_v51 = vadd.f32 %v642_v42, %v513_v48  ;;  %v537_v55 = vadd.f32 %v642_v42, %v514_v52  ;;  %v517_v58 = vld [vmem:[%s1182_s3 + $0x40] sm:$0xff]  ;;  %v541_v62 = vadd.f32 %v642_v42, %v518_v59  ;;  %v542_v63 = vadd.f32 %v642_v42, %v519_v60  ;;  %v520_v0 = vld [vmem:[%s1182_s3 + $0x58] sm:$0xff]  ;;  %v522_v2 = vld [vmem:[%s1182_s3 + $0x68] sm:$0xff] }
 0x104   : > { %v516_v54 = vld [vmem:[%s1182_s3 + $0x38] sm:$0xff]  ;;  %548 = vst.msk [vmem:[%s1182_s3] sm:$0xff] %vm279_vm5, %v532_v44  ;;  %549 = vst.msk [vmem:[%s1182_s3 + $0x8] sm:$0xff] %vm279_vm5, %v533_v45  ;;  %v540_v61 = vadd.f32 %v642_v42, %v517_v58  ;;  %v521_v1 = vld [vmem:[%s1182_s3 + $0x60] sm:$0xff]  ;;  %v543_v3 = vadd.f32 %v642_v42, %v520_v0  ;;  %v545_v5 = vadd.f32 %v642_v42, %v522_v2 }
 0x105   : > { %v539_v57 = vadd.f32 %v642_v42, %v516_v54  ;;  %550 = vst.msk [vmem:[%s1182_s3 + $0x10] sm:$0xff] %vm279_vm5, %v534_v49  ;;  %551 = vst.msk [vmem:[%s1182_s3 + $0x18] sm:$0xff] %vm279_vm5, %v535_v50  ;;  %v544_v4 = vadd.f32 %v642_v42, %v521_v1  ;;  %v524_v7 = vld [vmem:[%s1182_s3 + $0x78] sm:$0xff] }
 0x106   : > { %v515_v53 = vld [vmem:[%s1182_s3 + $0x30] sm:$0xff]  ;;  %552 = vst.msk [vmem:[%s1182_s3 + $0x20] sm:$0xff] %vm279_vm5, %v536_v51  ;;  %553 = vst.msk [vmem:[%s1182_s3 + $0x28] sm:$0xff] %vm279_vm5, %v537_v55  ;;  %v547_v9 = vadd.f32 %v642_v42, %v524_v7 }
 0x107   : > { %v538_v56 = vadd.f32 %v642_v42, %v515_v53  ;;  %555 = vst.msk [vmem:[%s1182_s3 + $0x38] sm:$0xff] %vm279_vm5, %v539_v57  ;;  %v523_v6 = vld [vmem:[%s1182_s3 + $0x70] sm:$0xff]  ;;  %556 = vst.msk [vmem:[%s1182_s3 + $0x40] sm:$0xff] %vm279_vm5, %v540_v61 }
 0x108   : > { %557 = vst.msk [vmem:[%s1182_s3 + $0x48] sm:$0xff] %vm279_vm5, %v541_v62  ;;  %558 = vst.msk [vmem:[%s1182_s3 + $0x50] sm:$0xff] %vm279_vm5, %v542_v63  ;;  %v546_v8 = vadd.f32 %v642_v42, %v523_v6 }
 0x109   : > { %554 = vst.msk [vmem:[%s1182_s3 + $0x30] sm:$0xff] %vm279_vm5, %v538_v56  ;;  %559 = vst.msk [vmem:[%s1182_s3 + $0x58] sm:$0xff] %vm279_vm5, %v543_v3 }
 0x10a   : > { %560 = vst.msk [vmem:[%s1182_s3 + $0x60] sm:$0xff] %vm279_vm5, %v544_v4  ;;  %561 = vst.msk [vmem:[%s1182_s3 + $0x68] sm:$0xff] %vm279_vm5, %v545_v5 }
 0x10b   : > { %562 = vst.msk [vmem:[%s1182_s3 + $0x70] sm:$0xff] %vm279_vm5, %v546_v8  ;;  %563 = vst.msk [vmem:[%s1182_s3 + $0x78] sm:$0xff] %vm279_vm5, %v547_v9 }
 0x10c PF: > { %s13_s14 = sadd.s32 1, %s774_s14   ;;  %s1183_s12 = smov %s770_s13 }
 0x10d   : > { %p10_p6 = scmp.ge.s32.totalorder %s13_s14, 5   ;;  %s1184_s13 = smov %s1186_s15 }
 0x10f   :  { %12 = sbr.rel (!%p10_p6) target bundleno = 2 (0x2), region = 69 }

// kernel: generator_forward.29
= control target key start
LH: loop header
LB: loop body
LE: loop exit
PB: predicated region body
PF: predicated region fallthrough
CT: control target
= control target key end

     0   :  { %s1876_s12 = smov 0   ;;  %s1878_s13 = smov 0   ;;  %s3348_s0 = inlined_call_operand.vmem [shape: f32[2,263,64], index: 0, kind: input, shape index: {}]   ;;  %s3349_s1 = inlined_call_operand.vmem [shape: f32[8,64,32], index: 1, kind: input, shape index: {}]   ;;  %s3350_s2 = inlined_call_operand.vmem [shape: f32[1,32], index: 2, kind: input, shape index: {}]   ;;  %s3351_s3 = inlined_call_operand.vmem [shape: f32[2,256,32], index: 3, kind: output, shape index: {}]  }
   0x1   :  { %s1880_s14 = smov 0  }
   0x2 LB: > { %s22_s15 = sadd.s32 1, %s1849_s13  ;;  %p1533_p0 = scmp.ge.s32.totalorder %s1853_s14, 1  ;;  %s1853_s14 = sphi %s1880_s14, %s13_s14   ;;  %s1849_s13 = sphi %s1878_s13, %s3353_s13   ;;  %s1845_s12 = sphi %s1876_s12, %s3352_s12  }
   0x3   : > { %p23_p1 = scmp.ge.s32.totalorder %s22_s15, 8  ;;  %p139_p2 = scmp.lt.s32.totalorder %s1853_s14, 9 }
   0x5   : > { %s3355_s15 = smov (%p23_p1, %s22_s15), 0  ;;  %p140_p3 = pnand %p1533_p0, %p139_p2 }
   0x6   : > { %p1534_p4 = scmp.ne.s32.totalorder (!%p140_p3), %s1845_s12, 0 }
   0x7   : > { %143 = sbr.rel (%p140_p3) target bundleno = 364 (0x16c), region = 32 }
   0xc   : > { %167 = sbr.rel (%p1534_p4) target bundleno = 50 (0x32), region = 36 }
  0x11   : > { %vm168_vm0 = vcmask 261120   ;;  %v1855_v0 = vmov 0.0  }
  0x12   : > { %169 = vst.msk [vmem:[%s3351_s3] sm:$0xff] %vm168_vm0, %v1855_v0  ;;  %170 = vst.msk [vmem:[%s3351_s3 + $0x8] sm:$0xff] %vm168_vm0, %v1855_v0 }
  0x13   : > { %171 = vst.msk [vmem:[%s3351_s3 + $0x10] sm:$0xff] %vm168_vm0, %v1855_v0  ;;  %172 = vst.msk [vmem:[%s3351_s3 + $0x18] sm:$0xff] %vm168_vm0, %v1855_v0 }
  0x14   : > { %173 = vst.msk [vmem:[%s3351_s3 + $0x20] sm:$0xff] %vm168_vm0, %v1855_v0  ;;  %174 = vst.msk [vmem:[%s3351_s3 + $0x28] sm:$0xff] %vm168_vm0, %v1855_v0 }
  0x15   : > { %175 = vst.msk [vmem:[%s3351_s3 + $0x30] sm:$0xff] %vm168_vm0, %v1855_v0  ;;  %176 = vst.msk [vmem:[%s3351_s3 + $0x38] sm:$0xff] %vm168_vm0, %v1855_v0 }
  0x16   : > { %177 = vst.msk [vmem:[%s3351_s3 + $0x40] sm:$0xff] %vm168_vm0, %v1855_v0  ;;  %178 = vst.msk [vmem:[%s3351_s3 + $0x48] sm:$0xff] %vm168_vm0, %v1855_v0 }
  0x17   : > { %179 = vst.msk [vmem:[%s3351_s3 + $0x50] sm:$0xff] %vm168_vm0, %v1855_v0  ;;  %180 = vst.msk [vmem:[%s3351_s3 + $0x58] sm:$0xff] %vm168_vm0, %v1855_v0 }
  0x18   : > { %181 = vst.msk [vmem:[%s3351_s3 + $0x60] sm:$0xff] %vm168_vm0, %v1855_v0  ;;  %182 = vst.msk [vmem:[%s3351_s3 + $0x68] sm:$0xff] %vm168_vm0, %v1855_v0 }
  0x19   : > { %183 = vst.msk [vmem:[%s3351_s3 + $0x70] sm:$0xff] %vm168_vm0, %v1855_v0  ;;  %184 = vst.msk [vmem:[%s3351_s3 + $0x78] sm:$0xff] %vm168_vm0, %v1855_v0 }
  0x1a   : > { %185 = vst.msk [vmem:[%s3351_s3 + $0x80] sm:$0xff] %vm168_vm0, %v1855_v0  ;;  %186 = vst.msk [vmem:[%s3351_s3 + $0x88] sm:$0xff] %vm168_vm0, %v1855_v0 }
  0x1b   : > { %187 = vst.msk [vmem:[%s3351_s3 + $0x90] sm:$0xff] %vm168_vm0, %v1855_v0  ;;  %188 = vst.msk [vmem:[%s3351_s3 + $0x98] sm:$0xff] %vm168_vm0, %v1855_v0 }
  0x1c   : > { %189 = vst.msk [vmem:[%s3351_s3 + $0xa0] sm:$0xff] %vm168_vm0, %v1855_v0  ;;  %190 = vst.msk [vmem:[%s3351_s3 + $0xa8] sm:$0xff] %vm168_vm0, %v1855_v0 }
  0x1d   : > { %191 = vst.msk [vmem:[%s3351_s3 + $0xb0] sm:$0xff] %vm168_vm0, %v1855_v0  ;;  %192 = vst.msk [vmem:[%s3351_s3 + $0xb8] sm:$0xff] %vm168_vm0, %v1855_v0 }
  0x1e   : > { %193 = vst.msk [vmem:[%s3351_s3 + $0xc0] sm:$0xff] %vm168_vm0, %v1855_v0  ;;  %194 = vst.msk [vmem:[%s3351_s3 + $0xc8] sm:$0xff] %vm168_vm0, %v1855_v0 }
  0x1f   : > { %195 = vst.msk [vmem:[%s3351_s3 + $0xd0] sm:$0xff] %vm168_vm0, %v1855_v0  ;;  %196 = vst.msk [vmem:[%s3351_s3 + $0xd8] sm:$0xff] %vm168_vm0, %v1855_v0 }
  0x20   : > { %197 = vst.msk [vmem:[%s3351_s3 + $0xe0] sm:$0xff] %vm168_vm0, %v1855_v0  ;;  %198 = vst.msk [vmem:[%s3351_s3 + $0xe8] sm:$0xff] %vm168_vm0, %v1855_v0 }
  0x21   : > { %199 = vst.msk [vmem:[%s3351_s3 + $0xf0] sm:$0xff] %vm168_vm0, %v1855_v0  ;;  %200 = vst.msk [vmem:[%s3351_s3 + $0xf8] sm:$0xff] %vm168_vm0, %v1855_v0 }
  0x22   : > { %201 = vst.msk [vmem:[%s3351_s3 + $0x100] sm:$0xff] %vm168_vm0, %v1855_v0  ;;  %202 = vst.msk [vmem:[%s3351_s3 + $0x108] sm:$0xff] %vm168_vm0, %v1855_v0 }
  0x23   : > { %203 = vst.msk [vmem:[%s3351_s3 + $0x110] sm:$0xff] %vm168_vm0, %v1855_v0  ;;  %204 = vst.msk [vmem:[%s3351_s3 + $0x118] sm:$0xff] %vm168_vm0, %v1855_v0 }
  0x24   : > { %205 = vst.msk [vmem:[%s3351_s3 + $0x120] sm:$0xff] %vm168_vm0, %v1855_v0  ;;  %206 = vst.msk [vmem:[%s3351_s3 + $0x128] sm:$0xff] %vm168_vm0, %v1855_v0 }
  0x25   : > { %207 = vst.msk [vmem:[%s3351_s3 + $0x130] sm:$0xff] %vm168_vm0, %v1855_v0  ;;  %208 = vst.msk [vmem:[%s3351_s3 + $0x138] sm:$0xff] %vm168_vm0, %v1855_v0 }
  0x26   : > { %209 = vst.msk [vmem:[%s3351_s3 + $0x140] sm:$0xff] %vm168_vm0, %v1855_v0  ;;  %210 = vst.msk [vmem:[%s3351_s3 + $0x148] sm:$0xff] %vm168_vm0, %v1855_v0 }
  0x27   : > { %211 = vst.msk [vmem:[%s3351_s3 + $0x150] sm:$0xff] %vm168_vm0, %v1855_v0  ;;  %212 = vst.msk [vmem:[%s3351_s3 + $0x158] sm:$0xff] %vm168_vm0, %v1855_v0 }
  0x28   : > { %213 = vst.msk [vmem:[%s3351_s3 + $0x160] sm:$0xff] %vm168_vm0, %v1855_v0  ;;  %214 = vst.msk [vmem:[%s3351_s3 + $0x168] sm:$0xff] %vm168_vm0, %v1855_v0 }
  0x29   : > { %215 = vst.msk [vmem:[%s3351_s3 + $0x170] sm:$0xff] %vm168_vm0, %v1855_v0  ;;  %216 = vst.msk [vmem:[%s3351_s3 + $0x178] sm:$0xff] %vm168_vm0, %v1855_v0 }
  0x2a   : > { %217 = vst.msk [vmem:[%s3351_s3 + $0x180] sm:$0xff] %vm168_vm0, %v1855_v0  ;;  %218 = vst.msk [vmem:[%s3351_s3 + $0x188] sm:$0xff] %vm168_vm0, %v1855_v0 }
  0x2b   : > { %219 = vst.msk [vmem:[%s3351_s3 + $0x190] sm:$0xff] %vm168_vm0, %v1855_v0  ;;  %220 = vst.msk [vmem:[%s3351_s3 + $0x198] sm:$0xff] %vm168_vm0, %v1855_v0 }
  0x2c   : > { %221 = vst.msk [vmem:[%s3351_s3 + $0x1a0] sm:$0xff] %vm168_vm0, %v1855_v0  ;;  %222 = vst.msk [vmem:[%s3351_s3 + $0x1a8] sm:$0xff] %vm168_vm0, %v1855_v0 }
  0x2d   : > { %223 = vst.msk [vmem:[%s3351_s3 + $0x1b0] sm:$0xff] %vm168_vm0, %v1855_v0  ;;  %224 = vst.msk [vmem:[%s3351_s3 + $0x1b8] sm:$0xff] %vm168_vm0, %v1855_v0 }
  0x2e   : > { %225 = vst.msk [vmem:[%s3351_s3 + $0x1c0] sm:$0xff] %vm168_vm0, %v1855_v0  ;;  %226 = vst.msk [vmem:[%s3351_s3 + $0x1c8] sm:$0xff] %vm168_vm0, %v1855_v0 }
  0x2f   : > { %227 = vst.msk [vmem:[%s3351_s3 + $0x1d0] sm:$0xff] %vm168_vm0, %v1855_v0  ;;  %228 = vst.msk [vmem:[%s3351_s3 + $0x1d8] sm:$0xff] %vm168_vm0, %v1855_v0 }
  0x30   : > { %229 = vst.msk [vmem:[%s3351_s3 + $0x1e0] sm:$0xff] %vm168_vm0, %v1855_v0  ;;  %230 = vst.msk [vmem:[%s3351_s3 + $0x1e8] sm:$0xff] %vm168_vm0, %v1855_v0 }
  0x31   : > { %231 = vst.msk [vmem:[%s3351_s3 + $0x1f0] sm:$0xff] %vm168_vm0, %v1855_v0  ;;  %232 = vst.msk [vmem:[%s3351_s3 + $0x1f8] sm:$0xff] %vm168_vm0, %v1855_v0 }
  0x32 PF: > { %s1535_s29 = sshll.u32 %s1845_s12, 6  ;;  %s2230_s8 = scalar_lea.vmem %s3348_s0, %s1845_s12  ;;  %vm566_vm5 = vcmask 523264  }
  0x33   : > { %s2221_s5 = scalar_lea.vmem %s3349_s1, %s1535_s29  ;;  %v236_v6 = vld [vmem:[%s2230_s8] sm:$0xff]  ;;  %v268_v7 = vld [vmem:[%s2230_s8 + $0x108] sm:$0xff]  ;;  %v269_v10 = vld [vmem:[%s2230_s8 + $0x110] sm:$0xff]  ;;  %p1600_p5 = scmp.ne.s32.totalorder %s1845_s12, 7 }
  0x34   : > { %v565_v1 = vld [vmem:[%s2221_s5 + $0x38] sm:$0xff]  ;;  %v564_v2 = vld [vmem:[%s2221_s5 + $0x30] sm:$0xff]  ;;  %v563_v3 = vld [vmem:[%s2221_s5 + $0x28] sm:$0xff]  ;;  %vm300_vm1 = vcmp.ge.f32.partialorder %v236_v6, 0.0  ;;  %v364_v11 = vmul.f32 0.1, %v236_v6 }
  0x35   : > { %1678 = vmatprep.subr.mxu0 %v565_v1  ;;  %1790 = vmatprep.subr.mxu1 %v565_v1  ;;  %v562_v4 = vld [vmem:[%s2221_s5 + $0x20] sm:$0xff]  ;;  %v561_v5 = vld [vmem:[%s2221_s5 + $0x18] sm:$0xff]  ;;  %v237_v8 = vld [vmem:[%s2230_s8 + $0x8] sm:$0xff]  ;;  %vm332_vm2 = vcmp.ge.f32.partialorder %v268_v7, 0.0  ;;  %v396_v15 = vmul.f32 0.1, %v268_v7 }
  0x36   : > { %1679 = vmatpush3.msra.mxu0 %v565_v1  ;;  %1798 = vmatpush3.msra.mxu1 %v565_v1  ;;  %v560_v9 = vld [vmem:[%s2221_s5 + $0x10] sm:$0xff]  ;;  %v270_v13 = vld [vmem:[%s2230_s8 + $0x118] sm:$0xff]  ;;  %v559_v14 = vld [vmem:[%s2221_s5 + $0x8] sm:$0xff]  ;;  %v365_v16 = vmul.f32 0.1, %v237_v8  ;;  %vm301_vm3 = vcmp.ge.f32.partialorder %v237_v8, 0.0  ;;  %v428_v24 = vsel %vm300_vm1, %v236_v6, %v364_v11 }
  0x37   : > { %1680 = vmatprep.subr.mxu0 %v564_v2  ;;  %1791 = vmatprep.subr.mxu1 %v564_v2  ;;  %v238_v12 = vld [vmem:[%s2230_s8 + $0x10] sm:$0xff]  ;;  %v558_v17 = vld [vmem:[%s2221_s5] sm:$0xff]  ;;  %v397_v18 = vmul.f32 0.1, %v269_v10  ;;  %v239_v19 = vld [vmem:[%s2230_s8 + $0x18] sm:$0xff]  ;;  %vm333_vm4 = vcmp.ge.f32.partialorder %v269_v10, 0.0  ;;  %v460_v26 = vsel %vm332_vm2, %v268_v7, %v396_v15 }
  0x38   : > { %1681 = vmatpush3.msra.mxu0 %v564_v2  ;;  %1799 = vmatpush3.msra.mxu1 %v564_v2  ;;  %v271_v20 = vld [vmem:[%s2230_s8 + $0x120] sm:$0xff]  ;;  %v366_v21 = vmul.f32 0.1, %v238_v12  ;;  %v398_v22 = vmul.f32 0.1, %v270_v13  ;;  %vm302_vm6 = vcmp.ge.f32.partialorder %v238_v12, 0.0  ;;  %v429_v27 = vsel %vm301_vm3, %v237_v8, %v365_v16 }
  0x39   : > { %1682 = vmatprep.subr.mxu0 %v563_v3  ;;  %1792 = vmatprep.subr.mxu1 %v563_v3  ;;  %v240_v23 = vld [vmem:[%s2230_s8 + $0x20] sm:$0xff]  ;;  %vm334_vm7 = vcmp.ge.f32.partialorder %v270_v13, 0.0  ;;  %v272_v25 = vld [vmem:[%s2230_s8 + $0x128] sm:$0xff]  ;;  %v367_v28 = vmul.f32 0.1, %v239_v19  ;;  %v461_v30 = vsel %vm333_vm4, %v269_v10, %v397_v18  ;;  %vm303_vm8 = vcmp.ge.f32.partialorder %v239_v19, 0.0 }
  0x3a   : > { %1683 = vmatpush3.msra.mxu0 %v563_v3  ;;  %1800 = vmatpush3.msra.mxu1 %v563_v3  ;;  %v399_v29 = vmul.f32 0.1, %v271_v20  ;;  %vm335_vm9 = vcmp.ge.f32.partialorder %v271_v20, 0.0  ;;  %v368_v31 = vmul.f32 0.1, %v240_v23  ;;  %v241_v32 = vld [vmem:[%s2230_s8 + $0x28] sm:$0xff]  ;;  %v430_v33 = vsel %vm302_vm6, %v238_v12, %v366_v21 }
  0x3b   : > { %1684 = vmatprep.subr.mxu0 %v562_v4  ;;  %1793 = vmatprep.subr.mxu1 %v562_v4  ;;  %v462_v34 = vsel %vm334_vm7, %v270_v13, %v398_v22  ;;  %vm304_vm10 = vcmp.ge.f32.partialorder %v240_v23, 0.0  ;;  %v400_v35 = vmul.f32 0.1, %v272_v25  ;;  %v273_v36 = vld [vmem:[%s2230_s8 + $0x130] sm:$0xff]  ;;  %vm336_vm11 = vcmp.ge.f32.partialorder %v272_v25, 0.0  ;;  %v274_v38 = vld [vmem:[%s2230_s8 + $0x138] sm:$0xff] }
  0x3c   : > { %1685 = vmatpush3.msra.mxu0 %v562_v4  ;;  %1801 = vmatpush3.msra.mxu1 %v562_v4  ;;  %v242_v37 = vld [vmem:[%s2230_s8 + $0x30] sm:$0xff]  ;;  %v431_v39 = vsel %vm303_vm8, %v239_v19, %v367_v28  ;;  %v463_v40 = vsel %vm335_vm9, %v271_v20, %v399_v29  ;;  %v369_v41 = vmul.f32 0.1, %v241_v32  ;;  %v432_v42 = vsel %vm304_vm10, %v240_v23, %v368_v31  ;;  %v243_v45 = vld [vmem:[%s2230_s8 + $0x38] sm:$0xff]  ;;  %v275_v48 = vld [vmem:[%s2230_s8 + $0x140] sm:$0xff] }
  0x3d   : > { %1686 = vmatprep.subr.mxu0 %v561_v5  ;;  %1794 = vmatprep.subr.mxu1 %v561_v5  ;;  %vm305_vm12 = vcmp.ge.f32.partialorder %v241_v32, 0.0  ;;  %v401_v43 = vmul.f32 0.1, %v273_v36  ;;  %v370_v44 = vmul.f32 0.1, %v242_v37  ;;  %v464_v46 = vsel %vm336_vm11, %v272_v25, %v400_v35  ;;  %v244_v49 = vld [vmem:[%s2230_s8 + $0x40] sm:$0xff] }
  0x3e   : > { %1687 = vmatpush3.msra.mxu0 %v561_v5  ;;  %1802 = vmatpush3.msra.mxu1 %v561_v5  ;;  %vm337_vm13 = vcmp.ge.f32.partialorder %v273_v36, 0.0  ;;  %vm306_vm14 = vcmp.ge.f32.partialorder %v242_v37, 0.0  ;;  %v402_v47 = vmul.f32 0.1, %v274_v38  ;;  %vm338_vm15 = vcmp.ge.f32.partialorder %v274_v38, 0.0  ;;  %v276_v50 = vld [vmem:[%s2230_s8 + $0x148] sm:$0xff] }
  0x3f   : > { %1688 = vmatprep.subr.mxu0 %v560_v9  ;;  %1795 = vmatprep.subr.mxu1 %v560_v9  ;;  %v433_v51 = vsel %vm305_vm12, %v241_v32, %v369_v41  ;;  %v371_v52 = vmul.f32 0.1, %v243_v45  ;;  %v465_v53 = vsel %vm337_vm13, %v273_v36, %v401_v43  ;;  %v434_v54 = vsel %vm306_vm14, %v242_v37, %v370_v44  ;;  %v245_v56 = vld [vmem:[%s2230_s8 + $0x48] sm:$0xff]  ;;  %v277_v57 = vld [vmem:[%s2230_s8 + $0x150] sm:$0xff]  ;;  %v278_v62 = vld [vmem:[%s2230_s8 + $0x158] sm:$0xff] }
  0x40   : > { %1689 = vmatpush3.msra.mxu0 %v560_v9  ;;  %1803 = vmatpush3.msra.mxu1 %v560_v9  ;;  %vm307_vm0 = vcmp.ge.f32.partialorder %v243_v45, 0.0  ;;  %v403_v55 = vmul.f32 0.1, %v275_v48  ;;  %v466_v58 = vsel %vm338_vm15, %v274_v38, %v402_v47  ;;  %vm339_vm1 = vcmp.ge.f32.partialorder %v275_v48, 0.0  ;;  %v246_v61 = vld [vmem:[%s2230_s8 + $0x50] sm:$0xff]  ;;  %v247_v4 = vld [vmem:[%s2230_s8 + $0x58] sm:$0xff] }
  0x41   : > { %1690 = vmatprep.subr.mxu0 %v559_v14  ;;  %1796 = vmatprep.subr.mxu1 %v559_v14  ;;  %v372_v59 = vmul.f32 0.1, %v244_v49  ;;  %v404_v60 = vmul.f32 0.1, %v276_v50  ;;  %vm308_vm2 = vcmp.ge.f32.partialorder %v244_v49, 0.0  ;;  %vm340_vm3 = vcmp.ge.f32.partialorder %v276_v50, 0.0 }
  0x42   : > { %1691 = vmatpush3.msra.mxu0 %v559_v14  ;;  %1804 = vmatpush3.msra.mxu1 %v559_v14  ;;  %v435_v63 = vsel %vm307_vm0, %v243_v45, %v371_v52  ;;  %v373_v0 = vmul.f32 0.1, %v245_v56  ;;  %v405_v1 = vmul.f32 0.1, %v277_v57  ;;  %v467_v2 = vsel %vm339_vm1, %v275_v48, %v403_v55  ;;  %v279_v8 = vld [vmem:[%s2230_s8 + $0x160] sm:$0xff]  ;;  %v280_v10 = vld [vmem:[%s2230_s8 + $0x168] sm:$0xff] }
  0x43   : > { %1692 = vmatprep.subr.mxu0 %v558_v17  ;;  %1797 = vmatprep.subr.mxu1 %v558_v17  ;;  %vm309_vm4 = vcmp.ge.f32.partialorder %v245_v56, 0.0  ;;  %vm341_vm6 = vcmp.ge.f32.partialorder %v277_v57, 0.0  ;;  %v374_v3 = vmul.f32 0.1, %v246_v61  ;;  %v436_v5 = vsel %vm308_vm2, %v244_v49, %v372_v59  ;;  %v248_v9 = vld [vmem:[%s2230_s8 + $0x60] sm:$0xff]  ;;  %v281_v20 = vld [vmem:[%s2230_s8 + $0x170] sm:$0xff] }
  0x44   : > { %1693 = vmatpush3.msra.mxu0 %v558_v17  ;;  %1805 = vmatpush3.msra.mxu1 %v558_v17  ;;  %v468_v6 = vsel %vm340_vm3, %v276_v50, %v404_v60  ;;  %vm310_vm7 = vcmp.ge.f32.partialorder %v246_v61, 0.0  ;;  %v406_v7 = vmul.f32 0.1, %v278_v62  ;;  %vm342_vm8 = vcmp.ge.f32.partialorder %v278_v62, 0.0  ;;  %v249_v17 = vld [vmem:[%s2230_s8 + $0x68] sm:$0xff]  ;;  %v250_v21 = vld [vmem:[%s2230_s8 + $0x70] sm:$0xff] }
  0x45   : > { %1694 = vmatprep.mubr.msk.f32.mxu0 %vm566_vm5, %v428_v24  ;;  %1742 = vmatprep.mubr.msk.f32.mxu1 %vm566_vm5, %v460_v26  ;;  %v437_v11 = vsel %vm309_vm4, %v245_v56, %v373_v0  ;;  %v469_v12 = vsel %vm341_vm6, %v277_v57, %v405_v1  ;;  %v375_v13 = vmul.f32 0.1, %v247_v4  ;;  %v438_v14 = vsel %vm310_vm7, %v246_v61, %v374_v3  ;;  %v282_v22 = vld [vmem:[%s2230_s8 + $0x178] sm:$0xff]  ;;  %v283_v29 = vld [vmem:[%s2230_s8 + $0x180] sm:$0xff]  ;;  %v285_v44 = vld [vmem:[%s2230_s8 + $0x190] sm:$0xff] }
  0x46   : > { %1695 = vmatmul.mubr.msk.f32.vlgmr.msra.gmra.mxu0 %vm566_vm5, %v429_v27  ;;  %1743 = vmatmul.mubr.msk.f32.vlgmr.msra.gmra.mxu1 %vm566_vm5, %v461_v30  ;;  %vm311_vm9 = vcmp.ge.f32.partialorder %v247_v4, 0.0  ;;  %v407_v15 = vmul.f32 0.1, %v279_v8  ;;  %v376_v16 = vmul.f32 0.1, %v248_v9  ;;  %v470_v18 = vsel %vm342_vm8, %v278_v62, %v406_v7  ;;  %v251_v28 = vld [vmem:[%s2230_s8 + $0x78] sm:$0xff] }
  0x47   : > { %1697 = vmatprep.mubr.msk.f32.mxu0 %vm566_vm5, %v430_v33  ;;  %1745 = vmatprep.mubr.msk.f32.mxu1 %vm566_vm5, %v462_v34  ;;  %vm343_vm10 = vcmp.ge.f32.partialorder %v279_v8, 0.0  ;;  %vm312_vm11 = vcmp.ge.f32.partialorder %v248_v9, 0.0  ;;  %v408_v19 = vmul.f32 0.1, %v280_v10  ;;  %vm344_vm12 = vcmp.ge.f32.partialorder %v280_v10, 0.0  ;;  %v252_v33 = vld [vmem:[%s2230_s8 + $0x80] sm:$0xff] }
  0x48   : > { %v439_v23 = vsel %vm311_vm9, %v247_v4, %v375_v13  ;;  %v377_v24 = vmul.f32 0.1, %v249_v17  ;;  %v471_v25 = vsel %vm343_vm10, %v279_v8, %v407_v15  ;;  %v440_v26 = vsel %vm312_vm11, %v248_v9, %v376_v16  ;;  %v284_v34 = vld [vmem:[%s2230_s8 + $0x188] sm:$0xff]  ;;  %v254_v45 = vld [vmem:[%s2230_s8 + $0x90] sm:$0xff]  ;;  %v287_v56 = vld [vmem:[%s2230_s8 + $0x1a0] sm:$0xff] }
  0x49   : > { %vm313_vm13 = vcmp.ge.f32.partialorder %v249_v17, 0.0  ;;  %v409_v27 = vmul.f32 0.1, %v281_v20  ;;  %v472_v30 = vsel %vm344_vm12, %v280_v10, %v408_v19  ;;  %vm345_vm14 = vcmp.ge.f32.partialorder %v281_v20, 0.0  ;;  %v256_v57 = vld [vmem:[%s2230_s8 + $0xa0] sm:$0xff]  ;;  %v257_v0 = vld [vmem:[%s2230_s8 + $0xa8] sm:$0xff] }
  0x4a   : > { %1698 = vmatmul.mubr.msk.f32.gmra.mxu0 %vm566_vm5, %v431_v39  ;;  %1746 = vmatmul.mubr.msk.f32.gmra.mxu1 %vm566_vm5, %v463_v40  ;;  %v378_v31 = vmul.f32 0.1, %v250_v21  ;;  %v410_v32 = vmul.f32 0.1, %v282_v22  ;;  %vm314_vm15 = vcmp.ge.f32.partialorder %v250_v21, 0.0  ;;  %vm346_vm0 = vcmp.ge.f32.partialorder %v282_v22, 0.0 }
  0x4b   : > { %1700 = vmatprep.mubr.msk.f32.mxu0 %vm566_vm5, %v432_v42  ;;  %1748 = vmatprep.mubr.msk.f32.mxu1 %vm566_vm5, %v464_v46  ;;  %v441_v35 = vsel %vm313_vm13, %v249_v17, %v377_v24  ;;  %v379_v36 = vmul.f32 0.1, %v251_v28  ;;  %v411_v37 = vmul.f32 0.1, %v283_v29  ;;  %v473_v38 = vsel %vm345_vm14, %v281_v20, %v409_v27  ;;  %v253_v40 = vld [vmem:[%s2230_s8 + $0x88] sm:$0xff]  ;;  %v286_v46 = vld [vmem:[%s2230_s8 + $0x198] sm:$0xff] }
  0x4c   : > { %vm315_vm1 = vcmp.ge.f32.partialorder %v251_v28, 0.0  ;;  %vm347_vm2 = vcmp.ge.f32.partialorder %v283_v29, 0.0  ;;  %v380_v39 = vmul.f32 0.1, %v252_v33  ;;  %v442_v41 = vsel %vm314_vm15, %v250_v21, %v378_v31  ;;  %v289_v1 = vld [vmem:[%s2230_s8 + $0x1b0] sm:$0xff]  ;;  %v291_v16 = vld [vmem:[%s2230_s8 + $0x1c0] sm:$0xff] }
  0x4d   : > { %v474_v42 = vsel %vm346_vm0, %v282_v22, %v410_v32  ;;  %vm316_vm3 = vcmp.ge.f32.partialorder %v252_v33, 0.0  ;;  %v412_v43 = vmul.f32 0.1, %v284_v34  ;;  %vm348_vm4 = vcmp.ge.f32.partialorder %v284_v34, 0.0  ;;  %v260_v17 = vld [vmem:[%s2230_s8 + $0xc0] sm:$0xff] }
  0x4e   : > { %1701 = vmatmul.mubr.msk.f32.gmra.mxu0 %vm566_vm5, %v433_v51  ;;  %1749 = vmatmul.mubr.msk.f32.gmra.mxu1 %vm566_vm5, %v465_v53  ;;  %v443_v47 = vsel %vm315_vm1, %v251_v28, %v379_v36  ;;  %v475_v48 = vsel %vm347_vm2, %v283_v29, %v411_v37  ;;  %v381_v49 = vmul.f32 0.1, %v253_v40  ;;  %v444_v50 = vsel %vm316_vm3, %v252_v33, %v380_v39  ;;  %v255_v53 = vld [vmem:[%s2230_s8 + $0x98] sm:$0xff]  ;;  %v293_v28 = vld [vmem:[%s2230_s8 + $0x1d0] sm:$0xff]  ;;  %v295_v37 = vld [vmem:[%s2230_s8 + $0x1e0] sm:$0xff] }
  0x4f   : > { %1703 = vmatprep.mubr.msk.f32.mxu0 %vm566_vm5, %v434_v54  ;;  %1751 = vmatprep.mubr.msk.f32.mxu1 %vm566_vm5, %v466_v58  ;;  %vm317_vm6 = vcmp.ge.f32.partialorder %v253_v40, 0.0  ;;  %v413_v51 = vmul.f32 0.1, %v285_v44  ;;  %v382_v52 = vmul.f32 0.1, %v254_v45  ;;  %v476_v54 = vsel %vm348_vm4, %v284_v34, %v412_v43  ;;  %v288_v58 = vld [vmem:[%s2230_s8 + $0x1a8] sm:$0xff] }
  0x50   : > { %vm349_vm7 = vcmp.ge.f32.partialorder %v285_v44, 0.0  ;;  %vm318_vm8 = vcmp.ge.f32.partialorder %v254_v45, 0.0  ;;  %v414_v55 = vmul.f32 0.1, %v286_v46  ;;  %vm350_vm9 = vcmp.ge.f32.partialorder %v286_v46, 0.0  ;;  %v262_v29 = vld [vmem:[%s2230_s8 + $0xd0] sm:$0xff] }
  0x51   : > { %v445_v59 = vsel %vm317_vm6, %v253_v40, %v381_v49  ;;  %v383_v60 = vmul.f32 0.1, %v255_v53  ;;  %v477_v61 = vsel %vm349_vm7, %v285_v44, %v413_v51  ;;  %v446_v62 = vsel %vm318_vm8, %v254_v45, %v382_v52  ;;  %v263_v36 = vld [vmem:[%s2230_s8 + $0xd8] sm:$0xff]  ;;  %v265_v51 = vld [vmem:[%s2230_s8 + $0xe8] sm:$0xff]  ;;  %v297_v52 = vld [vmem:[%s2230_s8 + $0x1f0] sm:$0xff] }
  0x52   : > { %1704 = vmatmul.mubr.msk.f32.gmra.mxu0 %vm566_vm5, %v435_v63  ;;  %1752 = vmatmul.mubr.msk.f32.gmra.mxu1 %vm566_vm5, %v467_v2  ;;  %vm319_vm10 = vcmp.ge.f32.partialorder %v255_v53, 0.0  ;;  %v415_v63 = vmul.f32 0.1, %v287_v56  ;;  %v478_v2 = vsel %vm350_vm9, %v286_v46, %v414_v55  ;;  %vm351_vm11 = vcmp.ge.f32.partialorder %v287_v56, 0.0 }
  0x53   : > { %1706 = vmatprep.mubr.msk.f32.mxu0 %vm566_vm5, %v436_v5  ;;  %1754 = vmatprep.mubr.msk.f32.mxu1 %vm566_vm5, %v468_v6  ;;  %v384_v3 = vmul.f32 0.1, %v256_v57  ;;  %v416_v4 = vmul.f32 0.1, %v288_v58  ;;  %v258_v5 = vld [vmem:[%s2230_s8 + $0xb0] sm:$0xff]  ;;  %vm320_vm12 = vcmp.ge.f32.partialorder %v256_v57, 0.0  ;;  %v447_v7 = vsel %vm319_vm10, %v255_v53, %v383_v60 }
  0x54   : > { %vm352_vm13 = vcmp.ge.f32.partialorder %v288_v58, 0.0  ;;  %v290_v6 = vld [vmem:[%s2230_s8 + $0x1b8] sm:$0xff]  ;;  %v385_v8 = vmul.f32 0.1, %v257_v0  ;;  %v417_v9 = vmul.f32 0.1, %v289_v1  ;;  %v479_v10 = vsel %vm351_vm11, %v287_v56, %v415_v63 }
  0x55   : > { %vm321_vm14 = vcmp.ge.f32.partialorder %v257_v0, 0.0  ;;  %vm353_vm15 = vcmp.ge.f32.partialorder %v289_v1, 0.0  ;;  %v448_v13 = vsel %vm320_vm12, %v256_v57, %v384_v3  ;;  %vm322_vm0 = vcmp.ge.f32.partialorder %v258_v5, 0.0  ;;  %v266_v53 = vld [vmem:[%s2230_s8 + $0xf0] sm:$0xff]  ;;  %v267_v60 = vld [vmem:[%s2230_s8 + $0xf8] sm:$0xff] }
  0x56   : > { %1707 = vmatmul.mubr.msk.f32.gmra.mxu0 %vm566_vm5, %v437_v11  ;;  %1755 = vmatmul.mubr.msk.f32.gmra.mxu1 %vm566_vm5, %v469_v12  ;;  %v386_v11 = vmul.f32 0.1, %v258_v5  ;;  %v259_v12 = vld [vmem:[%s2230_s8 + $0xb8] sm:$0xff]  ;;  %v418_v15 = vmul.f32 0.1, %v290_v6  ;;  %vm354_vm1 = vcmp.ge.f32.partialorder %v290_v6, 0.0  ;;  %v449_v19 = vsel %vm321_vm14, %v257_v0, %v385_v8 }
  0x57   : > { %1709 = vmatprep.mubr.msk.f32.mxu0 %vm566_vm5, %v438_v14  ;;  %1757 = vmatprep.mubr.msk.f32.mxu1 %vm566_vm5, %v470_v18  ;;  %v480_v14 = vsel %vm352_vm13, %v288_v58, %v416_v4  ;;  %v292_v18 = vld [vmem:[%s2230_s8 + $0x1c8] sm:$0xff]  ;;  %v481_v20 = vsel %vm353_vm15, %v289_v1, %v417_v9  ;;  %v387_v21 = vmul.f32 0.1, %v259_v12  ;;  %vm323_vm2 = vcmp.ge.f32.partialorder %v259_v12, 0.0  ;;  %v299_v0 = vld [vmem:[%s2230_s8 + $0x200] sm:$0xff] }
  0x58   : > { %v450_v22 = vsel %vm322_vm0, %v258_v5, %v386_v11  ;;  %v388_v24 = vmul.f32 0.1, %v260_v17  ;;  %vm355_vm3 = vcmp.ge.f32.partialorder %v291_v16, 0.0  ;;  %vm324_vm4 = vcmp.ge.f32.partialorder %v260_v17, 0.0  ;;  %v493_v9 = vld [vmem:[%s3351_s3 + $0x8] sm:$0xff] }
  0x59   : > { %v420_v27 = vmul.f32 0.1, %v292_v18  ;;  %vm356_vm6 = vcmp.ge.f32.partialorder %v292_v18, 0.0  ;;  %v451_v31 = vsel %vm323_vm2, %v259_v12, %v387_v21  ;;  %vm357_vm8 = vcmp.ge.f32.partialorder %v293_v28, 0.0 }
  0x5a   : > { %1710 = vmatmul.mubr.msk.f32.gmra.mxu0 %vm566_vm5, %v439_v23  ;;  %1758 = vmatmul.mubr.msk.f32.gmra.mxu1 %vm566_vm5, %v471_v25  ;;  %v419_v23 = vmul.f32 0.1, %v291_v16  ;;  %v261_v25 = vld [vmem:[%s2230_s8 + $0xc8] sm:$0xff]  ;;  %v452_v34 = vsel %vm324_vm4, %v260_v17, %v388_v24  ;;  %v390_v39 = vmul.f32 0.1, %v262_v29  ;;  %vm326_vm9 = vcmp.ge.f32.partialorder %v262_v29, 0.0 }
  0x5b   : > { %1712 = vmatprep.mubr.msk.f32.mxu0 %vm566_vm5, %v440_v26  ;;  %1760 = vmatprep.mubr.msk.f32.mxu1 %vm566_vm5, %v472_v30  ;;  %v482_v26 = vsel %vm354_vm1, %v290_v6, %v418_v15  ;;  %v294_v30 = vld [vmem:[%s2230_s8 + $0x1d8] sm:$0xff]  ;;  %v389_v32 = vmul.f32 0.1, %v261_v25  ;;  %vm325_vm7 = vcmp.ge.f32.partialorder %v261_v25, 0.0  ;;  %v391_v44 = vmul.f32 0.1, %v263_v36 }
  0x5c   : > { %v483_v33 = vsel %vm355_vm3, %v291_v16, %v419_v23  ;;  %v422_v40 = vmul.f32 0.1, %v294_v30  ;;  %vm358_vm10 = vcmp.ge.f32.partialorder %v294_v30, 0.0  ;;  %v423_v45 = vmul.f32 0.1, %v295_v37 }
  0x5d   : > { %v453_v43 = vsel %vm325_vm7, %v261_v25, %v389_v32  ;;  %vm327_vm11 = vcmp.ge.f32.partialorder %v263_v36, 0.0  ;;  %vm359_vm12 = vcmp.ge.f32.partialorder %v295_v37, 0.0  ;;  %vm329_vm15 = vcmp.ge.f32.partialorder %v265_v51, 0.0  ;;  %v494_v25 = vld [vmem:[%s3351_s3 + $0x10] sm:$0xff]  ;;  %v529_v32 = vld [vmem:[%s3351_s3 + $0x128] sm:$0xff] }
  0x5e   : > { %1713 = vmatmul.mubr.msk.f32.gmra.mxu0 %vm566_vm5, %v441_v35  ;;  %1761 = vmatmul.mubr.msk.f32.gmra.mxu1 %vm566_vm5, %v473_v38  ;;  %v421_v35 = vmul.f32 0.1, %v293_v28  ;;  %v484_v38 = vsel %vm356_vm6, %v292_v18, %v420_v27  ;;  %v486_v49 = vsel %vm358_vm10, %v294_v30, %v422_v40  ;;  %v455_v55 = vsel %vm327_vm11, %v263_v36, %v391_v44  ;;  %v531_v44 = vld [vmem:[%s3351_s3 + $0x138] sm:$0xff] }
  0x5f   : > { %1715 = vmatprep.mubr.msk.f32.mxu0 %vm566_vm5, %v442_v41  ;;  %1763 = vmatprep.mubr.msk.f32.mxu1 %vm566_vm5, %v474_v42  ;;  %v264_v41 = vld [vmem:[%s2230_s8 + $0xe0] sm:$0xff]  ;;  %v296_v42 = vld [vmem:[%s2230_s8 + $0x1e8] sm:$0xff]  ;;  %v487_v56 = vsel %vm359_vm12, %v295_v37, %v423_v45  ;;  %v393_v58 = vmul.f32 0.1, %v265_v51  ;;  %vm361_vm0 = vcmp.ge.f32.partialorder %v297_v52, 0.0  ;;  %vm330_vm1 = vcmp.ge.f32.partialorder %v266_v53, 0.0 }
  0x60   : > { %v485_v46 = vsel %vm357_vm8, %v293_v28, %v421_v35  ;;  %vm328_vm13 = vcmp.ge.f32.partialorder %v264_v41, 0.0  ;;  %vm360_vm14 = vcmp.ge.f32.partialorder %v296_v42, 0.0  ;;  %v395_v3 = vmul.f32 0.1, %v267_v60  ;;  %v496_v37 = vld [vmem:[%s3351_s3 + $0x20] sm:$0xff] }
  0x61   : > { %v457_v1 = vsel %vm329_vm15, %v265_v51, %v393_v58  ;;  %v427_v4 = vmul.f32 0.1, %v299_v0  ;;  %vm331_vm3 = vcmp.ge.f32.partialorder %v267_v60, 0.0  ;;  %vm363_vm4 = vcmp.ge.f32.partialorder %v299_v0, 0.0 }
  0x62   : > { %1716 = vmatmul.mubr.msk.f32.gmra.mxu0 %vm566_vm5, %v443_v47  ;;  %1764 = vmatmul.mubr.msk.f32.gmra.mxu1 %vm566_vm5, %v475_v48  ;;  %v392_v47 = vmul.f32 0.1, %v264_v41  ;;  %v454_v48 = vsel %vm326_vm9, %v262_v29, %v390_v39  ;;  %vm1208_vm6 = vcmask 261120  }
  0x63   : > { %1718 = vmatprep.mubr.msk.f32.mxu0 %vm566_vm5, %v444_v50  ;;  %1766 = vmatprep.mubr.msk.f32.mxu1 %vm566_vm5, %v476_v54  ;;  %v424_v50 = vmul.f32 0.1, %v296_v42  ;;  %v298_v54 = vld [vmem:[%s2230_s8 + $0x1f8] sm:$0xff]  ;;  %v491_v8 = vsel %vm363_vm4, %v299_v0, %v427_v4 }
  0x64   : > { %v456_v57 = vsel %vm328_vm13, %v264_v41, %v392_v47  ;;  %v426_v63 = vmul.f32 0.1, %v298_v54  ;;  %vm362_vm2 = vcmp.ge.f32.partialorder %v298_v54, 0.0  ;;  %v535_v4 = vld [vmem:[%s3351_s3 + $0x158] sm:$0xff] }
  0x66   : > { %1719 = vmatmul.mubr.msk.f32.gmra.mxu0 %vm566_vm5, %v445_v59  ;;  %1767 = vmatmul.mubr.msk.f32.gmra.mxu1 %vm566_vm5, %v477_v61  ;;  %v425_v59 = vmul.f32 0.1, %v297_v52  ;;  %v488_v61 = vsel %vm360_vm14, %v296_v42, %v424_v50  ;;  %v490_v6 = vsel %vm362_vm2, %v298_v54, %v426_v63  ;;  %v530_v50 = vld [vmem:[%s3351_s3 + $0x130] sm:$0xff] }
  0x67   : > { %1721 = vmatprep.mubr.msk.f32.mxu0 %vm566_vm5, %v446_v62  ;;  %1769 = vmatprep.mubr.msk.f32.mxu1 %vm566_vm5, %v478_v2  ;;  %v394_v62 = vmul.f32 0.1, %v266_v53 }
  0x68   : > { %v489_v2 = vsel %vm361_vm0, %v297_v52, %v425_v59 }
  0x69   : > { %v458_v5 = vsel %vm330_vm1, %v266_v53, %v394_v62  ;;  %v532_v62 = vld [vmem:[%s3351_s3 + $0x140] sm:$0xff] }
  0x6a   : > { %1722 = vmatmul.mubr.msk.f32.gmra.mxu0 %vm566_vm5, %v447_v7  ;;  %1770 = vmatmul.mubr.msk.f32.gmra.mxu1 %vm566_vm5, %v479_v10  ;;  %v459_v7 = vsel %vm331_vm3, %v267_v60, %v395_v3  ;;  %v525_v10 = vld [vmem:[%s3351_s3 + $0x108] sm:$0xff]  ;;  %v503_v3 = vld [vmem:[%s3351_s3 + $0x58] sm:$0xff] }
  0x6b   : > { %1724 = vmatprep.mubr.msk.f32.mxu0 %vm566_vm5, %v448_v13  ;;  %1772 = vmatprep.mubr.msk.f32.mxu1 %vm566_vm5, %v480_v14  ;;  %v492_v13 = vld [vmem:[%s3351_s3] sm:$0xff] }
  0x6c   : > { %v524_v14 = vld [vmem:[%s3351_s3 + $0x100] sm:$0xff] }
  0x6e   : > { %1725 = vmatmul.mubr.msk.f32.gmra.mxu0 %vm566_vm5, %v449_v19  ;;  %1773 = vmatmul.mubr.msk.f32.gmra.mxu1 %vm566_vm5, %v481_v20  ;;  %v495_v19 = vld [vmem:[%s3351_s3 + $0x18] sm:$0xff] }
  0x6f   : > { %1727 = vmatprep.mubr.msk.f32.mxu0 %vm566_vm5, %v450_v22  ;;  %1775 = vmatprep.mubr.msk.f32.mxu1 %vm566_vm5, %v482_v26  ;;  %v527_v20 = vld [vmem:[%s3351_s3 + $0x118] sm:$0xff]  ;;  %v526_v26 = vld [vmem:[%s3351_s3 + $0x110] sm:$0xff] }
  0x72   : > { %1728 = vmatmul.mubr.msk.f32.gmra.mxu0 %vm566_vm5, %v451_v31  ;;  %1776 = vmatmul.mubr.msk.f32.gmra.mxu1 %vm566_vm5, %v483_v33  ;;  %v497_v31 = vld [vmem:[%s3351_s3 + $0x28] sm:$0xff] }
  0x73   : > { %1730 = vmatprep.mubr.msk.f32.mxu0 %vm566_vm5, %v452_v34  ;;  %1778 = vmatprep.mubr.msk.f32.mxu1 %vm566_vm5, %v484_v38  ;;  %v528_v38 = vld [vmem:[%s3351_s3 + $0x120] sm:$0xff] }
  0x76   : > { %1731 = vmatmul.mubr.msk.f32.gmra.mxu0 %vm566_vm5, %v453_v43  ;;  %1779 = vmatmul.mubr.msk.f32.gmra.mxu1 %vm566_vm5, %v485_v46  ;;  %v499_v43 = vld [vmem:[%s3351_s3 + $0x38] sm:$0xff] }
  0x77   : > { %1733 = vmatprep.mubr.msk.f32.mxu0 %vm566_vm5, %v454_v48  ;;  %1781 = vmatprep.mubr.msk.f32.mxu1 %vm566_vm5, %v486_v49  ;;  %v498_v49 = vld [vmem:[%s3351_s3 + $0x30] sm:$0xff] }
  0x7a   : > { %1734 = vmatmul.mubr.msk.f32.gmra.mxu0 %vm566_vm5, %v455_v55  ;;  %1782 = vmatmul.mubr.msk.f32.gmra.mxu1 %vm566_vm5, %v487_v56  ;;  %v501_v55 = vld [vmem:[%s3351_s3 + $0x48] sm:$0xff] }
  0x7b   : > { %1736 = vmatprep.mubr.msk.f32.mxu0 %vm566_vm5, %v456_v57  ;;  %1784 = vmatprep.mubr.msk.f32.mxu1 %vm566_vm5, %v488_v61  ;;  %v533_v56 = vld [vmem:[%s3351_s3 + $0x148] sm:$0xff]  ;;  %v500_v61 = vld [vmem:[%s3351_s3 + $0x40] sm:$0xff] }
  0x7e   : > { %1737 = vmatmul.mubr.msk.f32.gmra.mxu0 %vm566_vm5, %v457_v1  ;;  %1785 = vmatmul.mubr.msk.f32.gmra.mxu1 %vm566_vm5, %v489_v2 }
  0x7f   : > { %1739 = vmatprep.mubr.msk.f32.mxu0 %vm566_vm5, %v458_v5  ;;  %1787 = vmatprep.mubr.msk.f32.mxu1 %vm566_vm5, %v490_v6 }
  0x82   : > { %1740 = vmatmul.mubr.msk.f32.gmra.mxu0 %vm566_vm5, %v459_v7  ;;  %1788 = vmatmul.mubr.msk.f32.gmra.mxu1 %vm566_vm5, %v491_v8 }
 0x106   : > { %v1696_v11 = vpop.f32.mrf.mxu0  ;;  %v1744_v12 = vpop.f32.mrf.mxu1 }
 0x107   : > { %v1145_v15 = vadd.f32 %v1696_v11, %v493_v9  ;;  %v1177_v16 = vadd.f32 %v1744_v12, %v525_v10  ;;  %v502_v9 = vld [vmem:[%s3351_s3 + $0x50] sm:$0xff] }
 0x108   : > { %v825_v17 = vpop.f32.mrf.mxu0  ;;  %v985_v18 = vpop.f32.mrf.mxu1  ;;  %v534_v10 = vld [vmem:[%s3351_s3 + $0x150] sm:$0xff] }
 0x109   : > { %1210 = vst.msk [vmem:[%s3351_s3 + $0x8] sm:$0xff] %vm1208_vm6, %v1145_v15  ;;  %1242 = vst.msk [vmem:[%s3351_s3 + $0x108] sm:$0xff] %vm1208_vm6, %v1177_v16  ;;  %v1144_v21 = vadd.f32 %v825_v17, %v492_v13  ;;  %v1176_v22 = vadd.f32 %v985_v18, %v524_v14  ;;  %v505_v15 = vld [vmem:[%s3351_s3 + $0x68] sm:$0xff] }
 0x10a   : > { %v1699_v23 = vpop.f32.mrf.mxu0  ;;  %v1747_v24 = vpop.f32.mrf.mxu1  ;;  %v537_v16 = vld [vmem:[%s3351_s3 + $0x168] sm:$0xff] }
 0x10b   : > { %1209 = vst.msk [vmem:[%s3351_s3] sm:$0xff] %vm1208_vm6, %v1144_v21  ;;  %1241 = vst.msk [vmem:[%s3351_s3 + $0x100] sm:$0xff] %vm1208_vm6, %v1176_v22  ;;  %v1147_v27 = vadd.f32 %v1699_v23, %v495_v19  ;;  %v1179_v28 = vadd.f32 %v1747_v24, %v527_v20  ;;  %v504_v21 = vld [vmem:[%s3351_s3 + $0x60] sm:$0xff] }
 0x10c   : > { %v835_v29 = vpop.f32.mrf.mxu0  ;;  %v995_v30 = vpop.f32.mrf.mxu1  ;;  %v536_v22 = vld [vmem:[%s3351_s3 + $0x160] sm:$0xff] }
 0x10d   : > { %1212 = vst.msk [vmem:[%s3351_s3 + $0x18] sm:$0xff] %vm1208_vm6, %v1147_v27  ;;  %1244 = vst.msk [vmem:[%s3351_s3 + $0x118] sm:$0xff] %vm1208_vm6, %v1179_v28  ;;  %v1146_v33 = vadd.f32 %v835_v29, %v494_v25  ;;  %v1178_v34 = vadd.f32 %v995_v30, %v526_v26  ;;  %v507_v27 = vld [vmem:[%s3351_s3 + $0x78] sm:$0xff] }
 0x10e   : > { %v1702_v35 = vpop.f32.mrf.mxu0  ;;  %v1750_v36 = vpop.f32.mrf.mxu1  ;;  %v539_v28 = vld [vmem:[%s3351_s3 + $0x178] sm:$0xff] }
 0x10f   : > { %1211 = vst.msk [vmem:[%s3351_s3 + $0x10] sm:$0xff] %vm1208_vm6, %v1146_v33  ;;  %1243 = vst.msk [vmem:[%s3351_s3 + $0x110] sm:$0xff] %vm1208_vm6, %v1178_v34  ;;  %v1149_v39 = vadd.f32 %v1702_v35, %v497_v31  ;;  %v1181_v40 = vadd.f32 %v1750_v36, %v529_v32  ;;  %v506_v33 = vld [vmem:[%s3351_s3 + $0x70] sm:$0xff] }
 0x110   : > { %v845_v41 = vpop.f32.mrf.mxu0  ;;  %v1005_v42 = vpop.f32.mrf.mxu1  ;;  %v538_v34 = vld [vmem:[%s3351_s3 + $0x170] sm:$0xff] }
 0x111   : > { %1214 = vst.msk [vmem:[%s3351_s3 + $0x28] sm:$0xff] %vm1208_vm6, %v1149_v39  ;;  %1246 = vst.msk [vmem:[%s3351_s3 + $0x128] sm:$0xff] %vm1208_vm6, %v1181_v40  ;;  %v1148_v45 = vadd.f32 %v845_v41, %v496_v37  ;;  %v1180_v46 = vadd.f32 %v1005_v42, %v528_v38  ;;  %v509_v39 = vld [vmem:[%s3351_s3 + $0x88] sm:$0xff] }
 0x112   : > { %v1705_v47 = vpop.f32.mrf.mxu0  ;;  %v1753_v48 = vpop.f32.mrf.mxu1  ;;  %v541_v40 = vld [vmem:[%s3351_s3 + $0x188] sm:$0xff] }
 0x113   : > { %1213 = vst.msk [vmem:[%s3351_s3 + $0x20] sm:$0xff] %vm1208_vm6, %v1148_v45  ;;  %1245 = vst.msk [vmem:[%s3351_s3 + $0x120] sm:$0xff] %vm1208_vm6, %v1180_v46  ;;  %v1151_v51 = vadd.f32 %v1705_v47, %v499_v43  ;;  %v1183_v52 = vadd.f32 %v1753_v48, %v531_v44  ;;  %v508_v45 = vld [vmem:[%s3351_s3 + $0x80] sm:$0xff] }
 0x114   : > { %v855_v53 = vpop.f32.mrf.mxu0  ;;  %v1015_v54 = vpop.f32.mrf.mxu1  ;;  %v540_v46 = vld [vmem:[%s3351_s3 + $0x180] sm:$0xff] }
 0x115   : > { %1216 = vst.msk [vmem:[%s3351_s3 + $0x38] sm:$0xff] %vm1208_vm6, %v1151_v51  ;;  %1248 = vst.msk [vmem:[%s3351_s3 + $0x138] sm:$0xff] %vm1208_vm6, %v1183_v52  ;;  %v1150_v57 = vadd.f32 %v855_v53, %v498_v49  ;;  %v1182_v58 = vadd.f32 %v1015_v54, %v530_v50  ;;  %v511_v51 = vld [vmem:[%s3351_s3 + $0x98] sm:$0xff] }
 0x116   : > { %v1708_v59 = vpop.f32.mrf.mxu0  ;;  %v1756_v60 = vpop.f32.mrf.mxu1  ;;  %v543_v52 = vld [vmem:[%s3351_s3 + $0x198] sm:$0xff] }
 0x117   : > { %1215 = vst.msk [vmem:[%s3351_s3 + $0x30] sm:$0xff] %vm1208_vm6, %v1150_v57  ;;  %1247 = vst.msk [vmem:[%s3351_s3 + $0x130] sm:$0xff] %vm1208_vm6, %v1182_v58  ;;  %v1153_v63 = vadd.f32 %v1708_v59, %v501_v55  ;;  %v1185_v0 = vadd.f32 %v1756_v60, %v533_v56  ;;  %v510_v57 = vld [vmem:[%s3351_s3 + $0x90] sm:$0xff] }
 0x118   : > { %v865_v1 = vpop.f32.mrf.mxu0  ;;  %v1025_v2 = vpop.f32.mrf.mxu1  ;;  %v542_v58 = vld [vmem:[%s3351_s3 + $0x190] sm:$0xff] }
 0x119   : > { %1218 = vst.msk [vmem:[%s3351_s3 + $0x48] sm:$0xff] %vm1208_vm6, %v1153_v63  ;;  %1250 = vst.msk [vmem:[%s3351_s3 + $0x148] sm:$0xff] %vm1208_vm6, %v1185_v0  ;;  %v1152_v5 = vadd.f32 %v865_v1, %v500_v61  ;;  %v1184_v6 = vadd.f32 %v1025_v2, %v532_v62  ;;  %v513_v63 = vld [vmem:[%s3351_s3 + $0xa8] sm:$0xff] }
 0x11a   : > { %v1711_v7 = vpop.f32.mrf.mxu0  ;;  %v1759_v8 = vpop.f32.mrf.mxu1  ;;  %v545_v0 = vld [vmem:[%s3351_s3 + $0x1a8] sm:$0xff] }
 0x11b   : > { %1217 = vst.msk [vmem:[%s3351_s3 + $0x40] sm:$0xff] %vm1208_vm6, %v1152_v5  ;;  %1249 = vst.msk [vmem:[%s3351_s3 + $0x140] sm:$0xff] %vm1208_vm6, %v1184_v6  ;;  %v1155_v11 = vadd.f32 %v1711_v7, %v503_v3  ;;  %v1187_v12 = vadd.f32 %v1759_v8, %v535_v4  ;;  %v512_v5 = vld [vmem:[%s3351_s3 + $0xa0] sm:$0xff] }
 0x11c   : > { %v875_v13 = vpop.f32.mrf.mxu0  ;;  %v1035_v14 = vpop.f32.mrf.mxu1  ;;  %v544_v6 = vld [vmem:[%s3351_s3 + $0x1a0] sm:$0xff] }
 0x11d   : > { %1220 = vst.msk [vmem:[%s3351_s3 + $0x58] sm:$0xff] %vm1208_vm6, %v1155_v11  ;;  %1252 = vst.msk [vmem:[%s3351_s3 + $0x158] sm:$0xff] %vm1208_vm6, %v1187_v12  ;;  %v1154_v17 = vadd.f32 %v875_v13, %v502_v9  ;;  %v1186_v18 = vadd.f32 %v1035_v14, %v534_v10  ;;  %v515_v11 = vld [vmem:[%s3351_s3 + $0xb8] sm:$0xff] }
 0x11e   : > { %v1714_v19 = vpop.f32.mrf.mxu0  ;;  %v1762_v20 = vpop.f32.mrf.mxu1  ;;  %v547_v12 = vld [vmem:[%s3351_s3 + $0x1b8] sm:$0xff] }
 0x11f   : > { %1219 = vst.msk [vmem:[%s3351_s3 + $0x50] sm:$0xff] %vm1208_vm6, %v1154_v17  ;;  %1251 = vst.msk [vmem:[%s3351_s3 + $0x150] sm:$0xff] %vm1208_vm6, %v1186_v18  ;;  %v1157_v23 = vadd.f32 %v1714_v19, %v505_v15  ;;  %v1189_v24 = vadd.f32 %v1762_v20, %v537_v16  ;;  %v514_v17 = vld [vmem:[%s3351_s3 + $0xb0] sm:$0xff] }
 0x120   : > { %v885_v25 = vpop.f32.mrf.mxu0  ;;  %v1045_v26 = vpop.f32.mrf.mxu1  ;;  %v546_v18 = vld [vmem:[%s3351_s3 + $0x1b0] sm:$0xff] }
 0x121   : > { %1222 = vst.msk [vmem:[%s3351_s3 + $0x68] sm:$0xff] %vm1208_vm6, %v1157_v23  ;;  %1254 = vst.msk [vmem:[%s3351_s3 + $0x168] sm:$0xff] %vm1208_vm6, %v1189_v24  ;;  %v1156_v29 = vadd.f32 %v885_v25, %v504_v21  ;;  %v1188_v30 = vadd.f32 %v1045_v26, %v536_v22  ;;  %v517_v23 = vld [vmem:[%s3351_s3 + $0xc8] sm:$0xff] }
 0x122   : > { %v1717_v31 = vpop.f32.mrf.mxu0  ;;  %v1765_v32 = vpop.f32.mrf.mxu1  ;;  %v549_v24 = vld [vmem:[%s3351_s3 + $0x1c8] sm:$0xff] }
 0x123   : > { %1221 = vst.msk [vmem:[%s3351_s3 + $0x60] sm:$0xff] %vm1208_vm6, %v1156_v29  ;;  %1253 = vst.msk [vmem:[%s3351_s3 + $0x160] sm:$0xff] %vm1208_vm6, %v1188_v30  ;;  %v1159_v35 = vadd.f32 %v1717_v31, %v507_v27  ;;  %v1191_v36 = vadd.f32 %v1765_v32, %v539_v28  ;;  %v516_v29 = vld [vmem:[%s3351_s3 + $0xc0] sm:$0xff] }
 0x124   : > { %v895_v37 = vpop.f32.mrf.mxu0  ;;  %v1055_v38 = vpop.f32.mrf.mxu1  ;;  %v548_v30 = vld [vmem:[%s3351_s3 + $0x1c0] sm:$0xff] }
 0x125   : > { %1224 = vst.msk [vmem:[%s3351_s3 + $0x78] sm:$0xff] %vm1208_vm6, %v1159_v35  ;;  %1256 = vst.msk [vmem:[%s3351_s3 + $0x178] sm:$0xff] %vm1208_vm6, %v1191_v36  ;;  %v1158_v41 = vadd.f32 %v895_v37, %v506_v33  ;;  %v1190_v42 = vadd.f32 %v1055_v38, %v538_v34  ;;  %v519_v35 = vld [vmem:[%s3351_s3 + $0xd8] sm:$0xff] }
 0x126   : > { %v1720_v43 = vpop.f32.mrf.mxu0  ;;  %v1768_v44 = vpop.f32.mrf.mxu1  ;;  %v551_v36 = vld [vmem:[%s3351_s3 + $0x1d8] sm:$0xff] }
 0x127   : > { %1223 = vst.msk [vmem:[%s3351_s3 + $0x70] sm:$0xff] %vm1208_vm6, %v1158_v41  ;;  %1255 = vst.msk [vmem:[%s3351_s3 + $0x170] sm:$0xff] %vm1208_vm6, %v1190_v42  ;;  %v1161_v47 = vadd.f32 %v1720_v43, %v509_v39  ;;  %v1193_v48 = vadd.f32 %v1768_v44, %v541_v40  ;;  %v518_v41 = vld [vmem:[%s3351_s3 + $0xd0] sm:$0xff] }
 0x128   : > { %v905_v49 = vpop.f32.mrf.mxu0  ;;  %v1065_v50 = vpop.f32.mrf.mxu1  ;;  %v550_v42 = vld [vmem:[%s3351_s3 + $0x1d0] sm:$0xff] }
 0x129   : > { %1226 = vst.msk [vmem:[%s3351_s3 + $0x88] sm:$0xff] %vm1208_vm6, %v1161_v47  ;;  %1258 = vst.msk [vmem:[%s3351_s3 + $0x188] sm:$0xff] %vm1208_vm6, %v1193_v48  ;;  %v1160_v53 = vadd.f32 %v905_v49, %v508_v45  ;;  %v1192_v54 = vadd.f32 %v1065_v50, %v540_v46  ;;  %v521_v47 = vld [vmem:[%s3351_s3 + $0xe8] sm:$0xff] }
 0x12a   : > { %v1723_v55 = vpop.f32.mrf.mxu0  ;;  %v1771_v56 = vpop.f32.mrf.mxu1  ;;  %v553_v48 = vld [vmem:[%s3351_s3 + $0x1e8] sm:$0xff] }
 0x12b   : > { %1225 = vst.msk [vmem:[%s3351_s3 + $0x80] sm:$0xff] %vm1208_vm6, %v1160_v53  ;;  %1257 = vst.msk [vmem:[%s3351_s3 + $0x180] sm:$0xff] %vm1208_vm6, %v1192_v54  ;;  %v1163_v59 = vadd.f32 %v1723_v55, %v511_v51  ;;  %v1195_v60 = vadd.f32 %v1771_v56, %v543_v52  ;;  %v520_v53 = vld [vmem:[%s3351_s3 + $0xe0] sm:$0xff] }
 0x12c   : > { %v915_v61 = vpop.f32.mrf.mxu0  ;;  %v1075_v62 = vpop.f32.mrf.mxu1  ;;  %v552_v54 = vld [vmem:[%s3351_s3 + $0x1e0] sm:$0xff] }
 0x12d   : > { %1228 = vst.msk [vmem:[%s3351_s3 + $0x98] sm:$0xff] %vm1208_vm6, %v1163_v59  ;;  %1260 = vst.msk [vmem:[%s3351_s3 + $0x198] sm:$0xff] %vm1208_vm6, %v1195_v60  ;;  %v1162_v1 = vadd.f32 %v915_v61, %v510_v57  ;;  %v1194_v2 = vadd.f32 %v1075_v62, %v542_v58  ;;  %v523_v59 = vld [vmem:[%s3351_s3 + $0xf8] sm:$0xff] }
 0x12e   : > { %v1726_v3 = vpop.f32.mrf.mxu0  ;;  %v1774_v4 = vpop.f32.mrf.mxu1  ;;  %v555_v60 = vld [vmem:[%s3351_s3 + $0x1f8] sm:$0xff] }
 0x12f   : > { %1227 = vst.msk [vmem:[%s3351_s3 + $0x90] sm:$0xff] %vm1208_vm6, %v1162_v1  ;;  %1259 = vst.msk [vmem:[%s3351_s3 + $0x190] sm:$0xff] %vm1208_vm6, %v1194_v2  ;;  %v1165_v7 = vadd.f32 %v1726_v3, %v513_v63  ;;  %v1197_v8 = vadd.f32 %v1774_v4, %v545_v0  ;;  %v522_v1 = vld [vmem:[%s3351_s3 + $0xf0] sm:$0xff] }
 0x130   : > { %v925_v9 = vpop.f32.mrf.mxu0  ;;  %v1085_v10 = vpop.f32.mrf.mxu1  ;;  %v554_v2 = vld [vmem:[%s3351_s3 + $0x1f0] sm:$0xff] }
 0x131   : > { %1230 = vst.msk [vmem:[%s3351_s3 + $0xa8] sm:$0xff] %vm1208_vm6, %v1165_v7  ;;  %1262 = vst.msk [vmem:[%s3351_s3 + $0x1a8] sm:$0xff] %vm1208_vm6, %v1197_v8  ;;  %v1164_v13 = vadd.f32 %v925_v9, %v512_v5  ;;  %v1196_v14 = vadd.f32 %v1085_v10, %v544_v6 }
 0x132   : > { %v1729_v15 = vpop.f32.mrf.mxu0  ;;  %v1777_v16 = vpop.f32.mrf.mxu1 }
 0x133   : > { %1229 = vst.msk [vmem:[%s3351_s3 + $0xa0] sm:$0xff] %vm1208_vm6, %v1164_v13  ;;  %1261 = vst.msk [vmem:[%s3351_s3 + $0x1a0] sm:$0xff] %vm1208_vm6, %v1196_v14  ;;  %v1167_v19 = vadd.f32 %v1729_v15, %v515_v11  ;;  %v1199_v20 = vadd.f32 %v1777_v16, %v547_v12 }
 0x134   : > { %v935_v21 = vpop.f32.mrf.mxu0  ;;  %v1095_v22 = vpop.f32.mrf.mxu1 }
 0x135   : > { %1232 = vst.msk [vmem:[%s3351_s3 + $0xb8] sm:$0xff] %vm1208_vm6, %v1167_v19  ;;  %1264 = vst.msk [vmem:[%s3351_s3 + $0x1b8] sm:$0xff] %vm1208_vm6, %v1199_v20  ;;  %v1166_v25 = vadd.f32 %v935_v21, %v514_v17  ;;  %v1198_v26 = vadd.f32 %v1095_v22, %v546_v18 }
 0x136   : > { %v1732_v27 = vpop.f32.mrf.mxu0  ;;  %v1780_v28 = vpop.f32.mrf.mxu1 }
 0x137   : > { %1231 = vst.msk [vmem:[%s3351_s3 + $0xb0] sm:$0xff] %vm1208_vm6, %v1166_v25  ;;  %1263 = vst.msk [vmem:[%s3351_s3 + $0x1b0] sm:$0xff] %vm1208_vm6, %v1198_v26  ;;  %v1169_v31 = vadd.f32 %v1732_v27, %v517_v23  ;;  %v1201_v32 = vadd.f32 %v1780_v28, %v549_v24 }
 0x138   : > { %v945_v33 = vpop.f32.mrf.mxu0  ;;  %v1105_v34 = vpop.f32.mrf.mxu1 }
 0x139   : > { %1234 = vst.msk [vmem:[%s3351_s3 + $0xc8] sm:$0xff] %vm1208_vm6, %v1169_v31  ;;  %1266 = vst.msk [vmem:[%s3351_s3 + $0x1c8] sm:$0xff] %vm1208_vm6, %v1201_v32  ;;  %v1168_v37 = vadd.f32 %v945_v33, %v516_v29  ;;  %v1200_v38 = vadd.f32 %v1105_v34, %v548_v30 }
 0x13a   : > { %v1735_v39 = vpop.f32.mrf.mxu0  ;;  %v1783_v40 = vpop.f32.mrf.mxu1 }
 0x13b   : > { %1233 = vst.msk [vmem:[%s3351_s3 + $0xc0] sm:$0xff] %vm1208_vm6, %v1168_v37  ;;  %1265 = vst.msk [vmem:[%s3351_s3 + $0x1c0] sm:$0xff] %vm1208_vm6, %v1200_v38  ;;  %v1171_v43 = vadd.f32 %v1735_v39, %v519_v35  ;;  %v1203_v44 = vadd.f32 %v1783_v40, %v551_v36 }
 0x13c   : > { %v955_v45 = vpop.f32.mrf.mxu0  ;;  %v1115_v46 = vpop.f32.mrf.mxu1 }
 0x13d   : > { %1236 = vst.msk [vmem:[%s3351_s3 + $0xd8] sm:$0xff] %vm1208_vm6, %v1171_v43  ;;  %1268 = vst.msk [vmem:[%s3351_s3 + $0x1d8] sm:$0xff] %vm1208_vm6, %v1203_v44  ;;  %v1170_v49 = vadd.f32 %v955_v45, %v518_v41  ;;  %v1202_v50 = vadd.f32 %v1115_v46, %v550_v42 }
 0x13e   : > { %v1738_v51 = vpop.f32.mrf.mxu0  ;;  %v1786_v52 = vpop.f32.mrf.mxu1 }
 0x13f   : > { %1235 = vst.msk [vmem:[%s3351_s3 + $0xd0] sm:$0xff] %vm1208_vm6, %v1170_v49  ;;  %1267 = vst.msk [vmem:[%s3351_s3 + $0x1d0] sm:$0xff] %vm1208_vm6, %v1202_v50  ;;  %v1173_v55 = vadd.f32 %v1738_v51, %v521_v47  ;;  %v1205_v56 = vadd.f32 %v1786_v52, %v553_v48 }
 0x140   : > { %v965_v57 = vpop.f32.mrf.mxu0  ;;  %v1125_v58 = vpop.f32.mrf.mxu1 }
 0x141   : > { %1238 = vst.msk [vmem:[%s3351_s3 + $0xe8] sm:$0xff] %vm1208_vm6, %v1173_v55  ;;  %1270 = vst.msk [vmem:[%s3351_s3 + $0x1e8] sm:$0xff] %vm1208_vm6, %v1205_v56  ;;  %v1172_v61 = vadd.f32 %v965_v57, %v520_v53  ;;  %v1204_v62 = vadd.f32 %v1125_v58, %v552_v54 }
 0x142   : > { %v1741_v63 = vpop.f32.mrf.mxu0  ;;  %v1789_v0 = vpop.f32.mrf.mxu1 }
 0x143   : > { %1237 = vst.msk [vmem:[%s3351_s3 + $0xe0] sm:$0xff] %vm1208_vm6, %v1172_v61  ;;  %1269 = vst.msk [vmem:[%s3351_s3 + $0x1e0] sm:$0xff] %vm1208_vm6, %v1204_v62  ;;  %v1175_v3 = vadd.f32 %v1741_v63, %v523_v59  ;;  %v1207_v4 = vadd.f32 %v1789_v0, %v555_v60  ;;  %1276 = sbr.rel (%p1600_p5) target bundleno = 364 (0x16c), region = 40 }
 0x144   : > { %v975_v5 = vpop.f32.mrf.mxu0  ;;  %v1135_v6 = vpop.f32.mrf.mxu1 }
 0x145   : > { %1240 = vst.msk [vmem:[%s3351_s3 + $0xf8] sm:$0xff] %vm1208_vm6, %v1175_v3  ;;  %1272 = vst.msk [vmem:[%s3351_s3 + $0x1f8] sm:$0xff] %vm1208_vm6, %v1207_v4  ;;  %v1174_v7 = vadd.f32 %v975_v5, %v522_v1  ;;  %v1206_v8 = vadd.f32 %v1135_v6, %v554_v2 }
 0x147   : > { %1239 = vst.msk [vmem:[%s3351_s3 + $0xf0] sm:$0xff] %vm1208_vm6, %v1174_v7  ;;  %1271 = vst.msk [vmem:[%s3351_s3 + $0x1f0] sm:$0xff] %vm1208_vm6, %v1206_v8 }
 0x148   : > { %v1277_v9 = vld [vmem:[%s3351_s3] sm:$0xff]  ;;  %v1278_v11 = vld [vmem:[%s3351_s3 + $0x8] sm:$0xff]  ;;  %v1279_v14 = vld [vmem:[%s3351_s3 + $0x10] sm:$0xff] }
 0x149   : > { %v2828_v10 = vld [vmem:[%s3350_s2] ss:$0 sm:$0xff]  ;;  %v1280_v15 = vld [vmem:[%s3351_s3 + $0x18] sm:$0xff]  ;;  %v1282_v20 = vld [vmem:[%s3351_s3 + $0x28] sm:$0xff] }
 0x14a   : > { %v1348_v12 = vadd.f32 %v2828_v10, %v1277_v9  ;;  %v1349_v13 = vadd.f32 %v2828_v10, %v1278_v11  ;;  %v1281_v16 = vld [vmem:[%s3351_s3 + $0x20] sm:$0xff]  ;;  %v1350_v17 = vadd.f32 %v2828_v10, %v1279_v14  ;;  %v1351_v18 = vadd.f32 %v2828_v10, %v1280_v15  ;;  %v1283_v21 = vld [vmem:[%s3351_s3 + $0x30] sm:$0xff]  ;;  %v1284_v22 = vld [vmem:[%s3351_s3 + $0x38] sm:$0xff] }
 0x14b   : > { %v1352_v19 = vadd.f32 %v2828_v10, %v1281_v16  ;;  %v1353_v23 = vadd.f32 %v2828_v10, %v1282_v20  ;;  %v1354_v24 = vadd.f32 %v2828_v10, %v1283_v21  ;;  %v1355_v25 = vadd.f32 %v2828_v10, %v1284_v22  ;;  %v1285_v26 = vld [vmem:[%s3351_s3 + $0x40] sm:$0xff]  ;;  %v1286_v27 = vld [vmem:[%s3351_s3 + $0x48] sm:$0xff]  ;;  %v1287_v28 = vld [vmem:[%s3351_s3 + $0x50] sm:$0xff] }
 0x14c   : > { %1412 = vst.msk [vmem:[%s3351_s3] sm:$0xff] %vm1208_vm6, %v1348_v12  ;;  %1413 = vst.msk [vmem:[%s3351_s3 + $0x8] sm:$0xff] %vm1208_vm6, %v1349_v13  ;;  %v1356_v29 = vadd.f32 %v2828_v10, %v1285_v26  ;;  %v1357_v30 = vadd.f32 %v2828_v10, %v1286_v27  ;;  %v1358_v31 = vadd.f32 %v2828_v10, %v1287_v28  ;;  %v1288_v32 = vld [vmem:[%s3351_s3 + $0x58] sm:$0xff]  ;;  %v1289_v33 = vld [vmem:[%s3351_s3 + $0x60] sm:$0xff] }
 0x14d   : > { %1414 = vst.msk [vmem:[%s3351_s3 + $0x10] sm:$0xff] %vm1208_vm6, %v1350_v17  ;;  %1415 = vst.msk [vmem:[%s3351_s3 + $0x18] sm:$0xff] %vm1208_vm6, %v1351_v18  ;;  %v1290_v34 = vld [vmem:[%s3351_s3 + $0x68] sm:$0xff]  ;;  %v1359_v35 = vadd.f32 %v2828_v10, %v1288_v32  ;;  %v1360_v36 = vadd.f32 %v2828_v10, %v1289_v33  ;;  %v1291_v38 = vld [vmem:[%s3351_s3 + $0x70] sm:$0xff] }
 0x14e   : > { %1416 = vst.msk [vmem:[%s3351_s3 + $0x20] sm:$0xff] %vm1208_vm6, %v1352_v19  ;;  %1417 = vst.msk [vmem:[%s3351_s3 + $0x28] sm:$0xff] %vm1208_vm6, %v1353_v23  ;;  %v1361_v37 = vadd.f32 %v2828_v10, %v1290_v34  ;;  %v1292_v39 = vld [vmem:[%s3351_s3 + $0x78] sm:$0xff]  ;;  %v1293_v40 = vld [vmem:[%s3351_s3 + $0x80] sm:$0xff]  ;;  %v1362_v41 = vadd.f32 %v2828_v10, %v1291_v38 }
 0x14f   : > { %1418 = vst.msk [vmem:[%s3351_s3 + $0x30] sm:$0xff] %vm1208_vm6, %v1354_v24  ;;  %1419 = vst.msk [vmem:[%s3351_s3 + $0x38] sm:$0xff] %vm1208_vm6, %v1355_v25  ;;  %v1363_v42 = vadd.f32 %v2828_v10, %v1292_v39  ;;  %v1364_v43 = vadd.f32 %v2828_v10, %v1293_v40  ;;  %v1294_v44 = vld [vmem:[%s3351_s3 + $0x88] sm:$0xff]  ;;  %v1295_v45 = vld [vmem:[%s3351_s3 + $0x90] sm:$0xff] }
 0x150   : > { %1420 = vst.msk [vmem:[%s3351_s3 + $0x40] sm:$0xff] %vm1208_vm6, %v1356_v29  ;;  %1421 = vst.msk [vmem:[%s3351_s3 + $0x48] sm:$0xff] %vm1208_vm6, %v1357_v30  ;;  %v1296_v46 = vld [vmem:[%s3351_s3 + $0x98] sm:$0xff]  ;;  %v1365_v47 = vadd.f32 %v2828_v10, %v1294_v44  ;;  %v1366_v48 = vadd.f32 %v2828_v10, %v1295_v45  ;;  %v1297_v50 = vld [vmem:[%s3351_s3 + $0xa0] sm:$0xff] }
 0x151   : > { %1422 = vst.msk [vmem:[%s3351_s3 + $0x50] sm:$0xff] %vm1208_vm6, %v1358_v31  ;;  %1423 = vst.msk [vmem:[%s3351_s3 + $0x58] sm:$0xff] %vm1208_vm6, %v1359_v35  ;;  %v1367_v49 = vadd.f32 %v2828_v10, %v1296_v46  ;;  %v1298_v51 = vld [vmem:[%s3351_s3 + $0xa8] sm:$0xff]  ;;  %v1299_v52 = vld [vmem:[%s3351_s3 + $0xb0] sm:$0xff]  ;;  %v1368_v53 = vadd.f32 %v2828_v10, %v1297_v50 }
 0x152   : > { %1424 = vst.msk [vmem:[%s3351_s3 + $0x60] sm:$0xff] %vm1208_vm6, %v1360_v36  ;;  %1425 = vst.msk [vmem:[%s3351_s3 + $0x68] sm:$0xff] %vm1208_vm6, %v1361_v37  ;;  %v1369_v54 = vadd.f32 %v2828_v10, %v1298_v51  ;;  %v1370_v55 = vadd.f32 %v2828_v10, %v1299_v52  ;;  %v1300_v56 = vld [vmem:[%s3351_s3 + $0xb8] sm:$0xff]  ;;  %v1301_v57 = vld [vmem:[%s3351_s3 + $0xc0] sm:$0xff] }
 0x153   : > { %1426 = vst.msk [vmem:[%s3351_s3 + $0x70] sm:$0xff] %vm1208_vm6, %v1362_v41  ;;  %1427 = vst.msk [vmem:[%s3351_s3 + $0x78] sm:$0xff] %vm1208_vm6, %v1363_v42  ;;  %v1302_v58 = vld [vmem:[%s3351_s3 + $0xc8] sm:$0xff]  ;;  %v1371_v59 = vadd.f32 %v2828_v10, %v1300_v56  ;;  %v1372_v60 = vadd.f32 %v2828_v10, %v1301_v57  ;;  %v1303_v62 = vld [vmem:[%s3351_s3 + $0xd0] sm:$0xff] }
 0x154   : > { %1428 = vst.msk [vmem:[%s3351_s3 + $0x80] sm:$0xff] %vm1208_vm6, %v1364_v43  ;;  %1429 = vst.msk [vmem:[%s3351_s3 + $0x88] sm:$0xff] %vm1208_vm6, %v1365_v47  ;;  %v1373_v61 = vadd.f32 %v2828_v10, %v1302_v58  ;;  %v1304_v63 = vld [vmem:[%s3351_s3 + $0xd8] sm:$0xff]  ;;  %v1305_v0 = vld [vmem:[%s3351_s3 + $0xe0] sm:$0xff]  ;;  %v1374_v1 = vadd.f32 %v2828_v10, %v1303_v62 }
 0x155   : > { %1430 = vst.msk [vmem:[%s3351_s3 + $0x90] sm:$0xff] %vm1208_vm6, %v1366_v48  ;;  %1431 = vst.msk [vmem:[%s3351_s3 + $0x98] sm:$0xff] %vm1208_vm6, %v1367_v49  ;;  %v1375_v2 = vadd.f32 %v2828_v10, %v1304_v63  ;;  %v1376_v3 = vadd.f32 %v2828_v10, %v1305_v0  ;;  %v1306_v4 = vld [vmem:[%s3351_s3 + $0xe8] sm:$0xff]  ;;  %v1307_v5 = vld [vmem:[%s3351_s3 + $0xf0] sm:$0xff] }
 0x156   : > { %1432 = vst.msk [vmem:[%s3351_s3 + $0xa0] sm:$0xff] %vm1208_vm6, %v1368_v53  ;;  %1433 = vst.msk [vmem:[%s3351_s3 + $0xa8] sm:$0xff] %vm1208_vm6, %v1369_v54  ;;  %v1308_v6 = vld [vmem:[%s3351_s3 + $0xf8] sm:$0xff]  ;;  %v1377_v7 = vadd.f32 %v2828_v10, %v1306_v4  ;;  %v1378_v8 = vadd.f32 %v2828_v10, %v1307_v5  ;;  %v1309_v11 = vld [vmem:[%s3351_s3 + $0x100] sm:$0xff] }
 0x157   : > { %1434 = vst.msk [vmem:[%s3351_s3 + $0xb0] sm:$0xff] %vm1208_vm6, %v1370_v55  ;;  %1435 = vst.msk [vmem:[%s3351_s3 + $0xb8] sm:$0xff] %vm1208_vm6, %v1371_v59  ;;  %v1379_v9 = vadd.f32 %v2828_v10, %v1308_v6  ;;  %v1310_v12 = vld [vmem:[%s3351_s3 + $0x108] sm:$0xff]  ;;  %v1311_v13 = vld [vmem:[%s3351_s3 + $0x110] sm:$0xff]  ;;  %v1380_v14 = vadd.f32 %v2828_v10, %v1309_v11 }
 0x158   : > { %1436 = vst.msk [vmem:[%s3351_s3 + $0xc0] sm:$0xff] %vm1208_vm6, %v1372_v60  ;;  %1437 = vst.msk [vmem:[%s3351_s3 + $0xc8] sm:$0xff] %vm1208_vm6, %v1373_v61  ;;  %v1381_v15 = vadd.f32 %v2828_v10, %v1310_v12  ;;  %v1382_v16 = vadd.f32 %v2828_v10, %v1311_v13  ;;  %v1312_v17 = vld [vmem:[%s3351_s3 + $0x118] sm:$0xff]  ;;  %v1313_v18 = vld [vmem:[%s3351_s3 + $0x120] sm:$0xff] }
 0x159   : > { %1438 = vst.msk [vmem:[%s3351_s3 + $0xd0] sm:$0xff] %vm1208_vm6, %v1374_v1  ;;  %1439 = vst.msk [vmem:[%s3351_s3 + $0xd8] sm:$0xff] %vm1208_vm6, %v1375_v2  ;;  %v1314_v19 = vld [vmem:[%s3351_s3 + $0x128] sm:$0xff]  ;;  %v1383_v20 = vadd.f32 %v2828_v10, %v1312_v17  ;;  %v1384_v21 = vadd.f32 %v2828_v10, %v1313_v18  ;;  %v1315_v23 = vld [vmem:[%s3351_s3 + $0x130] sm:$0xff] }
 0x15a   : > { %1440 = vst.msk [vmem:[%s3351_s3 + $0xe0] sm:$0xff] %vm1208_vm6, %v1376_v3  ;;  %1441 = vst.msk [vmem:[%s3351_s3 + $0xe8] sm:$0xff] %vm1208_vm6, %v1377_v7  ;;  %v1385_v22 = vadd.f32 %v2828_v10, %v1314_v19  ;;  %v1316_v24 = vld [vmem:[%s3351_s3 + $0x138] sm:$0xff]  ;;  %v1317_v25 = vld [vmem:[%s3351_s3 + $0x140] sm:$0xff]  ;;  %v1386_v26 = vadd.f32 %v2828_v10, %v1315_v23 }
 0x15b   : > { %1442 = vst.msk [vmem:[%s3351_s3 + $0xf0] sm:$0xff] %vm1208_vm6, %v1378_v8  ;;  %1443 = vst.msk [vmem:[%s3351_s3 + $0xf8] sm:$0xff] %vm1208_vm6, %v1379_v9  ;;  %v1387_v27 = vadd.f32 %v2828_v10, %v1316_v24  ;;  %v1388_v28 = vadd.f32 %v2828_v10, %v1317_v25  ;;  %v1318_v29 = vld [vmem:[%s3351_s3 + $0x148] sm:$0xff]  ;;  %v1319_v30 = vld [vmem:[%s3351_s3 + $0x150] sm:$0xff] }
 0x15c   : > { %1444 = vst.msk [vmem:[%s3351_s3 + $0x100] sm:$0xff] %vm1208_vm6, %v1380_v14  ;;  %1445 = vst.msk [vmem:[%s3351_s3 + $0x108] sm:$0xff] %vm1208_vm6, %v1381_v15  ;;  %v1320_v31 = vld [vmem:[%s3351_s3 + $0x158] sm:$0xff]  ;;  %v1389_v32 = vadd.f32 %v2828_v10, %v1318_v29  ;;  %v1390_v33 = vadd.f32 %v2828_v10, %v1319_v30  ;;  %v1321_v35 = vld [vmem:[%s3351_s3 + $0x160] sm:$0xff] }
 0x15d   : > { %1446 = vst.msk [vmem:[%s3351_s3 + $0x110] sm:$0xff] %vm1208_vm6, %v1382_v16  ;;  %1447 = vst.msk [vmem:[%s3351_s3 + $0x118] sm:$0xff] %vm1208_vm6, %v1383_v20  ;;  %v1391_v34 = vadd.f32 %v2828_v10, %v1320_v31  ;;  %v1322_v36 = vld [vmem:[%s3351_s3 + $0x168] sm:$0xff]  ;;  %v1323_v37 = vld [vmem:[%s3351_s3 + $0x170] sm:$0xff]  ;;  %v1392_v38 = vadd.f32 %v2828_v10, %v1321_v35 }
 0x15e   : > { %1448 = vst.msk [vmem:[%s3351_s3 + $0x120] sm:$0xff] %vm1208_vm6, %v1384_v21  ;;  %1449 = vst.msk [vmem:[%s3351_s3 + $0x128] sm:$0xff] %vm1208_vm6, %v1385_v22  ;;  %v1393_v39 = vadd.f32 %v2828_v10, %v1322_v36  ;;  %v1394_v40 = vadd.f32 %v2828_v10, %v1323_v37  ;;  %v1324_v41 = vld [vmem:[%s3351_s3 + $0x178] sm:$0xff]  ;;  %v1325_v42 = vld [vmem:[%s3351_s3 + $0x180] sm:$0xff] }
 0x15f   : > { %1450 = vst.msk [vmem:[%s3351_s3 + $0x130] sm:$0xff] %vm1208_vm6, %v1386_v26  ;;  %1451 = vst.msk [vmem:[%s3351_s3 + $0x138] sm:$0xff] %vm1208_vm6, %v1387_v27  ;;  %v1326_v43 = vld [vmem:[%s3351_s3 + $0x188] sm:$0xff]  ;;  %v1395_v44 = vadd.f32 %v2828_v10, %v1324_v41  ;;  %v1396_v45 = vadd.f32 %v2828_v10, %v1325_v42  ;;  %v1327_v47 = vld [vmem:[%s3351_s3 + $0x190] sm:$0xff] }
 0x160   : > { %1452 = vst.msk [vmem:[%s3351_s3 + $0x140] sm:$0xff] %vm1208_vm6, %v1388_v28  ;;  %1453 = vst.msk [vmem:[%s3351_s3 + $0x148] sm:$0xff] %vm1208_vm6, %v1389_v32  ;;  %v1397_v46 = vadd.f32 %v2828_v10, %v1326_v43  ;;  %v1328_v48 = vld [vmem:[%s3351_s3 + $0x198] sm:$0xff]  ;;  %v1329_v49 = vld [vmem:[%s3351_s3 + $0x1a0] sm:$0xff]  ;;  %v1398_v50 = vadd.f32 %v2828_v10, %v1327_v47 }
 0x161   : > { %1454 = vst.msk [vmem:[%s3351_s3 + $0x150] sm:$0xff] %vm1208_vm6, %v1390_v33  ;;  %1455 = vst.msk [vmem:[%s3351_s3 + $0x158] sm:$0xff] %vm1208_vm6, %v1391_v34  ;;  %v1399_v51 = vadd.f32 %v2828_v10, %v1328_v48  ;;  %v1400_v52 = vadd.f32 %v2828_v10, %v1329_v49  ;;  %v1330_v53 = vld [vmem:[%s3351_s3 + $0x1a8] sm:$0xff]  ;;  %v1331_v54 = vld [vmem:[%s3351_s3 + $0x1b0] sm:$0xff] }
 0x162   : > { %1456 = vst.msk [vmem:[%s3351_s3 + $0x160] sm:$0xff] %vm1208_vm6, %v1392_v38  ;;  %1457 = vst.msk [vmem:[%s3351_s3 + $0x168] sm:$0xff] %vm1208_vm6, %v1393_v39  ;;  %v1332_v55 = vld [vmem:[%s3351_s3 + $0x1b8] sm:$0xff]  ;;  %v1401_v56 = vadd.f32 %v2828_v10, %v1330_v53  ;;  %v1402_v57 = vadd.f32 %v2828_v10, %v1331_v54  ;;  %v1333_v59 = vld [vmem:[%s3351_s3 + $0x1c0] sm:$0xff] }
 0x163   : > { %1458 = vst.msk [vmem:[%s3351_s3 + $0x170] sm:$0xff] %vm1208_vm6, %v1394_v40  ;;  %1459 = vst.msk [vmem:[%s3351_s3 + $0x178] sm:$0xff] %vm1208_vm6, %v1395_v44  ;;  %v1403_v58 = vadd.f32 %v2828_v10, %v1332_v55  ;;  %v1334_v60 = vld [vmem:[%s3351_s3 + $0x1c8] sm:$0xff]  ;;  %v1335_v61 = vld [vmem:[%s3351_s3 + $0x1d0] sm:$0xff]  ;;  %v1404_v62 = vadd.f32 %v2828_v10, %v1333_v59 }
 0x164   : > { %1460 = vst.msk [vmem:[%s3351_s3 + $0x180] sm:$0xff] %vm1208_vm6, %v1396_v45  ;;  %1461 = vst.msk [vmem:[%s3351_s3 + $0x188] sm:$0xff] %vm1208_vm6, %v1397_v46  ;;  %v1405_v63 = vadd.f32 %v2828_v10, %v1334_v60  ;;  %v1406_v0 = vadd.f32 %v2828_v10, %v1335_v61  ;;  %v1336_v1 = vld [vmem:[%s3351_s3 + $0x1d8] sm:$0xff]  ;;  %v1337_v2 = vld [vmem:[%s3351_s3 + $0x1e0] sm:$0xff] }
 0x165   : > { %1462 = vst.msk [vmem:[%s3351_s3 + $0x190] sm:$0xff] %vm1208_vm6, %v1398_v50  ;;  %1463 = vst.msk [vmem:[%s3351_s3 + $0x198] sm:$0xff] %vm1208_vm6, %v1399_v51  ;;  %v1338_v3 = vld [vmem:[%s3351_s3 + $0x1e8] sm:$0xff]  ;;  %v1407_v4 = vadd.f32 %v2828_v10, %v1336_v1  ;;  %v1408_v5 = vadd.f32 %v2828_v10, %v1337_v2  ;;  %v1339_v7 = vld [vmem:[%s3351_s3 + $0x1f0] sm:$0xff] }
 0x166   : > { %1464 = vst.msk [vmem:[%s3351_s3 + $0x1a0] sm:$0xff] %vm1208_vm6, %v1400_v52  ;;  %1465 = vst.msk [vmem:[%s3351_s3 + $0x1a8] sm:$0xff] %vm1208_vm6, %v1401_v56  ;;  %v1409_v6 = vadd.f32 %v2828_v10, %v1338_v3  ;;  %v1340_v8 = vld [vmem:[%s3351_s3 + $0x1f8] sm:$0xff]  ;;  %v1410_v9 = vadd.f32 %v2828_v10, %v1339_v7 }
 0x167   : > { %1466 = vst.msk [vmem:[%s3351_s3 + $0x1b0] sm:$0xff] %vm1208_vm6, %v1402_v57  ;;  %1467 = vst.msk [vmem:[%s3351_s3 + $0x1b8] sm:$0xff] %vm1208_vm6, %v1403_v58  ;;  %v1411_v11 = vadd.f32 %v2828_v10, %v1340_v8 }
 0x168   : > { %1468 = vst.msk [vmem:[%s3351_s3 + $0x1c0] sm:$0xff] %vm1208_vm6, %v1404_v62  ;;  %1469 = vst.msk [vmem:[%s3351_s3 + $0x1c8] sm:$0xff] %vm1208_vm6, %v1405_v63 }
 0x169   : > { %1470 = vst.msk [vmem:[%s3351_s3 + $0x1d0] sm:$0xff] %vm1208_vm6, %v1406_v0  ;;  %1471 = vst.msk [vmem:[%s3351_s3 + $0x1d8] sm:$0xff] %vm1208_vm6, %v1407_v4 }
 0x16a   : > { %1472 = vst.msk [vmem:[%s3351_s3 + $0x1e0] sm:$0xff] %vm1208_vm6, %v1408_v5  ;;  %1473 = vst.msk [vmem:[%s3351_s3 + $0x1e8] sm:$0xff] %vm1208_vm6, %v1409_v6 }
 0x16b   : > { %1474 = vst.msk [vmem:[%s3351_s3 + $0x1f0] sm:$0xff] %vm1208_vm6, %v1410_v9  ;;  %1475 = vst.msk [vmem:[%s3351_s3 + $0x1f8] sm:$0xff] %vm1208_vm6, %v1411_v11 }
 0x16c PF: > { %s13_s14 = sadd.s32 1, %s1853_s14   ;;  %s3352_s12 = smov %s1849_s13 }
 0x16d   : > { %p10_p6 = scmp.ge.s32.totalorder %s13_s14, 10   ;;  %s3353_s13 = smov %s3355_s15 }
 0x16f   :  { %12 = sbr.rel (!%p10_p6) target bundleno = 2 (0x2), region = 69 }

// kernel: generator_forward.34
= control target key start
LH: loop header
LB: loop body
LE: loop exit
PB: predicated region body
PF: predicated region fallthrough
CT: control target
= control target key end

     0   :  { %s1851_s12 = smov 0   ;;  %s1853_s13 = smov 0   ;;  %s3327_s0 = inlined_call_operand.vmem [shape: f32[2,260,32], index: 0, kind: input, shape index: {}]   ;;  %s3328_s1 = inlined_call_operand.vmem [shape: f32[5,32,32], index: 1, kind: input, shape index: {}]   ;;  %s3329_s2 = inlined_call_operand.vmem [shape: f32[1,32], index: 2, kind: input, shape index: {}]   ;;  %s3330_s3 = inlined_call_operand.vmem [shape: f32[2,256,32], index: 3, kind: output, shape index: {}]  }
   0x1   :  { %s1855_s14 = smov 0  }
   0x2 LB: > { %s22_s15 = sadd.s32 1, %s1824_s13  ;;  %p1528_p0 = scmp.ge.s32.totalorder %s1828_s14, 1  ;;  %s1828_s14 = sphi %s1855_s14, %s13_s14   ;;  %s1824_s13 = sphi %s1853_s13, %s3332_s13   ;;  %s1820_s12 = sphi %s1851_s12, %s3331_s12  }
   0x3   : > { %p23_p1 = scmp.ge.s32.totalorder %s22_s15, 5  ;;  %p139_p2 = scmp.lt.s32.totalorder %s1828_s14, 6 }
   0x5   : > { %s3334_s15 = smov (%p23_p1, %s22_s15), 0  ;;  %p140_p3 = pnand %p1528_p0, %p139_p2 }
   0x6   : > { %p1529_p4 = scmp.ne.s32.totalorder (!%p140_p3), %s1820_s12, 0 }
   0x7   : > { %143 = sbr.rel (%p140_p3) target bundleno = 356 (0x164), region = 32 }
   0xc   : > { %167 = sbr.rel (%p1529_p4) target bundleno = 50 (0x32), region = 36 }
  0x11   : > { %vm168_vm0 = vcmask 261120   ;;  %v1830_v0 = vmov 0.0  }
  0x12   : > { %169 = vst.msk [vmem:[%s3330_s3] sm:$0xff] %vm168_vm0, %v1830_v0  ;;  %170 = vst.msk [vmem:[%s3330_s3 + $0x8] sm:$0xff] %vm168_vm0, %v1830_v0 }
  0x13   : > { %171 = vst.msk [vmem:[%s3330_s3 + $0x10] sm:$0xff] %vm168_vm0, %v1830_v0  ;;  %172 = vst.msk [vmem:[%s3330_s3 + $0x18] sm:$0xff] %vm168_vm0, %v1830_v0 }
  0x14   : > { %173 = vst.msk [vmem:[%s3330_s3 + $0x20] sm:$0xff] %vm168_vm0, %v1830_v0  ;;  %174 = vst.msk [vmem:[%s3330_s3 + $0x28] sm:$0xff] %vm168_vm0, %v1830_v0 }
  0x15   : > { %175 = vst.msk [vmem:[%s3330_s3 + $0x30] sm:$0xff] %vm168_vm0, %v1830_v0  ;;  %176 = vst.msk [vmem:[%s3330_s3 + $0x38] sm:$0xff] %vm168_vm0, %v1830_v0 }
  0x16   : > { %177 = vst.msk [vmem:[%s3330_s3 + $0x40] sm:$0xff] %vm168_vm0, %v1830_v0  ;;  %178 = vst.msk [vmem:[%s3330_s3 + $0x48] sm:$0xff] %vm168_vm0, %v1830_v0 }
  0x17   : > { %179 = vst.msk [vmem:[%s3330_s3 + $0x50] sm:$0xff] %vm168_vm0, %v1830_v0  ;;  %180 = vst.msk [vmem:[%s3330_s3 + $0x58] sm:$0xff] %vm168_vm0, %v1830_v0 }
  0x18   : > { %181 = vst.msk [vmem:[%s3330_s3 + $0x60] sm:$0xff] %vm168_vm0, %v1830_v0  ;;  %182 = vst.msk [vmem:[%s3330_s3 + $0x68] sm:$0xff] %vm168_vm0, %v1830_v0 }
  0x19   : > { %183 = vst.msk [vmem:[%s3330_s3 + $0x70] sm:$0xff] %vm168_vm0, %v1830_v0  ;;  %184 = vst.msk [vmem:[%s3330_s3 + $0x78] sm:$0xff] %vm168_vm0, %v1830_v0 }
  0x1a   : > { %185 = vst.msk [vmem:[%s3330_s3 + $0x80] sm:$0xff] %vm168_vm0, %v1830_v0  ;;  %186 = vst.msk [vmem:[%s3330_s3 + $0x88] sm:$0xff] %vm168_vm0, %v1830_v0 }
  0x1b   : > { %187 = vst.msk [vmem:[%s3330_s3 + $0x90] sm:$0xff] %vm168_vm0, %v1830_v0  ;;  %188 = vst.msk [vmem:[%s3330_s3 + $0x98] sm:$0xff] %vm168_vm0, %v1830_v0 }
  0x1c   : > { %189 = vst.msk [vmem:[%s3330_s3 + $0xa0] sm:$0xff] %vm168_vm0, %v1830_v0  ;;  %190 = vst.msk [vmem:[%s3330_s3 + $0xa8] sm:$0xff] %vm168_vm0, %v1830_v0 }
  0x1d   : > { %191 = vst.msk [vmem:[%s3330_s3 + $0xb0] sm:$0xff] %vm168_vm0, %v1830_v0  ;;  %192 = vst.msk [vmem:[%s3330_s3 + $0xb8] sm:$0xff] %vm168_vm0, %v1830_v0 }
  0x1e   : > { %193 = vst.msk [vmem:[%s3330_s3 + $0xc0] sm:$0xff] %vm168_vm0, %v1830_v0  ;;  %194 = vst.msk [vmem:[%s3330_s3 + $0xc8] sm:$0xff] %vm168_vm0, %v1830_v0 }
  0x1f   : > { %195 = vst.msk [vmem:[%s3330_s3 + $0xd0] sm:$0xff] %vm168_vm0, %v1830_v0  ;;  %196 = vst.msk [vmem:[%s3330_s3 + $0xd8] sm:$0xff] %vm168_vm0, %v1830_v0 }
  0x20   : > { %197 = vst.msk [vmem:[%s3330_s3 + $0xe0] sm:$0xff] %vm168_vm0, %v1830_v0  ;;  %198 = vst.msk [vmem:[%s3330_s3 + $0xe8] sm:$0xff] %vm168_vm0, %v1830_v0 }
  0x21   : > { %199 = vst.msk [vmem:[%s3330_s3 + $0xf0] sm:$0xff] %vm168_vm0, %v1830_v0  ;;  %200 = vst.msk [vmem:[%s3330_s3 + $0xf8] sm:$0xff] %vm168_vm0, %v1830_v0 }
  0x22   : > { %201 = vst.msk [vmem:[%s3330_s3 + $0x100] sm:$0xff] %vm168_vm0, %v1830_v0  ;;  %202 = vst.msk [vmem:[%s3330_s3 + $0x108] sm:$0xff] %vm168_vm0, %v1830_v0 }
  0x23   : > { %203 = vst.msk [vmem:[%s3330_s3 + $0x110] sm:$0xff] %vm168_vm0, %v1830_v0  ;;  %204 = vst.msk [vmem:[%s3330_s3 + $0x118] sm:$0xff] %vm168_vm0, %v1830_v0 }
  0x24   : > { %205 = vst.msk [vmem:[%s3330_s3 + $0x120] sm:$0xff] %vm168_vm0, %v1830_v0  ;;  %206 = vst.msk [vmem:[%s3330_s3 + $0x128] sm:$0xff] %vm168_vm0, %v1830_v0 }
  0x25   : > { %207 = vst.msk [vmem:[%s3330_s3 + $0x130] sm:$0xff] %vm168_vm0, %v1830_v0  ;;  %208 = vst.msk [vmem:[%s3330_s3 + $0x138] sm:$0xff] %vm168_vm0, %v1830_v0 }
  0x26   : > { %209 = vst.msk [vmem:[%s3330_s3 + $0x140] sm:$0xff] %vm168_vm0, %v1830_v0  ;;  %210 = vst.msk [vmem:[%s3330_s3 + $0x148] sm:$0xff] %vm168_vm0, %v1830_v0 }
  0x27   : > { %211 = vst.msk [vmem:[%s3330_s3 + $0x150] sm:$0xff] %vm168_vm0, %v1830_v0  ;;  %212 = vst.msk [vmem:[%s3330_s3 + $0x158] sm:$0xff] %vm168_vm0, %v1830_v0 }
  0x28   : > { %213 = vst.msk [vmem:[%s3330_s3 + $0x160] sm:$0xff] %vm168_vm0, %v1830_v0  ;;  %214 = vst.msk [vmem:[%s3330_s3 + $0x168] sm:$0xff] %vm168_vm0, %v1830_v0 }
  0x29   : > { %215 = vst.msk [vmem:[%s3330_s3 + $0x170] sm:$0xff] %vm168_vm0, %v1830_v0  ;;  %216 = vst.msk [vmem:[%s3330_s3 + $0x178] sm:$0xff] %vm168_vm0, %v1830_v0 }
  0x2a   : > { %217 = vst.msk [vmem:[%s3330_s3 + $0x180] sm:$0xff] %vm168_vm0, %v1830_v0  ;;  %218 = vst.msk [vmem:[%s3330_s3 + $0x188] sm:$0xff] %vm168_vm0, %v1830_v0 }
  0x2b   : > { %219 = vst.msk [vmem:[%s3330_s3 + $0x190] sm:$0xff] %vm168_vm0, %v1830_v0  ;;  %220 = vst.msk [vmem:[%s3330_s3 + $0x198] sm:$0xff] %vm168_vm0, %v1830_v0 }
  0x2c   : > { %221 = vst.msk [vmem:[%s3330_s3 + $0x1a0] sm:$0xff] %vm168_vm0, %v1830_v0  ;;  %222 = vst.msk [vmem:[%s3330_s3 + $0x1a8] sm:$0xff] %vm168_vm0, %v1830_v0 }
  0x2d   : > { %223 = vst.msk [vmem:[%s3330_s3 + $0x1b0] sm:$0xff] %vm168_vm0, %v1830_v0  ;;  %224 = vst.msk [vmem:[%s3330_s3 + $0x1b8] sm:$0xff] %vm168_vm0, %v1830_v0 }
  0x2e   : > { %225 = vst.msk [vmem:[%s3330_s3 + $0x1c0] sm:$0xff] %vm168_vm0, %v1830_v0  ;;  %226 = vst.msk [vmem:[%s3330_s3 + $0x1c8] sm:$0xff] %vm168_vm0, %v1830_v0 }
  0x2f   : > { %227 = vst.msk [vmem:[%s3330_s3 + $0x1d0] sm:$0xff] %vm168_vm0, %v1830_v0  ;;  %228 = vst.msk [vmem:[%s3330_s3 + $0x1d8] sm:$0xff] %vm168_vm0, %v1830_v0 }
  0x30   : > { %229 = vst.msk [vmem:[%s3330_s3 + $0x1e0] sm:$0xff] %vm168_vm0, %v1830_v0  ;;  %230 = vst.msk [vmem:[%s3330_s3 + $0x1e8] sm:$0xff] %vm168_vm0, %v1830_v0 }
  0x31   : > { %231 = vst.msk [vmem:[%s3330_s3 + $0x1f0] sm:$0xff] %vm168_vm0, %v1830_v0  ;;  %232 = vst.msk [vmem:[%s3330_s3 + $0x1f8] sm:$0xff] %vm168_vm0, %v1830_v0 }
  0x32 PF: > { %s1530_s29 = sshll.u32 %s1820_s12, 5  ;;  %s2197_s5 = scalar_lea.vmem %s3327_s0, %s1820_s12  ;;  %vm562_vm6 = vcmask 261120  }
  0x33   : > { %s557_s8 = scalar_lea.vmem %s3328_s1, %s1530_s29  ;;  %v236_v1 = vld [vmem:[%s2197_s5] sm:$0xff]  ;;  %v268_v2 = vld [vmem:[%s2197_s5 + $0x108] sm:$0xff]  ;;  %v269_v9 = vld [vmem:[%s2197_s5 + $0x110] sm:$0xff]  ;;  %p1595_p5 = scmp.ne.s32.totalorder %s1820_s12, 4 }
  0x34   : > { %v237_v3 = vld [vmem:[%s2197_s5 + $0x8] sm:$0xff]  ;;  %v561_v4 = vld [vmem:[%s557_s8 + $0x18] sm:$0xff]  ;;  %v560_v5 = vld [vmem:[%s557_s8 + $0x10] sm:$0xff]  ;;  %vm300_vm1 = vcmp.ge.f32.partialorder %v236_v1, 0.0  ;;  %v364_v7 = vmul.f32 0.1, %v236_v1 }
  0x35   : > { %v559_v6 = vld [vmem:[%s557_s8 + $0x8] sm:$0xff]  ;;  %1669 = vmatprep.subr.mxu0 %v561_v4  ;;  %1773 = vmatprep.subr.mxu1 %v561_v4  ;;  %v396_v8 = vmul.f32 0.1, %v268_v2  ;;  %vm332_vm2 = vcmp.ge.f32.partialorder %v268_v2, 0.0  ;;  %v365_v10 = vmul.f32 0.1, %v237_v3 }
  0x36   : > { %1670 = vmatpush3.msra.mxu0 %v561_v4  ;;  %1777 = vmatpush3.msra.mxu1 %v561_v4  ;;  %v397_v11 = vmul.f32 0.1, %v269_v9  ;;  %v238_v12 = vld [vmem:[%s2197_s5 + $0x10] sm:$0xff]  ;;  %vm301_vm3 = vcmp.ge.f32.partialorder %v237_v3, 0.0  ;;  %vm333_vm4 = vcmp.ge.f32.partialorder %v269_v9, 0.0  ;;  %v270_v14 = vld [vmem:[%s2197_s5 + $0x118] sm:$0xff]  ;;  %v428_v20 = vsel %vm300_vm1, %v236_v1, %v364_v7 }
  0x37   : > { %1671 = vmatprep.subr.mxu0 %v560_v5  ;;  %1774 = vmatprep.subr.mxu1 %v560_v5  ;;  %v366_v13 = vmul.f32 0.1, %v238_v12  ;;  %v239_v15 = vld [vmem:[%s2197_s5 + $0x18] sm:$0xff]  ;;  %v558_v16 = vld [vmem:[%s557_s8] sm:$0xff]  ;;  %vm302_vm5 = vcmp.ge.f32.partialorder %v238_v12, 0.0  ;;  %vm334_vm7 = vcmp.ge.f32.partialorder %v270_v14, 0.0  ;;  %v460_v22 = vsel %vm332_vm2, %v268_v2, %v396_v8 }
  0x38   : > { %1672 = vmatpush3.msra.mxu0 %v560_v5  ;;  %1778 = vmatpush3.msra.mxu1 %v560_v5  ;;  %v398_v17 = vmul.f32 0.1, %v270_v14  ;;  %v271_v18 = vld [vmem:[%s2197_s5 + $0x120] sm:$0xff]  ;;  %v272_v21 = vld [vmem:[%s2197_s5 + $0x128] sm:$0xff]  ;;  %v429_v23 = vsel %vm301_vm3, %v237_v3, %v365_v10  ;;  %v461_v24 = vsel %vm333_vm4, %v269_v9, %v397_v11  ;;  %v367_v25 = vmul.f32 0.1, %v239_v15 }
  0x39   : > { %v240_v19 = vld [vmem:[%s2197_s5 + $0x20] sm:$0xff]  ;;  %1673 = vmatprep.subr.mxu0 %v559_v6  ;;  %1775 = vmatprep.subr.mxu1 %v559_v6  ;;  %v430_v26 = vsel %vm302_vm5, %v238_v12, %v366_v13  ;;  %vm303_vm8 = vcmp.ge.f32.partialorder %v239_v15, 0.0  ;;  %v399_v27 = vmul.f32 0.1, %v271_v18  ;;  %v241_v29 = vld [vmem:[%s2197_s5 + $0x28] sm:$0xff]  ;;  %vm335_vm9 = vcmp.ge.f32.partialorder %v271_v18, 0.0 }
  0x3a   : > { %1674 = vmatpush3.msra.mxu0 %v559_v6  ;;  %1779 = vmatpush3.msra.mxu1 %v559_v6  ;;  %v368_v28 = vmul.f32 0.1, %v240_v19  ;;  %v462_v30 = vsel %vm334_vm7, %v270_v14, %v398_v17  ;;  %vm304_vm10 = vcmp.ge.f32.partialorder %v240_v19, 0.0  ;;  %v400_v31 = vmul.f32 0.1, %v272_v21  ;;  %v273_v32 = vld [vmem:[%s2197_s5 + $0x130] sm:$0xff] }
  0x3b   : > { %1675 = vmatprep.subr.mxu0 %v558_v16  ;;  %1776 = vmatprep.subr.mxu1 %v558_v16  ;;  %v242_v33 = vld [vmem:[%s2197_s5 + $0x30] sm:$0xff]  ;;  %vm336_vm11 = vcmp.ge.f32.partialorder %v272_v21, 0.0  ;;  %v274_v34 = vld [vmem:[%s2197_s5 + $0x138] sm:$0xff]  ;;  %v431_v35 = vsel %vm303_vm8, %v239_v15, %v367_v25  ;;  %vm305_vm12 = vcmp.ge.f32.partialorder %v241_v29, 0.0  ;;  %v369_v36 = vmul.f32 0.1, %v241_v29 }
  0x3c   : > { %1676 = vmatpush3.msra.mxu0 %v558_v16  ;;  %1780 = vmatpush3.msra.mxu1 %v558_v16  ;;  %v463_v37 = vsel %vm335_vm9, %v271_v18, %v399_v27  ;;  %v432_v38 = vsel %vm304_vm10, %v240_v19, %v368_v28  ;;  %v401_v39 = vmul.f32 0.1, %v273_v32  ;;  %v370_v40 = vmul.f32 0.1, %v242_v33  ;;  %v243_v41 = vld [vmem:[%s2197_s5 + $0x38] sm:$0xff]  ;;  %v275_v44 = vld [vmem:[%s2197_s5 + $0x140] sm:$0xff] }
  0x3d   : > { %1677 = vmatprep.mubr.msk.f32.mxu0 %vm562_vm6, %v428_v20  ;;  %1725 = vmatprep.mubr.msk.f32.mxu1 %vm562_vm6, %v460_v22  ;;  %v464_v42 = vsel %vm336_vm11, %v272_v21, %v400_v31  ;;  %vm337_vm13 = vcmp.ge.f32.partialorder %v273_v32, 0.0  ;;  %vm306_vm14 = vcmp.ge.f32.partialorder %v242_v33, 0.0  ;;  %v402_v43 = vmul.f32 0.1, %v274_v34  ;;  %v244_v45 = vld [vmem:[%s2197_s5 + $0x40] sm:$0xff]  ;;  %v276_v46 = vld [vmem:[%s2197_s5 + $0x148] sm:$0xff] }
  0x3e   : > { %1678 = vmatmul.mubr.msk.f32.vlgmr.msra.gmra.mxu0 %vm562_vm6, %v429_v23  ;;  %1726 = vmatmul.mubr.msk.f32.vlgmr.msra.gmra.mxu1 %vm562_vm6, %v461_v24  ;;  %vm338_vm15 = vcmp.ge.f32.partialorder %v274_v34, 0.0  ;;  %v433_v47 = vsel %vm305_vm12, %v241_v29, %v369_v36  ;;  %vm307_vm0 = vcmp.ge.f32.partialorder %v243_v41, 0.0  ;;  %v371_v48 = vmul.f32 0.1, %v243_v41  ;;  %v245_v53 = vld [vmem:[%s2197_s5 + $0x48] sm:$0xff]  ;;  %v277_v56 = vld [vmem:[%s2197_s5 + $0x150] sm:$0xff] }
  0x3f   : > { %1680 = vmatprep.mubr.msk.f32.mxu0 %vm562_vm6, %v430_v26  ;;  %1728 = vmatprep.mubr.msk.f32.mxu1 %vm562_vm6, %v462_v30  ;;  %v465_v49 = vsel %vm337_vm13, %v273_v32, %v401_v39  ;;  %v434_v50 = vsel %vm306_vm14, %v242_v33, %v370_v40  ;;  %v403_v51 = vmul.f32 0.1, %v275_v44  ;;  %v372_v52 = vmul.f32 0.1, %v244_v45  ;;  %v246_v57 = vld [vmem:[%s2197_s5 + $0x50] sm:$0xff]  ;;  %v278_v58 = vld [vmem:[%s2197_s5 + $0x158] sm:$0xff] }
  0x40   : > { %v466_v54 = vsel %vm338_vm15, %v274_v34, %v402_v43  ;;  %vm339_vm1 = vcmp.ge.f32.partialorder %v275_v44, 0.0  ;;  %vm308_vm2 = vcmp.ge.f32.partialorder %v244_v45, 0.0  ;;  %v404_v55 = vmul.f32 0.1, %v276_v46  ;;  %v247_v1 = vld [vmem:[%s2197_s5 + $0x58] sm:$0xff]  ;;  %v279_v4 = vld [vmem:[%s2197_s5 + $0x160] sm:$0xff] }
  0x41   : > { %vm340_vm3 = vcmp.ge.f32.partialorder %v276_v46, 0.0  ;;  %v435_v59 = vsel %vm307_vm0, %v243_v41, %v371_v48  ;;  %vm309_vm4 = vcmp.ge.f32.partialorder %v245_v53, 0.0  ;;  %v373_v60 = vmul.f32 0.1, %v245_v53  ;;  %v248_v5 = vld [vmem:[%s2197_s5 + $0x60] sm:$0xff]  ;;  %v280_v6 = vld [vmem:[%s2197_s5 + $0x168] sm:$0xff] }
  0x42   : > { %1681 = vmatmul.mubr.msk.f32.gmra.mxu0 %vm562_vm6, %v431_v35  ;;  %1729 = vmatmul.mubr.msk.f32.gmra.mxu1 %vm562_vm6, %v463_v37  ;;  %v467_v61 = vsel %vm339_vm1, %v275_v44, %v403_v51  ;;  %v436_v62 = vsel %vm308_vm2, %v244_v45, %v372_v52  ;;  %v405_v63 = vmul.f32 0.1, %v277_v56  ;;  %v374_v0 = vmul.f32 0.1, %v246_v57  ;;  %v249_v13 = vld [vmem:[%s2197_s5 + $0x68] sm:$0xff]  ;;  %v281_v16 = vld [vmem:[%s2197_s5 + $0x170] sm:$0xff] }
  0x43   : > { %1683 = vmatprep.mubr.msk.f32.mxu0 %vm562_vm6, %v432_v38  ;;  %1731 = vmatprep.mubr.msk.f32.mxu1 %vm562_vm6, %v464_v42  ;;  %v468_v2 = vsel %vm340_vm3, %v276_v46, %v404_v55  ;;  %vm341_vm5 = vcmp.ge.f32.partialorder %v277_v56, 0.0  ;;  %vm310_vm7 = vcmp.ge.f32.partialorder %v246_v57, 0.0  ;;  %v406_v3 = vmul.f32 0.1, %v278_v58  ;;  %v250_v17 = vld [vmem:[%s2197_s5 + $0x70] sm:$0xff]  ;;  %v282_v18 = vld [vmem:[%s2197_s5 + $0x178] sm:$0xff] }
  0x44   : > { %vm342_vm8 = vcmp.ge.f32.partialorder %v278_v58, 0.0  ;;  %v437_v7 = vsel %vm309_vm4, %v245_v53, %v373_v60  ;;  %vm311_vm9 = vcmp.ge.f32.partialorder %v247_v1, 0.0  ;;  %v375_v8 = vmul.f32 0.1, %v247_v1  ;;  %v251_v25 = vld [vmem:[%s2197_s5 + $0x78] sm:$0xff]  ;;  %v283_v28 = vld [vmem:[%s2197_s5 + $0x180] sm:$0xff] }
  0x45   : > { %v469_v9 = vsel %vm341_vm5, %v277_v56, %v405_v63  ;;  %v438_v10 = vsel %vm310_vm7, %v246_v57, %v374_v0  ;;  %v407_v11 = vmul.f32 0.1, %v279_v4  ;;  %v376_v12 = vmul.f32 0.1, %v248_v5  ;;  %v252_v29 = vld [vmem:[%s2197_s5 + $0x80] sm:$0xff]  ;;  %v284_v30 = vld [vmem:[%s2197_s5 + $0x188] sm:$0xff] }
  0x46   : > { %1684 = vmatmul.mubr.msk.f32.gmra.mxu0 %vm562_vm6, %v433_v47  ;;  %1732 = vmatmul.mubr.msk.f32.gmra.mxu1 %vm562_vm6, %v465_v49  ;;  %v470_v14 = vsel %vm342_vm8, %v278_v58, %v406_v3  ;;  %vm343_vm10 = vcmp.ge.f32.partialorder %v279_v4, 0.0  ;;  %vm312_vm11 = vcmp.ge.f32.partialorder %v248_v5, 0.0  ;;  %v408_v15 = vmul.f32 0.1, %v280_v6  ;;  %v253_v37 = vld [vmem:[%s2197_s5 + $0x88] sm:$0xff]  ;;  %v285_v40 = vld [vmem:[%s2197_s5 + $0x190] sm:$0xff] }
  0x47   : > { %1686 = vmatprep.mubr.msk.f32.mxu0 %vm562_vm6, %v434_v50  ;;  %1734 = vmatprep.mubr.msk.f32.mxu1 %vm562_vm6, %v466_v54  ;;  %vm344_vm12 = vcmp.ge.f32.partialorder %v280_v6, 0.0  ;;  %v439_v19 = vsel %vm311_vm9, %v247_v1, %v375_v8  ;;  %vm313_vm13 = vcmp.ge.f32.partialorder %v249_v13, 0.0  ;;  %v377_v20 = vmul.f32 0.1, %v249_v13  ;;  %v254_v41 = vld [vmem:[%s2197_s5 + $0x90] sm:$0xff]  ;;  %v286_v42 = vld [vmem:[%s2197_s5 + $0x198] sm:$0xff] }
  0x48   : > { %v471_v21 = vsel %vm343_vm10, %v279_v4, %v407_v11  ;;  %v440_v22 = vsel %vm312_vm11, %v248_v5, %v376_v12  ;;  %v409_v23 = vmul.f32 0.1, %v281_v16  ;;  %v378_v24 = vmul.f32 0.1, %v250_v17  ;;  %v255_v49 = vld [vmem:[%s2197_s5 + $0x98] sm:$0xff]  ;;  %v287_v52 = vld [vmem:[%s2197_s5 + $0x1a0] sm:$0xff] }
  0x49   : > { %v472_v26 = vsel %vm344_vm12, %v280_v6, %v408_v15  ;;  %vm345_vm14 = vcmp.ge.f32.partialorder %v281_v16, 0.0  ;;  %vm314_vm15 = vcmp.ge.f32.partialorder %v250_v17, 0.0  ;;  %v410_v27 = vmul.f32 0.1, %v282_v18  ;;  %v256_v53 = vld [vmem:[%s2197_s5 + $0xa0] sm:$0xff]  ;;  %v288_v54 = vld [vmem:[%s2197_s5 + $0x1a8] sm:$0xff] }
  0x4a   : > { %1687 = vmatmul.mubr.msk.f32.gmra.mxu0 %vm562_vm6, %v435_v59  ;;  %1735 = vmatmul.mubr.msk.f32.gmra.mxu1 %vm562_vm6, %v467_v61  ;;  %vm346_vm0 = vcmp.ge.f32.partialorder %v282_v18, 0.0  ;;  %v441_v31 = vsel %vm313_vm13, %v249_v13, %v377_v20  ;;  %vm315_vm1 = vcmp.ge.f32.partialorder %v251_v25, 0.0  ;;  %v379_v32 = vmul.f32 0.1, %v251_v25  ;;  %v257_v61 = vld [vmem:[%s2197_s5 + $0xa8] sm:$0xff]  ;;  %v289_v0 = vld [vmem:[%s2197_s5 + $0x1b0] sm:$0xff] }
  0x4b   : > { %1689 = vmatprep.mubr.msk.f32.mxu0 %vm562_vm6, %v436_v62  ;;  %1737 = vmatprep.mubr.msk.f32.mxu1 %vm562_vm6, %v468_v2  ;;  %v473_v33 = vsel %vm345_vm14, %v281_v16, %v409_v23  ;;  %v442_v34 = vsel %vm314_vm15, %v250_v17, %v378_v24  ;;  %v411_v35 = vmul.f32 0.1, %v283_v28  ;;  %v380_v36 = vmul.f32 0.1, %v252_v29  ;;  %v258_v1 = vld [vmem:[%s2197_s5 + $0xb0] sm:$0xff]  ;;  %v290_v2 = vld [vmem:[%s2197_s5 + $0x1b8] sm:$0xff] }
  0x4c   : > { %v474_v38 = vsel %vm346_vm0, %v282_v18, %v410_v27  ;;  %vm347_vm2 = vcmp.ge.f32.partialorder %v283_v28, 0.0  ;;  %vm316_vm3 = vcmp.ge.f32.partialorder %v252_v29, 0.0  ;;  %v412_v39 = vmul.f32 0.1, %v284_v30  ;;  %v291_v12 = vld [vmem:[%s2197_s5 + $0x1c0] sm:$0xff]  ;;  %v293_v24 = vld [vmem:[%s2197_s5 + $0x1d0] sm:$0xff] }
  0x4d   : > { %vm348_vm4 = vcmp.ge.f32.partialorder %v284_v30, 0.0  ;;  %v443_v43 = vsel %vm315_vm1, %v251_v25, %v379_v32  ;;  %vm317_vm5 = vcmp.ge.f32.partialorder %v253_v37, 0.0  ;;  %v381_v44 = vmul.f32 0.1, %v253_v37  ;;  %v260_v13 = vld [vmem:[%s2197_s5 + $0xc0] sm:$0xff]  ;;  %v262_v25 = vld [vmem:[%s2197_s5 + $0xd0] sm:$0xff] }
  0x4e   : > { %1690 = vmatmul.mubr.msk.f32.gmra.mxu0 %vm562_vm6, %v437_v7  ;;  %1738 = vmatmul.mubr.msk.f32.gmra.mxu1 %vm562_vm6, %v469_v9  ;;  %v475_v45 = vsel %vm347_vm2, %v283_v28, %v411_v35  ;;  %v444_v46 = vsel %vm316_vm3, %v252_v29, %v380_v36  ;;  %v413_v47 = vmul.f32 0.1, %v285_v40  ;;  %v382_v48 = vmul.f32 0.1, %v254_v41  ;;  %v259_v9 = vld [vmem:[%s2197_s5 + $0xb8] sm:$0xff]  ;;  %v295_v36 = vld [vmem:[%s2197_s5 + $0x1e0] sm:$0xff] }
  0x4f   : > { %1692 = vmatprep.mubr.msk.f32.mxu0 %vm562_vm6, %v438_v10  ;;  %1740 = vmatprep.mubr.msk.f32.mxu1 %vm562_vm6, %v470_v14  ;;  %v476_v50 = vsel %vm348_vm4, %v284_v30, %v412_v39  ;;  %vm349_vm7 = vcmp.ge.f32.partialorder %v285_v40, 0.0  ;;  %vm318_vm8 = vcmp.ge.f32.partialorder %v254_v41, 0.0  ;;  %v414_v51 = vmul.f32 0.1, %v286_v42  ;;  %v292_v14 = vld [vmem:[%s2197_s5 + $0x1c8] sm:$0xff] }
  0x50   : > { %vm350_vm9 = vcmp.ge.f32.partialorder %v286_v42, 0.0  ;;  %v445_v55 = vsel %vm317_vm5, %v253_v37, %v381_v44  ;;  %vm319_vm10 = vcmp.ge.f32.partialorder %v255_v49, 0.0  ;;  %v383_v56 = vmul.f32 0.1, %v255_v49  ;;  %v264_v37 = vld [vmem:[%s2197_s5 + $0xe0] sm:$0xff] }
  0x51   : > { %v477_v57 = vsel %vm349_vm7, %v285_v40, %v413_v47  ;;  %v446_v58 = vsel %vm318_vm8, %v254_v41, %v382_v48  ;;  %v415_v59 = vmul.f32 0.1, %v287_v52  ;;  %v384_v60 = vmul.f32 0.1, %v256_v53  ;;  %v297_v48 = vld [vmem:[%s2197_s5 + $0x1f0] sm:$0xff] }
  0x52   : > { %1693 = vmatmul.mubr.msk.f32.gmra.mxu0 %vm562_vm6, %v439_v19  ;;  %1741 = vmatmul.mubr.msk.f32.gmra.mxu1 %vm562_vm6, %v471_v21  ;;  %v478_v62 = vsel %vm350_vm9, %v286_v42, %v414_v51  ;;  %vm351_vm11 = vcmp.ge.f32.partialorder %v287_v52, 0.0  ;;  %vm320_vm12 = vcmp.ge.f32.partialorder %v256_v53, 0.0  ;;  %v416_v63 = vmul.f32 0.1, %v288_v54  ;;  %v261_v21 = vld [vmem:[%s2197_s5 + $0xc8] sm:$0xff] }
  0x53   : > { %1695 = vmatprep.mubr.msk.f32.mxu0 %vm562_vm6, %v440_v22  ;;  %1743 = vmatprep.mubr.msk.f32.mxu1 %vm562_vm6, %v472_v26  ;;  %vm352_vm13 = vcmp.ge.f32.partialorder %v288_v54, 0.0  ;;  %v447_v3 = vsel %vm319_vm10, %v255_v49, %v383_v56  ;;  %vm321_vm14 = vcmp.ge.f32.partialorder %v257_v61, 0.0  ;;  %v385_v4 = vmul.f32 0.1, %v257_v61  ;;  %v294_v26 = vld [vmem:[%s2197_s5 + $0x1d8] sm:$0xff]  ;;  %v266_v49 = vld [vmem:[%s2197_s5 + $0xf0] sm:$0xff] }
  0x54   : > { %v479_v5 = vsel %vm351_vm11, %v287_v52, %v415_v59  ;;  %v448_v6 = vsel %vm320_vm12, %v256_v53, %v384_v60  ;;  %v417_v7 = vmul.f32 0.1, %v289_v0  ;;  %v386_v8 = vmul.f32 0.1, %v258_v1  ;;  %v267_v56 = vld [vmem:[%s2197_s5 + $0xf8] sm:$0xff]  ;;  %v299_v60 = vld [vmem:[%s2197_s5 + $0x200] sm:$0xff] }
  0x55   : > { %v480_v10 = vsel %vm352_vm13, %v288_v54, %v416_v63  ;;  %vm353_vm15 = vcmp.ge.f32.partialorder %v289_v0, 0.0  ;;  %vm322_vm0 = vcmp.ge.f32.partialorder %v258_v1, 0.0  ;;  %v418_v11 = vmul.f32 0.1, %v290_v2 }
  0x56   : > { %1696 = vmatmul.mubr.msk.f32.gmra.mxu0 %vm562_vm6, %v441_v31  ;;  %1744 = vmatmul.mubr.msk.f32.gmra.mxu1 %vm562_vm6, %v473_v33  ;;  %vm354_vm1 = vcmp.ge.f32.partialorder %v290_v2, 0.0  ;;  %v449_v15 = vsel %vm321_vm14, %v257_v61, %v385_v4  ;;  %vm323_vm2 = vcmp.ge.f32.partialorder %v259_v9, 0.0  ;;  %v387_v16 = vmul.f32 0.1, %v259_v9  ;;  %v263_v33 = vld [vmem:[%s2197_s5 + $0xd8] sm:$0xff] }
  0x57   : > { %1698 = vmatprep.mubr.msk.f32.mxu0 %vm562_vm6, %v442_v34  ;;  %1746 = vmatprep.mubr.msk.f32.mxu1 %vm562_vm6, %v474_v38  ;;  %v481_v17 = vsel %vm353_vm15, %v289_v0, %v417_v7  ;;  %v450_v18 = vsel %vm322_vm0, %v258_v1, %v386_v8  ;;  %v419_v19 = vmul.f32 0.1, %v291_v12  ;;  %v388_v20 = vmul.f32 0.1, %v260_v13  ;;  %v296_v38 = vld [vmem:[%s2197_s5 + $0x1e8] sm:$0xff] }
  0x58   : > { %v482_v22 = vsel %vm354_vm1, %v290_v2, %v418_v11  ;;  %vm355_vm3 = vcmp.ge.f32.partialorder %v291_v12, 0.0  ;;  %vm324_vm4 = vcmp.ge.f32.partialorder %v260_v13, 0.0  ;;  %v420_v23 = vmul.f32 0.1, %v292_v14 }
  0x59   : > { %vm356_vm5 = vcmp.ge.f32.partialorder %v292_v14, 0.0  ;;  %v451_v27 = vsel %vm323_vm2, %v259_v9, %v387_v16  ;;  %vm325_vm7 = vcmp.ge.f32.partialorder %v261_v21, 0.0  ;;  %v389_v28 = vmul.f32 0.1, %v261_v21  ;;  %v492_v9 = vld [vmem:[%s3330_s3] sm:$0xff]  ;;  %v527_v16 = vld [vmem:[%s3330_s3 + $0x118] sm:$0xff] }
  0x5a   : > { %1699 = vmatmul.mubr.msk.f32.gmra.mxu0 %vm562_vm6, %v443_v43  ;;  %1747 = vmatmul.mubr.msk.f32.gmra.mxu1 %vm562_vm6, %v475_v45  ;;  %v483_v29 = vsel %vm355_vm3, %v291_v12, %v419_v19  ;;  %v452_v30 = vsel %vm324_vm4, %v260_v13, %v388_v20  ;;  %v421_v31 = vmul.f32 0.1, %v293_v24  ;;  %v390_v32 = vmul.f32 0.1, %v262_v25  ;;  %v265_v45 = vld [vmem:[%s2197_s5 + $0xe8] sm:$0xff] }
  0x5b   : > { %1701 = vmatprep.mubr.msk.f32.mxu0 %vm562_vm6, %v444_v46  ;;  %1749 = vmatprep.mubr.msk.f32.mxu1 %vm562_vm6, %v476_v50  ;;  %v484_v34 = vsel %vm356_vm5, %v292_v14, %v420_v23  ;;  %vm357_vm8 = vcmp.ge.f32.partialorder %v293_v24, 0.0  ;;  %vm326_vm9 = vcmp.ge.f32.partialorder %v262_v25, 0.0  ;;  %v422_v35 = vmul.f32 0.1, %v294_v26  ;;  %v298_v50 = vld [vmem:[%s2197_s5 + $0x1f8] sm:$0xff] }
  0x5c   : > { %vm358_vm10 = vcmp.ge.f32.partialorder %v294_v26, 0.0  ;;  %v453_v39 = vsel %vm325_vm7, %v261_v21, %v389_v28  ;;  %vm327_vm11 = vcmp.ge.f32.partialorder %v263_v33, 0.0  ;;  %v391_v40 = vmul.f32 0.1, %v263_v33  ;;  %v494_v21 = vld [vmem:[%s3330_s3 + $0x10] sm:$0xff]  ;;  %v529_v28 = vld [vmem:[%s3330_s3 + $0x128] sm:$0xff] }
  0x5d   : > { %v485_v41 = vsel %vm357_vm8, %v293_v24, %v421_v31  ;;  %v454_v42 = vsel %vm326_vm9, %v262_v25, %v390_v32  ;;  %v423_v43 = vmul.f32 0.1, %v295_v36  ;;  %v392_v44 = vmul.f32 0.1, %v264_v37 }
  0x5e   : > { %1702 = vmatmul.mubr.msk.f32.gmra.mxu0 %vm562_vm6, %v445_v55  ;;  %1750 = vmatmul.mubr.msk.f32.gmra.mxu1 %vm562_vm6, %v477_v57  ;;  %v486_v46 = vsel %vm358_vm10, %v294_v26, %v422_v35  ;;  %vm359_vm12 = vcmp.ge.f32.partialorder %v295_v36, 0.0  ;;  %vm328_vm13 = vcmp.ge.f32.partialorder %v264_v37, 0.0  ;;  %v424_v47 = vmul.f32 0.1, %v296_v38 }
  0x5f   : > { %1704 = vmatprep.mubr.msk.f32.mxu0 %vm562_vm6, %v446_v58  ;;  %1752 = vmatprep.mubr.msk.f32.mxu1 %vm562_vm6, %v478_v62  ;;  %vm360_vm14 = vcmp.ge.f32.partialorder %v296_v38, 0.0  ;;  %v455_v51 = vsel %vm327_vm11, %v263_v33, %v391_v40  ;;  %vm329_vm15 = vcmp.ge.f32.partialorder %v265_v45, 0.0  ;;  %v487_v52 = vsel %vm359_vm12, %v295_v36, %v423_v43  ;;  %v496_v33 = vld [vmem:[%s3330_s3 + $0x20] sm:$0xff]  ;;  %v531_v40 = vld [vmem:[%s3330_s3 + $0x138] sm:$0xff] }
  0x60   : > { %v456_v53 = vsel %vm328_vm13, %v264_v37, %v392_v44  ;;  %v393_v54 = vmul.f32 0.1, %v265_v45  ;;  %v425_v55 = vmul.f32 0.1, %v297_v48  ;;  %v488_v57 = vsel %vm360_vm14, %v296_v38, %v424_v47 }
  0x61   : > { %vm361_vm0 = vcmp.ge.f32.partialorder %v297_v48, 0.0  ;;  %v394_v58 = vmul.f32 0.1, %v266_v49  ;;  %v426_v59 = vmul.f32 0.1, %v298_v50  ;;  %vm330_vm1 = vcmp.ge.f32.partialorder %v266_v49, 0.0 }
  0x62   : > { %1705 = vmatmul.mubr.msk.f32.gmra.mxu0 %vm562_vm6, %v447_v3  ;;  %1753 = vmatmul.mubr.msk.f32.gmra.mxu1 %vm562_vm6, %v479_v5  ;;  %vm362_vm2 = vcmp.ge.f32.partialorder %v298_v50, 0.0  ;;  %v457_v61 = vsel %vm329_vm15, %v265_v45, %v393_v54  ;;  %v489_v62 = vsel %vm361_vm0, %v297_v48, %v425_v55  ;;  %v395_v63 = vmul.f32 0.1, %v267_v56  ;;  %v493_v5 = vld [vmem:[%s3330_s3 + $0x8] sm:$0xff]  ;;  %v498_v45 = vld [vmem:[%s3330_s3 + $0x30] sm:$0xff] }
  0x63   : > { %1707 = vmatprep.mubr.msk.f32.mxu0 %vm562_vm6, %v448_v6  ;;  %1755 = vmatprep.mubr.msk.f32.mxu1 %vm562_vm6, %v480_v10  ;;  %v427_v0 = vmul.f32 0.1, %v299_v60  ;;  %v458_v1 = vsel %vm330_vm1, %v266_v49, %v394_v58  ;;  %v490_v2 = vsel %vm362_vm2, %v298_v50, %v426_v59  ;;  %vm331_vm3 = vcmp.ge.f32.partialorder %v267_v56, 0.0  ;;  %v525_v6 = vld [vmem:[%s3330_s3 + $0x108] sm:$0xff]  ;;  %v524_v10 = vld [vmem:[%s3330_s3 + $0x100] sm:$0xff] }
  0x64   : > { %vm363_vm4 = vcmp.ge.f32.partialorder %v299_v60, 0.0  ;;  %v459_v3 = vsel %vm331_vm3, %v267_v56, %v395_v63  ;;  %v532_v58 = vld [vmem:[%s3330_s3 + $0x140] sm:$0xff]  ;;  %v503_v63 = vld [vmem:[%s3330_s3 + $0x58] sm:$0xff] }
  0x65   : > { %v491_v4 = vsel %vm363_vm4, %v299_v60, %v427_v0  ;;  %v535_v0 = vld [vmem:[%s3330_s3 + $0x158] sm:$0xff] }
  0x66   : > { %1708 = vmatmul.mubr.msk.f32.gmra.mxu0 %vm562_vm6, %v449_v15  ;;  %1756 = vmatmul.mubr.msk.f32.gmra.mxu1 %vm562_vm6, %v481_v17  ;;  %v495_v15 = vld [vmem:[%s3330_s3 + $0x18] sm:$0xff] }
  0x67   : > { %1710 = vmatprep.mubr.msk.f32.mxu0 %vm562_vm6, %v450_v18  ;;  %1758 = vmatprep.mubr.msk.f32.mxu1 %vm562_vm6, %v482_v22  ;;  %v526_v22 = vld [vmem:[%s3330_s3 + $0x110] sm:$0xff] }
  0x6a   : > { %1711 = vmatmul.mubr.msk.f32.gmra.mxu0 %vm562_vm6, %v451_v27  ;;  %1759 = vmatmul.mubr.msk.f32.gmra.mxu1 %vm562_vm6, %v483_v29  ;;  %v497_v27 = vld [vmem:[%s3330_s3 + $0x28] sm:$0xff] }
  0x6b   : > { %1713 = vmatprep.mubr.msk.f32.mxu0 %vm562_vm6, %v452_v30  ;;  %1761 = vmatprep.mubr.msk.f32.mxu1 %vm562_vm6, %v484_v34  ;;  %v528_v34 = vld [vmem:[%s3330_s3 + $0x120] sm:$0xff] }
  0x6e   : > { %1714 = vmatmul.mubr.msk.f32.gmra.mxu0 %vm562_vm6, %v453_v39  ;;  %1762 = vmatmul.mubr.msk.f32.gmra.mxu1 %vm562_vm6, %v485_v41  ;;  %v499_v39 = vld [vmem:[%s3330_s3 + $0x38] sm:$0xff] }
  0x6f   : > { %1716 = vmatprep.mubr.msk.f32.mxu0 %vm562_vm6, %v454_v42  ;;  %1764 = vmatprep.mubr.msk.f32.mxu1 %vm562_vm6, %v486_v46  ;;  %v530_v46 = vld [vmem:[%s3330_s3 + $0x130] sm:$0xff] }
  0x72   : > { %1717 = vmatmul.mubr.msk.f32.gmra.mxu0 %vm562_vm6, %v455_v51  ;;  %1765 = vmatmul.mubr.msk.f32.gmra.mxu1 %vm562_vm6, %v487_v52  ;;  %v501_v51 = vld [vmem:[%s3330_s3 + $0x48] sm:$0xff] }
  0x73   : > { %1719 = vmatprep.mubr.msk.f32.mxu0 %vm562_vm6, %v456_v53  ;;  %1767 = vmatprep.mubr.msk.f32.mxu1 %vm562_vm6, %v488_v57  ;;  %v533_v52 = vld [vmem:[%s3330_s3 + $0x148] sm:$0xff]  ;;  %v500_v57 = vld [vmem:[%s3330_s3 + $0x40] sm:$0xff] }
  0x76   : > { %1720 = vmatmul.mubr.msk.f32.gmra.mxu0 %vm562_vm6, %v457_v61  ;;  %1768 = vmatmul.mubr.msk.f32.gmra.mxu1 %vm562_vm6, %v489_v62 }
  0x77   : > { %1722 = vmatprep.mubr.msk.f32.mxu0 %vm562_vm6, %v458_v1  ;;  %1770 = vmatprep.mubr.msk.f32.mxu1 %vm562_vm6, %v490_v2 }
  0x7a   : > { %1723 = vmatmul.mubr.msk.f32.gmra.mxu0 %vm562_vm6, %v459_v3  ;;  %1771 = vmatmul.mubr.msk.f32.gmra.mxu1 %vm562_vm6, %v491_v4 }
  0xfe   : > { %v1679_v7 = vpop.f32.mrf.mxu0  ;;  %v1727_v8 = vpop.f32.mrf.mxu1 }
  0xff   : > { %v1141_v11 = vadd.f32 %v1679_v7, %v493_v5  ;;  %v1173_v12 = vadd.f32 %v1727_v8, %v525_v6  ;;  %v502_v5 = vld [vmem:[%s3330_s3 + $0x50] sm:$0xff] }
 0x100   : > { %v821_v13 = vpop.f32.mrf.mxu0  ;;  %v981_v14 = vpop.f32.mrf.mxu1  ;;  %v534_v6 = vld [vmem:[%s3330_s3 + $0x150] sm:$0xff] }
 0x101   : > { %1205 = vst.msk [vmem:[%s3330_s3 + $0x8] sm:$0xff] %vm562_vm6, %v1141_v11  ;;  %1237 = vst.msk [vmem:[%s3330_s3 + $0x108] sm:$0xff] %vm562_vm6, %v1173_v12  ;;  %v1140_v17 = vadd.f32 %v821_v13, %v492_v9  ;;  %v1172_v18 = vadd.f32 %v981_v14, %v524_v10  ;;  %v505_v11 = vld [vmem:[%s3330_s3 + $0x68] sm:$0xff] }
 0x102   : > { %v1682_v19 = vpop.f32.mrf.mxu0  ;;  %v1730_v20 = vpop.f32.mrf.mxu1  ;;  %v537_v12 = vld [vmem:[%s3330_s3 + $0x168] sm:$0xff] }
 0x103   : > { %1204 = vst.msk [vmem:[%s3330_s3] sm:$0xff] %vm562_vm6, %v1140_v17  ;;  %1236 = vst.msk [vmem:[%s3330_s3 + $0x100] sm:$0xff] %vm562_vm6, %v1172_v18  ;;  %v1143_v23 = vadd.f32 %v1682_v19, %v495_v15  ;;  %v1175_v24 = vadd.f32 %v1730_v20, %v527_v16  ;;  %v504_v17 = vld [vmem:[%s3330_s3 + $0x60] sm:$0xff] }
 0x104   : > { %v831_v25 = vpop.f32.mrf.mxu0  ;;  %v991_v26 = vpop.f32.mrf.mxu1  ;;  %v536_v18 = vld [vmem:[%s3330_s3 + $0x160] sm:$0xff] }
 0x105   : > { %1207 = vst.msk [vmem:[%s3330_s3 + $0x18] sm:$0xff] %vm562_vm6, %v1143_v23  ;;  %1239 = vst.msk [vmem:[%s3330_s3 + $0x118] sm:$0xff] %vm562_vm6, %v1175_v24  ;;  %v1142_v29 = vadd.f32 %v831_v25, %v494_v21  ;;  %v1174_v30 = vadd.f32 %v991_v26, %v526_v22  ;;  %v507_v23 = vld [vmem:[%s3330_s3 + $0x78] sm:$0xff] }
 0x106   : > { %v1685_v31 = vpop.f32.mrf.mxu0  ;;  %v1733_v32 = vpop.f32.mrf.mxu1  ;;  %v539_v24 = vld [vmem:[%s3330_s3 + $0x178] sm:$0xff] }
 0x107   : > { %1206 = vst.msk [vmem:[%s3330_s3 + $0x10] sm:$0xff] %vm562_vm6, %v1142_v29  ;;  %1238 = vst.msk [vmem:[%s3330_s3 + $0x110] sm:$0xff] %vm562_vm6, %v1174_v30  ;;  %v1145_v35 = vadd.f32 %v1685_v31, %v497_v27  ;;  %v1177_v36 = vadd.f32 %v1733_v32, %v529_v28  ;;  %v506_v29 = vld [vmem:[%s3330_s3 + $0x70] sm:$0xff] }
 0x108   : > { %v841_v37 = vpop.f32.mrf.mxu0  ;;  %v1001_v38 = vpop.f32.mrf.mxu1  ;;  %v538_v30 = vld [vmem:[%s3330_s3 + $0x170] sm:$0xff] }
 0x109   : > { %1209 = vst.msk [vmem:[%s3330_s3 + $0x28] sm:$0xff] %vm562_vm6, %v1145_v35  ;;  %1241 = vst.msk [vmem:[%s3330_s3 + $0x128] sm:$0xff] %vm562_vm6, %v1177_v36  ;;  %v1144_v41 = vadd.f32 %v841_v37, %v496_v33  ;;  %v1176_v42 = vadd.f32 %v1001_v38, %v528_v34  ;;  %v509_v35 = vld [vmem:[%s3330_s3 + $0x88] sm:$0xff] }
 0x10a   : > { %v1688_v43 = vpop.f32.mrf.mxu0  ;;  %v1736_v44 = vpop.f32.mrf.mxu1  ;;  %v541_v36 = vld [vmem:[%s3330_s3 + $0x188] sm:$0xff] }
 0x10b   : > { %1208 = vst.msk [vmem:[%s3330_s3 + $0x20] sm:$0xff] %vm562_vm6, %v1144_v41  ;;  %1240 = vst.msk [vmem:[%s3330_s3 + $0x120] sm:$0xff] %vm562_vm6, %v1176_v42  ;;  %v1147_v47 = vadd.f32 %v1688_v43, %v499_v39  ;;  %v1179_v48 = vadd.f32 %v1736_v44, %v531_v40  ;;  %v508_v41 = vld [vmem:[%s3330_s3 + $0x80] sm:$0xff] }
 0x10c   : > { %v851_v49 = vpop.f32.mrf.mxu0  ;;  %v1011_v50 = vpop.f32.mrf.mxu1  ;;  %v540_v42 = vld [vmem:[%s3330_s3 + $0x180] sm:$0xff] }
 0x10d   : > { %1211 = vst.msk [vmem:[%s3330_s3 + $0x38] sm:$0xff] %vm562_vm6, %v1147_v47  ;;  %1243 = vst.msk [vmem:[%s3330_s3 + $0x138] sm:$0xff] %vm562_vm6, %v1179_v48  ;;  %v1146_v53 = vadd.f32 %v851_v49, %v498_v45  ;;  %v1178_v54 = vadd.f32 %v1011_v50, %v530_v46  ;;  %v511_v47 = vld [vmem:[%s3330_s3 + $0x98] sm:$0xff] }
 0x10e   : > { %v1691_v55 = vpop.f32.mrf.mxu0  ;;  %v1739_v56 = vpop.f32.mrf.mxu1  ;;  %v543_v48 = vld [vmem:[%s3330_s3 + $0x198] sm:$0xff] }
 0x10f   : > { %1210 = vst.msk [vmem:[%s3330_s3 + $0x30] sm:$0xff] %vm562_vm6, %v1146_v53  ;;  %1242 = vst.msk [vmem:[%s3330_s3 + $0x130] sm:$0xff] %vm562_vm6, %v1178_v54  ;;  %v1149_v59 = vadd.f32 %v1691_v55, %v501_v51  ;;  %v1181_v60 = vadd.f32 %v1739_v56, %v533_v52  ;;  %v510_v53 = vld [vmem:[%s3330_s3 + $0x90] sm:$0xff] }
 0x110   : > { %v861_v61 = vpop.f32.mrf.mxu0  ;;  %v1021_v62 = vpop.f32.mrf.mxu1  ;;  %v542_v54 = vld [vmem:[%s3330_s3 + $0x190] sm:$0xff] }
 0x111   : > { %1213 = vst.msk [vmem:[%s3330_s3 + $0x48] sm:$0xff] %vm562_vm6, %v1149_v59  ;;  %1245 = vst.msk [vmem:[%s3330_s3 + $0x148] sm:$0xff] %vm562_vm6, %v1181_v60  ;;  %v1148_v1 = vadd.f32 %v861_v61, %v500_v57  ;;  %v1180_v2 = vadd.f32 %v1021_v62, %v532_v58  ;;  %v513_v59 = vld [vmem:[%s3330_s3 + $0xa8] sm:$0xff] }
 0x112   : > { %v1694_v3 = vpop.f32.mrf.mxu0  ;;  %v1742_v4 = vpop.f32.mrf.mxu1  ;;  %v545_v60 = vld [vmem:[%s3330_s3 + $0x1a8] sm:$0xff] }
 0x113   : > { %1212 = vst.msk [vmem:[%s3330_s3 + $0x40] sm:$0xff] %vm562_vm6, %v1148_v1  ;;  %1244 = vst.msk [vmem:[%s3330_s3 + $0x140] sm:$0xff] %vm562_vm6, %v1180_v2  ;;  %v1151_v7 = vadd.f32 %v1694_v3, %v503_v63  ;;  %v1183_v8 = vadd.f32 %v1742_v4, %v535_v0  ;;  %v512_v1 = vld [vmem:[%s3330_s3 + $0xa0] sm:$0xff] }
 0x114   : > { %v871_v9 = vpop.f32.mrf.mxu0  ;;  %v1031_v10 = vpop.f32.mrf.mxu1  ;;  %v544_v2 = vld [vmem:[%s3330_s3 + $0x1a0] sm:$0xff] }
 0x115   : > { %1215 = vst.msk [vmem:[%s3330_s3 + $0x58] sm:$0xff] %vm562_vm6, %v1151_v7  ;;  %1247 = vst.msk [vmem:[%s3330_s3 + $0x158] sm:$0xff] %vm562_vm6, %v1183_v8  ;;  %v1150_v13 = vadd.f32 %v871_v9, %v502_v5  ;;  %v1182_v14 = vadd.f32 %v1031_v10, %v534_v6  ;;  %v515_v7 = vld [vmem:[%s3330_s3 + $0xb8] sm:$0xff] }
 0x116   : > { %v1697_v15 = vpop.f32.mrf.mxu0  ;;  %v1745_v16 = vpop.f32.mrf.mxu1  ;;  %v547_v8 = vld [vmem:[%s3330_s3 + $0x1b8] sm:$0xff] }
 0x117   : > { %1214 = vst.msk [vmem:[%s3330_s3 + $0x50] sm:$0xff] %vm562_vm6, %v1150_v13  ;;  %1246 = vst.msk [vmem:[%s3330_s3 + $0x150] sm:$0xff] %vm562_vm6, %v1182_v14  ;;  %v1153_v19 = vadd.f32 %v1697_v15, %v505_v11  ;;  %v1185_v20 = vadd.f32 %v1745_v16, %v537_v12  ;;  %v514_v13 = vld [vmem:[%s3330_s3 + $0xb0] sm:$0xff] }
 0x118   : > { %v881_v21 = vpop.f32.mrf.mxu0  ;;  %v1041_v22 = vpop.f32.mrf.mxu1  ;;  %v546_v14 = vld [vmem:[%s3330_s3 + $0x1b0] sm:$0xff] }
 0x119   : > { %1217 = vst.msk [vmem:[%s3330_s3 + $0x68] sm:$0xff] %vm562_vm6, %v1153_v19  ;;  %1249 = vst.msk [vmem:[%s3330_s3 + $0x168] sm:$0xff] %vm562_vm6, %v1185_v20  ;;  %v1152_v25 = vadd.f32 %v881_v21, %v504_v17  ;;  %v1184_v26 = vadd.f32 %v1041_v22, %v536_v18  ;;  %v517_v19 = vld [vmem:[%s3330_s3 + $0xc8] sm:$0xff] }
 0x11a   : > { %v1700_v27 = vpop.f32.mrf.mxu0  ;;  %v1748_v28 = vpop.f32.mrf.mxu1  ;;  %v549_v20 = vld [vmem:[%s3330_s3 + $0x1c8] sm:$0xff] }
 0x11b   : > { %1216 = vst.msk [vmem:[%s3330_s3 + $0x60] sm:$0xff] %vm562_vm6, %v1152_v25  ;;  %1248 = vst.msk [vmem:[%s3330_s3 + $0x160] sm:$0xff] %vm562_vm6, %v1184_v26  ;;  %v1155_v31 = vadd.f32 %v1700_v27, %v507_v23  ;;  %v1187_v32 = vadd.f32 %v1748_v28, %v539_v24  ;;  %v516_v25 = vld [vmem:[%s3330_s3 + $0xc0] sm:$0xff] }
 0x11c   : > { %v891_v33 = vpop.f32.mrf.mxu0  ;;  %v1051_v34 = vpop.f32.mrf.mxu1  ;;  %v548_v26 = vld [vmem:[%s3330_s3 + $0x1c0] sm:$0xff] }
 0x11d   : > { %1219 = vst.msk [vmem:[%s3330_s3 + $0x78] sm:$0xff] %vm562_vm6, %v1155_v31  ;;  %1251 = vst.msk [vmem:[%s3330_s3 + $0x178] sm:$0xff] %vm562_vm6, %v1187_v32  ;;  %v1154_v37 = vadd.f32 %v891_v33, %v506_v29  ;;  %v1186_v38 = vadd.f32 %v1051_v34, %v538_v30  ;;  %v519_v31 = vld [vmem:[%s3330_s3 + $0xd8] sm:$0xff] }
 0x11e   : > { %v1703_v39 = vpop.f32.mrf.mxu0  ;;  %v1751_v40 = vpop.f32.mrf.mxu1  ;;  %v551_v32 = vld [vmem:[%s3330_s3 + $0x1d8] sm:$0xff] }
 0x11f   : > { %1218 = vst.msk [vmem:[%s3330_s3 + $0x70] sm:$0xff] %vm562_vm6, %v1154_v37  ;;  %1250 = vst.msk [vmem:[%s3330_s3 + $0x170] sm:$0xff] %vm562_vm6, %v1186_v38  ;;  %v1157_v43 = vadd.f32 %v1703_v39, %v509_v35  ;;  %v1189_v44 = vadd.f32 %v1751_v40, %v541_v36  ;;  %v518_v37 = vld [vmem:[%s3330_s3 + $0xd0] sm:$0xff] }
 0x120   : > { %v901_v45 = vpop.f32.mrf.mxu0  ;;  %v1061_v46 = vpop.f32.mrf.mxu1  ;;  %v550_v38 = vld [vmem:[%s3330_s3 + $0x1d0] sm:$0xff] }
 0x121   : > { %1221 = vst.msk [vmem:[%s3330_s3 + $0x88] sm:$0xff] %vm562_vm6, %v1157_v43  ;;  %1253 = vst.msk [vmem:[%s3330_s3 + $0x188] sm:$0xff] %vm562_vm6, %v1189_v44  ;;  %v1156_v49 = vadd.f32 %v901_v45, %v508_v41  ;;  %v1188_v50 = vadd.f32 %v1061_v46, %v540_v42  ;;  %v521_v43 = vld [vmem:[%s3330_s3 + $0xe8] sm:$0xff] }
 0x122   : > { %v1706_v51 = vpop.f32.mrf.mxu0  ;;  %v1754_v52 = vpop.f32.mrf.mxu1  ;;  %v553_v44 = vld [vmem:[%s3330_s3 + $0x1e8] sm:$0xff] }
 0x123   : > { %1220 = vst.msk [vmem:[%s3330_s3 + $0x80] sm:$0xff] %vm562_vm6, %v1156_v49  ;;  %1252 = vst.msk [vmem:[%s3330_s3 + $0x180] sm:$0xff] %vm562_vm6, %v1188_v50  ;;  %v1159_v55 = vadd.f32 %v1706_v51, %v511_v47  ;;  %v1191_v56 = vadd.f32 %v1754_v52, %v543_v48  ;;  %v520_v49 = vld [vmem:[%s3330_s3 + $0xe0] sm:$0xff] }
 0x124   : > { %v911_v57 = vpop.f32.mrf.mxu0  ;;  %v1071_v58 = vpop.f32.mrf.mxu1  ;;  %v552_v50 = vld [vmem:[%s3330_s3 + $0x1e0] sm:$0xff] }
 0x125   : > { %1223 = vst.msk [vmem:[%s3330_s3 + $0x98] sm:$0xff] %vm562_vm6, %v1159_v55  ;;  %1255 = vst.msk [vmem:[%s3330_s3 + $0x198] sm:$0xff] %vm562_vm6, %v1191_v56  ;;  %v1158_v61 = vadd.f32 %v911_v57, %v510_v53  ;;  %v1190_v62 = vadd.f32 %v1071_v58, %v542_v54  ;;  %v523_v55 = vld [vmem:[%s3330_s3 + $0xf8] sm:$0xff] }
 0x126   : > { %v1709_v63 = vpop.f32.mrf.mxu0  ;;  %v1757_v0 = vpop.f32.mrf.mxu1  ;;  %v555_v56 = vld [vmem:[%s3330_s3 + $0x1f8] sm:$0xff] }
 0x127   : > { %1222 = vst.msk [vmem:[%s3330_s3 + $0x90] sm:$0xff] %vm562_vm6, %v1158_v61  ;;  %1254 = vst.msk [vmem:[%s3330_s3 + $0x190] sm:$0xff] %vm562_vm6, %v1190_v62  ;;  %v1161_v3 = vadd.f32 %v1709_v63, %v513_v59  ;;  %v1193_v4 = vadd.f32 %v1757_v0, %v545_v60  ;;  %v522_v61 = vld [vmem:[%s3330_s3 + $0xf0] sm:$0xff] }
 0x128   : > { %v921_v5 = vpop.f32.mrf.mxu0  ;;  %v1081_v6 = vpop.f32.mrf.mxu1  ;;  %v554_v62 = vld [vmem:[%s3330_s3 + $0x1f0] sm:$0xff] }
 0x129   : > { %1225 = vst.msk [vmem:[%s3330_s3 + $0xa8] sm:$0xff] %vm562_vm6, %v1161_v3  ;;  %1257 = vst.msk [vmem:[%s3330_s3 + $0x1a8] sm:$0xff] %vm562_vm6, %v1193_v4  ;;  %v1160_v9 = vadd.f32 %v921_v5, %v512_v1  ;;  %v1192_v10 = vadd.f32 %v1081_v6, %v544_v2 }
 0x12a   : > { %v1712_v11 = vpop.f32.mrf.mxu0  ;;  %v1760_v12 = vpop.f32.mrf.mxu1 }
 0x12b   : > { %1224 = vst.msk [vmem:[%s3330_s3 + $0xa0] sm:$0xff] %vm562_vm6, %v1160_v9  ;;  %1256 = vst.msk [vmem:[%s3330_s3 + $0x1a0] sm:$0xff] %vm562_vm6, %v1192_v10  ;;  %v1163_v15 = vadd.f32 %v1712_v11, %v515_v7  ;;  %v1195_v16 = vadd.f32 %v1760_v12, %v547_v8 }
 0x12c   : > { %v931_v17 = vpop.f32.mrf.mxu0  ;;  %v1091_v18 = vpop.f32.mrf.mxu1 }
 0x12d   : > { %1227 = vst.msk [vmem:[%s3330_s3 + $0xb8] sm:$0xff] %vm562_vm6, %v1163_v15  ;;  %1259 = vst.msk [vmem:[%s3330_s3 + $0x1b8] sm:$0xff] %vm562_vm6, %v1195_v16  ;;  %v1162_v21 = vadd.f32 %v931_v17, %v514_v13  ;;  %v1194_v22 = vadd.f32 %v1091_v18, %v546_v14 }
 0x12e   : > { %v1715_v23 = vpop.f32.mrf.mxu0  ;;  %v1763_v24 = vpop.f32.mrf.mxu1 }
 0x12f   : > { %1226 = vst.msk [vmem:[%s3330_s3 + $0xb0] sm:$0xff] %vm562_vm6, %v1162_v21  ;;  %1258 = vst.msk [vmem:[%s3330_s3 + $0x1b0] sm:$0xff] %vm562_vm6, %v1194_v22  ;;  %v1165_v27 = vadd.f32 %v1715_v23, %v517_v19  ;;  %v1197_v28 = vadd.f32 %v1763_v24, %v549_v20 }
 0x130   : > { %v941_v29 = vpop.f32.mrf.mxu0  ;;  %v1101_v30 = vpop.f32.mrf.mxu1 }
 0x131   : > { %1229 = vst.msk [vmem:[%s3330_s3 + $0xc8] sm:$0xff] %vm562_vm6, %v1165_v27  ;;  %1261 = vst.msk [vmem:[%s3330_s3 + $0x1c8] sm:$0xff] %vm562_vm6, %v1197_v28  ;;  %v1164_v33 = vadd.f32 %v941_v29, %v516_v25  ;;  %v1196_v34 = vadd.f32 %v1101_v30, %v548_v26 }
 0x132   : > { %v1718_v35 = vpop.f32.mrf.mxu0  ;;  %v1766_v36 = vpop.f32.mrf.mxu1 }
 0x133   : > { %1228 = vst.msk [vmem:[%s3330_s3 + $0xc0] sm:$0xff] %vm562_vm6, %v1164_v33  ;;  %1260 = vst.msk [vmem:[%s3330_s3 + $0x1c0] sm:$0xff] %vm562_vm6, %v1196_v34  ;;  %v1167_v39 = vadd.f32 %v1718_v35, %v519_v31  ;;  %v1199_v40 = vadd.f32 %v1766_v36, %v551_v32 }
 0x134   : > { %v951_v41 = vpop.f32.mrf.mxu0  ;;  %v1111_v42 = vpop.f32.mrf.mxu1 }
 0x135   : > { %1231 = vst.msk [vmem:[%s3330_s3 + $0xd8] sm:$0xff] %vm562_vm6, %v1167_v39  ;;  %1263 = vst.msk [vmem:[%s3330_s3 + $0x1d8] sm:$0xff] %vm562_vm6, %v1199_v40  ;;  %v1166_v45 = vadd.f32 %v951_v41, %v518_v37  ;;  %v1198_v46 = vadd.f32 %v1111_v42, %v550_v38 }
 0x136   : > { %v1721_v47 = vpop.f32.mrf.mxu0  ;;  %v1769_v48 = vpop.f32.mrf.mxu1 }
 0x137   : > { %1230 = vst.msk [vmem:[%s3330_s3 + $0xd0] sm:$0xff] %vm562_vm6, %v1166_v45  ;;  %1262 = vst.msk [vmem:[%s3330_s3 + $0x1d0] sm:$0xff] %vm562_vm6, %v1198_v46  ;;  %v1169_v51 = vadd.f32 %v1721_v47, %v521_v43  ;;  %v1201_v52 = vadd.f32 %v1769_v48, %v553_v44 }
 0x138   : > { %v961_v53 = vpop.f32.mrf.mxu0  ;;  %v1121_v54 = vpop.f32.mrf.mxu1 }
 0x139   : > { %1233 = vst.msk [vmem:[%s3330_s3 + $0xe8] sm:$0xff] %vm562_vm6, %v1169_v51  ;;  %1265 = vst.msk [vmem:[%s3330_s3 + $0x1e8] sm:$0xff] %vm562_vm6, %v1201_v52  ;;  %v1168_v57 = vadd.f32 %v961_v53, %v520_v49  ;;  %v1200_v58 = vadd.f32 %v1121_v54, %v552_v50 }
 0x13a   : > { %v1724_v59 = vpop.f32.mrf.mxu0  ;;  %v1772_v60 = vpop.f32.mrf.mxu1 }
 0x13b   : > { %1232 = vst.msk [vmem:[%s3330_s3 + $0xe0] sm:$0xff] %vm562_vm6, %v1168_v57  ;;  %1264 = vst.msk [vmem:[%s3330_s3 + $0x1e0] sm:$0xff] %vm562_vm6, %v1200_v58  ;;  %v1171_v63 = vadd.f32 %v1724_v59, %v523_v55  ;;  %v1203_v0 = vadd.f32 %v1772_v60, %v555_v56  ;;  %1271 = sbr.rel (%p1595_p5) target bundleno = 356 (0x164), region = 40 }
 0x13c   : > { %v971_v1 = vpop.f32.mrf.mxu0  ;;  %v1131_v2 = vpop.f32.mrf.mxu1 }
 0x13d   : > { %1235 = vst.msk [vmem:[%s3330_s3 + $0xf8] sm:$0xff] %vm562_vm6, %v1171_v63  ;;  %1267 = vst.msk [vmem:[%s3330_s3 + $0x1f8] sm:$0xff] %vm562_vm6, %v1203_v0  ;;  %v1170_v3 = vadd.f32 %v971_v1, %v522_v61  ;;  %v1202_v4 = vadd.f32 %v1131_v2, %v554_v62 }
 0x13f   : > { %1234 = vst.msk [vmem:[%s3330_s3 + $0xf0] sm:$0xff] %vm562_vm6, %v1170_v3  ;;  %1266 = vst.msk [vmem:[%s3330_s3 + $0x1f0] sm:$0xff] %vm562_vm6, %v1202_v4 }
 0x140   : > { %v1272_v5 = vld [vmem:[%s3330_s3] sm:$0xff]  ;;  %v1273_v7 = vld [vmem:[%s3330_s3 + $0x8] sm:$0xff]  ;;  %v1274_v10 = vld [vmem:[%s3330_s3 + $0x10] sm:$0xff] }
 0x141   : > { %v2807_v6 = vld [vmem:[%s3329_s2] ss:$0 sm:$0xff]  ;;  %v1275_v11 = vld [vmem:[%s3330_s3 + $0x18] sm:$0xff]  ;;  %v1277_v16 = vld [vmem:[%s3330_s3 + $0x28] sm:$0xff] }
 0x142   : > { %v1343_v8 = vadd.f32 %v2807_v6, %v1272_v5  ;;  %v1344_v9 = vadd.f32 %v2807_v6, %v1273_v7  ;;  %v1276_v12 = vld [vmem:[%s3330_s3 + $0x20] sm:$0xff]  ;;  %v1345_v13 = vadd.f32 %v2807_v6, %v1274_v10  ;;  %v1346_v14 = vadd.f32 %v2807_v6, %v1275_v11  ;;  %v1278_v17 = vld [vmem:[%s3330_s3 + $0x30] sm:$0xff]  ;;  %v1279_v18 = vld [vmem:[%s3330_s3 + $0x38] sm:$0xff] }
 0x143   : > { %v1347_v15 = vadd.f32 %v2807_v6, %v1276_v12  ;;  %v1348_v19 = vadd.f32 %v2807_v6, %v1277_v16  ;;  %v1349_v20 = vadd.f32 %v2807_v6, %v1278_v17  ;;  %v1350_v21 = vadd.f32 %v2807_v6, %v1279_v18  ;;  %v1280_v22 = vld [vmem:[%s3330_s3 + $0x40] sm:$0xff]  ;;  %v1281_v23 = vld [vmem:[%s3330_s3 + $0x48] sm:$0xff]  ;;  %v1282_v24 = vld [vmem:[%s3330_s3 + $0x50] sm:$0xff] }
 0x144   : > { %1407 = vst.msk [vmem:[%s3330_s3] sm:$0xff] %vm562_vm6, %v1343_v8  ;;  %1408 = vst.msk [vmem:[%s3330_s3 + $0x8] sm:$0xff] %vm562_vm6, %v1344_v9  ;;  %v1351_v25 = vadd.f32 %v2807_v6, %v1280_v22  ;;  %v1352_v26 = vadd.f32 %v2807_v6, %v1281_v23  ;;  %v1353_v27 = vadd.f32 %v2807_v6, %v1282_v24  ;;  %v1283_v28 = vld [vmem:[%s3330_s3 + $0x58] sm:$0xff]  ;;  %v1284_v29 = vld [vmem:[%s3330_s3 + $0x60] sm:$0xff] }
 0x145   : > { %1409 = vst.msk [vmem:[%s3330_s3 + $0x10] sm:$0xff] %vm562_vm6, %v1345_v13  ;;  %1410 = vst.msk [vmem:[%s3330_s3 + $0x18] sm:$0xff] %vm562_vm6, %v1346_v14  ;;  %v1285_v30 = vld [vmem:[%s3330_s3 + $0x68] sm:$0xff]  ;;  %v1354_v31 = vadd.f32 %v2807_v6, %v1283_v28  ;;  %v1355_v32 = vadd.f32 %v2807_v6, %v1284_v29  ;;  %v1286_v34 = vld [vmem:[%s3330_s3 + $0x70] sm:$0xff] }
 0x146   : > { %1411 = vst.msk [vmem:[%s3330_s3 + $0x20] sm:$0xff] %vm562_vm6, %v1347_v15  ;;  %1412 = vst.msk [vmem:[%s3330_s3 + $0x28] sm:$0xff] %vm562_vm6, %v1348_v19  ;;  %v1356_v33 = vadd.f32 %v2807_v6, %v1285_v30  ;;  %v1287_v35 = vld [vmem:[%s3330_s3 + $0x78] sm:$0xff]  ;;  %v1288_v36 = vld [vmem:[%s3330_s3 + $0x80] sm:$0xff]  ;;  %v1357_v37 = vadd.f32 %v2807_v6, %v1286_v34 }
 0x147   : > { %1413 = vst.msk [vmem:[%s3330_s3 + $0x30] sm:$0xff] %vm562_vm6, %v1349_v20  ;;  %1414 = vst.msk [vmem:[%s3330_s3 + $0x38] sm:$0xff] %vm562_vm6, %v1350_v21  ;;  %v1358_v38 = vadd.f32 %v2807_v6, %v1287_v35  ;;  %v1359_v39 = vadd.f32 %v2807_v6, %v1288_v36  ;;  %v1289_v40 = vld [vmem:[%s3330_s3 + $0x88] sm:$0xff]  ;;  %v1290_v41 = vld [vmem:[%s3330_s3 + $0x90] sm:$0xff] }
 0x148   : > { %1415 = vst.msk [vmem:[%s3330_s3 + $0x40] sm:$0xff] %vm562_vm6, %v1351_v25  ;;  %1416 = vst.msk [vmem:[%s3330_s3 + $0x48] sm:$0xff] %vm562_vm6, %v1352_v26  ;;  %v1291_v42 = vld [vmem:[%s3330_s3 + $0x98] sm:$0xff]  ;;  %v1360_v43 = vadd.f32 %v2807_v6, %v1289_v40  ;;  %v1361_v44 = vadd.f32 %v2807_v6, %v1290_v41  ;;  %v1292_v46 = vld [vmem:[%s3330_s3 + $0xa0] sm:$0xff] }
 0x149   : > { %1417 = vst.msk [vmem:[%s3330_s3 + $0x50] sm:$0xff] %vm562_vm6, %v1353_v27  ;;  %1418 = vst.msk [vmem:[%s3330_s3 + $0x58] sm:$0xff] %vm562_vm6, %v1354_v31  ;;  %v1362_v45 = vadd.f32 %v2807_v6, %v1291_v42  ;;  %v1293_v47 = vld [vmem:[%s3330_s3 + $0xa8] sm:$0xff]  ;;  %v1294_v48 = vld [vmem:[%s3330_s3 + $0xb0] sm:$0xff]  ;;  %v1363_v49 = vadd.f32 %v2807_v6, %v1292_v46 }
 0x14a   : > { %1419 = vst.msk [vmem:[%s3330_s3 + $0x60] sm:$0xff] %vm562_vm6, %v1355_v32  ;;  %1420 = vst.msk [vmem:[%s3330_s3 + $0x68] sm:$0xff] %vm562_vm6, %v1356_v33  ;;  %v1364_v50 = vadd.f32 %v2807_v6, %v1293_v47  ;;  %v1365_v51 = vadd.f32 %v2807_v6, %v1294_v48  ;;  %v1295_v52 = vld [vmem:[%s3330_s3 + $0xb8] sm:$0xff]  ;;  %v1296_v53 = vld [vmem:[%s3330_s3 + $0xc0] sm:$0xff] }
 0x14b   : > { %1421 = vst.msk [vmem:[%s3330_s3 + $0x70] sm:$0xff] %vm562_vm6, %v1357_v37  ;;  %1422 = vst.msk [vmem:[%s3330_s3 + $0x78] sm:$0xff] %vm562_vm6, %v1358_v38  ;;  %v1297_v54 = vld [vmem:[%s3330_s3 + $0xc8] sm:$0xff]  ;;  %v1366_v55 = vadd.f32 %v2807_v6, %v1295_v52  ;;  %v1367_v56 = vadd.f32 %v2807_v6, %v1296_v53  ;;  %v1298_v58 = vld [vmem:[%s3330_s3 + $0xd0] sm:$0xff] }
 0x14c   : > { %1423 = vst.msk [vmem:[%s3330_s3 + $0x80] sm:$0xff] %vm562_vm6, %v1359_v39  ;;  %1424 = vst.msk [vmem:[%s3330_s3 + $0x88] sm:$0xff] %vm562_vm6, %v1360_v43  ;;  %v1368_v57 = vadd.f32 %v2807_v6, %v1297_v54  ;;  %v1299_v59 = vld [vmem:[%s3330_s3 + $0xd8] sm:$0xff]  ;;  %v1300_v60 = vld [vmem:[%s3330_s3 + $0xe0] sm:$0xff]  ;;  %v1369_v61 = vadd.f32 %v2807_v6, %v1298_v58 }
 0x14d   : > { %1425 = vst.msk [vmem:[%s3330_s3 + $0x90] sm:$0xff] %vm562_vm6, %v1361_v44  ;;  %1426 = vst.msk [vmem:[%s3330_s3 + $0x98] sm:$0xff] %vm562_vm6, %v1362_v45  ;;  %v1370_v62 = vadd.f32 %v2807_v6, %v1299_v59  ;;  %v1371_v63 = vadd.f32 %v2807_v6, %v1300_v60  ;;  %v1301_v0 = vld [vmem:[%s3330_s3 + $0xe8] sm:$0xff]  ;;  %v1302_v1 = vld [vmem:[%s3330_s3 + $0xf0] sm:$0xff] }
 0x14e   : > { %1427 = vst.msk [vmem:[%s3330_s3 + $0xa0] sm:$0xff] %vm562_vm6, %v1363_v49  ;;  %1428 = vst.msk [vmem:[%s3330_s3 + $0xa8] sm:$0xff] %vm562_vm6, %v1364_v50  ;;  %v1303_v2 = vld [vmem:[%s3330_s3 + $0xf8] sm:$0xff]  ;;  %v1372_v3 = vadd.f32 %v2807_v6, %v1301_v0  ;;  %v1373_v4 = vadd.f32 %v2807_v6, %v1302_v1  ;;  %v1304_v7 = vld [vmem:[%s3330_s3 + $0x100] sm:$0xff] }
 0x14f   : > { %1429 = vst.msk [vmem:[%s3330_s3 + $0xb0] sm:$0xff] %vm562_vm6, %v1365_v51  ;;  %1430 = vst.msk [vmem:[%s3330_s3 + $0xb8] sm:$0xff] %vm562_vm6, %v1366_v55  ;;  %v1374_v5 = vadd.f32 %v2807_v6, %v1303_v2  ;;  %v1305_v8 = vld [vmem:[%s3330_s3 + $0x108] sm:$0xff]  ;;  %v1306_v9 = vld [vmem:[%s3330_s3 + $0x110] sm:$0xff]  ;;  %v1375_v10 = vadd.f32 %v2807_v6, %v1304_v7 }
 0x150   : > { %1431 = vst.msk [vmem:[%s3330_s3 + $0xc0] sm:$0xff] %vm562_vm6, %v1367_v56  ;;  %1432 = vst.msk [vmem:[%s3330_s3 + $0xc8] sm:$0xff] %vm562_vm6, %v1368_v57  ;;  %v1376_v11 = vadd.f32 %v2807_v6, %v1305_v8  ;;  %v1377_v12 = vadd.f32 %v2807_v6, %v1306_v9  ;;  %v1307_v13 = vld [vmem:[%s3330_s3 + $0x118] sm:$0xff]  ;;  %v1308_v14 = vld [vmem:[%s3330_s3 + $0x120] sm:$0xff] }
 0x151   : > { %1433 = vst.msk [vmem:[%s3330_s3 + $0xd0] sm:$0xff] %vm562_vm6, %v1369_v61  ;;  %1434 = vst.msk [vmem:[%s3330_s3 + $0xd8] sm:$0xff] %vm562_vm6, %v1370_v62  ;;  %v1309_v15 = vld [vmem:[%s3330_s3 + $0x128] sm:$0xff]  ;;  %v1378_v16 = vadd.f32 %v2807_v6, %v1307_v13  ;;  %v1379_v17 = vadd.f32 %v2807_v6, %v1308_v14  ;;  %v1310_v19 = vld [vmem:[%s3330_s3 + $0x130] sm:$0xff] }
 0x152   : > { %1435 = vst.msk [vmem:[%s3330_s3 + $0xe0] sm:$0xff] %vm562_vm6, %v1371_v63  ;;  %1436 = vst.msk [vmem:[%s3330_s3 + $0xe8] sm:$0xff] %vm562_vm6, %v1372_v3  ;;  %v1380_v18 = vadd.f32 %v2807_v6, %v1309_v15  ;;  %v1311_v20 = vld [vmem:[%s3330_s3 + $0x138] sm:$0xff]  ;;  %v1312_v21 = vld [vmem:[%s3330_s3 + $0x140] sm:$0xff]  ;;  %v1381_v22 = vadd.f32 %v2807_v6, %v1310_v19 }
 0x153   : > { %1437 = vst.msk [vmem:[%s3330_s3 + $0xf0] sm:$0xff] %vm562_vm6, %v1373_v4  ;;  %1438 = vst.msk [vmem:[%s3330_s3 + $0xf8] sm:$0xff] %vm562_vm6, %v1374_v5  ;;  %v1382_v23 = vadd.f32 %v2807_v6, %v1311_v20  ;;  %v1383_v24 = vadd.f32 %v2807_v6, %v1312_v21  ;;  %v1313_v25 = vld [vmem:[%s3330_s3 + $0x148] sm:$0xff]  ;;  %v1314_v26 = vld [vmem:[%s3330_s3 + $0x150] sm:$0xff] }
 0x154   : > { %1439 = vst.msk [vmem:[%s3330_s3 + $0x100] sm:$0xff] %vm562_vm6, %v1375_v10  ;;  %1440 = vst.msk [vmem:[%s3330_s3 + $0x108] sm:$0xff] %vm562_vm6, %v1376_v11  ;;  %v1315_v27 = vld [vmem:[%s3330_s3 + $0x158] sm:$0xff]  ;;  %v1384_v28 = vadd.f32 %v2807_v6, %v1313_v25  ;;  %v1385_v29 = vadd.f32 %v2807_v6, %v1314_v26  ;;  %v1316_v31 = vld [vmem:[%s3330_s3 + $0x160] sm:$0xff] }
 0x155   : > { %1441 = vst.msk [vmem:[%s3330_s3 + $0x110] sm:$0xff] %vm562_vm6, %v1377_v12  ;;  %1442 = vst.msk [vmem:[%s3330_s3 + $0x118] sm:$0xff] %vm562_vm6, %v1378_v16  ;;  %v1386_v30 = vadd.f32 %v2807_v6, %v1315_v27  ;;  %v1317_v32 = vld [vmem:[%s3330_s3 + $0x168] sm:$0xff]  ;;  %v1318_v33 = vld [vmem:[%s3330_s3 + $0x170] sm:$0xff]  ;;  %v1387_v34 = vadd.f32 %v2807_v6, %v1316_v31 }
 0x156   : > { %1443 = vst.msk [vmem:[%s3330_s3 + $0x120] sm:$0xff] %vm562_vm6, %v1379_v17  ;;  %1444 = vst.msk [vmem:[%s3330_s3 + $0x128] sm:$0xff] %vm562_vm6, %v1380_v18  ;;  %v1388_v35 = vadd.f32 %v2807_v6, %v1317_v32  ;;  %v1389_v36 = vadd.f32 %v2807_v6, %v1318_v33  ;;  %v1319_v37 = vld [vmem:[%s3330_s3 + $0x178] sm:$0xff]  ;;  %v1320_v38 = vld [vmem:[%s3330_s3 + $0x180] sm:$0xff] }
 0x157   : > { %1445 = vst.msk [vmem:[%s3330_s3 + $0x130] sm:$0xff] %vm562_vm6, %v1381_v22  ;;  %1446 = vst.msk [vmem:[%s3330_s3 + $0x138] sm:$0xff] %vm562_vm6, %v1382_v23  ;;  %v1321_v39 = vld [vmem:[%s3330_s3 + $0x188] sm:$0xff]  ;;  %v1390_v40 = vadd.f32 %v2807_v6, %v1319_v37  ;;  %v1391_v41 = vadd.f32 %v2807_v6, %v1320_v38  ;;  %v1322_v43 = vld [vmem:[%s3330_s3 + $0x190] sm:$0xff] }
 0x158   : > { %1447 = vst.msk [vmem:[%s3330_s3 + $0x140] sm:$0xff] %vm562_vm6, %v1383_v24  ;;  %1448 = vst.msk [vmem:[%s3330_s3 + $0x148] sm:$0xff] %vm562_vm6, %v1384_v28  ;;  %v1392_v42 = vadd.f32 %v2807_v6, %v1321_v39  ;;  %v1323_v44 = vld [vmem:[%s3330_s3 + $0x198] sm:$0xff]  ;;  %v1324_v45 = vld [vmem:[%s3330_s3 + $0x1a0] sm:$0xff]  ;;  %v1393_v46 = vadd.f32 %v2807_v6, %v1322_v43 }
 0x159   : > { %1449 = vst.msk [vmem:[%s3330_s3 + $0x150] sm:$0xff] %vm562_vm6, %v1385_v29  ;;  %1450 = vst.msk [vmem:[%s3330_s3 + $0x158] sm:$0xff] %vm562_vm6, %v1386_v30  ;;  %v1394_v47 = vadd.f32 %v2807_v6, %v1323_v44  ;;  %v1395_v48 = vadd.f32 %v2807_v6, %v1324_v45  ;;  %v1325_v49 = vld [vmem:[%s3330_s3 + $0x1a8] sm:$0xff]  ;;  %v1326_v50 = vld [vmem:[%s3330_s3 + $0x1b0] sm:$0xff] }
 0x15a   : > { %1451 = vst.msk [vmem:[%s3330_s3 + $0x160] sm:$0xff] %vm562_vm6, %v1387_v34  ;;  %1452 = vst.msk [vmem:[%s3330_s3 + $0x168] sm:$0xff] %vm562_vm6, %v1388_v35  ;;  %v1327_v51 = vld [vmem:[%s3330_s3 + $0x1b8] sm:$0xff]  ;;  %v1396_v52 = vadd.f32 %v2807_v6, %v1325_v49  ;;  %v1397_v53 = vadd.f32 %v2807_v6, %v1326_v50  ;;  %v1328_v55 = vld [vmem:[%s3330_s3 + $0x1c0] sm:$0xff] }
 0x15b   : > { %1453 = vst.msk [vmem:[%s3330_s3 + $0x170] sm:$0xff] %vm562_vm6, %v1389_v36  ;;  %1454 = vst.msk [vmem:[%s3330_s3 + $0x178] sm:$0xff] %vm562_vm6, %v1390_v40  ;;  %v1398_v54 = vadd.f32 %v2807_v6, %v1327_v51  ;;  %v1329_v56 = vld [vmem:[%s3330_s3 + $0x1c8] sm:$0xff]  ;;  %v1330_v57 = vld [vmem:[%s3330_s3 + $0x1d0] sm:$0xff]  ;;  %v1399_v58 = vadd.f32 %v2807_v6, %v1328_v55 }
 0x15c   : > { %1455 = vst.msk [vmem:[%s3330_s3 + $0x180] sm:$0xff] %vm562_vm6, %v1391_v41  ;;  %1456 = vst.msk [vmem:[%s3330_s3 + $0x188] sm:$0xff] %vm562_vm6, %v1392_v42  ;;  %v1400_v59 = vadd.f32 %v2807_v6, %v1329_v56  ;;  %v1401_v60 = vadd.f32 %v2807_v6, %v1330_v57  ;;  %v1331_v61 = vld [vmem:[%s3330_s3 + $0x1d8] sm:$0xff]  ;;  %v1332_v62 = vld [vmem:[%s3330_s3 + $0x1e0] sm:$0xff] }
 0x15d   : > { %1457 = vst.msk [vmem:[%s3330_s3 + $0x190] sm:$0xff] %vm562_vm6, %v1393_v46  ;;  %1458 = vst.msk [vmem:[%s3330_s3 + $0x198] sm:$0xff] %vm562_vm6, %v1394_v47  ;;  %v1333_v63 = vld [vmem:[%s3330_s3 + $0x1e8] sm:$0xff]  ;;  %v1402_v0 = vadd.f32 %v2807_v6, %v1331_v61  ;;  %v1403_v1 = vadd.f32 %v2807_v6, %v1332_v62  ;;  %v1334_v3 = vld [vmem:[%s3330_s3 + $0x1f0] sm:$0xff] }
 0x15e   : > { %1459 = vst.msk [vmem:[%s3330_s3 + $0x1a0] sm:$0xff] %vm562_vm6, %v1395_v48  ;;  %1460 = vst.msk [vmem:[%s3330_s3 + $0x1a8] sm:$0xff] %vm562_vm6, %v1396_v52  ;;  %v1404_v2 = vadd.f32 %v2807_v6, %v1333_v63  ;;  %v1335_v4 = vld [vmem:[%s3330_s3 + $0x1f8] sm:$0xff]  ;;  %v1405_v5 = vadd.f32 %v2807_v6, %v1334_v3 }
 0x15f   : > { %1461 = vst.msk [vmem:[%s3330_s3 + $0x1b0] sm:$0xff] %vm562_vm6, %v1397_v53  ;;  %1462 = vst.msk [vmem:[%s3330_s3 + $0x1b8] sm:$0xff] %vm562_vm6, %v1398_v54  ;;  %v1406_v7 = vadd.f32 %v2807_v6, %v1335_v4 }
 0x160   : > { %1463 = vst.msk [vmem:[%s3330_s3 + $0x1c0] sm:$0xff] %vm562_vm6, %v1399_v58  ;;  %1464 = vst.msk [vmem:[%s3330_s3 + $0x1c8] sm:$0xff] %vm562_vm6, %v1400_v59 }
 0x161   : > { %1465 = vst.msk [vmem:[%s3330_s3 + $0x1d0] sm:$0xff] %vm562_vm6, %v1401_v60  ;;  %1466 = vst.msk [vmem:[%s3330_s3 + $0x1d8] sm:$0xff] %vm562_vm6, %v1402_v0 }
 0x162   : > { %1467 = vst.msk [vmem:[%s3330_s3 + $0x1e0] sm:$0xff] %vm562_vm6, %v1403_v1  ;;  %1468 = vst.msk [vmem:[%s3330_s3 + $0x1e8] sm:$0xff] %vm562_vm6, %v1404_v2 }
 0x163   : > { %1469 = vst.msk [vmem:[%s3330_s3 + $0x1f0] sm:$0xff] %vm562_vm6, %v1405_v5  ;;  %1470 = vst.msk [vmem:[%s3330_s3 + $0x1f8] sm:$0xff] %vm562_vm6, %v1406_v7 }
 0x164 PF: > { %s13_s14 = sadd.s32 1, %s1828_s14   ;;  %s3331_s12 = smov %s1824_s13 }
 0x165   : > { %p10_p6 = scmp.ge.s32.totalorder %s13_s14, 7   ;;  %s3332_s13 = smov %s3334_s15 }
 0x167   :  { %12 = sbr.rel (!%p10_p6) target bundleno = 2 (0x2), region = 69 }

// kernel: generator_forward.30
= control target key start
LH: loop header
LB: loop body
LE: loop exit
PB: predicated region body
PF: predicated region fallthrough
CT: control target
= control target key end

     0   :  { %s1851_s12 = smov 0   ;;  %s1853_s13 = smov 0   ;;  %s3327_s0 = inlined_call_operand.vmem [shape: f32[2,258,32], index: 0, kind: input, shape index: {}]   ;;  %s3328_s1 = inlined_call_operand.vmem [shape: f32[3,32,32], index: 1, kind: input, shape index: {}]   ;;  %s3329_s2 = inlined_call_operand.vmem [shape: f32[1,32], index: 2, kind: input, shape index: {}]   ;;  %s3330_s3 = inlined_call_operand.vmem [shape: f32[2,256,32], index: 3, kind: output, shape index: {}]  }
   0x1   :  { %s1855_s14 = smov 0  }
   0x2 LB: > { %s22_s15 = sadd.s32 1, %s1824_s13  ;;  %p1528_p0 = scmp.ge.s32.totalorder %s1828_s14, 1  ;;  %s1828_s14 = sphi %s1855_s14, %s13_s14   ;;  %s1824_s13 = sphi %s1853_s13, %s3332_s13   ;;  %s1820_s12 = sphi %s1851_s12, %s3331_s12  }
   0x3   : > { %p23_p1 = scmp.ge.s32.totalorder %s22_s15, 3  ;;  %p139_p2 = scmp.lt.s32.totalorder %s1828_s14, 4 }
   0x5   : > { %s3334_s15 = smov (%p23_p1, %s22_s15), 0  ;;  %p140_p3 = pnand %p1528_p0, %p139_p2 }
   0x6   : > { %p1529_p4 = scmp.ne.s32.totalorder (!%p140_p3), %s1820_s12, 0 }
   0x7   : > { %143 = sbr.rel (%p140_p3) target bundleno = 356 (0x164), region = 32 }
   0xc   : > { %167 = sbr.rel (%p1529_p4) target bundleno = 50 (0x32), region = 36 }
  0x11   : > { %vm168_vm0 = vcmask 261120   ;;  %v1830_v0 = vmov 0.0  }
  0x12   : > { %169 = vst.msk [vmem:[%s3330_s3] sm:$0xff] %vm168_vm0, %v1830_v0  ;;  %170 = vst.msk [vmem:[%s3330_s3 + $0x8] sm:$0xff] %vm168_vm0, %v1830_v0 }
  0x13   : > { %171 = vst.msk [vmem:[%s3330_s3 + $0x10] sm:$0xff] %vm168_vm0, %v1830_v0  ;;  %172 = vst.msk [vmem:[%s3330_s3 + $0x18] sm:$0xff] %vm168_vm0, %v1830_v0 }
  0x14   : > { %173 = vst.msk [vmem:[%s3330_s3 + $0x20] sm:$0xff] %vm168_vm0, %v1830_v0  ;;  %174 = vst.msk [vmem:[%s3330_s3 + $0x28] sm:$0xff] %vm168_vm0, %v1830_v0 }
  0x15   : > { %175 = vst.msk [vmem:[%s3330_s3 + $0x30] sm:$0xff] %vm168_vm0, %v1830_v0  ;;  %176 = vst.msk [vmem:[%s3330_s3 + $0x38] sm:$0xff] %vm168_vm0, %v1830_v0 }
  0x16   : > { %177 = vst.msk [vmem:[%s3330_s3 + $0x40] sm:$0xff] %vm168_vm0, %v1830_v0  ;;  %178 = vst.msk [vmem:[%s3330_s3 + $0x48] sm:$0xff] %vm168_vm0, %v1830_v0 }
  0x17   : > { %179 = vst.msk [vmem:[%s3330_s3 + $0x50] sm:$0xff] %vm168_vm0, %v1830_v0  ;;  %180 = vst.msk [vmem:[%s3330_s3 + $0x58] sm:$0xff] %vm168_vm0, %v1830_v0 }
  0x18   : > { %181 = vst.msk [vmem:[%s3330_s3 + $0x60] sm:$0xff] %vm168_vm0, %v1830_v0  ;;  %182 = vst.msk [vmem:[%s3330_s3 + $0x68] sm:$0xff] %vm168_vm0, %v1830_v0 }
  0x19   : > { %183 = vst.msk [vmem:[%s3330_s3 + $0x70] sm:$0xff] %vm168_vm0, %v1830_v0  ;;  %184 = vst.msk [vmem:[%s3330_s3 + $0x78] sm:$0xff] %vm168_vm0, %v1830_v0 }
  0x1a   : > { %185 = vst.msk [vmem:[%s3330_s3 + $0x80] sm:$0xff] %vm168_vm0, %v1830_v0  ;;  %186 = vst.msk [vmem:[%s3330_s3 + $0x88] sm:$0xff] %vm168_vm0, %v1830_v0 }
  0x1b   : > { %187 = vst.msk [vmem:[%s3330_s3 + $0x90] sm:$0xff] %vm168_vm0, %v1830_v0  ;;  %188 = vst.msk [vmem:[%s3330_s3 + $0x98] sm:$0xff] %vm168_vm0, %v1830_v0 }
  0x1c   : > { %189 = vst.msk [vmem:[%s3330_s3 + $0xa0] sm:$0xff] %vm168_vm0, %v1830_v0  ;;  %190 = vst.msk [vmem:[%s3330_s3 + $0xa8] sm:$0xff] %vm168_vm0, %v1830_v0 }
  0x1d   : > { %191 = vst.msk [vmem:[%s3330_s3 + $0xb0] sm:$0xff] %vm168_vm0, %v1830_v0  ;;  %192 = vst.msk [vmem:[%s3330_s3 + $0xb8] sm:$0xff] %vm168_vm0, %v1830_v0 }
  0x1e   : > { %193 = vst.msk [vmem:[%s3330_s3 + $0xc0] sm:$0xff] %vm168_vm0, %v1830_v0  ;;  %194 = vst.msk [vmem:[%s3330_s3 + $0xc8] sm:$0xff] %vm168_vm0, %v1830_v0 }
  0x1f   : > { %195 = vst.msk [vmem:[%s3330_s3 + $0xd0] sm:$0xff] %vm168_vm0, %v1830_v0  ;;  %196 = vst.msk [vmem:[%s3330_s3 + $0xd8] sm:$0xff] %vm168_vm0, %v1830_v0 }
  0x20   : > { %197 = vst.msk [vmem:[%s3330_s3 + $0xe0] sm:$0xff] %vm168_vm0, %v1830_v0  ;;  %198 = vst.msk [vmem:[%s3330_s3 + $0xe8] sm:$0xff] %vm168_vm0, %v1830_v0 }
  0x21   : > { %199 = vst.msk [vmem:[%s3330_s3 + $0xf0] sm:$0xff] %vm168_vm0, %v1830_v0  ;;  %200 = vst.msk [vmem:[%s3330_s3 + $0xf8] sm:$0xff] %vm168_vm0, %v1830_v0 }
  0x22   : > { %201 = vst.msk [vmem:[%s3330_s3 + $0x100] sm:$0xff] %vm168_vm0, %v1830_v0  ;;  %202 = vst.msk [vmem:[%s3330_s3 + $0x108] sm:$0xff] %vm168_vm0, %v1830_v0 }
  0x23   : > { %203 = vst.msk [vmem:[%s3330_s3 + $0x110] sm:$0xff] %vm168_vm0, %v1830_v0  ;;  %204 = vst.msk [vmem:[%s3330_s3 + $0x118] sm:$0xff] %vm168_vm0, %v1830_v0 }
  0x24   : > { %205 = vst.msk [vmem:[%s3330_s3 + $0x120] sm:$0xff] %vm168_vm0, %v1830_v0  ;;  %206 = vst.msk [vmem:[%s3330_s3 + $0x128] sm:$0xff] %vm168_vm0, %v1830_v0 }
  0x25   : > { %207 = vst.msk [vmem:[%s3330_s3 + $0x130] sm:$0xff] %vm168_vm0, %v1830_v0  ;;  %208 = vst.msk [vmem:[%s3330_s3 + $0x138] sm:$0xff] %vm168_vm0, %v1830_v0 }
  0x26   : > { %209 = vst.msk [vmem:[%s3330_s3 + $0x140] sm:$0xff] %vm168_vm0, %v1830_v0  ;;  %210 = vst.msk [vmem:[%s3330_s3 + $0x148] sm:$0xff] %vm168_vm0, %v1830_v0 }
  0x27   : > { %211 = vst.msk [vmem:[%s3330_s3 + $0x150] sm:$0xff] %vm168_vm0, %v1830_v0  ;;  %212 = vst.msk [vmem:[%s3330_s3 + $0x158] sm:$0xff] %vm168_vm0, %v1830_v0 }
  0x28   : > { %213 = vst.msk [vmem:[%s3330_s3 + $0x160] sm:$0xff] %vm168_vm0, %v1830_v0  ;;  %214 = vst.msk [vmem:[%s3330_s3 + $0x168] sm:$0xff] %vm168_vm0, %v1830_v0 }
  0x29   : > { %215 = vst.msk [vmem:[%s3330_s3 + $0x170] sm:$0xff] %vm168_vm0, %v1830_v0  ;;  %216 = vst.msk [vmem:[%s3330_s3 + $0x178] sm:$0xff] %vm168_vm0, %v1830_v0 }
  0x2a   : > { %217 = vst.msk [vmem:[%s3330_s3 + $0x180] sm:$0xff] %vm168_vm0, %v1830_v0  ;;  %218 = vst.msk [vmem:[%s3330_s3 + $0x188] sm:$0xff] %vm168_vm0, %v1830_v0 }
  0x2b   : > { %219 = vst.msk [vmem:[%s3330_s3 + $0x190] sm:$0xff] %vm168_vm0, %v1830_v0  ;;  %220 = vst.msk [vmem:[%s3330_s3 + $0x198] sm:$0xff] %vm168_vm0, %v1830_v0 }
  0x2c   : > { %221 = vst.msk [vmem:[%s3330_s3 + $0x1a0] sm:$0xff] %vm168_vm0, %v1830_v0  ;;  %222 = vst.msk [vmem:[%s3330_s3 + $0x1a8] sm:$0xff] %vm168_vm0, %v1830_v0 }
  0x2d   : > { %223 = vst.msk [vmem:[%s3330_s3 + $0x1b0] sm:$0xff] %vm168_vm0, %v1830_v0  ;;  %224 = vst.msk [vmem:[%s3330_s3 + $0x1b8] sm:$0xff] %vm168_vm0, %v1830_v0 }
  0x2e   : > { %225 = vst.msk [vmem:[%s3330_s3 + $0x1c0] sm:$0xff] %vm168_vm0, %v1830_v0  ;;  %226 = vst.msk [vmem:[%s3330_s3 + $0x1c8] sm:$0xff] %vm168_vm0, %v1830_v0 }
  0x2f   : > { %227 = vst.msk [vmem:[%s3330_s3 + $0x1d0] sm:$0xff] %vm168_vm0, %v1830_v0  ;;  %228 = vst.msk [vmem:[%s3330_s3 + $0x1d8] sm:$0xff] %vm168_vm0, %v1830_v0 }
  0x30   : > { %229 = vst.msk [vmem:[%s3330_s3 + $0x1e0] sm:$0xff] %vm168_vm0, %v1830_v0  ;;  %230 = vst.msk [vmem:[%s3330_s3 + $0x1e8] sm:$0xff] %vm168_vm0, %v1830_v0 }
  0x31   : > { %231 = vst.msk [vmem:[%s3330_s3 + $0x1f0] sm:$0xff] %vm168_vm0, %v1830_v0  ;;  %232 = vst.msk [vmem:[%s3330_s3 + $0x1f8] sm:$0xff] %vm168_vm0, %v1830_v0 }
  0x32 PF: > { %s1530_s29 = sshll.u32 %s1820_s12, 5  ;;  %s2197_s5 = scalar_lea.vmem %s3327_s0, %s1820_s12  ;;  %vm562_vm6 = vcmask 261120  }
  0x33   : > { %s557_s8 = scalar_lea.vmem %s3328_s1, %s1530_s29  ;;  %v236_v1 = vld [vmem:[%s2197_s5] sm:$0xff]  ;;  %v268_v2 = vld [vmem:[%s2197_s5 + $0x108] sm:$0xff]  ;;  %v269_v9 = vld [vmem:[%s2197_s5 + $0x110] sm:$0xff]  ;;  %p1595_p5 = scmp.ne.s32.totalorder %s1820_s12, 2 }
  0x34   : > { %v237_v3 = vld [vmem:[%s2197_s5 + $0x8] sm:$0xff]  ;;  %v561_v4 = vld [vmem:[%s557_s8 + $0x18] sm:$0xff]  ;;  %v560_v5 = vld [vmem:[%s557_s8 + $0x10] sm:$0xff]  ;;  %vm300_vm1 = vcmp.ge.f32.partialorder %v236_v1, 0.0  ;;  %v364_v7 = vmul.f32 0.1, %v236_v1 }
  0x35   : > { %v559_v6 = vld [vmem:[%s557_s8 + $0x8] sm:$0xff]  ;;  %1669 = vmatprep.subr.mxu0 %v561_v4  ;;  %1773 = vmatprep.subr.mxu1 %v561_v4  ;;  %v396_v8 = vmul.f32 0.1, %v268_v2  ;;  %vm332_vm2 = vcmp.ge.f32.partialorder %v268_v2, 0.0  ;;  %v365_v10 = vmul.f32 0.1, %v237_v3 }
  0x36   : > { %1670 = vmatpush3.msra.mxu0 %v561_v4  ;;  %1777 = vmatpush3.msra.mxu1 %v561_v4  ;;  %v397_v11 = vmul.f32 0.1, %v269_v9  ;;  %v238_v12 = vld [vmem:[%s2197_s5 + $0x10] sm:$0xff]  ;;  %vm301_vm3 = vcmp.ge.f32.partialorder %v237_v3, 0.0  ;;  %vm333_vm4 = vcmp.ge.f32.partialorder %v269_v9, 0.0  ;;  %v270_v14 = vld [vmem:[%s2197_s5 + $0x118] sm:$0xff]  ;;  %v428_v20 = vsel %vm300_vm1, %v236_v1, %v364_v7 }
  0x37   : > { %1671 = vmatprep.subr.mxu0 %v560_v5  ;;  %1774 = vmatprep.subr.mxu1 %v560_v5  ;;  %v366_v13 = vmul.f32 0.1, %v238_v12  ;;  %v239_v15 = vld [vmem:[%s2197_s5 + $0x18] sm:$0xff]  ;;  %v558_v16 = vld [vmem:[%s557_s8] sm:$0xff]  ;;  %vm302_vm5 = vcmp.ge.f32.partialorder %v238_v12, 0.0  ;;  %vm334_vm7 = vcmp.ge.f32.partialorder %v270_v14, 0.0  ;;  %v460_v22 = vsel %vm332_vm2, %v268_v2, %v396_v8 }
  0x38   : > { %1672 = vmatpush3.msra.mxu0 %v560_v5  ;;  %1778 = vmatpush3.msra.mxu1 %v560_v5  ;;  %v398_v17 = vmul.f32 0.1, %v270_v14  ;;  %v271_v18 = vld [vmem:[%s2197_s5 + $0x120] sm:$0xff]  ;;  %v272_v21 = vld [vmem:[%s2197_s5 + $0x128] sm:$0xff]  ;;  %v429_v23 = vsel %vm301_vm3, %v237_v3, %v365_v10  ;;  %v461_v24 = vsel %vm333_vm4, %v269_v9, %v397_v11  ;;  %v367_v25 = vmul.f32 0.1, %v239_v15 }
  0x39   : > { %v240_v19 = vld [vmem:[%s2197_s5 + $0x20] sm:$0xff]  ;;  %1673 = vmatprep.subr.mxu0 %v559_v6  ;;  %1775 = vmatprep.subr.mxu1 %v559_v6  ;;  %v430_v26 = vsel %vm302_vm5, %v238_v12, %v366_v13  ;;  %vm303_vm8 = vcmp.ge.f32.partialorder %v239_v15, 0.0  ;;  %v399_v27 = vmul.f32 0.1, %v271_v18  ;;  %v241_v29 = vld [vmem:[%s2197_s5 + $0x28] sm:$0xff]  ;;  %vm335_vm9 = vcmp.ge.f32.partialorder %v271_v18, 0.0 }
  0x3a   : > { %1674 = vmatpush3.msra.mxu0 %v559_v6  ;;  %1779 = vmatpush3.msra.mxu1 %v559_v6  ;;  %v368_v28 = vmul.f32 0.1, %v240_v19  ;;  %v462_v30 = vsel %vm334_vm7, %v270_v14, %v398_v17  ;;  %vm304_vm10 = vcmp.ge.f32.partialorder %v240_v19, 0.0  ;;  %v400_v31 = vmul.f32 0.1, %v272_v21  ;;  %v273_v32 = vld [vmem:[%s2197_s5 + $0x130] sm:$0xff] }
  0x3b   : > { %1675 = vmatprep.subr.mxu0 %v558_v16  ;;  %1776 = vmatprep.subr.mxu1 %v558_v16  ;;  %v242_v33 = vld [vmem:[%s2197_s5 + $0x30] sm:$0xff]  ;;  %vm336_vm11 = vcmp.ge.f32.partialorder %v272_v21, 0.0  ;;  %v274_v34 = vld [vmem:[%s2197_s5 + $0x138] sm:$0xff]  ;;  %v431_v35 = vsel %vm303_vm8, %v239_v15, %v367_v25  ;;  %vm305_vm12 = vcmp.ge.f32.partialorder %v241_v29, 0.0  ;;  %v369_v36 = vmul.f32 0.1, %v241_v29 }
  0x3c   : > { %1676 = vmatpush3.msra.mxu0 %v558_v16  ;;  %1780 = vmatpush3.msra.mxu1 %v558_v16  ;;  %v463_v37 = vsel %vm335_vm9, %v271_v18, %v399_v27  ;;  %v432_v38 = vsel %vm304_vm10, %v240_v19, %v368_v28  ;;  %v401_v39 = vmul.f32 0.1, %v273_v32  ;;  %v370_v40 = vmul.f32 0.1, %v242_v33  ;;  %v243_v41 = vld [vmem:[%s2197_s5 + $0x38] sm:$0xff]  ;;  %v275_v44 = vld [vmem:[%s2197_s5 + $0x140] sm:$0xff] }
  0x3d   : > { %1677 = vmatprep.mubr.msk.f32.mxu0 %vm562_vm6, %v428_v20  ;;  %1725 = vmatprep.mubr.msk.f32.mxu1 %vm562_vm6, %v460_v22  ;;  %v464_v42 = vsel %vm336_vm11, %v272_v21, %v400_v31  ;;  %vm337_vm13 = vcmp.ge.f32.partialorder %v273_v32, 0.0  ;;  %vm306_vm14 = vcmp.ge.f32.partialorder %v242_v33, 0.0  ;;  %v402_v43 = vmul.f32 0.1, %v274_v34  ;;  %v244_v45 = vld [vmem:[%s2197_s5 + $0x40] sm:$0xff]  ;;  %v276_v46 = vld [vmem:[%s2197_s5 + $0x148] sm:$0xff] }
  0x3e   : > { %1678 = vmatmul.mubr.msk.f32.vlgmr.msra.gmra.mxu0 %vm562_vm6, %v429_v23  ;;  %1726 = vmatmul.mubr.msk.f32.vlgmr.msra.gmra.mxu1 %vm562_vm6, %v461_v24  ;;  %vm338_vm15 = vcmp.ge.f32.partialorder %v274_v34, 0.0  ;;  %v433_v47 = vsel %vm305_vm12, %v241_v29, %v369_v36  ;;  %vm307_vm0 = vcmp.ge.f32.partialorder %v243_v41, 0.0  ;;  %v371_v48 = vmul.f32 0.1, %v243_v41  ;;  %v245_v53 = vld [vmem:[%s2197_s5 + $0x48] sm:$0xff]  ;;  %v277_v56 = vld [vmem:[%s2197_s5 + $0x150] sm:$0xff] }
  0x3f   : > { %1680 = vmatprep.mubr.msk.f32.mxu0 %vm562_vm6, %v430_v26  ;;  %1728 = vmatprep.mubr.msk.f32.mxu1 %vm562_vm6, %v462_v30  ;;  %v465_v49 = vsel %vm337_vm13, %v273_v32, %v401_v39  ;;  %v434_v50 = vsel %vm306_vm14, %v242_v33, %v370_v40  ;;  %v403_v51 = vmul.f32 0.1, %v275_v44  ;;  %v372_v52 = vmul.f32 0.1, %v244_v45  ;;  %v246_v57 = vld [vmem:[%s2197_s5 + $0x50] sm:$0xff]  ;;  %v278_v58 = vld [vmem:[%s2197_s5 + $0x158] sm:$0xff] }
  0x40   : > { %v466_v54 = vsel %vm338_vm15, %v274_v34, %v402_v43  ;;  %vm339_vm1 = vcmp.ge.f32.partialorder %v275_v44, 0.0  ;;  %vm308_vm2 = vcmp.ge.f32.partialorder %v244_v45, 0.0  ;;  %v404_v55 = vmul.f32 0.1, %v276_v46  ;;  %v247_v1 = vld [vmem:[%s2197_s5 + $0x58] sm:$0xff]  ;;  %v279_v4 = vld [vmem:[%s2197_s5 + $0x160] sm:$0xff] }
  0x41   : > { %vm340_vm3 = vcmp.ge.f32.partialorder %v276_v46, 0.0  ;;  %v435_v59 = vsel %vm307_vm0, %v243_v41, %v371_v48  ;;  %vm309_vm4 = vcmp.ge.f32.partialorder %v245_v53, 0.0  ;;  %v373_v60 = vmul.f32 0.1, %v245_v53  ;;  %v248_v5 = vld [vmem:[%s2197_s5 + $0x60] sm:$0xff]  ;;  %v280_v6 = vld [vmem:[%s2197_s5 + $0x168] sm:$0xff] }
  0x42   : > { %1681 = vmatmul.mubr.msk.f32.gmra.mxu0 %vm562_vm6, %v431_v35  ;;  %1729 = vmatmul.mubr.msk.f32.gmra.mxu1 %vm562_vm6, %v463_v37  ;;  %v467_v61 = vsel %vm339_vm1, %v275_v44, %v403_v51  ;;  %v436_v62 = vsel %vm308_vm2, %v244_v45, %v372_v52  ;;  %v405_v63 = vmul.f32 0.1, %v277_v56  ;;  %v374_v0 = vmul.f32 0.1, %v246_v57  ;;  %v249_v13 = vld [vmem:[%s2197_s5 + $0x68] sm:$0xff]  ;;  %v281_v16 = vld [vmem:[%s2197_s5 + $0x170] sm:$0xff] }
  0x43   : > { %1683 = vmatprep.mubr.msk.f32.mxu0 %vm562_vm6, %v432_v38  ;;  %1731 = vmatprep.mubr.msk.f32.mxu1 %vm562_vm6, %v464_v42  ;;  %v468_v2 = vsel %vm340_vm3, %v276_v46, %v404_v55  ;;  %vm341_vm5 = vcmp.ge.f32.partialorder %v277_v56, 0.0  ;;  %vm310_vm7 = vcmp.ge.f32.partialorder %v246_v57, 0.0  ;;  %v406_v3 = vmul.f32 0.1, %v278_v58  ;;  %v250_v17 = vld [vmem:[%s2197_s5 + $0x70] sm:$0xff]  ;;  %v282_v18 = vld [vmem:[%s2197_s5 + $0x178] sm:$0xff] }
  0x44   : > { %vm342_vm8 = vcmp.ge.f32.partialorder %v278_v58, 0.0  ;;  %v437_v7 = vsel %vm309_vm4, %v245_v53, %v373_v60  ;;  %vm311_vm9 = vcmp.ge.f32.partialorder %v247_v1, 0.0  ;;  %v375_v8 = vmul.f32 0.1, %v247_v1  ;;  %v251_v25 = vld [vmem:[%s2197_s5 + $0x78] sm:$0xff]  ;;  %v283_v28 = vld [vmem:[%s2197_s5 + $0x180] sm:$0xff] }
  0x45   : > { %v469_v9 = vsel %vm341_vm5, %v277_v56, %v405_v63  ;;  %v438_v10 = vsel %vm310_vm7, %v246_v57, %v374_v0  ;;  %v407_v11 = vmul.f32 0.1, %v279_v4  ;;  %v376_v12 = vmul.f32 0.1, %v248_v5  ;;  %v252_v29 = vld [vmem:[%s2197_s5 + $0x80] sm:$0xff]  ;;  %v284_v30 = vld [vmem:[%s2197_s5 + $0x188] sm:$0xff] }
  0x46   : > { %1684 = vmatmul.mubr.msk.f32.gmra.mxu0 %vm562_vm6, %v433_v47  ;;  %1732 = vmatmul.mubr.msk.f32.gmra.mxu1 %vm562_vm6, %v465_v49  ;;  %v470_v14 = vsel %vm342_vm8, %v278_v58, %v406_v3  ;;  %vm343_vm10 = vcmp.ge.f32.partialorder %v279_v4, 0.0  ;;  %vm312_vm11 = vcmp.ge.f32.partialorder %v248_v5, 0.0  ;;  %v408_v15 = vmul.f32 0.1, %v280_v6  ;;  %v253_v37 = vld [vmem:[%s2197_s5 + $0x88] sm:$0xff]  ;;  %v285_v40 = vld [vmem:[%s2197_s5 + $0x190] sm:$0xff] }
  0x47   : > { %1686 = vmatprep.mubr.msk.f32.mxu0 %vm562_vm6, %v434_v50  ;;  %1734 = vmatprep.mubr.msk.f32.mxu1 %vm562_vm6, %v466_v54  ;;  %vm344_vm12 = vcmp.ge.f32.partialorder %v280_v6, 0.0  ;;  %v439_v19 = vsel %vm311_vm9, %v247_v1, %v375_v8  ;;  %vm313_vm13 = vcmp.ge.f32.partialorder %v249_v13, 0.0  ;;  %v377_v20 = vmul.f32 0.1, %v249_v13  ;;  %v254_v41 = vld [vmem:[%s2197_s5 + $0x90] sm:$0xff]  ;;  %v286_v42 = vld [vmem:[%s2197_s5 + $0x198] sm:$0xff] }
  0x48   : > { %v471_v21 = vsel %vm343_vm10, %v279_v4, %v407_v11  ;;  %v440_v22 = vsel %vm312_vm11, %v248_v5, %v376_v12  ;;  %v409_v23 = vmul.f32 0.1, %v281_v16  ;;  %v378_v24 = vmul.f32 0.1, %v250_v17  ;;  %v255_v49 = vld [vmem:[%s2197_s5 + $0x98] sm:$0xff]  ;;  %v287_v52 = vld [vmem:[%s2197_s5 + $0x1a0] sm:$0xff] }
  0x49   : > { %v472_v26 = vsel %vm344_vm12, %v280_v6, %v408_v15  ;;  %vm345_vm14 = vcmp.ge.f32.partialorder %v281_v16, 0.0  ;;  %vm314_vm15 = vcmp.ge.f32.partialorder %v250_v17, 0.0  ;;  %v410_v27 = vmul.f32 0.1, %v282_v18  ;;  %v256_v53 = vld [vmem:[%s2197_s5 + $0xa0] sm:$0xff]  ;;  %v288_v54 = vld [vmem:[%s2197_s5 + $0x1a8] sm:$0xff] }
  0x4a   : > { %1687 = vmatmul.mubr.msk.f32.gmra.mxu0 %vm562_vm6, %v435_v59  ;;  %1735 = vmatmul.mubr.msk.f32.gmra.mxu1 %vm562_vm6, %v467_v61  ;;  %vm346_vm0 = vcmp.ge.f32.partialorder %v282_v18, 0.0  ;;  %v441_v31 = vsel %vm313_vm13, %v249_v13, %v377_v20  ;;  %vm315_vm1 = vcmp.ge.f32.partialorder %v251_v25, 0.0  ;;  %v379_v32 = vmul.f32 0.1, %v251_v25  ;;  %v257_v61 = vld [vmem:[%s2197_s5 + $0xa8] sm:$0xff]  ;;  %v289_v0 = vld [vmem:[%s2197_s5 + $0x1b0] sm:$0xff] }
  0x4b   : > { %1689 = vmatprep.mubr.msk.f32.mxu0 %vm562_vm6, %v436_v62  ;;  %1737 = vmatprep.mubr.msk.f32.mxu1 %vm562_vm6, %v468_v2  ;;  %v473_v33 = vsel %vm345_vm14, %v281_v16, %v409_v23  ;;  %v442_v34 = vsel %vm314_vm15, %v250_v17, %v378_v24  ;;  %v411_v35 = vmul.f32 0.1, %v283_v28  ;;  %v380_v36 = vmul.f32 0.1, %v252_v29  ;;  %v258_v1 = vld [vmem:[%s2197_s5 + $0xb0] sm:$0xff]  ;;  %v290_v2 = vld [vmem:[%s2197_s5 + $0x1b8] sm:$0xff] }
  0x4c   : > { %v474_v38 = vsel %vm346_vm0, %v282_v18, %v410_v27  ;;  %vm347_vm2 = vcmp.ge.f32.partialorder %v283_v28, 0.0  ;;  %vm316_vm3 = vcmp.ge.f32.partialorder %v252_v29, 0.0  ;;  %v412_v39 = vmul.f32 0.1, %v284_v30  ;;  %v291_v12 = vld [vmem:[%s2197_s5 + $0x1c0] sm:$0xff]  ;;  %v293_v24 = vld [vmem:[%s2197_s5 + $0x1d0] sm:$0xff] }
  0x4d   : > { %vm348_vm4 = vcmp.ge.f32.partialorder %v284_v30, 0.0  ;;  %v443_v43 = vsel %vm315_vm1, %v251_v25, %v379_v32  ;;  %vm317_vm5 = vcmp.ge.f32.partialorder %v253_v37, 0.0  ;;  %v381_v44 = vmul.f32 0.1, %v253_v37  ;;  %v260_v13 = vld [vmem:[%s2197_s5 + $0xc0] sm:$0xff]  ;;  %v262_v25 = vld [vmem:[%s2197_s5 + $0xd0] sm:$0xff] }
  0x4e   : > { %1690 = vmatmul.mubr.msk.f32.gmra.mxu0 %vm562_vm6, %v437_v7  ;;  %1738 = vmatmul.mubr.msk.f32.gmra.mxu1 %vm562_vm6, %v469_v9  ;;  %v475_v45 = vsel %vm347_vm2, %v283_v28, %v411_v35  ;;  %v444_v46 = vsel %vm316_vm3, %v252_v29, %v380_v36  ;;  %v413_v47 = vmul.f32 0.1, %v285_v40  ;;  %v382_v48 = vmul.f32 0.1, %v254_v41  ;;  %v259_v9 = vld [vmem:[%s2197_s5 + $0xb8] sm:$0xff]  ;;  %v295_v36 = vld [vmem:[%s2197_s5 + $0x1e0] sm:$0xff] }
  0x4f   : > { %1692 = vmatprep.mubr.msk.f32.mxu0 %vm562_vm6, %v438_v10  ;;  %1740 = vmatprep.mubr.msk.f32.mxu1 %vm562_vm6, %v470_v14  ;;  %v476_v50 = vsel %vm348_vm4, %v284_v30, %v412_v39  ;;  %vm349_vm7 = vcmp.ge.f32.partialorder %v285_v40, 0.0  ;;  %vm318_vm8 = vcmp.ge.f32.partialorder %v254_v41, 0.0  ;;  %v414_v51 = vmul.f32 0.1, %v286_v42  ;;  %v292_v14 = vld [vmem:[%s2197_s5 + $0x1c8] sm:$0xff] }
  0x50   : > { %vm350_vm9 = vcmp.ge.f32.partialorder %v286_v42, 0.0  ;;  %v445_v55 = vsel %vm317_vm5, %v253_v37, %v381_v44  ;;  %vm319_vm10 = vcmp.ge.f32.partialorder %v255_v49, 0.0  ;;  %v383_v56 = vmul.f32 0.1, %v255_v49  ;;  %v264_v37 = vld [vmem:[%s2197_s5 + $0xe0] sm:$0xff] }
  0x51   : > { %v477_v57 = vsel %vm349_vm7, %v285_v40, %v413_v47  ;;  %v446_v58 = vsel %vm318_vm8, %v254_v41, %v382_v48  ;;  %v415_v59 = vmul.f32 0.1, %v287_v52  ;;  %v384_v60 = vmul.f32 0.1, %v256_v53  ;;  %v297_v48 = vld [vmem:[%s2197_s5 + $0x1f0] sm:$0xff] }
  0x52   : > { %1693 = vmatmul.mubr.msk.f32.gmra.mxu0 %vm562_vm6, %v439_v19  ;;  %1741 = vmatmul.mubr.msk.f32.gmra.mxu1 %vm562_vm6, %v471_v21  ;;  %v478_v62 = vsel %vm350_vm9, %v286_v42, %v414_v51  ;;  %vm351_vm11 = vcmp.ge.f32.partialorder %v287_v52, 0.0  ;;  %vm320_vm12 = vcmp.ge.f32.partialorder %v256_v53, 0.0  ;;  %v416_v63 = vmul.f32 0.1, %v288_v54  ;;  %v261_v21 = vld [vmem:[%s2197_s5 + $0xc8] sm:$0xff] }
  0x53   : > { %1695 = vmatprep.mubr.msk.f32.mxu0 %vm562_vm6, %v440_v22  ;;  %1743 = vmatprep.mubr.msk.f32.mxu1 %vm562_vm6, %v472_v26  ;;  %vm352_vm13 = vcmp.ge.f32.partialorder %v288_v54, 0.0  ;;  %v447_v3 = vsel %vm319_vm10, %v255_v49, %v383_v56  ;;  %vm321_vm14 = vcmp.ge.f32.partialorder %v257_v61, 0.0  ;;  %v385_v4 = vmul.f32 0.1, %v257_v61  ;;  %v294_v26 = vld [vmem:[%s2197_s5 + $0x1d8] sm:$0xff]  ;;  %v266_v49 = vld [vmem:[%s2197_s5 + $0xf0] sm:$0xff] }
  0x54   : > { %v479_v5 = vsel %vm351_vm11, %v287_v52, %v415_v59  ;;  %v448_v6 = vsel %vm320_vm12, %v256_v53, %v384_v60  ;;  %v417_v7 = vmul.f32 0.1, %v289_v0  ;;  %v386_v8 = vmul.f32 0.1, %v258_v1  ;;  %v267_v56 = vld [vmem:[%s2197_s5 + $0xf8] sm:$0xff]  ;;  %v299_v60 = vld [vmem:[%s2197_s5 + $0x200] sm:$0xff] }
  0x55   : > { %v480_v10 = vsel %vm352_vm13, %v288_v54, %v416_v63  ;;  %vm353_vm15 = vcmp.ge.f32.partialorder %v289_v0, 0.0  ;;  %vm322_vm0 = vcmp.ge.f32.partialorder %v258_v1, 0.0  ;;  %v418_v11 = vmul.f32 0.1, %v290_v2 }
  0x56   : > { %1696 = vmatmul.mubr.msk.f32.gmra.mxu0 %vm562_vm6, %v441_v31  ;;  %1744 = vmatmul.mubr.msk.f32.gmra.mxu1 %vm562_vm6, %v473_v33  ;;  %vm354_vm1 = vcmp.ge.f32.partialorder %v290_v2, 0.0  ;;  %v449_v15 = vsel %vm321_vm14, %v257_v61, %v385_v4  ;;  %vm323_vm2 = vcmp.ge.f32.partialorder %v259_v9, 0.0  ;;  %v387_v16 = vmul.f32 0.1, %v259_v9  ;;  %v263_v33 = vld [vmem:[%s2197_s5 + $0xd8] sm:$0xff] }
  0x57   : > { %1698 = vmatprep.mubr.msk.f32.mxu0 %vm562_vm6, %v442_v34  ;;  %1746 = vmatprep.mubr.msk.f32.mxu1 %vm562_vm6, %v474_v38  ;;  %v481_v17 = vsel %vm353_vm15, %v289_v0, %v417_v7  ;;  %v450_v18 = vsel %vm322_vm0, %v258_v1, %v386_v8  ;;  %v419_v19 = vmul.f32 0.1, %v291_v12  ;;  %v388_v20 = vmul.f32 0.1, %v260_v13  ;;  %v296_v38 = vld [vmem:[%s2197_s5 + $0x1e8] sm:$0xff] }
  0x58   : > { %v482_v22 = vsel %vm354_vm1, %v290_v2, %v418_v11  ;;  %vm355_vm3 = vcmp.ge.f32.partialorder %v291_v12, 0.0  ;;  %vm324_vm4 = vcmp.ge.f32.partialorder %v260_v13, 0.0  ;;  %v420_v23 = vmul.f32 0.1, %v292_v14 }
  0x59   : > { %vm356_vm5 = vcmp.ge.f32.partialorder %v292_v14, 0.0  ;;  %v451_v27 = vsel %vm323_vm2, %v259_v9, %v387_v16  ;;  %vm325_vm7 = vcmp.ge.f32.partialorder %v261_v21, 0.0  ;;  %v389_v28 = vmul.f32 0.1, %v261_v21  ;;  %v492_v9 = vld [vmem:[%s3330_s3] sm:$0xff]  ;;  %v527_v16 = vld [vmem:[%s3330_s3 + $0x118] sm:$0xff] }
  0x5a   : > { %1699 = vmatmul.mubr.msk.f32.gmra.mxu0 %vm562_vm6, %v443_v43  ;;  %1747 = vmatmul.mubr.msk.f32.gmra.mxu1 %vm562_vm6, %v475_v45  ;;  %v483_v29 = vsel %vm355_vm3, %v291_v12, %v419_v19  ;;  %v452_v30 = vsel %vm324_vm4, %v260_v13, %v388_v20  ;;  %v421_v31 = vmul.f32 0.1, %v293_v24  ;;  %v390_v32 = vmul.f32 0.1, %v262_v25  ;;  %v265_v45 = vld [vmem:[%s2197_s5 + $0xe8] sm:$0xff] }
  0x5b   : > { %1701 = vmatprep.mubr.msk.f32.mxu0 %vm562_vm6, %v444_v46  ;;  %1749 = vmatprep.mubr.msk.f32.mxu1 %vm562_vm6, %v476_v50  ;;  %v484_v34 = vsel %vm356_vm5, %v292_v14, %v420_v23  ;;  %vm357_vm8 = vcmp.ge.f32.partialorder %v293_v24, 0.0  ;;  %vm326_vm9 = vcmp.ge.f32.partialorder %v262_v25, 0.0  ;;  %v422_v35 = vmul.f32 0.1, %v294_v26  ;;  %v298_v50 = vld [vmem:[%s2197_s5 + $0x1f8] sm:$0xff] }
  0x5c   : > { %vm358_vm10 = vcmp.ge.f32.partialorder %v294_v26, 0.0  ;;  %v453_v39 = vsel %vm325_vm7, %v261_v21, %v389_v28  ;;  %vm327_vm11 = vcmp.ge.f32.partialorder %v263_v33, 0.0  ;;  %v391_v40 = vmul.f32 0.1, %v263_v33  ;;  %v494_v21 = vld [vmem:[%s3330_s3 + $0x10] sm:$0xff]  ;;  %v529_v28 = vld [vmem:[%s3330_s3 + $0x128] sm:$0xff] }
  0x5d   : > { %v485_v41 = vsel %vm357_vm8, %v293_v24, %v421_v31  ;;  %v454_v42 = vsel %vm326_vm9, %v262_v25, %v390_v32  ;;  %v423_v43 = vmul.f32 0.1, %v295_v36  ;;  %v392_v44 = vmul.f32 0.1, %v264_v37 }
  0x5e   : > { %1702 = vmatmul.mubr.msk.f32.gmra.mxu0 %vm562_vm6, %v445_v55  ;;  %1750 = vmatmul.mubr.msk.f32.gmra.mxu1 %vm562_vm6, %v477_v57  ;;  %v486_v46 = vsel %vm358_vm10, %v294_v26, %v422_v35  ;;  %vm359_vm12 = vcmp.ge.f32.partialorder %v295_v36, 0.0  ;;  %vm328_vm13 = vcmp.ge.f32.partialorder %v264_v37, 0.0  ;;  %v424_v47 = vmul.f32 0.1, %v296_v38 }
  0x5f   : > { %1704 = vmatprep.mubr.msk.f32.mxu0 %vm562_vm6, %v446_v58  ;;  %1752 = vmatprep.mubr.msk.f32.mxu1 %vm562_vm6, %v478_v62  ;;  %vm360_vm14 = vcmp.ge.f32.partialorder %v296_v38, 0.0  ;;  %v455_v51 = vsel %vm327_vm11, %v263_v33, %v391_v40  ;;  %vm329_vm15 = vcmp.ge.f32.partialorder %v265_v45, 0.0  ;;  %v487_v52 = vsel %vm359_vm12, %v295_v36, %v423_v43  ;;  %v496_v33 = vld [vmem:[%s3330_s3 + $0x20] sm:$0xff]  ;;  %v531_v40 = vld [vmem:[%s3330_s3 + $0x138] sm:$0xff] }
  0x60   : > { %v456_v53 = vsel %vm328_vm13, %v264_v37, %v392_v44  ;;  %v393_v54 = vmul.f32 0.1, %v265_v45  ;;  %v425_v55 = vmul.f32 0.1, %v297_v48  ;;  %v488_v57 = vsel %vm360_vm14, %v296_v38, %v424_v47 }
  0x61   : > { %vm361_vm0 = vcmp.ge.f32.partialorder %v297_v48, 0.0  ;;  %v394_v58 = vmul.f32 0.1, %v266_v49  ;;  %v426_v59 = vmul.f32 0.1, %v298_v50  ;;  %vm330_vm1 = vcmp.ge.f32.partialorder %v266_v49, 0.0 }
  0x62   : > { %1705 = vmatmul.mubr.msk.f32.gmra.mxu0 %vm562_vm6, %v447_v3  ;;  %1753 = vmatmul.mubr.msk.f32.gmra.mxu1 %vm562_vm6, %v479_v5  ;;  %vm362_vm2 = vcmp.ge.f32.partialorder %v298_v50, 0.0  ;;  %v457_v61 = vsel %vm329_vm15, %v265_v45, %v393_v54  ;;  %v489_v62 = vsel %vm361_vm0, %v297_v48, %v425_v55  ;;  %v395_v63 = vmul.f32 0.1, %v267_v56  ;;  %v493_v5 = vld [vmem:[%s3330_s3 + $0x8] sm:$0xff]  ;;  %v498_v45 = vld [vmem:[%s3330_s3 + $0x30] sm:$0xff] }
  0x63   : > { %1707 = vmatprep.mubr.msk.f32.mxu0 %vm562_vm6, %v448_v6  ;;  %1755 = vmatprep.mubr.msk.f32.mxu1 %vm562_vm6, %v480_v10  ;;  %v427_v0 = vmul.f32 0.1, %v299_v60  ;;  %v458_v1 = vsel %vm330_vm1, %v266_v49, %v394_v58  ;;  %v490_v2 = vsel %vm362_vm2, %v298_v50, %v426_v59  ;;  %vm331_vm3 = vcmp.ge.f32.partialorder %v267_v56, 0.0  ;;  %v525_v6 = vld [vmem:[%s3330_s3 + $0x108] sm:$0xff]  ;;  %v524_v10 = vld [vmem:[%s3330_s3 + $0x100] sm:$0xff] }
  0x64   : > { %vm363_vm4 = vcmp.ge.f32.partialorder %v299_v60, 0.0  ;;  %v459_v3 = vsel %vm331_vm3, %v267_v56, %v395_v63  ;;  %v532_v58 = vld [vmem:[%s3330_s3 + $0x140] sm:$0xff]  ;;  %v503_v63 = vld [vmem:[%s3330_s3 + $0x58] sm:$0xff] }
  0x65   : > { %v491_v4 = vsel %vm363_vm4, %v299_v60, %v427_v0  ;;  %v535_v0 = vld [vmem:[%s3330_s3 + $0x158] sm:$0xff] }
  0x66   : > { %1708 = vmatmul.mubr.msk.f32.gmra.mxu0 %vm562_vm6, %v449_v15  ;;  %1756 = vmatmul.mubr.msk.f32.gmra.mxu1 %vm562_vm6, %v481_v17  ;;  %v495_v15 = vld [vmem:[%s3330_s3 + $0x18] sm:$0xff] }
  0x67   : > { %1710 = vmatprep.mubr.msk.f32.mxu0 %vm562_vm6, %v450_v18  ;;  %1758 = vmatprep.mubr.msk.f32.mxu1 %vm562_vm6, %v482_v22  ;;  %v526_v22 = vld [vmem:[%s3330_s3 + $0x110] sm:$0xff] }
  0x6a   : > { %1711 = vmatmul.mubr.msk.f32.gmra.mxu0 %vm562_vm6, %v451_v27  ;;  %1759 = vmatmul.mubr.msk.f32.gmra.mxu1 %vm562_vm6, %v483_v29  ;;  %v497_v27 = vld [vmem:[%s3330_s3 + $0x28] sm:$0xff] }
  0x6b   : > { %1713 = vmatprep.mubr.msk.f32.mxu0 %vm562_vm6, %v452_v30  ;;  %1761 = vmatprep.mubr.msk.f32.mxu1 %vm562_vm6, %v484_v34  ;;  %v528_v34 = vld [vmem:[%s3330_s3 + $0x120] sm:$0xff] }
  0x6e   : > { %1714 = vmatmul.mubr.msk.f32.gmra.mxu0 %vm562_vm6, %v453_v39  ;;  %1762 = vmatmul.mubr.msk.f32.gmra.mxu1 %vm562_vm6, %v485_v41  ;;  %v499_v39 = vld [vmem:[%s3330_s3 + $0x38] sm:$0xff] }
  0x6f   : > { %1716 = vmatprep.mubr.msk.f32.mxu0 %vm562_vm6, %v454_v42  ;;  %1764 = vmatprep.mubr.msk.f32.mxu1 %vm562_vm6, %v486_v46  ;;  %v530_v46 = vld [vmem:[%s3330_s3 + $0x130] sm:$0xff] }
  0x72   : > { %1717 = vmatmul.mubr.msk.f32.gmra.mxu0 %vm562_vm6, %v455_v51  ;;  %1765 = vmatmul.mubr.msk.f32.gmra.mxu1 %vm562_vm6, %v487_v52  ;;  %v501_v51 = vld [vmem:[%s3330_s3 + $0x48] sm:$0xff] }
  0x73   : > { %1719 = vmatprep.mubr.msk.f32.mxu0 %vm562_vm6, %v456_v53  ;;  %1767 = vmatprep.mubr.msk.f32.mxu1 %vm562_vm6, %v488_v57  ;;  %v533_v52 = vld [vmem:[%s3330_s3 + $0x148] sm:$0xff]  ;;  %v500_v57 = vld [vmem:[%s3330_s3 + $0x40] sm:$0xff] }
  0x76   : > { %1720 = vmatmul.mubr.msk.f32.gmra.mxu0 %vm562_vm6, %v457_v61  ;;  %1768 = vmatmul.mubr.msk.f32.gmra.mxu1 %vm562_vm6, %v489_v62 }
  0x77   : > { %1722 = vmatprep.mubr.msk.f32.mxu0 %vm562_vm6, %v458_v1  ;;  %1770 = vmatprep.mubr.msk.f32.mxu1 %vm562_vm6, %v490_v2 }
  0x7a   : > { %1723 = vmatmul.mubr.msk.f32.gmra.mxu0 %vm562_vm6, %v459_v3  ;;  %1771 = vmatmul.mubr.msk.f32.gmra.mxu1 %vm562_vm6, %v491_v4 }
  0xfe   : > { %v1679_v7 = vpop.f32.mrf.mxu0  ;;  %v1727_v8 = vpop.f32.mrf.mxu1 }
  0xff   : > { %v1141_v11 = vadd.f32 %v1679_v7, %v493_v5  ;;  %v1173_v12 = vadd.f32 %v1727_v8, %v525_v6  ;;  %v502_v5 = vld [vmem:[%s3330_s3 + $0x50] sm:$0xff] }
 0x100   : > { %v821_v13 = vpop.f32.mrf.mxu0  ;;  %v981_v14 = vpop.f32.mrf.mxu1  ;;  %v534_v6 = vld [vmem:[%s3330_s3 + $0x150] sm:$0xff] }
 0x101   : > { %1205 = vst.msk [vmem:[%s3330_s3 + $0x8] sm:$0xff] %vm562_vm6, %v1141_v11  ;;  %1237 = vst.msk [vmem:[%s3330_s3 + $0x108] sm:$0xff] %vm562_vm6, %v1173_v12  ;;  %v1140_v17 = vadd.f32 %v821_v13, %v492_v9  ;;  %v1172_v18 = vadd.f32 %v981_v14, %v524_v10  ;;  %v505_v11 = vld [vmem:[%s3330_s3 + $0x68] sm:$0xff] }
 0x102   : > { %v1682_v19 = vpop.f32.mrf.mxu0  ;;  %v1730_v20 = vpop.f32.mrf.mxu1  ;;  %v537_v12 = vld [vmem:[%s3330_s3 + $0x168] sm:$0xff] }
 0x103   : > { %1204 = vst.msk [vmem:[%s3330_s3] sm:$0xff] %vm562_vm6, %v1140_v17  ;;  %1236 = vst.msk [vmem:[%s3330_s3 + $0x100] sm:$0xff] %vm562_vm6, %v1172_v18  ;;  %v1143_v23 = vadd.f32 %v1682_v19, %v495_v15  ;;  %v1175_v24 = vadd.f32 %v1730_v20, %v527_v16  ;;  %v504_v17 = vld [vmem:[%s3330_s3 + $0x60] sm:$0xff] }
 0x104   : > { %v831_v25 = vpop.f32.mrf.mxu0  ;;  %v991_v26 = vpop.f32.mrf.mxu1  ;;  %v536_v18 = vld [vmem:[%s3330_s3 + $0x160] sm:$0xff] }
 0x105   : > { %1207 = vst.msk [vmem:[%s3330_s3 + $0x18] sm:$0xff] %vm562_vm6, %v1143_v23  ;;  %1239 = vst.msk [vmem:[%s3330_s3 + $0x118] sm:$0xff] %vm562_vm6, %v1175_v24  ;;  %v1142_v29 = vadd.f32 %v831_v25, %v494_v21  ;;  %v1174_v30 = vadd.f32 %v991_v26, %v526_v22  ;;  %v507_v23 = vld [vmem:[%s3330_s3 + $0x78] sm:$0xff] }
 0x106   : > { %v1685_v31 = vpop.f32.mrf.mxu0  ;;  %v1733_v32 = vpop.f32.mrf.mxu1  ;;  %v539_v24 = vld [vmem:[%s3330_s3 + $0x178] sm:$0xff] }
 0x107   : > { %1206 = vst.msk [vmem:[%s3330_s3 + $0x10] sm:$0xff] %vm562_vm6, %v1142_v29  ;;  %1238 = vst.msk [vmem:[%s3330_s3 + $0x110] sm:$0xff] %vm562_vm6, %v1174_v30  ;;  %v1145_v35 = vadd.f32 %v1685_v31, %v497_v27  ;;  %v1177_v36 = vadd.f32 %v1733_v32, %v529_v28  ;;  %v506_v29 = vld [vmem:[%s3330_s3 + $0x70] sm:$0xff] }
 0x108   : > { %v841_v37 = vpop.f32.mrf.mxu0  ;;  %v1001_v38 = vpop.f32.mrf.mxu1  ;;  %v538_v30 = vld [vmem:[%s3330_s3 + $0x170] sm:$0xff] }
 0x109   : > { %1209 = vst.msk [vmem:[%s3330_s3 + $0x28] sm:$0xff] %vm562_vm6, %v1145_v35  ;;  %1241 = vst.msk [vmem:[%s3330_s3 + $0x128] sm:$0xff] %vm562_vm6, %v1177_v36  ;;  %v1144_v41 = vadd.f32 %v841_v37, %v496_v33  ;;  %v1176_v42 = vadd.f32 %v1001_v38, %v528_v34  ;;  %v509_v35 = vld [vmem:[%s3330_s3 + $0x88] sm:$0xff] }
 0x10a   : > { %v1688_v43 = vpop.f32.mrf.mxu0  ;;  %v1736_v44 = vpop.f32.mrf.mxu1  ;;  %v541_v36 = vld [vmem:[%s3330_s3 + $0x188] sm:$0xff] }
 0x10b   : > { %1208 = vst.msk [vmem:[%s3330_s3 + $0x20] sm:$0xff] %vm562_vm6, %v1144_v41  ;;  %1240 = vst.msk [vmem:[%s3330_s3 + $0x120] sm:$0xff] %vm562_vm6, %v1176_v42  ;;  %v1147_v47 = vadd.f32 %v1688_v43, %v499_v39  ;;  %v1179_v48 = vadd.f32 %v1736_v44, %v531_v40  ;;  %v508_v41 = vld [vmem:[%s3330_s3 + $0x80] sm:$0xff] }
 0x10c   : > { %v851_v49 = vpop.f32.mrf.mxu0  ;;  %v1011_v50 = vpop.f32.mrf.mxu1  ;;  %v540_v42 = vld [vmem:[%s3330_s3 + $0x180] sm:$0xff] }
 0x10d   : > { %1211 = vst.msk [vmem:[%s3330_s3 + $0x38] sm:$0xff] %vm562_vm6, %v1147_v47  ;;  %1243 = vst.msk [vmem:[%s3330_s3 + $0x138] sm:$0xff] %vm562_vm6, %v1179_v48  ;;  %v1146_v53 = vadd.f32 %v851_v49, %v498_v45  ;;  %v1178_v54 = vadd.f32 %v1011_v50, %v530_v46  ;;  %v511_v47 = vld [vmem:[%s3330_s3 + $0x98] sm:$0xff] }
 0x10e   : > { %v1691_v55 = vpop.f32.mrf.mxu0  ;;  %v1739_v56 = vpop.f32.mrf.mxu1  ;;  %v543_v48 = vld [vmem:[%s3330_s3 + $0x198] sm:$0xff] }
 0x10f   : > { %1210 = vst.msk [vmem:[%s3330_s3 + $0x30] sm:$0xff] %vm562_vm6, %v1146_v53  ;;  %1242 = vst.msk [vmem:[%s3330_s3 + $0x130] sm:$0xff] %vm562_vm6, %v1178_v54  ;;  %v1149_v59 = vadd.f32 %v1691_v55, %v501_v51  ;;  %v1181_v60 = vadd.f32 %v1739_v56, %v533_v52  ;;  %v510_v53 = vld [vmem:[%s3330_s3 + $0x90] sm:$0xff] }
 0x110   : > { %v861_v61 = vpop.f32.mrf.mxu0  ;;  %v1021_v62 = vpop.f32.mrf.mxu1  ;;  %v542_v54 = vld [vmem:[%s3330_s3 + $0x190] sm:$0xff] }
 0x111   : > { %1213 = vst.msk [vmem:[%s3330_s3 + $0x48] sm:$0xff] %vm562_vm6, %v1149_v59  ;;  %1245 = vst.msk [vmem:[%s3330_s3 + $0x148] sm:$0xff] %vm562_vm6, %v1181_v60  ;;  %v1148_v1 = vadd.f32 %v861_v61, %v500_v57  ;;  %v1180_v2 = vadd.f32 %v1021_v62, %v532_v58  ;;  %v513_v59 = vld [vmem:[%s3330_s3 + $0xa8] sm:$0xff] }
 0x112   : > { %v1694_v3 = vpop.f32.mrf.mxu0  ;;  %v1742_v4 = vpop.f32.mrf.mxu1  ;;  %v545_v60 = vld [vmem:[%s3330_s3 + $0x1a8] sm:$0xff] }
 0x113   : > { %1212 = vst.msk [vmem:[%s3330_s3 + $0x40] sm:$0xff] %vm562_vm6, %v1148_v1  ;;  %1244 = vst.msk [vmem:[%s3330_s3 + $0x140] sm:$0xff] %vm562_vm6, %v1180_v2  ;;  %v1151_v7 = vadd.f32 %v1694_v3, %v503_v63  ;;  %v1183_v8 = vadd.f32 %v1742_v4, %v535_v0  ;;  %v512_v1 = vld [vmem:[%s3330_s3 + $0xa0] sm:$0xff] }
 0x114   : > { %v871_v9 = vpop.f32.mrf.mxu0  ;;  %v1031_v10 = vpop.f32.mrf.mxu1  ;;  %v544_v2 = vld [vmem:[%s3330_s3 + $0x1a0] sm:$0xff] }
 0x115   : > { %1215 = vst.msk [vmem:[%s3330_s3 + $0x58] sm:$0xff] %vm562_vm6, %v1151_v7  ;;  %1247 = vst.msk [vmem:[%s3330_s3 + $0x158] sm:$0xff] %vm562_vm6, %v1183_v8  ;;  %v1150_v13 = vadd.f32 %v871_v9, %v502_v5  ;;  %v1182_v14 = vadd.f32 %v1031_v10, %v534_v6  ;;  %v515_v7 = vld [vmem:[%s3330_s3 + $0xb8] sm:$0xff] }
 0x116   : > { %v1697_v15 = vpop.f32.mrf.mxu0  ;;  %v1745_v16 = vpop.f32.mrf.mxu1  ;;  %v547_v8 = vld [vmem:[%s3330_s3 + $0x1b8] sm:$0xff] }
 0x117   : > { %1214 = vst.msk [vmem:[%s3330_s3 + $0x50] sm:$0xff] %vm562_vm6, %v1150_v13  ;;  %1246 = vst.msk [vmem:[%s3330_s3 + $0x150] sm:$0xff] %vm562_vm6, %v1182_v14  ;;  %v1153_v19 = vadd.f32 %v1697_v15, %v505_v11  ;;  %v1185_v20 = vadd.f32 %v1745_v16, %v537_v12  ;;  %v514_v13 = vld [vmem:[%s3330_s3 + $0xb0] sm:$0xff] }
 0x118   : > { %v881_v21 = vpop.f32.mrf.mxu0  ;;  %v1041_v22 = vpop.f32.mrf.mxu1  ;;  %v546_v14 = vld [vmem:[%s3330_s3 + $0x1b0] sm:$0xff] }
 0x119   : > { %1217 = vst.msk [vmem:[%s3330_s3 + $0x68] sm:$0xff] %vm562_vm6, %v1153_v19  ;;  %1249 = vst.msk [vmem:[%s3330_s3 + $0x168] sm:$0xff] %vm562_vm6, %v1185_v20  ;;  %v1152_v25 = vadd.f32 %v881_v21, %v504_v17  ;;  %v1184_v26 = vadd.f32 %v1041_v22, %v536_v18  ;;  %v517_v19 = vld [vmem:[%s3330_s3 + $0xc8] sm:$0xff] }
 0x11a   : > { %v1700_v27 = vpop.f32.mrf.mxu0  ;;  %v1748_v28 = vpop.f32.mrf.mxu1  ;;  %v549_v20 = vld [vmem:[%s3330_s3 + $0x1c8] sm:$0xff] }
 0x11b   : > { %1216 = vst.msk [vmem:[%s3330_s3 + $0x60] sm:$0xff] %vm562_vm6, %v1152_v25  ;;  %1248 = vst.msk [vmem:[%s3330_s3 + $0x160] sm:$0xff] %vm562_vm6, %v1184_v26  ;;  %v1155_v31 = vadd.f32 %v1700_v27, %v507_v23  ;;  %v1187_v32 = vadd.f32 %v1748_v28, %v539_v24  ;;  %v516_v25 = vld [vmem:[%s3330_s3 + $0xc0] sm:$0xff] }
 0x11c   : > { %v891_v33 = vpop.f32.mrf.mxu0  ;;  %v1051_v34 = vpop.f32.mrf.mxu1  ;;  %v548_v26 = vld [vmem:[%s3330_s3 + $0x1c0] sm:$0xff] }
 0x11d   : > { %1219 = vst.msk [vmem:[%s3330_s3 + $0x78] sm:$0xff] %vm562_vm6, %v1155_v31  ;;  %1251 = vst.msk [vmem:[%s3330_s3 + $0x178] sm:$0xff] %vm562_vm6, %v1187_v32  ;;  %v1154_v37 = vadd.f32 %v891_v33, %v506_v29  ;;  %v1186_v38 = vadd.f32 %v1051_v34, %v538_v30  ;;  %v519_v31 = vld [vmem:[%s3330_s3 + $0xd8] sm:$0xff] }
 0x11e   : > { %v1703_v39 = vpop.f32.mrf.mxu0  ;;  %v1751_v40 = vpop.f32.mrf.mxu1  ;;  %v551_v32 = vld [vmem:[%s3330_s3 + $0x1d8] sm:$0xff] }
 0x11f   : > { %1218 = vst.msk [vmem:[%s3330_s3 + $0x70] sm:$0xff] %vm562_vm6, %v1154_v37  ;;  %1250 = vst.msk [vmem:[%s3330_s3 + $0x170] sm:$0xff] %vm562_vm6, %v1186_v38  ;;  %v1157_v43 = vadd.f32 %v1703_v39, %v509_v35  ;;  %v1189_v44 = vadd.f32 %v1751_v40, %v541_v36  ;;  %v518_v37 = vld [vmem:[%s3330_s3 + $0xd0] sm:$0xff] }
 0x120   : > { %v901_v45 = vpop.f32.mrf.mxu0  ;;  %v1061_v46 = vpop.f32.mrf.mxu1  ;;  %v550_v38 = vld [vmem:[%s3330_s3 + $0x1d0] sm:$0xff] }
 0x121   : > { %1221 = vst.msk [vmem:[%s3330_s3 + $0x88] sm:$0xff] %vm562_vm6, %v1157_v43  ;;  %1253 = vst.msk [vmem:[%s3330_s3 + $0x188] sm:$0xff] %vm562_vm6, %v1189_v44  ;;  %v1156_v49 = vadd.f32 %v901_v45, %v508_v41  ;;  %v1188_v50 = vadd.f32 %v1061_v46, %v540_v42  ;;  %v521_v43 = vld [vmem:[%s3330_s3 + $0xe8] sm:$0xff] }
 0x122   : > { %v1706_v51 = vpop.f32.mrf.mxu0  ;;  %v1754_v52 = vpop.f32.mrf.mxu1  ;;  %v553_v44 = vld [vmem:[%s3330_s3 + $0x1e8] sm:$0xff] }
 0x123   : > { %1220 = vst.msk [vmem:[%s3330_s3 + $0x80] sm:$0xff] %vm562_vm6, %v1156_v49  ;;  %1252 = vst.msk [vmem:[%s3330_s3 + $0x180] sm:$0xff] %vm562_vm6, %v1188_v50  ;;  %v1159_v55 = vadd.f32 %v1706_v51, %v511_v47  ;;  %v1191_v56 = vadd.f32 %v1754_v52, %v543_v48  ;;  %v520_v49 = vld [vmem:[%s3330_s3 + $0xe0] sm:$0xff] }
 0x124   : > { %v911_v57 = vpop.f32.mrf.mxu0  ;;  %v1071_v58 = vpop.f32.mrf.mxu1  ;;  %v552_v50 = vld [vmem:[%s3330_s3 + $0x1e0] sm:$0xff] }
 0x125   : > { %1223 = vst.msk [vmem:[%s3330_s3 + $0x98] sm:$0xff] %vm562_vm6, %v1159_v55  ;;  %1255 = vst.msk [vmem:[%s3330_s3 + $0x198] sm:$0xff] %vm562_vm6, %v1191_v56  ;;  %v1158_v61 = vadd.f32 %v911_v57, %v510_v53  ;;  %v1190_v62 = vadd.f32 %v1071_v58, %v542_v54  ;;  %v523_v55 = vld [vmem:[%s3330_s3 + $0xf8] sm:$0xff] }
 0x126   : > { %v1709_v63 = vpop.f32.mrf.mxu0  ;;  %v1757_v0 = vpop.f32.mrf.mxu1  ;;  %v555_v56 = vld [vmem:[%s3330_s3 + $0x1f8] sm:$0xff] }
 0x127   : > { %1222 = vst.msk [vmem:[%s3330_s3 + $0x90] sm:$0xff] %vm562_vm6, %v1158_v61  ;;  %1254 = vst.msk [vmem:[%s3330_s3 + $0x190] sm:$0xff] %vm562_vm6, %v1190_v62  ;;  %v1161_v3 = vadd.f32 %v1709_v63, %v513_v59  ;;  %v1193_v4 = vadd.f32 %v1757_v0, %v545_v60  ;;  %v522_v61 = vld [vmem:[%s3330_s3 + $0xf0] sm:$0xff] }
 0x128   : > { %v921_v5 = vpop.f32.mrf.mxu0  ;;  %v1081_v6 = vpop.f32.mrf.mxu1  ;;  %v554_v62 = vld [vmem:[%s3330_s3 + $0x1f0] sm:$0xff] }
 0x129   : > { %1225 = vst.msk [vmem:[%s3330_s3 + $0xa8] sm:$0xff] %vm562_vm6, %v1161_v3  ;;  %1257 = vst.msk [vmem:[%s3330_s3 + $0x1a8] sm:$0xff] %vm562_vm6, %v1193_v4  ;;  %v1160_v9 = vadd.f32 %v921_v5, %v512_v1  ;;  %v1192_v10 = vadd.f32 %v1081_v6, %v544_v2 }
 0x12a   : > { %v1712_v11 = vpop.f32.mrf.mxu0  ;;  %v1760_v12 = vpop.f32.mrf.mxu1 }
 0x12b   : > { %1224 = vst.msk [vmem:[%s3330_s3 + $0xa0] sm:$0xff] %vm562_vm6, %v1160_v9  ;;  %1256 = vst.msk [vmem:[%s3330_s3 + $0x1a0] sm:$0xff] %vm562_vm6, %v1192_v10  ;;  %v1163_v15 = vadd.f32 %v1712_v11, %v515_v7  ;;  %v1195_v16 = vadd.f32 %v1760_v12, %v547_v8 }
 0x12c   : > { %v931_v17 = vpop.f32.mrf.mxu0  ;;  %v1091_v18 = vpop.f32.mrf.mxu1 }
 0x12d   : > { %1227 = vst.msk [vmem:[%s3330_s3 + $0xb8] sm:$0xff] %vm562_vm6, %v1163_v15  ;;  %1259 = vst.msk [vmem:[%s3330_s3 + $0x1b8] sm:$0xff] %vm562_vm6, %v1195_v16  ;;  %v1162_v21 = vadd.f32 %v931_v17, %v514_v13  ;;  %v1194_v22 = vadd.f32 %v1091_v18, %v546_v14 }
 0x12e   : > { %v1715_v23 = vpop.f32.mrf.mxu0  ;;  %v1763_v24 = vpop.f32.mrf.mxu1 }
 0x12f   : > { %1226 = vst.msk [vmem:[%s3330_s3 + $0xb0] sm:$0xff] %vm562_vm6, %v1162_v21  ;;  %1258 = vst.msk [vmem:[%s3330_s3 + $0x1b0] sm:$0xff] %vm562_vm6, %v1194_v22  ;;  %v1165_v27 = vadd.f32 %v1715_v23, %v517_v19  ;;  %v1197_v28 = vadd.f32 %v1763_v24, %v549_v20 }
 0x130   : > { %v941_v29 = vpop.f32.mrf.mxu0  ;;  %v1101_v30 = vpop.f32.mrf.mxu1 }
 0x131   : > { %1229 = vst.msk [vmem:[%s3330_s3 + $0xc8] sm:$0xff] %vm562_vm6, %v1165_v27  ;;  %1261 = vst.msk [vmem:[%s3330_s3 + $0x1c8] sm:$0xff] %vm562_vm6, %v1197_v28  ;;  %v1164_v33 = vadd.f32 %v941_v29, %v516_v25  ;;  %v1196_v34 = vadd.f32 %v1101_v30, %v548_v26 }
 0x132   : > { %v1718_v35 = vpop.f32.mrf.mxu0  ;;  %v1766_v36 = vpop.f32.mrf.mxu1 }
 0x133   : > { %1228 = vst.msk [vmem:[%s3330_s3 + $0xc0] sm:$0xff] %vm562_vm6, %v1164_v33  ;;  %1260 = vst.msk [vmem:[%s3330_s3 + $0x1c0] sm:$0xff] %vm562_vm6, %v1196_v34  ;;  %v1167_v39 = vadd.f32 %v1718_v35, %v519_v31  ;;  %v1199_v40 = vadd.f32 %v1766_v36, %v551_v32 }
 0x134   : > { %v951_v41 = vpop.f32.mrf.mxu0  ;;  %v1111_v42 = vpop.f32.mrf.mxu1 }
 0x135   : > { %1231 = vst.msk [vmem:[%s3330_s3 + $0xd8] sm:$0xff] %vm562_vm6, %v1167_v39  ;;  %1263 = vst.msk [vmem:[%s3330_s3 + $0x1d8] sm:$0xff] %vm562_vm6, %v1199_v40  ;;  %v1166_v45 = vadd.f32 %v951_v41, %v518_v37  ;;  %v1198_v46 = vadd.f32 %v1111_v42, %v550_v38 }
 0x136   : > { %v1721_v47 = vpop.f32.mrf.mxu0  ;;  %v1769_v48 = vpop.f32.mrf.mxu1 }
 0x137   : > { %1230 = vst.msk [vmem:[%s3330_s3 + $0xd0] sm:$0xff] %vm562_vm6, %v1166_v45  ;;  %1262 = vst.msk [vmem:[%s3330_s3 + $0x1d0] sm:$0xff] %vm562_vm6, %v1198_v46  ;;  %v1169_v51 = vadd.f32 %v1721_v47, %v521_v43  ;;  %v1201_v52 = vadd.f32 %v1769_v48, %v553_v44 }
 0x138   : > { %v961_v53 = vpop.f32.mrf.mxu0  ;;  %v1121_v54 = vpop.f32.mrf.mxu1 }
 0x139   : > { %1233 = vst.msk [vmem:[%s3330_s3 + $0xe8] sm:$0xff] %vm562_vm6, %v1169_v51  ;;  %1265 = vst.msk [vmem:[%s3330_s3 + $0x1e8] sm:$0xff] %vm562_vm6, %v1201_v52  ;;  %v1168_v57 = vadd.f32 %v961_v53, %v520_v49  ;;  %v1200_v58 = vadd.f32 %v1121_v54, %v552_v50 }
 0x13a   : > { %v1724_v59 = vpop.f32.mrf.mxu0  ;;  %v1772_v60 = vpop.f32.mrf.mxu1 }
 0x13b   : > { %1232 = vst.msk [vmem:[%s3330_s3 + $0xe0] sm:$0xff] %vm562_vm6, %v1168_v57  ;;  %1264 = vst.msk [vmem:[%s3330_s3 + $0x1e0] sm:$0xff] %vm562_vm6, %v1200_v58  ;;  %v1171_v63 = vadd.f32 %v1724_v59, %v523_v55  ;;  %v1203_v0 = vadd.f32 %v1772_v60, %v555_v56  ;;  %1271 = sbr.rel (%p1595_p5) target bundleno = 356 (0x164), region = 40 }
 0x13c   : > { %v971_v1 = vpop.f32.mrf.mxu0  ;;  %v1131_v2 = vpop.f32.mrf.mxu1 }
 0x13d   : > { %1235 = vst.msk [vmem:[%s3330_s3 + $0xf8] sm:$0xff] %vm562_vm6, %v1171_v63  ;;  %1267 = vst.msk [vmem:[%s3330_s3 + $0x1f8] sm:$0xff] %vm562_vm6, %v1203_v0  ;;  %v1170_v3 = vadd.f32 %v971_v1, %v522_v61  ;;  %v1202_v4 = vadd.f32 %v1131_v2, %v554_v62 }
 0x13f   : > { %1234 = vst.msk [vmem:[%s3330_s3 + $0xf0] sm:$0xff] %vm562_vm6, %v1170_v3  ;;  %1266 = vst.msk [vmem:[%s3330_s3 + $0x1f0] sm:$0xff] %vm562_vm6, %v1202_v4 }
 0x140   : > { %v1272_v5 = vld [vmem:[%s3330_s3] sm:$0xff]  ;;  %v1273_v7 = vld [vmem:[%s3330_s3 + $0x8] sm:$0xff]  ;;  %v1274_v10 = vld [vmem:[%s3330_s3 + $0x10] sm:$0xff] }
 0x141   : > { %v2807_v6 = vld [vmem:[%s3329_s2] ss:$0 sm:$0xff]  ;;  %v1275_v11 = vld [vmem:[%s3330_s3 + $0x18] sm:$0xff]  ;;  %v1277_v16 = vld [vmem:[%s3330_s3 + $0x28] sm:$0xff] }
 0x142   : > { %v1343_v8 = vadd.f32 %v2807_v6, %v1272_v5  ;;  %v1344_v9 = vadd.f32 %v2807_v6, %v1273_v7  ;;  %v1276_v12 = vld [vmem:[%s3330_s3 + $0x20] sm:$0xff]  ;;  %v1345_v13 = vadd.f32 %v2807_v6, %v1274_v10  ;;  %v1346_v14 = vadd.f32 %v2807_v6, %v1275_v11  ;;  %v1278_v17 = vld [vmem:[%s3330_s3 + $0x30] sm:$0xff]  ;;  %v1279_v18 = vld [vmem:[%s3330_s3 + $0x38] sm:$0xff] }
 0x143   : > { %v1347_v15 = vadd.f32 %v2807_v6, %v1276_v12  ;;  %v1348_v19 = vadd.f32 %v2807_v6, %v1277_v16  ;;  %v1349_v20 = vadd.f32 %v2807_v6, %v1278_v17  ;;  %v1350_v21 = vadd.f32 %v2807_v6, %v1279_v18  ;;  %v1280_v22 = vld [vmem:[%s3330_s3 + $0x40] sm:$0xff]  ;;  %v1281_v23 = vld [vmem:[%s3330_s3 + $0x48] sm:$0xff]  ;;  %v1282_v24 = vld [vmem:[%s3330_s3 + $0x50] sm:$0xff] }
 0x144   : > { %1407 = vst.msk [vmem:[%s3330_s3] sm:$0xff] %vm562_vm6, %v1343_v8  ;;  %1408 = vst.msk [vmem:[%s3330_s3 + $0x8] sm:$0xff] %vm562_vm6, %v1344_v9  ;;  %v1351_v25 = vadd.f32 %v2807_v6, %v1280_v22  ;;  %v1352_v26 = vadd.f32 %v2807_v6, %v1281_v23  ;;  %v1353_v27 = vadd.f32 %v2807_v6, %v1282_v24  ;;  %v1283_v28 = vld [vmem:[%s3330_s3 + $0x58] sm:$0xff]  ;;  %v1284_v29 = vld [vmem:[%s3330_s3 + $0x60] sm:$0xff] }
 0x145   : > { %1409 = vst.msk [vmem:[%s3330_s3 + $0x10] sm:$0xff] %vm562_vm6, %v1345_v13  ;;  %1410 = vst.msk [vmem:[%s3330_s3 + $0x18] sm:$0xff] %vm562_vm6, %v1346_v14  ;;  %v1285_v30 = vld [vmem:[%s3330_s3 + $0x68] sm:$0xff]  ;;  %v1354_v31 = vadd.f32 %v2807_v6, %v1283_v28  ;;  %v1355_v32 = vadd.f32 %v2807_v6, %v1284_v29  ;;  %v1286_v34 = vld [vmem:[%s3330_s3 + $0x70] sm:$0xff] }
 0x146   : > { %1411 = vst.msk [vmem:[%s3330_s3 + $0x20] sm:$0xff] %vm562_vm6, %v1347_v15  ;;  %1412 = vst.msk [vmem:[%s3330_s3 + $0x28] sm:$0xff] %vm562_vm6, %v1348_v19  ;;  %v1356_v33 = vadd.f32 %v2807_v6, %v1285_v30  ;;  %v1287_v35 = vld [vmem:[%s3330_s3 + $0x78] sm:$0xff]  ;;  %v1288_v36 = vld [vmem:[%s3330_s3 + $0x80] sm:$0xff]  ;;  %v1357_v37 = vadd.f32 %v2807_v6, %v1286_v34 }
 0x147   : > { %1413 = vst.msk [vmem:[%s3330_s3 + $0x30] sm:$0xff] %vm562_vm6, %v1349_v20  ;;  %1414 = vst.msk [vmem:[%s3330_s3 + $0x38] sm:$0xff] %vm562_vm6, %v1350_v21  ;;  %v1358_v38 = vadd.f32 %v2807_v6, %v1287_v35  ;;  %v1359_v39 = vadd.f32 %v2807_v6, %v1288_v36  ;;  %v1289_v40 = vld [vmem:[%s3330_s3 + $0x88] sm:$0xff]  ;;  %v1290_v41 = vld [vmem:[%s3330_s3 + $0x90] sm:$0xff] }
 0x148   : > { %1415 = vst.msk [vmem:[%s3330_s3 + $0x40] sm:$0xff] %vm562_vm6, %v1351_v25  ;;  %1416 = vst.msk [vmem:[%s3330_s3 + $0x48] sm:$0xff] %vm562_vm6, %v1352_v26  ;;  %v1291_v42 = vld [vmem:[%s3330_s3 + $0x98] sm:$0xff]  ;;  %v1360_v43 = vadd.f32 %v2807_v6, %v1289_v40  ;;  %v1361_v44 = vadd.f32 %v2807_v6, %v1290_v41  ;;  %v1292_v46 = vld [vmem:[%s3330_s3 + $0xa0] sm:$0xff] }
 0x149   : > { %1417 = vst.msk [vmem:[%s3330_s3 + $0x50] sm:$0xff] %vm562_vm6, %v1353_v27  ;;  %1418 = vst.msk [vmem:[%s3330_s3 + $0x58] sm:$0xff] %vm562_vm6, %v1354_v31  ;;  %v1362_v45 = vadd.f32 %v2807_v6, %v1291_v42  ;;  %v1293_v47 = vld [vmem:[%s3330_s3 + $0xa8] sm:$0xff]  ;;  %v1294_v48 = vld [vmem:[%s3330_s3 + $0xb0] sm:$0xff]  ;;  %v1363_v49 = vadd.f32 %v2807_v6, %v1292_v46 }
 0x14a   : > { %1419 = vst.msk [vmem:[%s3330_s3 + $0x60] sm:$0xff] %vm562_vm6, %v1355_v32  ;;  %1420 = vst.msk [vmem:[%s3330_s3 + $0x68] sm:$0xff] %vm562_vm6, %v1356_v33  ;;  %v1364_v50 = vadd.f32 %v2807_v6, %v1293_v47  ;;  %v1365_v51 = vadd.f32 %v2807_v6, %v1294_v48  ;;  %v1295_v52 = vld [vmem:[%s3330_s3 + $0xb8] sm:$0xff]  ;;  %v1296_v53 = vld [vmem:[%s3330_s3 + $0xc0] sm:$0xff] }
 0x14b   : > { %1421 = vst.msk [vmem:[%s3330_s3 + $0x70] sm:$0xff] %vm562_vm6, %v1357_v37  ;;  %1422 = vst.msk [vmem:[%s3330_s3 + $0x78] sm:$0xff] %vm562_vm6, %v1358_v38  ;;  %v1297_v54 = vld [vmem:[%s3330_s3 + $0xc8] sm:$0xff]  ;;  %v1366_v55 = vadd.f32 %v2807_v6, %v1295_v52  ;;  %v1367_v56 = vadd.f32 %v2807_v6, %v1296_v53  ;;  %v1298_v58 = vld [vmem:[%s3330_s3 + $0xd0] sm:$0xff] }
 0x14c   : > { %1423 = vst.msk [vmem:[%s3330_s3 + $0x80] sm:$0xff] %vm562_vm6, %v1359_v39  ;;  %1424 = vst.msk [vmem:[%s3330_s3 + $0x88] sm:$0xff] %vm562_vm6, %v1360_v43  ;;  %v1368_v57 = vadd.f32 %v2807_v6, %v1297_v54  ;;  %v1299_v59 = vld [vmem:[%s3330_s3 + $0xd8] sm:$0xff]  ;;  %v1300_v60 = vld [vmem:[%s3330_s3 + $0xe0] sm:$0xff]  ;;  %v1369_v61 = vadd.f32 %v2807_v6, %v1298_v58 }
 0x14d   : > { %1425 = vst.msk [vmem:[%s3330_s3 + $0x90] sm:$0xff] %vm562_vm6, %v1361_v44  ;;  %1426 = vst.msk [vmem:[%s3330_s3 + $0x98] sm:$0xff] %vm562_vm6, %v1362_v45  ;;  %v1370_v62 = vadd.f32 %v2807_v6, %v1299_v59  ;;  %v1371_v63 = vadd.f32 %v2807_v6, %v1300_v60  ;;  %v1301_v0 = vld [vmem:[%s3330_s3 + $0xe8] sm:$0xff]  ;;  %v1302_v1 = vld [vmem:[%s3330_s3 + $0xf0] sm:$0xff] }
 0x14e   : > { %1427 = vst.msk [vmem:[%s3330_s3 + $0xa0] sm:$0xff] %vm562_vm6, %v1363_v49  ;;  %1428 = vst.msk [vmem:[%s3330_s3 + $0xa8] sm:$0xff] %vm562_vm6, %v1364_v50  ;;  %v1303_v2 = vld [vmem:[%s3330_s3 + $0xf8] sm:$0xff]  ;;  %v1372_v3 = vadd.f32 %v2807_v6, %v1301_v0  ;;  %v1373_v4 = vadd.f32 %v2807_v6, %v1302_v1  ;;  %v1304_v7 = vld [vmem:[%s3330_s3 + $0x100] sm:$0xff] }
 0x14f   : > { %1429 = vst.msk [vmem:[%s3330_s3 + $0xb0] sm:$0xff] %vm562_vm6, %v1365_v51  ;;  %1430 = vst.msk [vmem:[%s3330_s3 + $0xb8] sm:$0xff] %vm562_vm6, %v1366_v55  ;;  %v1374_v5 = vadd.f32 %v2807_v6, %v1303_v2  ;;  %v1305_v8 = vld [vmem:[%s3330_s3 + $0x108] sm:$0xff]  ;;  %v1306_v9 = vld [vmem:[%s3330_s3 + $0x110] sm:$0xff]  ;;  %v1375_v10 = vadd.f32 %v2807_v6, %v1304_v7 }
 0x150   : > { %1431 = vst.msk [vmem:[%s3330_s3 + $0xc0] sm:$0xff] %vm562_vm6, %v1367_v56  ;;  %1432 = vst.msk [vmem:[%s3330_s3 + $0xc8] sm:$0xff] %vm562_vm6, %v1368_v57  ;;  %v1376_v11 = vadd.f32 %v2807_v6, %v1305_v8  ;;  %v1377_v12 = vadd.f32 %v2807_v6, %v1306_v9  ;;  %v1307_v13 = vld [vmem:[%s3330_s3 + $0x118] sm:$0xff]  ;;  %v1308_v14 = vld [vmem:[%s3330_s3 + $0x120] sm:$0xff] }
 0x151   : > { %1433 = vst.msk [vmem:[%s3330_s3 + $0xd0] sm:$0xff] %vm562_vm6, %v1369_v61  ;;  %1434 = vst.msk [vmem:[%s3330_s3 + $0xd8] sm:$0xff] %vm562_vm6, %v1370_v62  ;;  %v1309_v15 = vld [vmem:[%s3330_s3 + $0x128] sm:$0xff]  ;;  %v1378_v16 = vadd.f32 %v2807_v6, %v1307_v13  ;;  %v1379_v17 = vadd.f32 %v2807_v6, %v1308_v14  ;;  %v1310_v19 = vld [vmem:[%s3330_s3 + $0x130] sm:$0xff] }
 0x152   : > { %1435 = vst.msk [vmem:[%s3330_s3 + $0xe0] sm:$0xff] %vm562_vm6, %v1371_v63  ;;  %1436 = vst.msk [vmem:[%s3330_s3 + $0xe8] sm:$0xff] %vm562_vm6, %v1372_v3  ;;  %v1380_v18 = vadd.f32 %v2807_v6, %v1309_v15  ;;  %v1311_v20 = vld [vmem:[%s3330_s3 + $0x138] sm:$0xff]  ;;  %v1312_v21 = vld [vmem:[%s3330_s3 + $0x140] sm:$0xff]  ;;  %v1381_v22 = vadd.f32 %v2807_v6, %v1310_v19 }
 0x153   : > { %1437 = vst.msk [vmem:[%s3330_s3 + $0xf0] sm:$0xff] %vm562_vm6, %v1373_v4  ;;  %1438 = vst.msk [vmem:[%s3330_s3 + $0xf8] sm:$0xff] %vm562_vm6, %v1374_v5  ;;  %v1382_v23 = vadd.f32 %v2807_v6, %v1311_v20  ;;  %v1383_v24 = vadd.f32 %v2807_v6, %v1312_v21  ;;  %v1313_v25 = vld [vmem:[%s3330_s3 + $0x148] sm:$0xff]  ;;  %v1314_v26 = vld [vmem:[%s3330_s3 + $0x150] sm:$0xff] }
 0x154   : > { %1439 = vst.msk [vmem:[%s3330_s3 + $0x100] sm:$0xff] %vm562_vm6, %v1375_v10  ;;  %1440 = vst.msk [vmem:[%s3330_s3 + $0x108] sm:$0xff] %vm562_vm6, %v1376_v11  ;;  %v1315_v27 = vld [vmem:[%s3330_s3 + $0x158] sm:$0xff]  ;;  %v1384_v28 = vadd.f32 %v2807_v6, %v1313_v25  ;;  %v1385_v29 = vadd.f32 %v2807_v6, %v1314_v26  ;;  %v1316_v31 = vld [vmem:[%s3330_s3 + $0x160] sm:$0xff] }
 0x155   : > { %1441 = vst.msk [vmem:[%s3330_s3 + $0x110] sm:$0xff] %vm562_vm6, %v1377_v12  ;;  %1442 = vst.msk [vmem:[%s3330_s3 + $0x118] sm:$0xff] %vm562_vm6, %v1378_v16  ;;  %v1386_v30 = vadd.f32 %v2807_v6, %v1315_v27  ;;  %v1317_v32 = vld [vmem:[%s3330_s3 + $0x168] sm:$0xff]  ;;  %v1318_v33 = vld [vmem:[%s3330_s3 + $0x170] sm:$0xff]  ;;  %v1387_v34 = vadd.f32 %v2807_v6, %v1316_v31 }
 0x156   : > { %1443 = vst.msk [vmem:[%s3330_s3 + $0x120] sm:$0xff] %vm562_vm6, %v1379_v17  ;;  %1444 = vst.msk [vmem:[%s3330_s3 + $0x128] sm:$0xff] %vm562_vm6, %v1380_v18  ;;  %v1388_v35 = vadd.f32 %v2807_v6, %v1317_v32  ;;  %v1389_v36 = vadd.f32 %v2807_v6, %v1318_v33  ;;  %v1319_v37 = vld [vmem:[%s3330_s3 + $0x178] sm:$0xff]  ;;  %v1320_v38 = vld [vmem:[%s3330_s3 + $0x180] sm:$0xff] }
 0x157   : > { %1445 = vst.msk [vmem:[%s3330_s3 + $0x130] sm:$0xff] %vm562_vm6, %v1381_v22  ;;  %1446 = vst.msk [vmem:[%s3330_s3 + $0x138] sm:$0xff] %vm562_vm6, %v1382_v23  ;;  %v1321_v39 = vld [vmem:[%s3330_s3 + $0x188] sm:$0xff]  ;;  %v1390_v40 = vadd.f32 %v2807_v6, %v1319_v37  ;;  %v1391_v41 = vadd.f32 %v2807_v6, %v1320_v38  ;;  %v1322_v43 = vld [vmem:[%s3330_s3 + $0x190] sm:$0xff] }
 0x158   : > { %1447 = vst.msk [vmem:[%s3330_s3 + $0x140] sm:$0xff] %vm562_vm6, %v1383_v24  ;;  %1448 = vst.msk [vmem:[%s3330_s3 + $0x148] sm:$0xff] %vm562_vm6, %v1384_v28  ;;  %v1392_v42 = vadd.f32 %v2807_v6, %v1321_v39  ;;  %v1323_v44 = vld [vmem:[%s3330_s3 + $0x198] sm:$0xff]  ;;  %v1324_v45 = vld [vmem:[%s3330_s3 + $0x1a0] sm:$0xff]  ;;  %v1393_v46 = vadd.f32 %v2807_v6, %v1322_v43 }
 0x159   : > { %1449 = vst.msk [vmem:[%s3330_s3 + $0x150] sm:$0xff] %vm562_vm6, %v1385_v29  ;;  %1450 = vst.msk [vmem:[%s3330_s3 + $0x158] sm:$0xff] %vm562_vm6, %v1386_v30  ;;  %v1394_v47 = vadd.f32 %v2807_v6, %v1323_v44  ;;  %v1395_v48 = vadd.f32 %v2807_v6, %v1324_v45  ;;  %v1325_v49 = vld [vmem:[%s3330_s3 + $0x1a8] sm:$0xff]  ;;  %v1326_v50 = vld [vmem:[%s3330_s3 + $0x1b0] sm:$0xff] }
 0x15a   : > { %1451 = vst.msk [vmem:[%s3330_s3 + $0x160] sm:$0xff] %vm562_vm6, %v1387_v34  ;;  %1452 = vst.msk [vmem:[%s3330_s3 + $0x168] sm:$0xff] %vm562_vm6, %v1388_v35  ;;  %v1327_v51 = vld [vmem:[%s3330_s3 + $0x1b8] sm:$0xff]  ;;  %v1396_v52 = vadd.f32 %v2807_v6, %v1325_v49  ;;  %v1397_v53 = vadd.f32 %v2807_v6, %v1326_v50  ;;  %v1328_v55 = vld [vmem:[%s3330_s3 + $0x1c0] sm:$0xff] }
 0x15b   : > { %1453 = vst.msk [vmem:[%s3330_s3 + $0x170] sm:$0xff] %vm562_vm6, %v1389_v36  ;;  %1454 = vst.msk [vmem:[%s3330_s3 + $0x178] sm:$0xff] %vm562_vm6, %v1390_v40  ;;  %v1398_v54 = vadd.f32 %v2807_v6, %v1327_v51  ;;  %v1329_v56 = vld [vmem:[%s3330_s3 + $0x1c8] sm:$0xff]  ;;  %v1330_v57 = vld [vmem:[%s3330_s3 + $0x1d0] sm:$0xff]  ;;  %v1399_v58 = vadd.f32 %v2807_v6, %v1328_v55 }
 0x15c   : > { %1455 = vst.msk [vmem:[%s3330_s3 + $0x180] sm:$0xff] %vm562_vm6, %v1391_v41  ;;  %1456 = vst.msk [vmem:[%s3330_s3 + $0x188] sm:$0xff] %vm562_vm6, %v1392_v42  ;;  %v1400_v59 = vadd.f32 %v2807_v6, %v1329_v56  ;;  %v1401_v60 = vadd.f32 %v2807_v6, %v1330_v57  ;;  %v1331_v61 = vld [vmem:[%s3330_s3 + $0x1d8] sm:$0xff]  ;;  %v1332_v62 = vld [vmem:[%s3330_s3 + $0x1e0] sm:$0xff] }
 0x15d   : > { %1457 = vst.msk [vmem:[%s3330_s3 + $0x190] sm:$0xff] %vm562_vm6, %v1393_v46  ;;  %1458 = vst.msk [vmem:[%s3330_s3 + $0x198] sm:$0xff] %vm562_vm6, %v1394_v47  ;;  %v1333_v63 = vld [vmem:[%s3330_s3 + $0x1e8] sm:$0xff]  ;;  %v1402_v0 = vadd.f32 %v2807_v6, %v1331_v61  ;;  %v1403_v1 = vadd.f32 %v2807_v6, %v1332_v62  ;;  %v1334_v3 = vld [vmem:[%s3330_s3 + $0x1f0] sm:$0xff] }
 0x15e   : > { %1459 = vst.msk [vmem:[%s3330_s3 + $0x1a0] sm:$0xff] %vm562_vm6, %v1395_v48  ;;  %1460 = vst.msk [vmem:[%s3330_s3 + $0x1a8] sm:$0xff] %vm562_vm6, %v1396_v52  ;;  %v1404_v2 = vadd.f32 %v2807_v6, %v1333_v63  ;;  %v1335_v4 = vld [vmem:[%s3330_s3 + $0x1f8] sm:$0xff]  ;;  %v1405_v5 = vadd.f32 %v2807_v6, %v1334_v3 }
 0x15f   : > { %1461 = vst.msk [vmem:[%s3330_s3 + $0x1b0] sm:$0xff] %vm562_vm6, %v1397_v53  ;;  %1462 = vst.msk [vmem:[%s3330_s3 + $0x1b8] sm:$0xff] %vm562_vm6, %v1398_v54  ;;  %v1406_v7 = vadd.f32 %v2807_v6, %v1335_v4 }
 0x160   : > { %1463 = vst.msk [vmem:[%s3330_s3 + $0x1c0] sm:$0xff] %vm562_vm6, %v1399_v58  ;;  %1464 = vst.msk [vmem:[%s3330_s3 + $0x1c8] sm:$0xff] %vm562_vm6, %v1400_v59 }
 0x161   : > { %1465 = vst.msk [vmem:[%s3330_s3 + $0x1d0] sm:$0xff] %vm562_vm6, %v1401_v60  ;;  %1466 = vst.msk [vmem:[%s3330_s3 + $0x1d8] sm:$0xff] %vm562_vm6, %v1402_v0 }
 0x162   : > { %1467 = vst.msk [vmem:[%s3330_s3 + $0x1e0] sm:$0xff] %vm562_vm6, %v1403_v1  ;;  %1468 = vst.msk [vmem:[%s3330_s3 + $0x1e8] sm:$0xff] %vm562_vm6, %v1404_v2 }
 0x163   : > { %1469 = vst.msk [vmem:[%s3330_s3 + $0x1f0] sm:$0xff] %vm562_vm6, %v1405_v5  ;;  %1470 = vst.msk [vmem:[%s3330_s3 + $0x1f8] sm:$0xff] %vm562_vm6, %v1406_v7 }
 0x164 PF: > { %s13_s14 = sadd.s32 1, %s1828_s14   ;;  %s3331_s12 = smov %s1824_s13 }
 0x165   : > { %p10_p6 = scmp.ge.s32.totalorder %s13_s14, 5   ;;  %s3332_s13 = smov %s3334_s15 }
 0x167   :  { %12 = sbr.rel (!%p10_p6) target bundleno = 2 (0x2), region = 69 }

// kernel: generator_forward.36
= control target key start
LH: loop header
LB: loop body
LE: loop exit
PB: predicated region body
PF: predicated region fallthrough
CT: control target
= control target key end

     0   :  { %s1853_s12 = smov 0   ;;  %s1855_s13 = smov 0   ;;  %s3323_s0 = inlined_call_operand.vmem [shape: f32[2,268,32], index: 0, kind: input, shape index: {}]   ;;  %s3324_s1 = inlined_call_operand.vmem [shape: f32[5,32,32], index: 1, kind: input, shape index: {}]   ;;  %s3325_s2 = inlined_call_operand.vmem [shape: f32[1,32], index: 2, kind: input, shape index: {}]   ;;  %s3326_s3 = inlined_call_operand.vmem [shape: f32[2,256,32], index: 3, kind: output, shape index: {}]  }
   0x1   :  { %s1857_s14 = smov 0  }
   0x2 LB: > { %s22_s15 = sadd.s32 1, %s1826_s13  ;;  %p1530_p0 = scmp.ge.s32.totalorder %s1830_s14, 1  ;;  %s1830_s14 = sphi %s1857_s14, %s13_s14   ;;  %s1826_s13 = sphi %s1855_s13, %s3328_s13   ;;  %s1822_s12 = sphi %s1853_s12, %s3327_s12  }
   0x3   : > { %p23_p1 = scmp.ge.s32.totalorder %s22_s15, 5  ;;  %p139_p2 = scmp.lt.s32.totalorder %s1830_s14, 6 }
   0x5   : > { %s3330_s15 = smov (%p23_p1, %s22_s15), 0  ;;  %p140_p3 = pnand %p1530_p0, %p139_p2 }
   0x6   : > { %p1531_p4 = scmp.ne.s32.totalorder (!%p140_p3), %s1822_s12, 0 }
   0x7   : > { %143 = sbr.rel (%p140_p3) target bundleno = 356 (0x164), region = 32 }
   0xc   : > { %167 = sbr.rel (%p1531_p4) target bundleno = 50 (0x32), region = 36 }
  0x11   : > { %vm168_vm0 = vcmask 261120   ;;  %v1832_v0 = vmov 0.0  }
  0x12   : > { %169 = vst.msk [vmem:[%s3326_s3] sm:$0xff] %vm168_vm0, %v1832_v0  ;;  %170 = vst.msk [vmem:[%s3326_s3 + $0x8] sm:$0xff] %vm168_vm0, %v1832_v0 }
  0x13   : > { %171 = vst.msk [vmem:[%s3326_s3 + $0x10] sm:$0xff] %vm168_vm0, %v1832_v0  ;;  %172 = vst.msk [vmem:[%s3326_s3 + $0x18] sm:$0xff] %vm168_vm0, %v1832_v0 }
  0x14   : > { %173 = vst.msk [vmem:[%s3326_s3 + $0x20] sm:$0xff] %vm168_vm0, %v1832_v0  ;;  %174 = vst.msk [vmem:[%s3326_s3 + $0x28] sm:$0xff] %vm168_vm0, %v1832_v0 }
  0x15   : > { %175 = vst.msk [vmem:[%s3326_s3 + $0x30] sm:$0xff] %vm168_vm0, %v1832_v0  ;;  %176 = vst.msk [vmem:[%s3326_s3 + $0x38] sm:$0xff] %vm168_vm0, %v1832_v0 }
  0x16   : > { %177 = vst.msk [vmem:[%s3326_s3 + $0x40] sm:$0xff] %vm168_vm0, %v1832_v0  ;;  %178 = vst.msk [vmem:[%s3326_s3 + $0x48] sm:$0xff] %vm168_vm0, %v1832_v0 }
  0x17   : > { %179 = vst.msk [vmem:[%s3326_s3 + $0x50] sm:$0xff] %vm168_vm0, %v1832_v0  ;;  %180 = vst.msk [vmem:[%s3326_s3 + $0x58] sm:$0xff] %vm168_vm0, %v1832_v0 }
  0x18   : > { %181 = vst.msk [vmem:[%s3326_s3 + $0x60] sm:$0xff] %vm168_vm0, %v1832_v0  ;;  %182 = vst.msk [vmem:[%s3326_s3 + $0x68] sm:$0xff] %vm168_vm0, %v1832_v0 }
  0x19   : > { %183 = vst.msk [vmem:[%s3326_s3 + $0x70] sm:$0xff] %vm168_vm0, %v1832_v0  ;;  %184 = vst.msk [vmem:[%s3326_s3 + $0x78] sm:$0xff] %vm168_vm0, %v1832_v0 }
  0x1a   : > { %185 = vst.msk [vmem:[%s3326_s3 + $0x80] sm:$0xff] %vm168_vm0, %v1832_v0  ;;  %186 = vst.msk [vmem:[%s3326_s3 + $0x88] sm:$0xff] %vm168_vm0, %v1832_v0 }
  0x1b   : > { %187 = vst.msk [vmem:[%s3326_s3 + $0x90] sm:$0xff] %vm168_vm0, %v1832_v0  ;;  %188 = vst.msk [vmem:[%s3326_s3 + $0x98] sm:$0xff] %vm168_vm0, %v1832_v0 }
  0x1c   : > { %189 = vst.msk [vmem:[%s3326_s3 + $0xa0] sm:$0xff] %vm168_vm0, %v1832_v0  ;;  %190 = vst.msk [vmem:[%s3326_s3 + $0xa8] sm:$0xff] %vm168_vm0, %v1832_v0 }
  0x1d   : > { %191 = vst.msk [vmem:[%s3326_s3 + $0xb0] sm:$0xff] %vm168_vm0, %v1832_v0  ;;  %192 = vst.msk [vmem:[%s3326_s3 + $0xb8] sm:$0xff] %vm168_vm0, %v1832_v0 }
  0x1e   : > { %193 = vst.msk [vmem:[%s3326_s3 + $0xc0] sm:$0xff] %vm168_vm0, %v1832_v0  ;;  %194 = vst.msk [vmem:[%s3326_s3 + $0xc8] sm:$0xff] %vm168_vm0, %v1832_v0 }
  0x1f   : > { %195 = vst.msk [vmem:[%s3326_s3 + $0xd0] sm:$0xff] %vm168_vm0, %v1832_v0  ;;  %196 = vst.msk [vmem:[%s3326_s3 + $0xd8] sm:$0xff] %vm168_vm0, %v1832_v0 }
  0x20   : > { %197 = vst.msk [vmem:[%s3326_s3 + $0xe0] sm:$0xff] %vm168_vm0, %v1832_v0  ;;  %198 = vst.msk [vmem:[%s3326_s3 + $0xe8] sm:$0xff] %vm168_vm0, %v1832_v0 }
  0x21   : > { %199 = vst.msk [vmem:[%s3326_s3 + $0xf0] sm:$0xff] %vm168_vm0, %v1832_v0  ;;  %200 = vst.msk [vmem:[%s3326_s3 + $0xf8] sm:$0xff] %vm168_vm0, %v1832_v0 }
  0x22   : > { %201 = vst.msk [vmem:[%s3326_s3 + $0x100] sm:$0xff] %vm168_vm0, %v1832_v0  ;;  %202 = vst.msk [vmem:[%s3326_s3 + $0x108] sm:$0xff] %vm168_vm0, %v1832_v0 }
  0x23   : > { %203 = vst.msk [vmem:[%s3326_s3 + $0x110] sm:$0xff] %vm168_vm0, %v1832_v0  ;;  %204 = vst.msk [vmem:[%s3326_s3 + $0x118] sm:$0xff] %vm168_vm0, %v1832_v0 }
  0x24   : > { %205 = vst.msk [vmem:[%s3326_s3 + $0x120] sm:$0xff] %vm168_vm0, %v1832_v0  ;;  %206 = vst.msk [vmem:[%s3326_s3 + $0x128] sm:$0xff] %vm168_vm0, %v1832_v0 }
  0x25   : > { %207 = vst.msk [vmem:[%s3326_s3 + $0x130] sm:$0xff] %vm168_vm0, %v1832_v0  ;;  %208 = vst.msk [vmem:[%s3326_s3 + $0x138] sm:$0xff] %vm168_vm0, %v1832_v0 }
  0x26   : > { %209 = vst.msk [vmem:[%s3326_s3 + $0x140] sm:$0xff] %vm168_vm0, %v1832_v0  ;;  %210 = vst.msk [vmem:[%s3326_s3 + $0x148] sm:$0xff] %vm168_vm0, %v1832_v0 }
  0x27   : > { %211 = vst.msk [vmem:[%s3326_s3 + $0x150] sm:$0xff] %vm168_vm0, %v1832_v0  ;;  %212 = vst.msk [vmem:[%s3326_s3 + $0x158] sm:$0xff] %vm168_vm0, %v1832_v0 }
  0x28   : > { %213 = vst.msk [vmem:[%s3326_s3 + $0x160] sm:$0xff] %vm168_vm0, %v1832_v0  ;;  %214 = vst.msk [vmem:[%s3326_s3 + $0x168] sm:$0xff] %vm168_vm0, %v1832_v0 }
  0x29   : > { %215 = vst.msk [vmem:[%s3326_s3 + $0x170] sm:$0xff] %vm168_vm0, %v1832_v0  ;;  %216 = vst.msk [vmem:[%s3326_s3 + $0x178] sm:$0xff] %vm168_vm0, %v1832_v0 }
  0x2a   : > { %217 = vst.msk [vmem:[%s3326_s3 + $0x180] sm:$0xff] %vm168_vm0, %v1832_v0  ;;  %218 = vst.msk [vmem:[%s3326_s3 + $0x188] sm:$0xff] %vm168_vm0, %v1832_v0 }
  0x2b   : > { %219 = vst.msk [vmem:[%s3326_s3 + $0x190] sm:$0xff] %vm168_vm0, %v1832_v0  ;;  %220 = vst.msk [vmem:[%s3326_s3 + $0x198] sm:$0xff] %vm168_vm0, %v1832_v0 }
  0x2c   : > { %221 = vst.msk [vmem:[%s3326_s3 + $0x1a0] sm:$0xff] %vm168_vm0, %v1832_v0  ;;  %222 = vst.msk [vmem:[%s3326_s3 + $0x1a8] sm:$0xff] %vm168_vm0, %v1832_v0 }
  0x2d   : > { %223 = vst.msk [vmem:[%s3326_s3 + $0x1b0] sm:$0xff] %vm168_vm0, %v1832_v0  ;;  %224 = vst.msk [vmem:[%s3326_s3 + $0x1b8] sm:$0xff] %vm168_vm0, %v1832_v0 }
  0x2e   : > { %225 = vst.msk [vmem:[%s3326_s3 + $0x1c0] sm:$0xff] %vm168_vm0, %v1832_v0  ;;  %226 = vst.msk [vmem:[%s3326_s3 + $0x1c8] sm:$0xff] %vm168_vm0, %v1832_v0 }
  0x2f   : > { %227 = vst.msk [vmem:[%s3326_s3 + $0x1d0] sm:$0xff] %vm168_vm0, %v1832_v0  ;;  %228 = vst.msk [vmem:[%s3326_s3 + $0x1d8] sm:$0xff] %vm168_vm0, %v1832_v0 }
  0x30   : > { %229 = vst.msk [vmem:[%s3326_s3 + $0x1e0] sm:$0xff] %vm168_vm0, %v1832_v0  ;;  %230 = vst.msk [vmem:[%s3326_s3 + $0x1e8] sm:$0xff] %vm168_vm0, %v1832_v0 }
  0x31   : > { %231 = vst.msk [vmem:[%s3326_s3 + $0x1f0] sm:$0xff] %vm168_vm0, %v1832_v0  ;;  %232 = vst.msk [vmem:[%s3326_s3 + $0x1f8] sm:$0xff] %vm168_vm0, %v1832_v0 }
  0x32 PF: > { %s1532_s29 = sshll.u32 %s1822_s12, 5  ;;  %s234_s30 = smul.u32 3, %s1822_s12  ;;  %vm563_vm3 = vcmask 261120  }
  0x33   : > { %s558_s6 = scalar_lea.vmem %s3324_s1, %s1532_s29  ;;  %p1597_p5 = scmp.ne.s32.totalorder %s1822_s12, 4 }
  0x34   : > { %v562_v1 = vld [vmem:[%s558_s6 + $0x18] sm:$0xff]  ;;  %v561_v2 = vld [vmem:[%s558_s6 + $0x10] sm:$0xff]  ;;  %s2202_s9 = scalar_lea.vmem %s3323_s0, %s234_s30  ;;  %v560_v3 = vld [vmem:[%s558_s6 + $0x8] sm:$0xff] }
  0x35   : > { %1671 = vmatprep.subr.mxu0 %v562_v1  ;;  %1775 = vmatprep.subr.mxu1 %v562_v1  ;;  %v237_v4 = vld [vmem:[%s2202_s9] sm:$0xff]  ;;  %v269_v5 = vld [vmem:[%s2202_s9 + $0x110] sm:$0xff]  ;;  %v238_v9 = vld [vmem:[%s2202_s9 + $0x8] sm:$0xff] }
  0x36   : > { %1672 = vmatpush3.msra.mxu0 %v562_v1  ;;  %1779 = vmatpush3.msra.mxu1 %v562_v1  ;;  %v559_v6 = vld [vmem:[%s558_s6] sm:$0xff]  ;;  %vm301_vm1 = vcmp.ge.f32.partialorder %v237_v4, 0.0  ;;  %v365_v7 = vmul.f32 0.1, %v237_v4  ;;  %vm333_vm2 = vcmp.ge.f32.partialorder %v269_v5, 0.0  ;;  %v270_v10 = vld [vmem:[%s2202_s9 + $0x118] sm:$0xff] }
  0x37   : > { %v397_v8 = vmul.f32 0.1, %v269_v5  ;;  %1673 = vmatprep.subr.mxu0 %v561_v2  ;;  %1776 = vmatprep.subr.mxu1 %v561_v2  ;;  %v239_v11 = vld [vmem:[%s2202_s9 + $0x10] sm:$0xff]  ;;  %vm302_vm4 = vcmp.ge.f32.partialorder %v238_v9, 0.0  ;;  %v366_v14 = vmul.f32 0.1, %v238_v9 }
  0x38   : > { %1674 = vmatpush3.msra.mxu0 %v561_v2  ;;  %1780 = vmatpush3.msra.mxu1 %v561_v2  ;;  %v429_v12 = vsel %vm301_vm1, %v237_v4, %v365_v7  ;;  %v271_v15 = vld [vmem:[%s2202_s9 + $0x120] sm:$0xff]  ;;  %v240_v16 = vld [vmem:[%s2202_s9 + $0x18] sm:$0xff]  ;;  %v272_v17 = vld [vmem:[%s2202_s9 + $0x128] sm:$0xff]  ;;  %vm334_vm5 = vcmp.ge.f32.partialorder %v270_v10, 0.0  ;;  %v398_v18 = vmul.f32 0.1, %v270_v10 }
  0x39   : > { %v461_v13 = vsel %vm333_vm2, %v269_v5, %v397_v8  ;;  %1675 = vmatprep.subr.mxu0 %v560_v3  ;;  %1777 = vmatprep.subr.mxu1 %v560_v3  ;;  %vm303_vm6 = vcmp.ge.f32.partialorder %v239_v11, 0.0  ;;  %v367_v19 = vmul.f32 0.1, %v239_v11  ;;  %v430_v20 = vsel %vm302_vm4, %v238_v9, %v366_v14  ;;  %v241_v22 = vld [vmem:[%s2202_s9 + $0x20] sm:$0xff]  ;;  %v273_v23 = vld [vmem:[%s2202_s9 + $0x130] sm:$0xff]  ;;  %v242_v27 = vld [vmem:[%s2202_s9 + $0x28] sm:$0xff] }
  0x3a   : > { %1676 = vmatpush3.msra.mxu0 %v560_v3  ;;  %1781 = vmatpush3.msra.mxu1 %v560_v3  ;;  %vm335_vm7 = vcmp.ge.f32.partialorder %v271_v15, 0.0  ;;  %v399_v21 = vmul.f32 0.1, %v271_v15  ;;  %vm304_vm8 = vcmp.ge.f32.partialorder %v240_v16, 0.0  ;;  %v462_v24 = vsel %vm334_vm5, %v270_v10, %v398_v18  ;;  %v274_v28 = vld [vmem:[%s2202_s9 + $0x138] sm:$0xff]  ;;  %v243_v32 = vld [vmem:[%s2202_s9 + $0x30] sm:$0xff] }
  0x3b   : > { %1677 = vmatprep.subr.mxu0 %v559_v6  ;;  %1778 = vmatprep.subr.mxu1 %v559_v6  ;;  %v431_v25 = vsel %vm303_vm6, %v239_v11, %v367_v19  ;;  %v368_v26 = vmul.f32 0.1, %v240_v16  ;;  %vm336_vm9 = vcmp.ge.f32.partialorder %v272_v17, 0.0  ;;  %v400_v30 = vmul.f32 0.1, %v272_v17  ;;  %v275_v34 = vld [vmem:[%s2202_s9 + $0x140] sm:$0xff] }
  0x3c   : > { %1678 = vmatpush3.msra.mxu0 %v559_v6  ;;  %1782 = vmatpush3.msra.mxu1 %v559_v6  ;;  %v463_v29 = vsel %vm335_vm7, %v271_v15, %v399_v21  ;;  %vm305_vm10 = vcmp.ge.f32.partialorder %v241_v22, 0.0  ;;  %v369_v31 = vmul.f32 0.1, %v241_v22  ;;  %vm337_vm11 = vcmp.ge.f32.partialorder %v273_v23, 0.0  ;;  %v244_v41 = vld [vmem:[%s2202_s9 + $0x38] sm:$0xff]  ;;  %v276_v44 = vld [vmem:[%s2202_s9 + $0x148] sm:$0xff] }
  0x3d   : > { %1679 = vmatprep.mubr.msk.f32.mxu0 %vm563_vm3, %v429_v12  ;;  %1727 = vmatprep.mubr.msk.f32.mxu1 %vm563_vm3, %v461_v13  ;;  %v401_v33 = vmul.f32 0.1, %v273_v23  ;;  %v432_v35 = vsel %vm304_vm8, %v240_v16, %v368_v26  ;;  %vm306_vm12 = vcmp.ge.f32.partialorder %v242_v27, 0.0  ;;  %v370_v36 = vmul.f32 0.1, %v242_v27  ;;  %v245_v45 = vld [vmem:[%s2202_s9 + $0x40] sm:$0xff] }
  0x3e   : > { %1680 = vmatmul.mubr.msk.f32.vlgmr.msra.gmra.mxu0 %vm563_vm3, %v430_v20  ;;  %1728 = vmatmul.mubr.msk.f32.vlgmr.msra.gmra.mxu1 %vm563_vm3, %v462_v24  ;;  %v464_v37 = vsel %vm336_vm9, %v272_v17, %v400_v30  ;;  %v433_v38 = vsel %vm305_vm10, %v241_v22, %v369_v31  ;;  %v402_v39 = vmul.f32 0.1, %v274_v28  ;;  %v371_v40 = vmul.f32 0.1, %v243_v32  ;;  %v277_v46 = vld [vmem:[%s2202_s9 + $0x150] sm:$0xff]  ;;  %v246_v53 = vld [vmem:[%s2202_s9 + $0x48] sm:$0xff] }
  0x3f   : > { %1682 = vmatprep.mubr.msk.f32.mxu0 %vm563_vm3, %v431_v25  ;;  %1730 = vmatprep.mubr.msk.f32.mxu1 %vm563_vm3, %v463_v29  ;;  %v465_v42 = vsel %vm337_vm11, %v273_v23, %v401_v33  ;;  %vm338_vm13 = vcmp.ge.f32.partialorder %v274_v28, 0.0  ;;  %vm307_vm14 = vcmp.ge.f32.partialorder %v243_v32, 0.0  ;;  %v403_v43 = vmul.f32 0.1, %v275_v34  ;;  %v278_v56 = vld [vmem:[%s2202_s9 + $0x158] sm:$0xff]  ;;  %v247_v57 = vld [vmem:[%s2202_s9 + $0x50] sm:$0xff] }
  0x40   : > { %vm339_vm15 = vcmp.ge.f32.partialorder %v275_v34, 0.0  ;;  %v434_v47 = vsel %vm306_vm12, %v242_v27, %v370_v36  ;;  %vm308_vm0 = vcmp.ge.f32.partialorder %v244_v41, 0.0  ;;  %v372_v48 = vmul.f32 0.1, %v244_v41  ;;  %v279_v58 = vld [vmem:[%s2202_s9 + $0x160] sm:$0xff]  ;;  %v248_v1 = vld [vmem:[%s2202_s9 + $0x58] sm:$0xff] }
  0x41   : > { %v466_v49 = vsel %vm338_vm13, %v274_v28, %v402_v39  ;;  %v435_v50 = vsel %vm307_vm14, %v243_v32, %v371_v40  ;;  %v404_v51 = vmul.f32 0.1, %v276_v44  ;;  %v373_v52 = vmul.f32 0.1, %v245_v45  ;;  %v280_v4 = vld [vmem:[%s2202_s9 + $0x168] sm:$0xff]  ;;  %v249_v5 = vld [vmem:[%s2202_s9 + $0x60] sm:$0xff] }
  0x42   : > { %1683 = vmatmul.mubr.msk.f32.gmra.mxu0 %vm563_vm3, %v432_v35  ;;  %1731 = vmatmul.mubr.msk.f32.gmra.mxu1 %vm563_vm3, %v464_v37  ;;  %v467_v54 = vsel %vm339_vm15, %v275_v34, %v403_v43  ;;  %vm340_vm1 = vcmp.ge.f32.partialorder %v276_v44, 0.0  ;;  %vm309_vm2 = vcmp.ge.f32.partialorder %v245_v45, 0.0  ;;  %v405_v55 = vmul.f32 0.1, %v277_v46  ;;  %v281_v6 = vld [vmem:[%s2202_s9 + $0x170] sm:$0xff]  ;;  %v250_v13 = vld [vmem:[%s2202_s9 + $0x68] sm:$0xff] }
  0x43   : > { %1685 = vmatprep.mubr.msk.f32.mxu0 %vm563_vm3, %v433_v38  ;;  %1733 = vmatprep.mubr.msk.f32.mxu1 %vm563_vm3, %v465_v42  ;;  %vm341_vm4 = vcmp.ge.f32.partialorder %v277_v46, 0.0  ;;  %v436_v59 = vsel %vm308_vm0, %v244_v41, %v372_v48  ;;  %vm310_vm5 = vcmp.ge.f32.partialorder %v246_v53, 0.0  ;;  %v374_v60 = vmul.f32 0.1, %v246_v53  ;;  %v282_v16 = vld [vmem:[%s2202_s9 + $0x178] sm:$0xff]  ;;  %v251_v17 = vld [vmem:[%s2202_s9 + $0x70] sm:$0xff] }
  0x44   : > { %v468_v61 = vsel %vm340_vm1, %v276_v44, %v404_v51  ;;  %v437_v62 = vsel %vm309_vm2, %v245_v45, %v373_v52  ;;  %v406_v63 = vmul.f32 0.1, %v278_v56  ;;  %v375_v0 = vmul.f32 0.1, %v247_v57  ;;  %v283_v18 = vld [vmem:[%s2202_s9 + $0x180] sm:$0xff]  ;;  %v252_v25 = vld [vmem:[%s2202_s9 + $0x78] sm:$0xff] }
  0x45   : > { %v469_v2 = vsel %vm341_vm4, %v277_v46, %v405_v55  ;;  %vm342_vm6 = vcmp.ge.f32.partialorder %v278_v56, 0.0  ;;  %vm311_vm7 = vcmp.ge.f32.partialorder %v247_v57, 0.0  ;;  %v407_v3 = vmul.f32 0.1, %v279_v58  ;;  %v284_v28 = vld [vmem:[%s2202_s9 + $0x188] sm:$0xff]  ;;  %v253_v29 = vld [vmem:[%s2202_s9 + $0x80] sm:$0xff] }
  0x46   : > { %1686 = vmatmul.mubr.msk.f32.gmra.mxu0 %vm563_vm3, %v434_v47  ;;  %1734 = vmatmul.mubr.msk.f32.gmra.mxu1 %vm563_vm3, %v466_v49  ;;  %vm343_vm8 = vcmp.ge.f32.partialorder %v279_v58, 0.0  ;;  %v438_v7 = vsel %vm310_vm5, %v246_v53, %v374_v60  ;;  %vm312_vm9 = vcmp.ge.f32.partialorder %v248_v1, 0.0  ;;  %v376_v8 = vmul.f32 0.1, %v248_v1  ;;  %v285_v30 = vld [vmem:[%s2202_s9 + $0x190] sm:$0xff]  ;;  %v254_v37 = vld [vmem:[%s2202_s9 + $0x88] sm:$0xff] }
  0x47   : > { %1688 = vmatprep.mubr.msk.f32.mxu0 %vm563_vm3, %v435_v50  ;;  %1736 = vmatprep.mubr.msk.f32.mxu1 %vm563_vm3, %v467_v54  ;;  %v470_v9 = vsel %vm342_vm6, %v278_v56, %v406_v63  ;;  %v439_v10 = vsel %vm311_vm7, %v247_v57, %v375_v0  ;;  %v408_v11 = vmul.f32 0.1, %v280_v4  ;;  %v377_v12 = vmul.f32 0.1, %v249_v5  ;;  %v286_v40 = vld [vmem:[%s2202_s9 + $0x198] sm:$0xff]  ;;  %v255_v41 = vld [vmem:[%s2202_s9 + $0x90] sm:$0xff] }
  0x48   : > { %v471_v14 = vsel %vm343_vm8, %v279_v58, %v407_v3  ;;  %vm344_vm10 = vcmp.ge.f32.partialorder %v280_v4, 0.0  ;;  %vm313_vm11 = vcmp.ge.f32.partialorder %v249_v5, 0.0  ;;  %v409_v15 = vmul.f32 0.1, %v281_v6  ;;  %v287_v42 = vld [vmem:[%s2202_s9 + $0x1a0] sm:$0xff]  ;;  %v256_v49 = vld [vmem:[%s2202_s9 + $0x98] sm:$0xff] }
  0x49   : > { %vm345_vm12 = vcmp.ge.f32.partialorder %v281_v6, 0.0  ;;  %v440_v19 = vsel %vm312_vm9, %v248_v1, %v376_v8  ;;  %vm314_vm13 = vcmp.ge.f32.partialorder %v250_v13, 0.0  ;;  %v378_v20 = vmul.f32 0.1, %v250_v13  ;;  %v288_v52 = vld [vmem:[%s2202_s9 + $0x1a8] sm:$0xff]  ;;  %v257_v53 = vld [vmem:[%s2202_s9 + $0xa0] sm:$0xff] }
  0x4a   : > { %1689 = vmatmul.mubr.msk.f32.gmra.mxu0 %vm563_vm3, %v436_v59  ;;  %1737 = vmatmul.mubr.msk.f32.gmra.mxu1 %vm563_vm3, %v468_v61  ;;  %v472_v21 = vsel %vm344_vm10, %v280_v4, %v408_v11  ;;  %v441_v22 = vsel %vm313_vm11, %v249_v5, %v377_v12  ;;  %v410_v23 = vmul.f32 0.1, %v282_v16  ;;  %v379_v24 = vmul.f32 0.1, %v251_v17  ;;  %v289_v54 = vld [vmem:[%s2202_s9 + $0x1b0] sm:$0xff]  ;;  %v258_v61 = vld [vmem:[%s2202_s9 + $0xa8] sm:$0xff] }
  0x4b   : > { %1691 = vmatprep.mubr.msk.f32.mxu0 %vm563_vm3, %v437_v62  ;;  %1739 = vmatprep.mubr.msk.f32.mxu1 %vm563_vm3, %v469_v2  ;;  %v473_v26 = vsel %vm345_vm12, %v281_v6, %v409_v15  ;;  %vm346_vm14 = vcmp.ge.f32.partialorder %v282_v16, 0.0  ;;  %vm315_vm15 = vcmp.ge.f32.partialorder %v251_v17, 0.0  ;;  %v411_v27 = vmul.f32 0.1, %v283_v18  ;;  %v290_v0 = vld [vmem:[%s2202_s9 + $0x1b8] sm:$0xff]  ;;  %v259_v1 = vld [vmem:[%s2202_s9 + $0xb0] sm:$0xff] }
  0x4c   : > { %vm347_vm0 = vcmp.ge.f32.partialorder %v283_v18, 0.0  ;;  %v442_v31 = vsel %vm314_vm13, %v250_v13, %v378_v20  ;;  %vm316_vm1 = vcmp.ge.f32.partialorder %v252_v25, 0.0  ;;  %v380_v32 = vmul.f32 0.1, %v252_v25  ;;  %v291_v2 = vld [vmem:[%s2202_s9 + $0x1c0] sm:$0xff]  ;;  %v292_v12 = vld [vmem:[%s2202_s9 + $0x1c8] sm:$0xff] }
  0x4d   : > { %v474_v33 = vsel %vm346_vm14, %v282_v16, %v410_v23  ;;  %v443_v34 = vsel %vm315_vm15, %v251_v17, %v379_v24  ;;  %v412_v35 = vmul.f32 0.1, %v284_v28  ;;  %v381_v36 = vmul.f32 0.1, %v253_v29  ;;  %v261_v13 = vld [vmem:[%s2202_s9 + $0xc0] sm:$0xff]  ;;  %v294_v24 = vld [vmem:[%s2202_s9 + $0x1d8] sm:$0xff] }
  0x4e   : > { %1692 = vmatmul.mubr.msk.f32.gmra.mxu0 %vm563_vm3, %v438_v7  ;;  %1740 = vmatmul.mubr.msk.f32.gmra.mxu1 %vm563_vm3, %v470_v9  ;;  %v475_v38 = vsel %vm347_vm0, %v283_v18, %v411_v27  ;;  %vm348_vm2 = vcmp.ge.f32.partialorder %v284_v28, 0.0  ;;  %vm317_vm4 = vcmp.ge.f32.partialorder %v253_v29, 0.0  ;;  %v413_v39 = vmul.f32 0.1, %v285_v30  ;;  %v260_v9 = vld [vmem:[%s2202_s9 + $0xb8] sm:$0xff] }
  0x4f   : > { %1694 = vmatprep.mubr.msk.f32.mxu0 %vm563_vm3, %v439_v10  ;;  %1742 = vmatprep.mubr.msk.f32.mxu1 %vm563_vm3, %v471_v14  ;;  %vm349_vm5 = vcmp.ge.f32.partialorder %v285_v30, 0.0  ;;  %v444_v43 = vsel %vm316_vm1, %v252_v25, %v380_v32  ;;  %vm318_vm6 = vcmp.ge.f32.partialorder %v254_v37, 0.0  ;;  %v382_v44 = vmul.f32 0.1, %v254_v37  ;;  %v293_v14 = vld [vmem:[%s2202_s9 + $0x1d0] sm:$0xff] }
  0x50   : > { %v476_v45 = vsel %vm348_vm2, %v284_v28, %v412_v35  ;;  %v445_v46 = vsel %vm317_vm4, %v253_v29, %v381_v36  ;;  %v414_v47 = vmul.f32 0.1, %v286_v40  ;;  %v383_v48 = vmul.f32 0.1, %v255_v41  ;;  %v263_v25 = vld [vmem:[%s2202_s9 + $0xd0] sm:$0xff]  ;;  %v296_v36 = vld [vmem:[%s2202_s9 + $0x1e8] sm:$0xff] }
  0x51   : > { %v477_v50 = vsel %vm349_vm5, %v285_v30, %v413_v39  ;;  %vm350_vm7 = vcmp.ge.f32.partialorder %v286_v40, 0.0  ;;  %vm319_vm8 = vcmp.ge.f32.partialorder %v255_v41, 0.0  ;;  %v415_v51 = vmul.f32 0.1, %v287_v42 }
  0x52   : > { %1695 = vmatmul.mubr.msk.f32.gmra.mxu0 %vm563_vm3, %v440_v19  ;;  %1743 = vmatmul.mubr.msk.f32.gmra.mxu1 %vm563_vm3, %v472_v21  ;;  %vm351_vm9 = vcmp.ge.f32.partialorder %v287_v42, 0.0  ;;  %v446_v55 = vsel %vm318_vm6, %v254_v37, %v382_v44  ;;  %vm320_vm10 = vcmp.ge.f32.partialorder %v256_v49, 0.0  ;;  %v384_v56 = vmul.f32 0.1, %v256_v49  ;;  %v262_v21 = vld [vmem:[%s2202_s9 + $0xc8] sm:$0xff]  ;;  %v265_v37 = vld [vmem:[%s2202_s9 + $0xe0] sm:$0xff] }
  0x53   : > { %1697 = vmatprep.mubr.msk.f32.mxu0 %vm563_vm3, %v441_v22  ;;  %1745 = vmatprep.mubr.msk.f32.mxu1 %vm563_vm3, %v473_v26  ;;  %v478_v57 = vsel %vm350_vm7, %v286_v40, %v414_v47  ;;  %v447_v58 = vsel %vm319_vm8, %v255_v41, %v383_v48  ;;  %v416_v59 = vmul.f32 0.1, %v288_v52  ;;  %v385_v60 = vmul.f32 0.1, %v257_v53  ;;  %v295_v26 = vld [vmem:[%s2202_s9 + $0x1e0] sm:$0xff]  ;;  %v298_v48 = vld [vmem:[%s2202_s9 + $0x1f8] sm:$0xff] }
  0x54   : > { %v479_v62 = vsel %vm351_vm9, %v287_v42, %v415_v51  ;;  %vm352_vm11 = vcmp.ge.f32.partialorder %v288_v52, 0.0  ;;  %vm321_vm12 = vcmp.ge.f32.partialorder %v257_v53, 0.0  ;;  %v417_v63 = vmul.f32 0.1, %v289_v54 }
  0x55   : > { %vm353_vm13 = vcmp.ge.f32.partialorder %v289_v54, 0.0  ;;  %v448_v3 = vsel %vm320_vm10, %v256_v49, %v384_v56  ;;  %vm322_vm14 = vcmp.ge.f32.partialorder %v258_v61, 0.0  ;;  %v386_v4 = vmul.f32 0.1, %v258_v61  ;;  %v267_v49 = vld [vmem:[%s2202_s9 + $0xf0] sm:$0xff]  ;;  %v268_v56 = vld [vmem:[%s2202_s9 + $0xf8] sm:$0xff] }
  0x56   : > { %1698 = vmatmul.mubr.msk.f32.gmra.mxu0 %vm563_vm3, %v442_v31  ;;  %1746 = vmatmul.mubr.msk.f32.gmra.mxu1 %vm563_vm3, %v474_v33  ;;  %v480_v5 = vsel %vm352_vm11, %v288_v52, %v416_v59  ;;  %v449_v6 = vsel %vm321_vm12, %v257_v53, %v385_v60  ;;  %v418_v7 = vmul.f32 0.1, %v290_v0  ;;  %v387_v8 = vmul.f32 0.1, %v259_v1  ;;  %v264_v33 = vld [vmem:[%s2202_s9 + $0xd8] sm:$0xff]  ;;  %v300_v60 = vld [vmem:[%s2202_s9 + $0x208] sm:$0xff] }
  0x57   : > { %1700 = vmatprep.mubr.msk.f32.mxu0 %vm563_vm3, %v443_v34  ;;  %1748 = vmatprep.mubr.msk.f32.mxu1 %vm563_vm3, %v475_v38  ;;  %v481_v10 = vsel %vm353_vm13, %v289_v54, %v417_v63  ;;  %vm354_vm15 = vcmp.ge.f32.partialorder %v290_v0, 0.0  ;;  %vm323_vm0 = vcmp.ge.f32.partialorder %v259_v1, 0.0  ;;  %v419_v11 = vmul.f32 0.1, %v291_v2  ;;  %v297_v38 = vld [vmem:[%s2202_s9 + $0x1f0] sm:$0xff] }
  0x58   : > { %vm355_vm1 = vcmp.ge.f32.partialorder %v291_v2, 0.0  ;;  %v450_v15 = vsel %vm322_vm14, %v258_v61, %v386_v4  ;;  %vm324_vm2 = vcmp.ge.f32.partialorder %v260_v9, 0.0  ;;  %v388_v16 = vmul.f32 0.1, %v260_v9 }
  0x59   : > { %v482_v17 = vsel %vm354_vm15, %v290_v0, %v418_v7  ;;  %v451_v18 = vsel %vm323_vm0, %v259_v1, %v387_v8  ;;  %v420_v19 = vmul.f32 0.1, %v292_v12  ;;  %v389_v20 = vmul.f32 0.1, %v261_v13 }
  0x5a   : > { %1701 = vmatmul.mubr.msk.f32.gmra.mxu0 %vm563_vm3, %v444_v43  ;;  %1749 = vmatmul.mubr.msk.f32.gmra.mxu1 %vm563_vm3, %v476_v45  ;;  %v483_v22 = vsel %vm355_vm1, %v291_v2, %v419_v11  ;;  %vm356_vm4 = vcmp.ge.f32.partialorder %v292_v12, 0.0  ;;  %vm325_vm5 = vcmp.ge.f32.partialorder %v261_v13, 0.0  ;;  %v421_v23 = vmul.f32 0.1, %v293_v14  ;;  %v266_v45 = vld [vmem:[%s2202_s9 + $0xe8] sm:$0xff] }
  0x5b   : > { %1703 = vmatprep.mubr.msk.f32.mxu0 %vm563_vm3, %v445_v46  ;;  %1751 = vmatprep.mubr.msk.f32.mxu1 %vm563_vm3, %v477_v50  ;;  %vm357_vm6 = vcmp.ge.f32.partialorder %v293_v14, 0.0  ;;  %v452_v27 = vsel %vm324_vm2, %v260_v9, %v388_v16  ;;  %vm326_vm7 = vcmp.ge.f32.partialorder %v262_v21, 0.0  ;;  %v390_v28 = vmul.f32 0.1, %v262_v21  ;;  %v299_v50 = vld [vmem:[%s2202_s9 + $0x200] sm:$0xff]  ;;  %v528_v16 = vld [vmem:[%s3326_s3 + $0x118] sm:$0xff] }
  0x5c   : > { %v484_v29 = vsel %vm356_vm4, %v292_v12, %v420_v19  ;;  %v453_v30 = vsel %vm325_vm5, %v261_v13, %v389_v20  ;;  %v422_v31 = vmul.f32 0.1, %v294_v24  ;;  %v391_v32 = vmul.f32 0.1, %v263_v25  ;;  %v493_v9 = vld [vmem:[%s3326_s3] sm:$0xff] }
  0x5d   : > { %v485_v34 = vsel %vm357_vm6, %v293_v14, %v421_v23  ;;  %vm358_vm8 = vcmp.ge.f32.partialorder %v294_v24, 0.0  ;;  %vm327_vm9 = vcmp.ge.f32.partialorder %v263_v25, 0.0  ;;  %v423_v35 = vmul.f32 0.1, %v295_v26 }
  0x5e   : > { %1704 = vmatmul.mubr.msk.f32.gmra.mxu0 %vm563_vm3, %v446_v55  ;;  %1752 = vmatmul.mubr.msk.f32.gmra.mxu1 %vm563_vm3, %v478_v57  ;;  %vm359_vm10 = vcmp.ge.f32.partialorder %v295_v26, 0.0  ;;  %v454_v39 = vsel %vm326_vm7, %v262_v21, %v390_v28  ;;  %vm328_vm11 = vcmp.ge.f32.partialorder %v264_v33, 0.0  ;;  %v392_v40 = vmul.f32 0.1, %v264_v33  ;;  %v495_v21 = vld [vmem:[%s3326_s3 + $0x10] sm:$0xff]  ;;  %v530_v28 = vld [vmem:[%s3326_s3 + $0x128] sm:$0xff] }
  0x5f   : > { %1706 = vmatprep.mubr.msk.f32.mxu0 %vm563_vm3, %v447_v58  ;;  %1754 = vmatprep.mubr.msk.f32.mxu1 %vm563_vm3, %v479_v62  ;;  %v486_v41 = vsel %vm358_vm8, %v294_v24, %v422_v31  ;;  %v455_v42 = vsel %vm327_vm9, %v263_v25, %v391_v32  ;;  %v424_v43 = vmul.f32 0.1, %v296_v36  ;;  %v393_v44 = vmul.f32 0.1, %v265_v37 }
  0x60   : > { %v487_v46 = vsel %vm359_vm10, %v295_v26, %v423_v35  ;;  %vm360_vm12 = vcmp.ge.f32.partialorder %v296_v36, 0.0  ;;  %vm329_vm13 = vcmp.ge.f32.partialorder %v265_v37, 0.0  ;;  %v425_v47 = vmul.f32 0.1, %v297_v38 }
  0x61   : > { %vm361_vm14 = vcmp.ge.f32.partialorder %v297_v38, 0.0  ;;  %v456_v51 = vsel %vm328_vm11, %v264_v33, %v392_v40  ;;  %vm330_vm15 = vcmp.ge.f32.partialorder %v266_v45, 0.0  ;;  %v488_v52 = vsel %vm360_vm12, %v296_v36, %v424_v43  ;;  %v497_v33 = vld [vmem:[%s3326_s3 + $0x20] sm:$0xff]  ;;  %v532_v40 = vld [vmem:[%s3326_s3 + $0x138] sm:$0xff] }
  0x62   : > { %1707 = vmatmul.mubr.msk.f32.gmra.mxu0 %vm563_vm3, %v448_v3  ;;  %1755 = vmatmul.mubr.msk.f32.gmra.mxu1 %vm563_vm3, %v480_v5  ;;  %v457_v53 = vsel %vm329_vm13, %v265_v37, %v393_v44  ;;  %v394_v54 = vmul.f32 0.1, %v266_v45  ;;  %v426_v55 = vmul.f32 0.1, %v298_v48  ;;  %v489_v57 = vsel %vm361_vm14, %v297_v38, %v425_v47  ;;  %v494_v5 = vld [vmem:[%s3326_s3 + $0x8] sm:$0xff] }
  0x63   : > { %1709 = vmatprep.mubr.msk.f32.mxu0 %vm563_vm3, %v449_v6  ;;  %1757 = vmatprep.mubr.msk.f32.mxu1 %vm563_vm3, %v481_v10  ;;  %vm362_vm0 = vcmp.ge.f32.partialorder %v298_v48, 0.0  ;;  %v395_v58 = vmul.f32 0.1, %v267_v49  ;;  %v427_v59 = vmul.f32 0.1, %v299_v50  ;;  %vm331_vm1 = vcmp.ge.f32.partialorder %v267_v49, 0.0 }
  0x64   : > { %vm363_vm2 = vcmp.ge.f32.partialorder %v299_v50, 0.0  ;;  %v458_v61 = vsel %vm330_vm15, %v266_v45, %v394_v54  ;;  %v490_v62 = vsel %vm362_vm0, %v298_v48, %v426_v55  ;;  %v396_v63 = vmul.f32 0.1, %v268_v56  ;;  %v526_v6 = vld [vmem:[%s3326_s3 + $0x108] sm:$0xff]  ;;  %v525_v10 = vld [vmem:[%s3326_s3 + $0x100] sm:$0xff]  ;;  %v499_v45 = vld [vmem:[%s3326_s3 + $0x30] sm:$0xff] }
  0x65   : > { %v428_v0 = vmul.f32 0.1, %v300_v60  ;;  %v459_v1 = vsel %vm331_vm1, %v267_v49, %v395_v58  ;;  %v491_v2 = vsel %vm363_vm2, %v299_v50, %v427_v59  ;;  %vm332_vm4 = vcmp.ge.f32.partialorder %v268_v56, 0.0  ;;  %v533_v58 = vld [vmem:[%s3326_s3 + $0x140] sm:$0xff] }
  0x66   : > { %1710 = vmatmul.mubr.msk.f32.gmra.mxu0 %vm563_vm3, %v450_v15  ;;  %1758 = vmatmul.mubr.msk.f32.gmra.mxu1 %vm563_vm3, %v482_v17  ;;  %vm364_vm5 = vcmp.ge.f32.partialorder %v300_v60, 0.0  ;;  %v460_v3 = vsel %vm332_vm4, %v268_v56, %v396_v63  ;;  %v496_v15 = vld [vmem:[%s3326_s3 + $0x18] sm:$0xff] }
  0x67   : > { %1712 = vmatprep.mubr.msk.f32.mxu0 %vm563_vm3, %v451_v18  ;;  %1760 = vmatprep.mubr.msk.f32.mxu1 %vm563_vm3, %v483_v22  ;;  %v492_v4 = vsel %vm364_vm5, %v300_v60, %v428_v0  ;;  %v527_v22 = vld [vmem:[%s3326_s3 + $0x110] sm:$0xff]  ;;  %v504_v63 = vld [vmem:[%s3326_s3 + $0x58] sm:$0xff] }
  0x68   : > { %v536_v0 = vld [vmem:[%s3326_s3 + $0x158] sm:$0xff] }
  0x6a   : > { %1713 = vmatmul.mubr.msk.f32.gmra.mxu0 %vm563_vm3, %v452_v27  ;;  %1761 = vmatmul.mubr.msk.f32.gmra.mxu1 %vm563_vm3, %v484_v29  ;;  %v498_v27 = vld [vmem:[%s3326_s3 + $0x28] sm:$0xff] }
  0x6b   : > { %1715 = vmatprep.mubr.msk.f32.mxu0 %vm563_vm3, %v453_v30  ;;  %1763 = vmatprep.mubr.msk.f32.mxu1 %vm563_vm3, %v485_v34  ;;  %v529_v34 = vld [vmem:[%s3326_s3 + $0x120] sm:$0xff] }
  0x6e   : > { %1716 = vmatmul.mubr.msk.f32.gmra.mxu0 %vm563_vm3, %v454_v39  ;;  %1764 = vmatmul.mubr.msk.f32.gmra.mxu1 %vm563_vm3, %v486_v41  ;;  %v500_v39 = vld [vmem:[%s3326_s3 + $0x38] sm:$0xff] }
  0x6f   : > { %1718 = vmatprep.mubr.msk.f32.mxu0 %vm563_vm3, %v455_v42  ;;  %1766 = vmatprep.mubr.msk.f32.mxu1 %vm563_vm3, %v487_v46  ;;  %v531_v46 = vld [vmem:[%s3326_s3 + $0x130] sm:$0xff] }
  0x72   : > { %1719 = vmatmul.mubr.msk.f32.gmra.mxu0 %vm563_vm3, %v456_v51  ;;  %1767 = vmatmul.mubr.msk.f32.gmra.mxu1 %vm563_vm3, %v488_v52  ;;  %v502_v51 = vld [vmem:[%s3326_s3 + $0x48] sm:$0xff] }
  0x73   : > { %1721 = vmatprep.mubr.msk.f32.mxu0 %vm563_vm3, %v457_v53  ;;  %1769 = vmatprep.mubr.msk.f32.mxu1 %vm563_vm3, %v489_v57  ;;  %v534_v52 = vld [vmem:[%s3326_s3 + $0x148] sm:$0xff]  ;;  %v501_v57 = vld [vmem:[%s3326_s3 + $0x40] sm:$0xff] }
  0x76   : > { %1722 = vmatmul.mubr.msk.f32.gmra.mxu0 %vm563_vm3, %v458_v61  ;;  %1770 = vmatmul.mubr.msk.f32.gmra.mxu1 %vm563_vm3, %v490_v62 }
  0x77   : > { %1724 = vmatprep.mubr.msk.f32.mxu0 %vm563_vm3, %v459_v1  ;;  %1772 = vmatprep.mubr.msk.f32.mxu1 %vm563_vm3, %v491_v2 }
  0x7a   : > { %1725 = vmatmul.mubr.msk.f32.gmra.mxu0 %vm563_vm3, %v460_v3  ;;  %1773 = vmatmul.mubr.msk.f32.gmra.mxu1 %vm563_vm3, %v492_v4 }
  0xfe   : > { %v1681_v7 = vpop.f32.mrf.mxu0  ;;  %v1729_v8 = vpop.f32.mrf.mxu1 }
  0xff   : > { %v1142_v11 = vadd.f32 %v1681_v7, %v494_v5  ;;  %v1174_v12 = vadd.f32 %v1729_v8, %v526_v6  ;;  %v503_v5 = vld [vmem:[%s3326_s3 + $0x50] sm:$0xff] }
 0x100   : > { %v822_v13 = vpop.f32.mrf.mxu0  ;;  %v982_v14 = vpop.f32.mrf.mxu1  ;;  %v535_v6 = vld [vmem:[%s3326_s3 + $0x150] sm:$0xff] }
 0x101   : > { %1206 = vst.msk [vmem:[%s3326_s3 + $0x8] sm:$0xff] %vm563_vm3, %v1142_v11  ;;  %1238 = vst.msk [vmem:[%s3326_s3 + $0x108] sm:$0xff] %vm563_vm3, %v1174_v12  ;;  %v1141_v17 = vadd.f32 %v822_v13, %v493_v9  ;;  %v1173_v18 = vadd.f32 %v982_v14, %v525_v10  ;;  %v506_v11 = vld [vmem:[%s3326_s3 + $0x68] sm:$0xff] }
 0x102   : > { %v1684_v19 = vpop.f32.mrf.mxu0  ;;  %v1732_v20 = vpop.f32.mrf.mxu1  ;;  %v538_v12 = vld [vmem:[%s3326_s3 + $0x168] sm:$0xff] }
 0x103   : > { %1205 = vst.msk [vmem:[%s3326_s3] sm:$0xff] %vm563_vm3, %v1141_v17  ;;  %1237 = vst.msk [vmem:[%s3326_s3 + $0x100] sm:$0xff] %vm563_vm3, %v1173_v18  ;;  %v1144_v23 = vadd.f32 %v1684_v19, %v496_v15  ;;  %v1176_v24 = vadd.f32 %v1732_v20, %v528_v16  ;;  %v505_v17 = vld [vmem:[%s3326_s3 + $0x60] sm:$0xff] }
 0x104   : > { %v832_v25 = vpop.f32.mrf.mxu0  ;;  %v992_v26 = vpop.f32.mrf.mxu1  ;;  %v537_v18 = vld [vmem:[%s3326_s3 + $0x160] sm:$0xff] }
 0x105   : > { %1208 = vst.msk [vmem:[%s3326_s3 + $0x18] sm:$0xff] %vm563_vm3, %v1144_v23  ;;  %1240 = vst.msk [vmem:[%s3326_s3 + $0x118] sm:$0xff] %vm563_vm3, %v1176_v24  ;;  %v1143_v29 = vadd.f32 %v832_v25, %v495_v21  ;;  %v1175_v30 = vadd.f32 %v992_v26, %v527_v22  ;;  %v508_v23 = vld [vmem:[%s3326_s3 + $0x78] sm:$0xff] }
 0x106   : > { %v1687_v31 = vpop.f32.mrf.mxu0  ;;  %v1735_v32 = vpop.f32.mrf.mxu1  ;;  %v540_v24 = vld [vmem:[%s3326_s3 + $0x178] sm:$0xff] }
 0x107   : > { %1207 = vst.msk [vmem:[%s3326_s3 + $0x10] sm:$0xff] %vm563_vm3, %v1143_v29  ;;  %1239 = vst.msk [vmem:[%s3326_s3 + $0x110] sm:$0xff] %vm563_vm3, %v1175_v30  ;;  %v1146_v35 = vadd.f32 %v1687_v31, %v498_v27  ;;  %v1178_v36 = vadd.f32 %v1735_v32, %v530_v28  ;;  %v507_v29 = vld [vmem:[%s3326_s3 + $0x70] sm:$0xff] }
 0x108   : > { %v842_v37 = vpop.f32.mrf.mxu0  ;;  %v1002_v38 = vpop.f32.mrf.mxu1  ;;  %v539_v30 = vld [vmem:[%s3326_s3 + $0x170] sm:$0xff] }
 0x109   : > { %1210 = vst.msk [vmem:[%s3326_s3 + $0x28] sm:$0xff] %vm563_vm3, %v1146_v35  ;;  %1242 = vst.msk [vmem:[%s3326_s3 + $0x128] sm:$0xff] %vm563_vm3, %v1178_v36  ;;  %v1145_v41 = vadd.f32 %v842_v37, %v497_v33  ;;  %v1177_v42 = vadd.f32 %v1002_v38, %v529_v34  ;;  %v510_v35 = vld [vmem:[%s3326_s3 + $0x88] sm:$0xff] }
 0x10a   : > { %v1690_v43 = vpop.f32.mrf.mxu0  ;;  %v1738_v44 = vpop.f32.mrf.mxu1  ;;  %v542_v36 = vld [vmem:[%s3326_s3 + $0x188] sm:$0xff] }
 0x10b   : > { %1209 = vst.msk [vmem:[%s3326_s3 + $0x20] sm:$0xff] %vm563_vm3, %v1145_v41  ;;  %1241 = vst.msk [vmem:[%s3326_s3 + $0x120] sm:$0xff] %vm563_vm3, %v1177_v42  ;;  %v1148_v47 = vadd.f32 %v1690_v43, %v500_v39  ;;  %v1180_v48 = vadd.f32 %v1738_v44, %v532_v40  ;;  %v509_v41 = vld [vmem:[%s3326_s3 + $0x80] sm:$0xff] }
 0x10c   : > { %v852_v49 = vpop.f32.mrf.mxu0  ;;  %v1012_v50 = vpop.f32.mrf.mxu1  ;;  %v541_v42 = vld [vmem:[%s3326_s3 + $0x180] sm:$0xff] }
 0x10d   : > { %1212 = vst.msk [vmem:[%s3326_s3 + $0x38] sm:$0xff] %vm563_vm3, %v1148_v47  ;;  %1244 = vst.msk [vmem:[%s3326_s3 + $0x138] sm:$0xff] %vm563_vm3, %v1180_v48  ;;  %v1147_v53 = vadd.f32 %v852_v49, %v499_v45  ;;  %v1179_v54 = vadd.f32 %v1012_v50, %v531_v46  ;;  %v512_v47 = vld [vmem:[%s3326_s3 + $0x98] sm:$0xff] }
 0x10e   : > { %v1693_v55 = vpop.f32.mrf.mxu0  ;;  %v1741_v56 = vpop.f32.mrf.mxu1  ;;  %v544_v48 = vld [vmem:[%s3326_s3 + $0x198] sm:$0xff] }
 0x10f   : > { %1211 = vst.msk [vmem:[%s3326_s3 + $0x30] sm:$0xff] %vm563_vm3, %v1147_v53  ;;  %1243 = vst.msk [vmem:[%s3326_s3 + $0x130] sm:$0xff] %vm563_vm3, %v1179_v54  ;;  %v1150_v59 = vadd.f32 %v1693_v55, %v502_v51  ;;  %v1182_v60 = vadd.f32 %v1741_v56, %v534_v52  ;;  %v511_v53 = vld [vmem:[%s3326_s3 + $0x90] sm:$0xff] }
 0x110   : > { %v862_v61 = vpop.f32.mrf.mxu0  ;;  %v1022_v62 = vpop.f32.mrf.mxu1  ;;  %v543_v54 = vld [vmem:[%s3326_s3 + $0x190] sm:$0xff] }
 0x111   : > { %1214 = vst.msk [vmem:[%s3326_s3 + $0x48] sm:$0xff] %vm563_vm3, %v1150_v59  ;;  %1246 = vst.msk [vmem:[%s3326_s3 + $0x148] sm:$0xff] %vm563_vm3, %v1182_v60  ;;  %v1149_v1 = vadd.f32 %v862_v61, %v501_v57  ;;  %v1181_v2 = vadd.f32 %v1022_v62, %v533_v58  ;;  %v514_v59 = vld [vmem:[%s3326_s3 + $0xa8] sm:$0xff] }
 0x112   : > { %v1696_v3 = vpop.f32.mrf.mxu0  ;;  %v1744_v4 = vpop.f32.mrf.mxu1  ;;  %v546_v60 = vld [vmem:[%s3326_s3 + $0x1a8] sm:$0xff] }
 0x113   : > { %1213 = vst.msk [vmem:[%s3326_s3 + $0x40] sm:$0xff] %vm563_vm3, %v1149_v1  ;;  %1245 = vst.msk [vmem:[%s3326_s3 + $0x140] sm:$0xff] %vm563_vm3, %v1181_v2  ;;  %v1152_v7 = vadd.f32 %v1696_v3, %v504_v63  ;;  %v1184_v8 = vadd.f32 %v1744_v4, %v536_v0  ;;  %v513_v1 = vld [vmem:[%s3326_s3 + $0xa0] sm:$0xff] }
 0x114   : > { %v872_v9 = vpop.f32.mrf.mxu0  ;;  %v1032_v10 = vpop.f32.mrf.mxu1  ;;  %v545_v2 = vld [vmem:[%s3326_s3 + $0x1a0] sm:$0xff] }
 0x115   : > { %1216 = vst.msk [vmem:[%s3326_s3 + $0x58] sm:$0xff] %vm563_vm3, %v1152_v7  ;;  %1248 = vst.msk [vmem:[%s3326_s3 + $0x158] sm:$0xff] %vm563_vm3, %v1184_v8  ;;  %v1151_v13 = vadd.f32 %v872_v9, %v503_v5  ;;  %v1183_v14 = vadd.f32 %v1032_v10, %v535_v6  ;;  %v516_v7 = vld [vmem:[%s3326_s3 + $0xb8] sm:$0xff] }
 0x116   : > { %v1699_v15 = vpop.f32.mrf.mxu0  ;;  %v1747_v16 = vpop.f32.mrf.mxu1  ;;  %v548_v8 = vld [vmem:[%s3326_s3 + $0x1b8] sm:$0xff] }
 0x117   : > { %1215 = vst.msk [vmem:[%s3326_s3 + $0x50] sm:$0xff] %vm563_vm3, %v1151_v13  ;;  %1247 = vst.msk [vmem:[%s3326_s3 + $0x150] sm:$0xff] %vm563_vm3, %v1183_v14  ;;  %v1154_v19 = vadd.f32 %v1699_v15, %v506_v11  ;;  %v1186_v20 = vadd.f32 %v1747_v16, %v538_v12  ;;  %v515_v13 = vld [vmem:[%s3326_s3 + $0xb0] sm:$0xff] }
 0x118   : > { %v882_v21 = vpop.f32.mrf.mxu0  ;;  %v1042_v22 = vpop.f32.mrf.mxu1  ;;  %v547_v14 = vld [vmem:[%s3326_s3 + $0x1b0] sm:$0xff] }
 0x119   : > { %1218 = vst.msk [vmem:[%s3326_s3 + $0x68] sm:$0xff] %vm563_vm3, %v1154_v19  ;;  %1250 = vst.msk [vmem:[%s3326_s3 + $0x168] sm:$0xff] %vm563_vm3, %v1186_v20  ;;  %v1153_v25 = vadd.f32 %v882_v21, %v505_v17  ;;  %v1185_v26 = vadd.f32 %v1042_v22, %v537_v18  ;;  %v518_v19 = vld [vmem:[%s3326_s3 + $0xc8] sm:$0xff] }
 0x11a   : > { %v1702_v27 = vpop.f32.mrf.mxu0  ;;  %v1750_v28 = vpop.f32.mrf.mxu1  ;;  %v550_v20 = vld [vmem:[%s3326_s3 + $0x1c8] sm:$0xff] }
 0x11b   : > { %1217 = vst.msk [vmem:[%s3326_s3 + $0x60] sm:$0xff] %vm563_vm3, %v1153_v25  ;;  %1249 = vst.msk [vmem:[%s3326_s3 + $0x160] sm:$0xff] %vm563_vm3, %v1185_v26  ;;  %v1156_v31 = vadd.f32 %v1702_v27, %v508_v23  ;;  %v1188_v32 = vadd.f32 %v1750_v28, %v540_v24  ;;  %v517_v25 = vld [vmem:[%s3326_s3 + $0xc0] sm:$0xff] }
 0x11c   : > { %v892_v33 = vpop.f32.mrf.mxu0  ;;  %v1052_v34 = vpop.f32.mrf.mxu1  ;;  %v549_v26 = vld [vmem:[%s3326_s3 + $0x1c0] sm:$0xff] }
 0x11d   : > { %1220 = vst.msk [vmem:[%s3326_s3 + $0x78] sm:$0xff] %vm563_vm3, %v1156_v31  ;;  %1252 = vst.msk [vmem:[%s3326_s3 + $0x178] sm:$0xff] %vm563_vm3, %v1188_v32  ;;  %v1155_v37 = vadd.f32 %v892_v33, %v507_v29  ;;  %v1187_v38 = vadd.f32 %v1052_v34, %v539_v30  ;;  %v520_v31 = vld [vmem:[%s3326_s3 + $0xd8] sm:$0xff] }
 0x11e   : > { %v1705_v39 = vpop.f32.mrf.mxu0  ;;  %v1753_v40 = vpop.f32.mrf.mxu1  ;;  %v552_v32 = vld [vmem:[%s3326_s3 + $0x1d8] sm:$0xff] }
 0x11f   : > { %1219 = vst.msk [vmem:[%s3326_s3 + $0x70] sm:$0xff] %vm563_vm3, %v1155_v37  ;;  %1251 = vst.msk [vmem:[%s3326_s3 + $0x170] sm:$0xff] %vm563_vm3, %v1187_v38  ;;  %v1158_v43 = vadd.f32 %v1705_v39, %v510_v35  ;;  %v1190_v44 = vadd.f32 %v1753_v40, %v542_v36  ;;  %v519_v37 = vld [vmem:[%s3326_s3 + $0xd0] sm:$0xff] }
 0x120   : > { %v902_v45 = vpop.f32.mrf.mxu0  ;;  %v1062_v46 = vpop.f32.mrf.mxu1  ;;  %v551_v38 = vld [vmem:[%s3326_s3 + $0x1d0] sm:$0xff] }
 0x121   : > { %1222 = vst.msk [vmem:[%s3326_s3 + $0x88] sm:$0xff] %vm563_vm3, %v1158_v43  ;;  %1254 = vst.msk [vmem:[%s3326_s3 + $0x188] sm:$0xff] %vm563_vm3, %v1190_v44  ;;  %v1157_v49 = vadd.f32 %v902_v45, %v509_v41  ;;  %v1189_v50 = vadd.f32 %v1062_v46, %v541_v42  ;;  %v522_v43 = vld [vmem:[%s3326_s3 + $0xe8] sm:$0xff] }
 0x122   : > { %v1708_v51 = vpop.f32.mrf.mxu0  ;;  %v1756_v52 = vpop.f32.mrf.mxu1  ;;  %v554_v44 = vld [vmem:[%s3326_s3 + $0x1e8] sm:$0xff] }
 0x123   : > { %1221 = vst.msk [vmem:[%s3326_s3 + $0x80] sm:$0xff] %vm563_vm3, %v1157_v49  ;;  %1253 = vst.msk [vmem:[%s3326_s3 + $0x180] sm:$0xff] %vm563_vm3, %v1189_v50  ;;  %v1160_v55 = vadd.f32 %v1708_v51, %v512_v47  ;;  %v1192_v56 = vadd.f32 %v1756_v52, %v544_v48  ;;  %v521_v49 = vld [vmem:[%s3326_s3 + $0xe0] sm:$0xff] }
 0x124   : > { %v912_v57 = vpop.f32.mrf.mxu0  ;;  %v1072_v58 = vpop.f32.mrf.mxu1  ;;  %v553_v50 = vld [vmem:[%s3326_s3 + $0x1e0] sm:$0xff] }
 0x125   : > { %1224 = vst.msk [vmem:[%s3326_s3 + $0x98] sm:$0xff] %vm563_vm3, %v1160_v55  ;;  %1256 = vst.msk [vmem:[%s3326_s3 + $0x198] sm:$0xff] %vm563_vm3, %v1192_v56  ;;  %v1159_v61 = vadd.f32 %v912_v57, %v511_v53  ;;  %v1191_v62 = vadd.f32 %v1072_v58, %v543_v54  ;;  %v524_v55 = vld [vmem:[%s3326_s3 + $0xf8] sm:$0xff] }
 0x126   : > { %v1711_v63 = vpop.f32.mrf.mxu0  ;;  %v1759_v0 = vpop.f32.mrf.mxu1  ;;  %v556_v56 = vld [vmem:[%s3326_s3 + $0x1f8] sm:$0xff] }
 0x127   : > { %1223 = vst.msk [vmem:[%s3326_s3 + $0x90] sm:$0xff] %vm563_vm3, %v1159_v61  ;;  %1255 = vst.msk [vmem:[%s3326_s3 + $0x190] sm:$0xff] %vm563_vm3, %v1191_v62  ;;  %v1162_v3 = vadd.f32 %v1711_v63, %v514_v59  ;;  %v1194_v4 = vadd.f32 %v1759_v0, %v546_v60  ;;  %v523_v61 = vld [vmem:[%s3326_s3 + $0xf0] sm:$0xff] }
 0x128   : > { %v922_v5 = vpop.f32.mrf.mxu0  ;;  %v1082_v6 = vpop.f32.mrf.mxu1  ;;  %v555_v62 = vld [vmem:[%s3326_s3 + $0x1f0] sm:$0xff] }
 0x129   : > { %1226 = vst.msk [vmem:[%s3326_s3 + $0xa8] sm:$0xff] %vm563_vm3, %v1162_v3  ;;  %1258 = vst.msk [vmem:[%s3326_s3 + $0x1a8] sm:$0xff] %vm563_vm3, %v1194_v4  ;;  %v1161_v9 = vadd.f32 %v922_v5, %v513_v1  ;;  %v1193_v10 = vadd.f32 %v1082_v6, %v545_v2 }
 0x12a   : > { %v1714_v11 = vpop.f32.mrf.mxu0  ;;  %v1762_v12 = vpop.f32.mrf.mxu1 }
 0x12b   : > { %1225 = vst.msk [vmem:[%s3326_s3 + $0xa0] sm:$0xff] %vm563_vm3, %v1161_v9  ;;  %1257 = vst.msk [vmem:[%s3326_s3 + $0x1a0] sm:$0xff] %vm563_vm3, %v1193_v10  ;;  %v1164_v15 = vadd.f32 %v1714_v11, %v516_v7  ;;  %v1196_v16 = vadd.f32 %v1762_v12, %v548_v8 }
 0x12c   : > { %v932_v17 = vpop.f32.mrf.mxu0  ;;  %v1092_v18 = vpop.f32.mrf.mxu1 }
 0x12d   : > { %1228 = vst.msk [vmem:[%s3326_s3 + $0xb8] sm:$0xff] %vm563_vm3, %v1164_v15  ;;  %1260 = vst.msk [vmem:[%s3326_s3 + $0x1b8] sm:$0xff] %vm563_vm3, %v1196_v16  ;;  %v1163_v21 = vadd.f32 %v932_v17, %v515_v13  ;;  %v1195_v22 = vadd.f32 %v1092_v18, %v547_v14 }
 0x12e   : > { %v1717_v23 = vpop.f32.mrf.mxu0  ;;  %v1765_v24 = vpop.f32.mrf.mxu1 }
 0x12f   : > { %1227 = vst.msk [vmem:[%s3326_s3 + $0xb0] sm:$0xff] %vm563_vm3, %v1163_v21  ;;  %1259 = vst.msk [vmem:[%s3326_s3 + $0x1b0] sm:$0xff] %vm563_vm3, %v1195_v22  ;;  %v1166_v27 = vadd.f32 %v1717_v23, %v518_v19  ;;  %v1198_v28 = vadd.f32 %v1765_v24, %v550_v20 }
 0x130   : > { %v942_v29 = vpop.f32.mrf.mxu0  ;;  %v1102_v30 = vpop.f32.mrf.mxu1 }
 0x131   : > { %1230 = vst.msk [vmem:[%s3326_s3 + $0xc8] sm:$0xff] %vm563_vm3, %v1166_v27  ;;  %1262 = vst.msk [vmem:[%s3326_s3 + $0x1c8] sm:$0xff] %vm563_vm3, %v1198_v28  ;;  %v1165_v33 = vadd.f32 %v942_v29, %v517_v25  ;;  %v1197_v34 = vadd.f32 %v1102_v30, %v549_v26 }
 0x132   : > { %v1720_v35 = vpop.f32.mrf.mxu0  ;;  %v1768_v36 = vpop.f32.mrf.mxu1 }
 0x133   : > { %1229 = vst.msk [vmem:[%s3326_s3 + $0xc0] sm:$0xff] %vm563_vm3, %v1165_v33  ;;  %1261 = vst.msk [vmem:[%s3326_s3 + $0x1c0] sm:$0xff] %vm563_vm3, %v1197_v34  ;;  %v1168_v39 = vadd.f32 %v1720_v35, %v520_v31  ;;  %v1200_v40 = vadd.f32 %v1768_v36, %v552_v32 }
 0x134   : > { %v952_v41 = vpop.f32.mrf.mxu0  ;;  %v1112_v42 = vpop.f32.mrf.mxu1 }
 0x135   : > { %1232 = vst.msk [vmem:[%s3326_s3 + $0xd8] sm:$0xff] %vm563_vm3, %v1168_v39  ;;  %1264 = vst.msk [vmem:[%s3326_s3 + $0x1d8] sm:$0xff] %vm563_vm3, %v1200_v40  ;;  %v1167_v45 = vadd.f32 %v952_v41, %v519_v37  ;;  %v1199_v46 = vadd.f32 %v1112_v42, %v551_v38 }
 0x136   : > { %v1723_v47 = vpop.f32.mrf.mxu0  ;;  %v1771_v48 = vpop.f32.mrf.mxu1 }
 0x137   : > { %1231 = vst.msk [vmem:[%s3326_s3 + $0xd0] sm:$0xff] %vm563_vm3, %v1167_v45  ;;  %1263 = vst.msk [vmem:[%s3326_s3 + $0x1d0] sm:$0xff] %vm563_vm3, %v1199_v46  ;;  %v1170_v51 = vadd.f32 %v1723_v47, %v522_v43  ;;  %v1202_v52 = vadd.f32 %v1771_v48, %v554_v44 }
 0x138   : > { %v962_v53 = vpop.f32.mrf.mxu0  ;;  %v1122_v54 = vpop.f32.mrf.mxu1 }
 0x139   : > { %1234 = vst.msk [vmem:[%s3326_s3 + $0xe8] sm:$0xff] %vm563_vm3, %v1170_v51  ;;  %1266 = vst.msk [vmem:[%s3326_s3 + $0x1e8] sm:$0xff] %vm563_vm3, %v1202_v52  ;;  %v1169_v57 = vadd.f32 %v962_v53, %v521_v49  ;;  %v1201_v58 = vadd.f32 %v1122_v54, %v553_v50 }
 0x13a   : > { %v1726_v59 = vpop.f32.mrf.mxu0  ;;  %v1774_v60 = vpop.f32.mrf.mxu1 }
 0x13b   : > { %1233 = vst.msk [vmem:[%s3326_s3 + $0xe0] sm:$0xff] %vm563_vm3, %v1169_v57  ;;  %1265 = vst.msk [vmem:[%s3326_s3 + $0x1e0] sm:$0xff] %vm563_vm3, %v1201_v58  ;;  %v1172_v63 = vadd.f32 %v1726_v59, %v524_v55  ;;  %v1204_v0 = vadd.f32 %v1774_v60, %v556_v56  ;;  %1272 = sbr.rel (%p1597_p5) target bundleno = 356 (0x164), region = 40 }
 0x13c   : > { %v972_v1 = vpop.f32.mrf.mxu0  ;;  %v1132_v2 = vpop.f32.mrf.mxu1 }
 0x13d   : > { %1236 = vst.msk [vmem:[%s3326_s3 + $0xf8] sm:$0xff] %vm563_vm3, %v1172_v63  ;;  %1268 = vst.msk [vmem:[%s3326_s3 + $0x1f8] sm:$0xff] %vm563_vm3, %v1204_v0  ;;  %v1171_v3 = vadd.f32 %v972_v1, %v523_v61  ;;  %v1203_v4 = vadd.f32 %v1132_v2, %v555_v62 }
 0x13f   : > { %1235 = vst.msk [vmem:[%s3326_s3 + $0xf0] sm:$0xff] %vm563_vm3, %v1171_v3  ;;  %1267 = vst.msk [vmem:[%s3326_s3 + $0x1f0] sm:$0xff] %vm563_vm3, %v1203_v4 }
 0x140   : > { %v1273_v5 = vld [vmem:[%s3326_s3] sm:$0xff]  ;;  %v1274_v7 = vld [vmem:[%s3326_s3 + $0x8] sm:$0xff]  ;;  %v1275_v10 = vld [vmem:[%s3326_s3 + $0x10] sm:$0xff] }
 0x141   : > { %v2803_v6 = vld [vmem:[%s3325_s2] ss:$0 sm:$0xff]  ;;  %v1276_v11 = vld [vmem:[%s3326_s3 + $0x18] sm:$0xff]  ;;  %v1278_v16 = vld [vmem:[%s3326_s3 + $0x28] sm:$0xff] }
 0x142   : > { %v1344_v8 = vadd.f32 %v2803_v6, %v1273_v5  ;;  %v1345_v9 = vadd.f32 %v2803_v6, %v1274_v7  ;;  %v1277_v12 = vld [vmem:[%s3326_s3 + $0x20] sm:$0xff]  ;;  %v1346_v13 = vadd.f32 %v2803_v6, %v1275_v10  ;;  %v1347_v14 = vadd.f32 %v2803_v6, %v1276_v11  ;;  %v1279_v17 = vld [vmem:[%s3326_s3 + $0x30] sm:$0xff]  ;;  %v1280_v18 = vld [vmem:[%s3326_s3 + $0x38] sm:$0xff] }
 0x143   : > { %v1348_v15 = vadd.f32 %v2803_v6, %v1277_v12  ;;  %v1349_v19 = vadd.f32 %v2803_v6, %v1278_v16  ;;  %v1350_v20 = vadd.f32 %v2803_v6, %v1279_v17  ;;  %v1351_v21 = vadd.f32 %v2803_v6, %v1280_v18  ;;  %v1281_v22 = vld [vmem:[%s3326_s3 + $0x40] sm:$0xff]  ;;  %v1282_v23 = vld [vmem:[%s3326_s3 + $0x48] sm:$0xff]  ;;  %v1283_v24 = vld [vmem:[%s3326_s3 + $0x50] sm:$0xff] }
 0x144   : > { %1408 = vst.msk [vmem:[%s3326_s3] sm:$0xff] %vm563_vm3, %v1344_v8  ;;  %1409 = vst.msk [vmem:[%s3326_s3 + $0x8] sm:$0xff] %vm563_vm3, %v1345_v9  ;;  %v1352_v25 = vadd.f32 %v2803_v6, %v1281_v22  ;;  %v1353_v26 = vadd.f32 %v2803_v6, %v1282_v23  ;;  %v1354_v27 = vadd.f32 %v2803_v6, %v1283_v24  ;;  %v1284_v28 = vld [vmem:[%s3326_s3 + $0x58] sm:$0xff]  ;;  %v1285_v29 = vld [vmem:[%s3326_s3 + $0x60] sm:$0xff] }
 0x145   : > { %1410 = vst.msk [vmem:[%s3326_s3 + $0x10] sm:$0xff] %vm563_vm3, %v1346_v13  ;;  %1411 = vst.msk [vmem:[%s3326_s3 + $0x18] sm:$0xff] %vm563_vm3, %v1347_v14  ;;  %v1286_v30 = vld [vmem:[%s3326_s3 + $0x68] sm:$0xff]  ;;  %v1355_v31 = vadd.f32 %v2803_v6, %v1284_v28  ;;  %v1356_v32 = vadd.f32 %v2803_v6, %v1285_v29  ;;  %v1287_v34 = vld [vmem:[%s3326_s3 + $0x70] sm:$0xff] }
 0x146   : > { %1412 = vst.msk [vmem:[%s3326_s3 + $0x20] sm:$0xff] %vm563_vm3, %v1348_v15  ;;  %1413 = vst.msk [vmem:[%s3326_s3 + $0x28] sm:$0xff] %vm563_vm3, %v1349_v19  ;;  %v1357_v33 = vadd.f32 %v2803_v6, %v1286_v30  ;;  %v1288_v35 = vld [vmem:[%s3326_s3 + $0x78] sm:$0xff]  ;;  %v1289_v36 = vld [vmem:[%s3326_s3 + $0x80] sm:$0xff]  ;;  %v1358_v37 = vadd.f32 %v2803_v6, %v1287_v34 }
 0x147   : > { %1414 = vst.msk [vmem:[%s3326_s3 + $0x30] sm:$0xff] %vm563_vm3, %v1350_v20  ;;  %1415 = vst.msk [vmem:[%s3326_s3 + $0x38] sm:$0xff] %vm563_vm3, %v1351_v21  ;;  %v1359_v38 = vadd.f32 %v2803_v6, %v1288_v35  ;;  %v1360_v39 = vadd.f32 %v2803_v6, %v1289_v36  ;;  %v1290_v40 = vld [vmem:[%s3326_s3 + $0x88] sm:$0xff]  ;;  %v1291_v41 = vld [vmem:[%s3326_s3 + $0x90] sm:$0xff] }
 0x148   : > { %1416 = vst.msk [vmem:[%s3326_s3 + $0x40] sm:$0xff] %vm563_vm3, %v1352_v25  ;;  %1417 = vst.msk [vmem:[%s3326_s3 + $0x48] sm:$0xff] %vm563_vm3, %v1353_v26  ;;  %v1292_v42 = vld [vmem:[%s3326_s3 + $0x98] sm:$0xff]  ;;  %v1361_v43 = vadd.f32 %v2803_v6, %v1290_v40  ;;  %v1362_v44 = vadd.f32 %v2803_v6, %v1291_v41  ;;  %v1293_v46 = vld [vmem:[%s3326_s3 + $0xa0] sm:$0xff] }
 0x149   : > { %1418 = vst.msk [vmem:[%s3326_s3 + $0x50] sm:$0xff] %vm563_vm3, %v1354_v27  ;;  %1419 = vst.msk [vmem:[%s3326_s3 + $0x58] sm:$0xff] %vm563_vm3, %v1355_v31  ;;  %v1363_v45 = vadd.f32 %v2803_v6, %v1292_v42  ;;  %v1294_v47 = vld [vmem:[%s3326_s3 + $0xa8] sm:$0xff]  ;;  %v1295_v48 = vld [vmem:[%s3326_s3 + $0xb0] sm:$0xff]  ;;  %v1364_v49 = vadd.f32 %v2803_v6, %v1293_v46 }
 0x14a   : > { %1420 = vst.msk [vmem:[%s3326_s3 + $0x60] sm:$0xff] %vm563_vm3, %v1356_v32  ;;  %1421 = vst.msk [vmem:[%s3326_s3 + $0x68] sm:$0xff] %vm563_vm3, %v1357_v33  ;;  %v1365_v50 = vadd.f32 %v2803_v6, %v1294_v47  ;;  %v1366_v51 = vadd.f32 %v2803_v6, %v1295_v48  ;;  %v1296_v52 = vld [vmem:[%s3326_s3 + $0xb8] sm:$0xff]  ;;  %v1297_v53 = vld [vmem:[%s3326_s3 + $0xc0] sm:$0xff] }
 0x14b   : > { %1422 = vst.msk [vmem:[%s3326_s3 + $0x70] sm:$0xff] %vm563_vm3, %v1358_v37  ;;  %1423 = vst.msk [vmem:[%s3326_s3 + $0x78] sm:$0xff] %vm563_vm3, %v1359_v38  ;;  %v1298_v54 = vld [vmem:[%s3326_s3 + $0xc8] sm:$0xff]  ;;  %v1367_v55 = vadd.f32 %v2803_v6, %v1296_v52  ;;  %v1368_v56 = vadd.f32 %v2803_v6, %v1297_v53  ;;  %v1299_v58 = vld [vmem:[%s3326_s3 + $0xd0] sm:$0xff] }
 0x14c   : > { %1424 = vst.msk [vmem:[%s3326_s3 + $0x80] sm:$0xff] %vm563_vm3, %v1360_v39  ;;  %1425 = vst.msk [vmem:[%s3326_s3 + $0x88] sm:$0xff] %vm563_vm3, %v1361_v43  ;;  %v1369_v57 = vadd.f32 %v2803_v6, %v1298_v54  ;;  %v1300_v59 = vld [vmem:[%s3326_s3 + $0xd8] sm:$0xff]  ;;  %v1301_v60 = vld [vmem:[%s3326_s3 + $0xe0] sm:$0xff]  ;;  %v1370_v61 = vadd.f32 %v2803_v6, %v1299_v58 }
 0x14d   : > { %1426 = vst.msk [vmem:[%s3326_s3 + $0x90] sm:$0xff] %vm563_vm3, %v1362_v44  ;;  %1427 = vst.msk [vmem:[%s3326_s3 + $0x98] sm:$0xff] %vm563_vm3, %v1363_v45  ;;  %v1371_v62 = vadd.f32 %v2803_v6, %v1300_v59  ;;  %v1372_v63 = vadd.f32 %v2803_v6, %v1301_v60  ;;  %v1302_v0 = vld [vmem:[%s3326_s3 + $0xe8] sm:$0xff]  ;;  %v1303_v1 = vld [vmem:[%s3326_s3 + $0xf0] sm:$0xff] }
 0x14e   : > { %1428 = vst.msk [vmem:[%s3326_s3 + $0xa0] sm:$0xff] %vm563_vm3, %v1364_v49  ;;  %1429 = vst.msk [vmem:[%s3326_s3 + $0xa8] sm:$0xff] %vm563_vm3, %v1365_v50  ;;  %v1304_v2 = vld [vmem:[%s3326_s3 + $0xf8] sm:$0xff]  ;;  %v1373_v3 = vadd.f32 %v2803_v6, %v1302_v0  ;;  %v1374_v4 = vadd.f32 %v2803_v6, %v1303_v1  ;;  %v1305_v7 = vld [vmem:[%s3326_s3 + $0x100] sm:$0xff] }
 0x14f   : > { %1430 = vst.msk [vmem:[%s3326_s3 + $0xb0] sm:$0xff] %vm563_vm3, %v1366_v51  ;;  %1431 = vst.msk [vmem:[%s3326_s3 + $0xb8] sm:$0xff] %vm563_vm3, %v1367_v55  ;;  %v1375_v5 = vadd.f32 %v2803_v6, %v1304_v2  ;;  %v1306_v8 = vld [vmem:[%s3326_s3 + $0x108] sm:$0xff]  ;;  %v1307_v9 = vld [vmem:[%s3326_s3 + $0x110] sm:$0xff]  ;;  %v1376_v10 = vadd.f32 %v2803_v6, %v1305_v7 }
 0x150   : > { %1432 = vst.msk [vmem:[%s3326_s3 + $0xc0] sm:$0xff] %vm563_vm3, %v1368_v56  ;;  %1433 = vst.msk [vmem:[%s3326_s3 + $0xc8] sm:$0xff] %vm563_vm3, %v1369_v57  ;;  %v1377_v11 = vadd.f32 %v2803_v6, %v1306_v8  ;;  %v1378_v12 = vadd.f32 %v2803_v6, %v1307_v9  ;;  %v1308_v13 = vld [vmem:[%s3326_s3 + $0x118] sm:$0xff]  ;;  %v1309_v14 = vld [vmem:[%s3326_s3 + $0x120] sm:$0xff] }
 0x151   : > { %1434 = vst.msk [vmem:[%s3326_s3 + $0xd0] sm:$0xff] %vm563_vm3, %v1370_v61  ;;  %1435 = vst.msk [vmem:[%s3326_s3 + $0xd8] sm:$0xff] %vm563_vm3, %v1371_v62  ;;  %v1310_v15 = vld [vmem:[%s3326_s3 + $0x128] sm:$0xff]  ;;  %v1379_v16 = vadd.f32 %v2803_v6, %v1308_v13  ;;  %v1380_v17 = vadd.f32 %v2803_v6, %v1309_v14  ;;  %v1311_v19 = vld [vmem:[%s3326_s3 + $0x130] sm:$0xff] }
 0x152   : > { %1436 = vst.msk [vmem:[%s3326_s3 + $0xe0] sm:$0xff] %vm563_vm3, %v1372_v63  ;;  %1437 = vst.msk [vmem:[%s3326_s3 + $0xe8] sm:$0xff] %vm563_vm3, %v1373_v3  ;;  %v1381_v18 = vadd.f32 %v2803_v6, %v1310_v15  ;;  %v1312_v20 = vld [vmem:[%s3326_s3 + $0x138] sm:$0xff]  ;;  %v1313_v21 = vld [vmem:[%s3326_s3 + $0x140] sm:$0xff]  ;;  %v1382_v22 = vadd.f32 %v2803_v6, %v1311_v19 }
 0x153   : > { %1438 = vst.msk [vmem:[%s3326_s3 + $0xf0] sm:$0xff] %vm563_vm3, %v1374_v4  ;;  %1439 = vst.msk [vmem:[%s3326_s3 + $0xf8] sm:$0xff] %vm563_vm3, %v1375_v5  ;;  %v1383_v23 = vadd.f32 %v2803_v6, %v1312_v20  ;;  %v1384_v24 = vadd.f32 %v2803_v6, %v1313_v21  ;;  %v1314_v25 = vld [vmem:[%s3326_s3 + $0x148] sm:$0xff]  ;;  %v1315_v26 = vld [vmem:[%s3326_s3 + $0x150] sm:$0xff] }
 0x154   : > { %1440 = vst.msk [vmem:[%s3326_s3 + $0x100] sm:$0xff] %vm563_vm3, %v1376_v10  ;;  %1441 = vst.msk [vmem:[%s3326_s3 + $0x108] sm:$0xff] %vm563_vm3, %v1377_v11  ;;  %v1316_v27 = vld [vmem:[%s3326_s3 + $0x158] sm:$0xff]  ;;  %v1385_v28 = vadd.f32 %v2803_v6, %v1314_v25  ;;  %v1386_v29 = vadd.f32 %v2803_v6, %v1315_v26  ;;  %v1317_v31 = vld [vmem:[%s3326_s3 + $0x160] sm:$0xff] }
 0x155   : > { %1442 = vst.msk [vmem:[%s3326_s3 + $0x110] sm:$0xff] %vm563_vm3, %v1378_v12  ;;  %1443 = vst.msk [vmem:[%s3326_s3 + $0x118] sm:$0xff] %vm563_vm3, %v1379_v16  ;;  %v1387_v30 = vadd.f32 %v2803_v6, %v1316_v27  ;;  %v1318_v32 = vld [vmem:[%s3326_s3 + $0x168] sm:$0xff]  ;;  %v1319_v33 = vld [vmem:[%s3326_s3 + $0x170] sm:$0xff]  ;;  %v1388_v34 = vadd.f32 %v2803_v6, %v1317_v31 }
 0x156   : > { %1444 = vst.msk [vmem:[%s3326_s3 + $0x120] sm:$0xff] %vm563_vm3, %v1380_v17  ;;  %1445 = vst.msk [vmem:[%s3326_s3 + $0x128] sm:$0xff] %vm563_vm3, %v1381_v18  ;;  %v1389_v35 = vadd.f32 %v2803_v6, %v1318_v32  ;;  %v1390_v36 = vadd.f32 %v2803_v6, %v1319_v33  ;;  %v1320_v37 = vld [vmem:[%s3326_s3 + $0x178] sm:$0xff]  ;;  %v1321_v38 = vld [vmem:[%s3326_s3 + $0x180] sm:$0xff] }
 0x157   : > { %1446 = vst.msk [vmem:[%s3326_s3 + $0x130] sm:$0xff] %vm563_vm3, %v1382_v22  ;;  %1447 = vst.msk [vmem:[%s3326_s3 + $0x138] sm:$0xff] %vm563_vm3, %v1383_v23  ;;  %v1322_v39 = vld [vmem:[%s3326_s3 + $0x188] sm:$0xff]  ;;  %v1391_v40 = vadd.f32 %v2803_v6, %v1320_v37  ;;  %v1392_v41 = vadd.f32 %v2803_v6, %v1321_v38  ;;  %v1323_v43 = vld [vmem:[%s3326_s3 + $0x190] sm:$0xff] }
 0x158   : > { %1448 = vst.msk [vmem:[%s3326_s3 + $0x140] sm:$0xff] %vm563_vm3, %v1384_v24  ;;  %1449 = vst.msk [vmem:[%s3326_s3 + $0x148] sm:$0xff] %vm563_vm3, %v1385_v28  ;;  %v1393_v42 = vadd.f32 %v2803_v6, %v1322_v39  ;;  %v1324_v44 = vld [vmem:[%s3326_s3 + $0x198] sm:$0xff]  ;;  %v1325_v45 = vld [vmem:[%s3326_s3 + $0x1a0] sm:$0xff]  ;;  %v1394_v46 = vadd.f32 %v2803_v6, %v1323_v43 }
 0x159   : > { %1450 = vst.msk [vmem:[%s3326_s3 + $0x150] sm:$0xff] %vm563_vm3, %v1386_v29  ;;  %1451 = vst.msk [vmem:[%s3326_s3 + $0x158] sm:$0xff] %vm563_vm3, %v1387_v30  ;;  %v1395_v47 = vadd.f32 %v2803_v6, %v1324_v44  ;;  %v1396_v48 = vadd.f32 %v2803_v6, %v1325_v45  ;;  %v1326_v49 = vld [vmem:[%s3326_s3 + $0x1a8] sm:$0xff]  ;;  %v1327_v50 = vld [vmem:[%s3326_s3 + $0x1b0] sm:$0xff] }
 0x15a   : > { %1452 = vst.msk [vmem:[%s3326_s3 + $0x160] sm:$0xff] %vm563_vm3, %v1388_v34  ;;  %1453 = vst.msk [vmem:[%s3326_s3 + $0x168] sm:$0xff] %vm563_vm3, %v1389_v35  ;;  %v1328_v51 = vld [vmem:[%s3326_s3 + $0x1b8] sm:$0xff]  ;;  %v1397_v52 = vadd.f32 %v2803_v6, %v1326_v49  ;;  %v1398_v53 = vadd.f32 %v2803_v6, %v1327_v50  ;;  %v1329_v55 = vld [vmem:[%s3326_s3 + $0x1c0] sm:$0xff] }
 0x15b   : > { %1454 = vst.msk [vmem:[%s3326_s3 + $0x170] sm:$0xff] %vm563_vm3, %v1390_v36  ;;  %1455 = vst.msk [vmem:[%s3326_s3 + $0x178] sm:$0xff] %vm563_vm3, %v1391_v40  ;;  %v1399_v54 = vadd.f32 %v2803_v6, %v1328_v51  ;;  %v1330_v56 = vld [vmem:[%s3326_s3 + $0x1c8] sm:$0xff]  ;;  %v1331_v57 = vld [vmem:[%s3326_s3 + $0x1d0] sm:$0xff]  ;;  %v1400_v58 = vadd.f32 %v2803_v6, %v1329_v55 }
 0x15c   : > { %1456 = vst.msk [vmem:[%s3326_s3 + $0x180] sm:$0xff] %vm563_vm3, %v1392_v41  ;;  %1457 = vst.msk [vmem:[%s3326_s3 + $0x188] sm:$0xff] %vm563_vm3, %v1393_v42  ;;  %v1401_v59 = vadd.f32 %v2803_v6, %v1330_v56  ;;  %v1402_v60 = vadd.f32 %v2803_v6, %v1331_v57  ;;  %v1332_v61 = vld [vmem:[%s3326_s3 + $0x1d8] sm:$0xff]  ;;  %v1333_v62 = vld [vmem:[%s3326_s3 + $0x1e0] sm:$0xff] }
 0x15d   : > { %1458 = vst.msk [vmem:[%s3326_s3 + $0x190] sm:$0xff] %vm563_vm3, %v1394_v46  ;;  %1459 = vst.msk [vmem:[%s3326_s3 + $0x198] sm:$0xff] %vm563_vm3, %v1395_v47  ;;  %v1334_v63 = vld [vmem:[%s3326_s3 + $0x1e8] sm:$0xff]  ;;  %v1403_v0 = vadd.f32 %v2803_v6, %v1332_v61  ;;  %v1404_v1 = vadd.f32 %v2803_v6, %v1333_v62  ;;  %v1335_v3 = vld [vmem:[%s3326_s3 + $0x1f0] sm:$0xff] }
 0x15e   : > { %1460 = vst.msk [vmem:[%s3326_s3 + $0x1a0] sm:$0xff] %vm563_vm3, %v1396_v48  ;;  %1461 = vst.msk [vmem:[%s3326_s3 + $0x1a8] sm:$0xff] %vm563_vm3, %v1397_v52  ;;  %v1405_v2 = vadd.f32 %v2803_v6, %v1334_v63  ;;  %v1336_v4 = vld [vmem:[%s3326_s3 + $0x1f8] sm:$0xff]  ;;  %v1406_v5 = vadd.f32 %v2803_v6, %v1335_v3 }
 0x15f   : > { %1462 = vst.msk [vmem:[%s3326_s3 + $0x1b0] sm:$0xff] %vm563_vm3, %v1398_v53  ;;  %1463 = vst.msk [vmem:[%s3326_s3 + $0x1b8] sm:$0xff] %vm563_vm3, %v1399_v54  ;;  %v1407_v7 = vadd.f32 %v2803_v6, %v1336_v4 }
 0x160   : > { %1464 = vst.msk [vmem:[%s3326_s3 + $0x1c0] sm:$0xff] %vm563_vm3, %v1400_v58  ;;  %1465 = vst.msk [vmem:[%s3326_s3 + $0x1c8] sm:$0xff] %vm563_vm3, %v1401_v59 }
 0x161   : > { %1466 = vst.msk [vmem:[%s3326_s3 + $0x1d0] sm:$0xff] %vm563_vm3, %v1402_v60  ;;  %1467 = vst.msk [vmem:[%s3326_s3 + $0x1d8] sm:$0xff] %vm563_vm3, %v1403_v0 }
 0x162   : > { %1468 = vst.msk [vmem:[%s3326_s3 + $0x1e0] sm:$0xff] %vm563_vm3, %v1404_v1  ;;  %1469 = vst.msk [vmem:[%s3326_s3 + $0x1e8] sm:$0xff] %vm563_vm3, %v1405_v2 }
 0x163   : > { %1470 = vst.msk [vmem:[%s3326_s3 + $0x1f0] sm:$0xff] %vm563_vm3, %v1406_v5  ;;  %1471 = vst.msk [vmem:[%s3326_s3 + $0x1f8] sm:$0xff] %vm563_vm3, %v1407_v7 }
 0x164 PF: > { %s13_s14 = sadd.s32 1, %s1830_s14   ;;  %s3327_s12 = smov %s1826_s13 }
 0x165   : > { %p10_p6 = scmp.ge.s32.totalorder %s13_s14, 7   ;;  %s3328_s13 = smov %s3330_s15 }
 0x167   :  { %12 = sbr.rel (!%p10_p6) target bundleno = 2 (0x2), region = 69 }

// kernel: generator_forward.32
= control target key start
LH: loop header
LB: loop body
LE: loop exit
PB: predicated region body
PF: predicated region fallthrough
CT: control target
= control target key end

     0   :  { %s1853_s12 = smov 0   ;;  %s1855_s13 = smov 0   ;;  %s3323_s0 = inlined_call_operand.vmem [shape: f32[2,262,32], index: 0, kind: input, shape index: {}]   ;;  %s3324_s1 = inlined_call_operand.vmem [shape: f32[3,32,32], index: 1, kind: input, shape index: {}]   ;;  %s3325_s2 = inlined_call_operand.vmem [shape: f32[1,32], index: 2, kind: input, shape index: {}]   ;;  %s3326_s3 = inlined_call_operand.vmem [shape: f32[2,256,32], index: 3, kind: output, shape index: {}]  }
   0x1   :  { %s1857_s14 = smov 0  }
   0x2 LB: > { %s22_s15 = sadd.s32 1, %s1826_s13  ;;  %p1530_p0 = scmp.ge.s32.totalorder %s1830_s14, 1  ;;  %s1830_s14 = sphi %s1857_s14, %s13_s14   ;;  %s1826_s13 = sphi %s1855_s13, %s3328_s13   ;;  %s1822_s12 = sphi %s1853_s12, %s3327_s12  }
   0x3   : > { %p23_p1 = scmp.ge.s32.totalorder %s22_s15, 3  ;;  %p139_p2 = scmp.lt.s32.totalorder %s1830_s14, 4 }
   0x5   : > { %s3330_s15 = smov (%p23_p1, %s22_s15), 0  ;;  %p140_p3 = pnand %p1530_p0, %p139_p2 }
   0x6   : > { %p1531_p4 = scmp.ne.s32.totalorder (!%p140_p3), %s1822_s12, 0 }
   0x7   : > { %143 = sbr.rel (%p140_p3) target bundleno = 356 (0x164), region = 32 }
   0xc   : > { %167 = sbr.rel (%p1531_p4) target bundleno = 50 (0x32), region = 36 }
  0x11   : > { %vm168_vm0 = vcmask 261120   ;;  %v1832_v0 = vmov 0.0  }
  0x12   : > { %169 = vst.msk [vmem:[%s3326_s3] sm:$0xff] %vm168_vm0, %v1832_v0  ;;  %170 = vst.msk [vmem:[%s3326_s3 + $0x8] sm:$0xff] %vm168_vm0, %v1832_v0 }
  0x13   : > { %171 = vst.msk [vmem:[%s3326_s3 + $0x10] sm:$0xff] %vm168_vm0, %v1832_v0  ;;  %172 = vst.msk [vmem:[%s3326_s3 + $0x18] sm:$0xff] %vm168_vm0, %v1832_v0 }
  0x14   : > { %173 = vst.msk [vmem:[%s3326_s3 + $0x20] sm:$0xff] %vm168_vm0, %v1832_v0  ;;  %174 = vst.msk [vmem:[%s3326_s3 + $0x28] sm:$0xff] %vm168_vm0, %v1832_v0 }
  0x15   : > { %175 = vst.msk [vmem:[%s3326_s3 + $0x30] sm:$0xff] %vm168_vm0, %v1832_v0  ;;  %176 = vst.msk [vmem:[%s3326_s3 + $0x38] sm:$0xff] %vm168_vm0, %v1832_v0 }
  0x16   : > { %177 = vst.msk [vmem:[%s3326_s3 + $0x40] sm:$0xff] %vm168_vm0, %v1832_v0  ;;  %178 = vst.msk [vmem:[%s3326_s3 + $0x48] sm:$0xff] %vm168_vm0, %v1832_v0 }
  0x17   : > { %179 = vst.msk [vmem:[%s3326_s3 + $0x50] sm:$0xff] %vm168_vm0, %v1832_v0  ;;  %180 = vst.msk [vmem:[%s3326_s3 + $0x58] sm:$0xff] %vm168_vm0, %v1832_v0 }
  0x18   : > { %181 = vst.msk [vmem:[%s3326_s3 + $0x60] sm:$0xff] %vm168_vm0, %v1832_v0  ;;  %182 = vst.msk [vmem:[%s3326_s3 + $0x68] sm:$0xff] %vm168_vm0, %v1832_v0 }
  0x19   : > { %183 = vst.msk [vmem:[%s3326_s3 + $0x70] sm:$0xff] %vm168_vm0, %v1832_v0  ;;  %184 = vst.msk [vmem:[%s3326_s3 + $0x78] sm:$0xff] %vm168_vm0, %v1832_v0 }
  0x1a   : > { %185 = vst.msk [vmem:[%s3326_s3 + $0x80] sm:$0xff] %vm168_vm0, %v1832_v0  ;;  %186 = vst.msk [vmem:[%s3326_s3 + $0x88] sm:$0xff] %vm168_vm0, %v1832_v0 }
  0x1b   : > { %187 = vst.msk [vmem:[%s3326_s3 + $0x90] sm:$0xff] %vm168_vm0, %v1832_v0  ;;  %188 = vst.msk [vmem:[%s3326_s3 + $0x98] sm:$0xff] %vm168_vm0, %v1832_v0 }
  0x1c   : > { %189 = vst.msk [vmem:[%s3326_s3 + $0xa0] sm:$0xff] %vm168_vm0, %v1832_v0  ;;  %190 = vst.msk [vmem:[%s3326_s3 + $0xa8] sm:$0xff] %vm168_vm0, %v1832_v0 }
  0x1d   : > { %191 = vst.msk [vmem:[%s3326_s3 + $0xb0] sm:$0xff] %vm168_vm0, %v1832_v0  ;;  %192 = vst.msk [vmem:[%s3326_s3 + $0xb8] sm:$0xff] %vm168_vm0, %v1832_v0 }
  0x1e   : > { %193 = vst.msk [vmem:[%s3326_s3 + $0xc0] sm:$0xff] %vm168_vm0, %v1832_v0  ;;  %194 = vst.msk [vmem:[%s3326_s3 + $0xc8] sm:$0xff] %vm168_vm0, %v1832_v0 }
  0x1f   : > { %195 = vst.msk [vmem:[%s3326_s3 + $0xd0] sm:$0xff] %vm168_vm0, %v1832_v0  ;;  %196 = vst.msk [vmem:[%s3326_s3 + $0xd8] sm:$0xff] %vm168_vm0, %v1832_v0 }
  0x20   : > { %197 = vst.msk [vmem:[%s3326_s3 + $0xe0] sm:$0xff] %vm168_vm0, %v1832_v0  ;;  %198 = vst.msk [vmem:[%s3326_s3 + $0xe8] sm:$0xff] %vm168_vm0, %v1832_v0 }
  0x21   : > { %199 = vst.msk [vmem:[%s3326_s3 + $0xf0] sm:$0xff] %vm168_vm0, %v1832_v0  ;;  %200 = vst.msk [vmem:[%s3326_s3 + $0xf8] sm:$0xff] %vm168_vm0, %v1832_v0 }
  0x22   : > { %201 = vst.msk [vmem:[%s3326_s3 + $0x100] sm:$0xff] %vm168_vm0, %v1832_v0  ;;  %202 = vst.msk [vmem:[%s3326_s3 + $0x108] sm:$0xff] %vm168_vm0, %v1832_v0 }
  0x23   : > { %203 = vst.msk [vmem:[%s3326_s3 + $0x110] sm:$0xff] %vm168_vm0, %v1832_v0  ;;  %204 = vst.msk [vmem:[%s3326_s3 + $0x118] sm:$0xff] %vm168_vm0, %v1832_v0 }
  0x24   : > { %205 = vst.msk [vmem:[%s3326_s3 + $0x120] sm:$0xff] %vm168_vm0, %v1832_v0  ;;  %206 = vst.msk [vmem:[%s3326_s3 + $0x128] sm:$0xff] %vm168_vm0, %v1832_v0 }
  0x25   : > { %207 = vst.msk [vmem:[%s3326_s3 + $0x130] sm:$0xff] %vm168_vm0, %v1832_v0  ;;  %208 = vst.msk [vmem:[%s3326_s3 + $0x138] sm:$0xff] %vm168_vm0, %v1832_v0 }
  0x26   : > { %209 = vst.msk [vmem:[%s3326_s3 + $0x140] sm:$0xff] %vm168_vm0, %v1832_v0  ;;  %210 = vst.msk [vmem:[%s3326_s3 + $0x148] sm:$0xff] %vm168_vm0, %v1832_v0 }
  0x27   : > { %211 = vst.msk [vmem:[%s3326_s3 + $0x150] sm:$0xff] %vm168_vm0, %v1832_v0  ;;  %212 = vst.msk [vmem:[%s3326_s3 + $0x158] sm:$0xff] %vm168_vm0, %v1832_v0 }
  0x28   : > { %213 = vst.msk [vmem:[%s3326_s3 + $0x160] sm:$0xff] %vm168_vm0, %v1832_v0  ;;  %214 = vst.msk [vmem:[%s3326_s3 + $0x168] sm:$0xff] %vm168_vm0, %v1832_v0 }
  0x29   : > { %215 = vst.msk [vmem:[%s3326_s3 + $0x170] sm:$0xff] %vm168_vm0, %v1832_v0  ;;  %216 = vst.msk [vmem:[%s3326_s3 + $0x178] sm:$0xff] %vm168_vm0, %v1832_v0 }
  0x2a   : > { %217 = vst.msk [vmem:[%s3326_s3 + $0x180] sm:$0xff] %vm168_vm0, %v1832_v0  ;;  %218 = vst.msk [vmem:[%s3326_s3 + $0x188] sm:$0xff] %vm168_vm0, %v1832_v0 }
  0x2b   : > { %219 = vst.msk [vmem:[%s3326_s3 + $0x190] sm:$0xff] %vm168_vm0, %v1832_v0  ;;  %220 = vst.msk [vmem:[%s3326_s3 + $0x198] sm:$0xff] %vm168_vm0, %v1832_v0 }
  0x2c   : > { %221 = vst.msk [vmem:[%s3326_s3 + $0x1a0] sm:$0xff] %vm168_vm0, %v1832_v0  ;;  %222 = vst.msk [vmem:[%s3326_s3 + $0x1a8] sm:$0xff] %vm168_vm0, %v1832_v0 }
  0x2d   : > { %223 = vst.msk [vmem:[%s3326_s3 + $0x1b0] sm:$0xff] %vm168_vm0, %v1832_v0  ;;  %224 = vst.msk [vmem:[%s3326_s3 + $0x1b8] sm:$0xff] %vm168_vm0, %v1832_v0 }
  0x2e   : > { %225 = vst.msk [vmem:[%s3326_s3 + $0x1c0] sm:$0xff] %vm168_vm0, %v1832_v0  ;;  %226 = vst.msk [vmem:[%s3326_s3 + $0x1c8] sm:$0xff] %vm168_vm0, %v1832_v0 }
  0x2f   : > { %227 = vst.msk [vmem:[%s3326_s3 + $0x1d0] sm:$0xff] %vm168_vm0, %v1832_v0  ;;  %228 = vst.msk [vmem:[%s3326_s3 + $0x1d8] sm:$0xff] %vm168_vm0, %v1832_v0 }
  0x30   : > { %229 = vst.msk [vmem:[%s3326_s3 + $0x1e0] sm:$0xff] %vm168_vm0, %v1832_v0  ;;  %230 = vst.msk [vmem:[%s3326_s3 + $0x1e8] sm:$0xff] %vm168_vm0, %v1832_v0 }
  0x31   : > { %231 = vst.msk [vmem:[%s3326_s3 + $0x1f0] sm:$0xff] %vm168_vm0, %v1832_v0  ;;  %232 = vst.msk [vmem:[%s3326_s3 + $0x1f8] sm:$0xff] %vm168_vm0, %v1832_v0 }
  0x32 PF: > { %s1532_s29 = sshll.u32 %s1822_s12, 5  ;;  %s234_s30 = smul.u32 3, %s1822_s12  ;;  %vm563_vm3 = vcmask 261120  }
  0x33   : > { %s558_s6 = scalar_lea.vmem %s3324_s1, %s1532_s29  ;;  %p1597_p5 = scmp.ne.s32.totalorder %s1822_s12, 2 }
  0x34   : > { %v562_v1 = vld [vmem:[%s558_s6 + $0x18] sm:$0xff]  ;;  %v561_v2 = vld [vmem:[%s558_s6 + $0x10] sm:$0xff]  ;;  %s2202_s9 = scalar_lea.vmem %s3323_s0, %s234_s30  ;;  %v560_v3 = vld [vmem:[%s558_s6 + $0x8] sm:$0xff] }
  0x35   : > { %1671 = vmatprep.subr.mxu0 %v562_v1  ;;  %1775 = vmatprep.subr.mxu1 %v562_v1  ;;  %v237_v4 = vld [vmem:[%s2202_s9] sm:$0xff]  ;;  %v269_v5 = vld [vmem:[%s2202_s9 + $0x108] sm:$0xff]  ;;  %v270_v10 = vld [vmem:[%s2202_s9 + $0x110] sm:$0xff] }
  0x36   : > { %1672 = vmatpush3.msra.mxu0 %v562_v1  ;;  %1779 = vmatpush3.msra.mxu1 %v562_v1  ;;  %v559_v6 = vld [vmem:[%s558_s6] sm:$0xff]  ;;  %vm301_vm1 = vcmp.ge.f32.partialorder %v237_v4, 0.0  ;;  %v365_v7 = vmul.f32 0.1, %v237_v4  ;;  %vm333_vm2 = vcmp.ge.f32.partialorder %v269_v5, 0.0  ;;  %v238_v9 = vld [vmem:[%s2202_s9 + $0x8] sm:$0xff] }
  0x37   : > { %v397_v8 = vmul.f32 0.1, %v269_v5  ;;  %1673 = vmatprep.subr.mxu0 %v561_v2  ;;  %1776 = vmatprep.subr.mxu1 %v561_v2  ;;  %v239_v11 = vld [vmem:[%s2202_s9 + $0x10] sm:$0xff]  ;;  %vm302_vm4 = vcmp.ge.f32.partialorder %v238_v9, 0.0  ;;  %v366_v14 = vmul.f32 0.1, %v238_v9 }
  0x38   : > { %1674 = vmatpush3.msra.mxu0 %v561_v2  ;;  %1780 = vmatpush3.msra.mxu1 %v561_v2  ;;  %v429_v12 = vsel %vm301_vm1, %v237_v4, %v365_v7  ;;  %v271_v15 = vld [vmem:[%s2202_s9 + $0x118] sm:$0xff]  ;;  %v272_v17 = vld [vmem:[%s2202_s9 + $0x120] sm:$0xff]  ;;  %vm334_vm5 = vcmp.ge.f32.partialorder %v270_v10, 0.0  ;;  %v398_v18 = vmul.f32 0.1, %v270_v10  ;;  %vm303_vm6 = vcmp.ge.f32.partialorder %v239_v11, 0.0 }
  0x39   : > { %v461_v13 = vsel %vm333_vm2, %v269_v5, %v397_v8  ;;  %v240_v16 = vld [vmem:[%s2202_s9 + $0x18] sm:$0xff]  ;;  %1675 = vmatprep.subr.mxu0 %v560_v3  ;;  %1777 = vmatprep.subr.mxu1 %v560_v3  ;;  %v367_v19 = vmul.f32 0.1, %v239_v11  ;;  %v430_v20 = vsel %vm302_vm4, %v238_v9, %v366_v14  ;;  %vm335_vm7 = vcmp.ge.f32.partialorder %v271_v15, 0.0  ;;  %v241_v22 = vld [vmem:[%s2202_s9 + $0x20] sm:$0xff]  ;;  %v273_v23 = vld [vmem:[%s2202_s9 + $0x128] sm:$0xff] }
  0x3a   : > { %1676 = vmatpush3.msra.mxu0 %v560_v3  ;;  %1781 = vmatpush3.msra.mxu1 %v560_v3  ;;  %v399_v21 = vmul.f32 0.1, %v271_v15  ;;  %vm304_vm8 = vcmp.ge.f32.partialorder %v240_v16, 0.0  ;;  %v462_v24 = vsel %vm334_vm5, %v270_v10, %v398_v18  ;;  %v368_v26 = vmul.f32 0.1, %v240_v16  ;;  %v242_v27 = vld [vmem:[%s2202_s9 + $0x28] sm:$0xff] }
  0x3b   : > { %1677 = vmatprep.subr.mxu0 %v559_v6  ;;  %1778 = vmatprep.subr.mxu1 %v559_v6  ;;  %v431_v25 = vsel %vm303_vm6, %v239_v11, %v367_v19  ;;  %vm336_vm9 = vcmp.ge.f32.partialorder %v272_v17, 0.0  ;;  %v274_v28 = vld [vmem:[%s2202_s9 + $0x130] sm:$0xff]  ;;  %v400_v30 = vmul.f32 0.1, %v272_v17  ;;  %vm305_vm10 = vcmp.ge.f32.partialorder %v241_v22, 0.0  ;;  %v275_v34 = vld [vmem:[%s2202_s9 + $0x138] sm:$0xff] }
  0x3c   : > { %1678 = vmatpush3.msra.mxu0 %v559_v6  ;;  %1782 = vmatpush3.msra.mxu1 %v559_v6  ;;  %v463_v29 = vsel %vm335_vm7, %v271_v15, %v399_v21  ;;  %v369_v31 = vmul.f32 0.1, %v241_v22  ;;  %v243_v32 = vld [vmem:[%s2202_s9 + $0x30] sm:$0xff]  ;;  %vm337_vm11 = vcmp.ge.f32.partialorder %v273_v23, 0.0  ;;  %v401_v33 = vmul.f32 0.1, %v273_v23 }
  0x3d   : > { %1679 = vmatprep.mubr.msk.f32.mxu0 %vm563_vm3, %v429_v12  ;;  %1727 = vmatprep.mubr.msk.f32.mxu1 %vm563_vm3, %v461_v13  ;;  %v432_v35 = vsel %vm304_vm8, %v240_v16, %v368_v26  ;;  %vm306_vm12 = vcmp.ge.f32.partialorder %v242_v27, 0.0  ;;  %v370_v36 = vmul.f32 0.1, %v242_v27  ;;  %v464_v37 = vsel %vm336_vm9, %v272_v17, %v400_v30  ;;  %v244_v41 = vld [vmem:[%s2202_s9 + $0x38] sm:$0xff]  ;;  %v276_v44 = vld [vmem:[%s2202_s9 + $0x140] sm:$0xff]  ;;  %v277_v46 = vld [vmem:[%s2202_s9 + $0x148] sm:$0xff] }
  0x3e   : > { %1680 = vmatmul.mubr.msk.f32.vlgmr.msra.gmra.mxu0 %vm563_vm3, %v430_v20  ;;  %1728 = vmatmul.mubr.msk.f32.vlgmr.msra.gmra.mxu1 %vm563_vm3, %v462_v24  ;;  %v433_v38 = vsel %vm305_vm10, %v241_v22, %v369_v31  ;;  %v402_v39 = vmul.f32 0.1, %v274_v28  ;;  %v371_v40 = vmul.f32 0.1, %v243_v32  ;;  %v465_v42 = vsel %vm337_vm11, %v273_v23, %v401_v33  ;;  %v245_v45 = vld [vmem:[%s2202_s9 + $0x40] sm:$0xff]  ;;  %v246_v53 = vld [vmem:[%s2202_s9 + $0x48] sm:$0xff] }
  0x3f   : > { %1682 = vmatprep.mubr.msk.f32.mxu0 %vm563_vm3, %v431_v25  ;;  %1730 = vmatprep.mubr.msk.f32.mxu1 %vm563_vm3, %v463_v29  ;;  %vm338_vm13 = vcmp.ge.f32.partialorder %v274_v28, 0.0  ;;  %vm307_vm14 = vcmp.ge.f32.partialorder %v243_v32, 0.0  ;;  %v403_v43 = vmul.f32 0.1, %v275_v34  ;;  %vm339_vm15 = vcmp.ge.f32.partialorder %v275_v34, 0.0  ;;  %v278_v56 = vld [vmem:[%s2202_s9 + $0x150] sm:$0xff] }
  0x40   : > { %v434_v47 = vsel %vm306_vm12, %v242_v27, %v370_v36  ;;  %vm308_vm0 = vcmp.ge.f32.partialorder %v244_v41, 0.0  ;;  %v372_v48 = vmul.f32 0.1, %v244_v41  ;;  %v466_v49 = vsel %vm338_vm13, %v274_v28, %v402_v39  ;;  %v247_v57 = vld [vmem:[%s2202_s9 + $0x50] sm:$0xff]  ;;  %v279_v58 = vld [vmem:[%s2202_s9 + $0x158] sm:$0xff]  ;;  %v280_v4 = vld [vmem:[%s2202_s9 + $0x160] sm:$0xff] }
  0x41   : > { %v435_v50 = vsel %vm307_vm14, %v243_v32, %v371_v40  ;;  %v404_v51 = vmul.f32 0.1, %v276_v44  ;;  %v373_v52 = vmul.f32 0.1, %v245_v45  ;;  %v467_v54 = vsel %vm339_vm15, %v275_v34, %v403_v43  ;;  %v248_v1 = vld [vmem:[%s2202_s9 + $0x58] sm:$0xff]  ;;  %v249_v5 = vld [vmem:[%s2202_s9 + $0x60] sm:$0xff] }
  0x42   : > { %1683 = vmatmul.mubr.msk.f32.gmra.mxu0 %vm563_vm3, %v432_v35  ;;  %1731 = vmatmul.mubr.msk.f32.gmra.mxu1 %vm563_vm3, %v464_v37  ;;  %vm340_vm1 = vcmp.ge.f32.partialorder %v276_v44, 0.0  ;;  %vm309_vm2 = vcmp.ge.f32.partialorder %v245_v45, 0.0  ;;  %v405_v55 = vmul.f32 0.1, %v277_v46  ;;  %vm341_vm4 = vcmp.ge.f32.partialorder %v277_v46, 0.0  ;;  %v281_v6 = vld [vmem:[%s2202_s9 + $0x168] sm:$0xff] }
  0x43   : > { %1685 = vmatprep.mubr.msk.f32.mxu0 %vm563_vm3, %v433_v38  ;;  %1733 = vmatprep.mubr.msk.f32.mxu1 %vm563_vm3, %v465_v42  ;;  %v436_v59 = vsel %vm308_vm0, %v244_v41, %v372_v48  ;;  %vm310_vm5 = vcmp.ge.f32.partialorder %v246_v53, 0.0  ;;  %v374_v60 = vmul.f32 0.1, %v246_v53  ;;  %v468_v61 = vsel %vm340_vm1, %v276_v44, %v404_v51  ;;  %v250_v13 = vld [vmem:[%s2202_s9 + $0x68] sm:$0xff]  ;;  %v282_v16 = vld [vmem:[%s2202_s9 + $0x170] sm:$0xff]  ;;  %v283_v18 = vld [vmem:[%s2202_s9 + $0x178] sm:$0xff] }
  0x44   : > { %v437_v62 = vsel %vm309_vm2, %v245_v45, %v373_v52  ;;  %v406_v63 = vmul.f32 0.1, %v278_v56  ;;  %v375_v0 = vmul.f32 0.1, %v247_v57  ;;  %v469_v2 = vsel %vm341_vm4, %v277_v46, %v405_v55  ;;  %v251_v17 = vld [vmem:[%s2202_s9 + $0x70] sm:$0xff]  ;;  %v252_v25 = vld [vmem:[%s2202_s9 + $0x78] sm:$0xff] }
  0x45   : > { %vm342_vm6 = vcmp.ge.f32.partialorder %v278_v56, 0.0  ;;  %vm311_vm7 = vcmp.ge.f32.partialorder %v247_v57, 0.0  ;;  %v407_v3 = vmul.f32 0.1, %v279_v58  ;;  %vm343_vm8 = vcmp.ge.f32.partialorder %v279_v58, 0.0  ;;  %v284_v28 = vld [vmem:[%s2202_s9 + $0x180] sm:$0xff] }
  0x46   : > { %1686 = vmatmul.mubr.msk.f32.gmra.mxu0 %vm563_vm3, %v434_v47  ;;  %1734 = vmatmul.mubr.msk.f32.gmra.mxu1 %vm563_vm3, %v466_v49  ;;  %v438_v7 = vsel %vm310_vm5, %v246_v53, %v374_v60  ;;  %vm312_vm9 = vcmp.ge.f32.partialorder %v248_v1, 0.0  ;;  %v376_v8 = vmul.f32 0.1, %v248_v1  ;;  %v470_v9 = vsel %vm342_vm6, %v278_v56, %v406_v63  ;;  %v253_v29 = vld [vmem:[%s2202_s9 + $0x80] sm:$0xff]  ;;  %v285_v30 = vld [vmem:[%s2202_s9 + $0x188] sm:$0xff]  ;;  %v286_v40 = vld [vmem:[%s2202_s9 + $0x190] sm:$0xff] }
  0x47   : > { %1688 = vmatprep.mubr.msk.f32.mxu0 %vm563_vm3, %v435_v50  ;;  %1736 = vmatprep.mubr.msk.f32.mxu1 %vm563_vm3, %v467_v54  ;;  %v439_v10 = vsel %vm311_vm7, %v247_v57, %v375_v0  ;;  %v408_v11 = vmul.f32 0.1, %v280_v4  ;;  %v377_v12 = vmul.f32 0.1, %v249_v5  ;;  %v471_v14 = vsel %vm343_vm8, %v279_v58, %v407_v3  ;;  %v254_v37 = vld [vmem:[%s2202_s9 + $0x88] sm:$0xff]  ;;  %v255_v41 = vld [vmem:[%s2202_s9 + $0x90] sm:$0xff] }
  0x48   : > { %vm344_vm10 = vcmp.ge.f32.partialorder %v280_v4, 0.0  ;;  %vm313_vm11 = vcmp.ge.f32.partialorder %v249_v5, 0.0  ;;  %v409_v15 = vmul.f32 0.1, %v281_v6  ;;  %vm345_vm12 = vcmp.ge.f32.partialorder %v281_v6, 0.0  ;;  %v287_v42 = vld [vmem:[%s2202_s9 + $0x198] sm:$0xff] }
  0x49   : > { %v440_v19 = vsel %vm312_vm9, %v248_v1, %v376_v8  ;;  %vm314_vm13 = vcmp.ge.f32.partialorder %v250_v13, 0.0  ;;  %v378_v20 = vmul.f32 0.1, %v250_v13  ;;  %v472_v21 = vsel %vm344_vm10, %v280_v4, %v408_v11  ;;  %v256_v49 = vld [vmem:[%s2202_s9 + $0x98] sm:$0xff]  ;;  %v288_v52 = vld [vmem:[%s2202_s9 + $0x1a0] sm:$0xff]  ;;  %v289_v54 = vld [vmem:[%s2202_s9 + $0x1a8] sm:$0xff] }
  0x4a   : > { %1689 = vmatmul.mubr.msk.f32.gmra.mxu0 %vm563_vm3, %v436_v59  ;;  %1737 = vmatmul.mubr.msk.f32.gmra.mxu1 %vm563_vm3, %v468_v61  ;;  %v441_v22 = vsel %vm313_vm11, %v249_v5, %v377_v12  ;;  %v410_v23 = vmul.f32 0.1, %v282_v16  ;;  %v379_v24 = vmul.f32 0.1, %v251_v17  ;;  %v473_v26 = vsel %vm345_vm12, %v281_v6, %v409_v15  ;;  %v257_v53 = vld [vmem:[%s2202_s9 + $0xa0] sm:$0xff]  ;;  %v258_v61 = vld [vmem:[%s2202_s9 + $0xa8] sm:$0xff] }
  0x4b   : > { %1691 = vmatprep.mubr.msk.f32.mxu0 %vm563_vm3, %v437_v62  ;;  %1739 = vmatprep.mubr.msk.f32.mxu1 %vm563_vm3, %v469_v2  ;;  %vm346_vm14 = vcmp.ge.f32.partialorder %v282_v16, 0.0  ;;  %vm315_vm15 = vcmp.ge.f32.partialorder %v251_v17, 0.0  ;;  %v411_v27 = vmul.f32 0.1, %v283_v18  ;;  %vm347_vm0 = vcmp.ge.f32.partialorder %v283_v18, 0.0  ;;  %v290_v0 = vld [vmem:[%s2202_s9 + $0x1b0] sm:$0xff] }
  0x4c   : > { %v442_v31 = vsel %vm314_vm13, %v250_v13, %v378_v20  ;;  %vm316_vm1 = vcmp.ge.f32.partialorder %v252_v25, 0.0  ;;  %v380_v32 = vmul.f32 0.1, %v252_v25  ;;  %v474_v33 = vsel %vm346_vm14, %v282_v16, %v410_v23  ;;  %v259_v1 = vld [vmem:[%s2202_s9 + $0xb0] sm:$0xff]  ;;  %v291_v2 = vld [vmem:[%s2202_s9 + $0x1b8] sm:$0xff]  ;;  %v292_v12 = vld [vmem:[%s2202_s9 + $0x1c0] sm:$0xff] }
  0x4d   : > { %v443_v34 = vsel %vm315_vm15, %v251_v17, %v379_v24  ;;  %v412_v35 = vmul.f32 0.1, %v284_v28  ;;  %v381_v36 = vmul.f32 0.1, %v253_v29  ;;  %v475_v38 = vsel %vm347_vm0, %v283_v18, %v411_v27  ;;  %v261_v13 = vld [vmem:[%s2202_s9 + $0xc0] sm:$0xff]  ;;  %v294_v24 = vld [vmem:[%s2202_s9 + $0x1d0] sm:$0xff] }
  0x4e   : > { %1692 = vmatmul.mubr.msk.f32.gmra.mxu0 %vm563_vm3, %v438_v7  ;;  %1740 = vmatmul.mubr.msk.f32.gmra.mxu1 %vm563_vm3, %v470_v9  ;;  %vm348_vm2 = vcmp.ge.f32.partialorder %v284_v28, 0.0  ;;  %vm317_vm4 = vcmp.ge.f32.partialorder %v253_v29, 0.0  ;;  %v413_v39 = vmul.f32 0.1, %v285_v30  ;;  %vm349_vm5 = vcmp.ge.f32.partialorder %v285_v30, 0.0  ;;  %v260_v9 = vld [vmem:[%s2202_s9 + $0xb8] sm:$0xff] }
  0x4f   : > { %1694 = vmatprep.mubr.msk.f32.mxu0 %vm563_vm3, %v439_v10  ;;  %1742 = vmatprep.mubr.msk.f32.mxu1 %vm563_vm3, %v471_v14  ;;  %v444_v43 = vsel %vm316_vm1, %v252_v25, %v380_v32  ;;  %vm318_vm6 = vcmp.ge.f32.partialorder %v254_v37, 0.0  ;;  %v382_v44 = vmul.f32 0.1, %v254_v37  ;;  %v476_v45 = vsel %vm348_vm2, %v284_v28, %v412_v35  ;;  %v293_v14 = vld [vmem:[%s2202_s9 + $0x1c8] sm:$0xff]  ;;  %v263_v25 = vld [vmem:[%s2202_s9 + $0xd0] sm:$0xff] }
  0x50   : > { %v445_v46 = vsel %vm317_vm4, %v253_v29, %v381_v36  ;;  %v414_v47 = vmul.f32 0.1, %v286_v40  ;;  %v383_v48 = vmul.f32 0.1, %v255_v41  ;;  %v477_v50 = vsel %vm349_vm5, %v285_v30, %v413_v39  ;;  %v296_v36 = vld [vmem:[%s2202_s9 + $0x1e0] sm:$0xff] }
  0x51   : > { %vm350_vm7 = vcmp.ge.f32.partialorder %v286_v40, 0.0  ;;  %vm319_vm8 = vcmp.ge.f32.partialorder %v255_v41, 0.0  ;;  %v415_v51 = vmul.f32 0.1, %v287_v42  ;;  %vm351_vm9 = vcmp.ge.f32.partialorder %v287_v42, 0.0 }
  0x52   : > { %1695 = vmatmul.mubr.msk.f32.gmra.mxu0 %vm563_vm3, %v440_v19  ;;  %1743 = vmatmul.mubr.msk.f32.gmra.mxu1 %vm563_vm3, %v472_v21  ;;  %v446_v55 = vsel %vm318_vm6, %v254_v37, %v382_v44  ;;  %vm320_vm10 = vcmp.ge.f32.partialorder %v256_v49, 0.0  ;;  %v384_v56 = vmul.f32 0.1, %v256_v49  ;;  %v478_v57 = vsel %vm350_vm7, %v286_v40, %v414_v47  ;;  %v262_v21 = vld [vmem:[%s2202_s9 + $0xc8] sm:$0xff]  ;;  %v265_v37 = vld [vmem:[%s2202_s9 + $0xe0] sm:$0xff] }
  0x53   : > { %1697 = vmatprep.mubr.msk.f32.mxu0 %vm563_vm3, %v441_v22  ;;  %1745 = vmatprep.mubr.msk.f32.mxu1 %vm563_vm3, %v473_v26  ;;  %v447_v58 = vsel %vm319_vm8, %v255_v41, %v383_v48  ;;  %v416_v59 = vmul.f32 0.1, %v288_v52  ;;  %v385_v60 = vmul.f32 0.1, %v257_v53  ;;  %v479_v62 = vsel %vm351_vm9, %v287_v42, %v415_v51  ;;  %v295_v26 = vld [vmem:[%s2202_s9 + $0x1d8] sm:$0xff]  ;;  %v298_v48 = vld [vmem:[%s2202_s9 + $0x1f0] sm:$0xff] }
  0x54   : > { %vm352_vm11 = vcmp.ge.f32.partialorder %v288_v52, 0.0  ;;  %vm321_vm12 = vcmp.ge.f32.partialorder %v257_v53, 0.0  ;;  %v417_v63 = vmul.f32 0.1, %v289_v54  ;;  %vm353_vm13 = vcmp.ge.f32.partialorder %v289_v54, 0.0 }
  0x55   : > { %v448_v3 = vsel %vm320_vm10, %v256_v49, %v384_v56  ;;  %vm322_vm14 = vcmp.ge.f32.partialorder %v258_v61, 0.0  ;;  %v386_v4 = vmul.f32 0.1, %v258_v61  ;;  %v480_v5 = vsel %vm352_vm11, %v288_v52, %v416_v59  ;;  %v267_v49 = vld [vmem:[%s2202_s9 + $0xf0] sm:$0xff]  ;;  %v268_v56 = vld [vmem:[%s2202_s9 + $0xf8] sm:$0xff] }
  0x56   : > { %1698 = vmatmul.mubr.msk.f32.gmra.mxu0 %vm563_vm3, %v442_v31  ;;  %1746 = vmatmul.mubr.msk.f32.gmra.mxu1 %vm563_vm3, %v474_v33  ;;  %v449_v6 = vsel %vm321_vm12, %v257_v53, %v385_v60  ;;  %v418_v7 = vmul.f32 0.1, %v290_v0  ;;  %v387_v8 = vmul.f32 0.1, %v259_v1  ;;  %v481_v10 = vsel %vm353_vm13, %v289_v54, %v417_v63  ;;  %v264_v33 = vld [vmem:[%s2202_s9 + $0xd8] sm:$0xff]  ;;  %v300_v60 = vld [vmem:[%s2202_s9 + $0x200] sm:$0xff] }
  0x57   : > { %1700 = vmatprep.mubr.msk.f32.mxu0 %vm563_vm3, %v443_v34  ;;  %1748 = vmatprep.mubr.msk.f32.mxu1 %vm563_vm3, %v475_v38  ;;  %vm354_vm15 = vcmp.ge.f32.partialorder %v290_v0, 0.0  ;;  %vm323_vm0 = vcmp.ge.f32.partialorder %v259_v1, 0.0  ;;  %v419_v11 = vmul.f32 0.1, %v291_v2  ;;  %vm355_vm1 = vcmp.ge.f32.partialorder %v291_v2, 0.0  ;;  %v297_v38 = vld [vmem:[%s2202_s9 + $0x1e8] sm:$0xff] }
  0x58   : > { %v450_v15 = vsel %vm322_vm14, %v258_v61, %v386_v4  ;;  %vm324_vm2 = vcmp.ge.f32.partialorder %v260_v9, 0.0  ;;  %v388_v16 = vmul.f32 0.1, %v260_v9  ;;  %v482_v17 = vsel %vm354_vm15, %v290_v0, %v418_v7 }
  0x59   : > { %v451_v18 = vsel %vm323_vm0, %v259_v1, %v387_v8  ;;  %v420_v19 = vmul.f32 0.1, %v292_v12  ;;  %v389_v20 = vmul.f32 0.1, %v261_v13  ;;  %v483_v22 = vsel %vm355_vm1, %v291_v2, %v419_v11 }
  0x5a   : > { %1701 = vmatmul.mubr.msk.f32.gmra.mxu0 %vm563_vm3, %v444_v43  ;;  %1749 = vmatmul.mubr.msk.f32.gmra.mxu1 %vm563_vm3, %v476_v45  ;;  %vm356_vm4 = vcmp.ge.f32.partialorder %v292_v12, 0.0  ;;  %vm325_vm5 = vcmp.ge.f32.partialorder %v261_v13, 0.0  ;;  %v421_v23 = vmul.f32 0.1, %v293_v14  ;;  %vm357_vm6 = vcmp.ge.f32.partialorder %v293_v14, 0.0  ;;  %v266_v45 = vld [vmem:[%s2202_s9 + $0xe8] sm:$0xff] }
  0x5b   : > { %1703 = vmatprep.mubr.msk.f32.mxu0 %vm563_vm3, %v445_v46  ;;  %1751 = vmatprep.mubr.msk.f32.mxu1 %vm563_vm3, %v477_v50  ;;  %v452_v27 = vsel %vm324_vm2, %v260_v9, %v388_v16  ;;  %vm326_vm7 = vcmp.ge.f32.partialorder %v262_v21, 0.0  ;;  %v390_v28 = vmul.f32 0.1, %v262_v21  ;;  %v484_v29 = vsel %vm356_vm4, %v292_v12, %v420_v19  ;;  %v299_v50 = vld [vmem:[%s2202_s9 + $0x1f8] sm:$0xff]  ;;  %v493_v9 = vld [vmem:[%s3326_s3] sm:$0xff] }
  0x5c   : > { %v453_v30 = vsel %vm325_vm5, %v261_v13, %v389_v20  ;;  %v422_v31 = vmul.f32 0.1, %v294_v24  ;;  %v391_v32 = vmul.f32 0.1, %v263_v25  ;;  %v485_v34 = vsel %vm357_vm6, %v293_v14, %v421_v23  ;;  %v528_v16 = vld [vmem:[%s3326_s3 + $0x118] sm:$0xff] }
  0x5d   : > { %vm358_vm8 = vcmp.ge.f32.partialorder %v294_v24, 0.0  ;;  %vm327_vm9 = vcmp.ge.f32.partialorder %v263_v25, 0.0  ;;  %v423_v35 = vmul.f32 0.1, %v295_v26  ;;  %vm359_vm10 = vcmp.ge.f32.partialorder %v295_v26, 0.0 }
  0x5e   : > { %1704 = vmatmul.mubr.msk.f32.gmra.mxu0 %vm563_vm3, %v446_v55  ;;  %1752 = vmatmul.mubr.msk.f32.gmra.mxu1 %vm563_vm3, %v478_v57  ;;  %v454_v39 = vsel %vm326_vm7, %v262_v21, %v390_v28  ;;  %vm328_vm11 = vcmp.ge.f32.partialorder %v264_v33, 0.0  ;;  %v392_v40 = vmul.f32 0.1, %v264_v33  ;;  %v486_v41 = vsel %vm358_vm8, %v294_v24, %v422_v31  ;;  %v495_v21 = vld [vmem:[%s3326_s3 + $0x10] sm:$0xff]  ;;  %v530_v28 = vld [vmem:[%s3326_s3 + $0x128] sm:$0xff] }
  0x5f   : > { %1706 = vmatprep.mubr.msk.f32.mxu0 %vm563_vm3, %v447_v58  ;;  %1754 = vmatprep.mubr.msk.f32.mxu1 %vm563_vm3, %v479_v62  ;;  %v455_v42 = vsel %vm327_vm9, %v263_v25, %v391_v32  ;;  %v424_v43 = vmul.f32 0.1, %v296_v36  ;;  %v393_v44 = vmul.f32 0.1, %v265_v37  ;;  %v487_v46 = vsel %vm359_vm10, %v295_v26, %v423_v35 }
  0x60   : > { %vm360_vm12 = vcmp.ge.f32.partialorder %v296_v36, 0.0  ;;  %vm329_vm13 = vcmp.ge.f32.partialorder %v265_v37, 0.0  ;;  %v425_v47 = vmul.f32 0.1, %v297_v38  ;;  %vm361_vm14 = vcmp.ge.f32.partialorder %v297_v38, 0.0 }
  0x61   : > { %v456_v51 = vsel %vm328_vm11, %v264_v33, %v392_v40  ;;  %vm330_vm15 = vcmp.ge.f32.partialorder %v266_v45, 0.0  ;;  %v488_v52 = vsel %vm360_vm12, %v296_v36, %v424_v43  ;;  %v457_v53 = vsel %vm329_vm13, %v265_v37, %v393_v44  ;;  %v497_v33 = vld [vmem:[%s3326_s3 + $0x20] sm:$0xff]  ;;  %v532_v40 = vld [vmem:[%s3326_s3 + $0x138] sm:$0xff] }
  0x62   : > { %1707 = vmatmul.mubr.msk.f32.gmra.mxu0 %vm563_vm3, %v448_v3  ;;  %1755 = vmatmul.mubr.msk.f32.gmra.mxu1 %vm563_vm3, %v480_v5  ;;  %v394_v54 = vmul.f32 0.1, %v266_v45  ;;  %v426_v55 = vmul.f32 0.1, %v298_v48  ;;  %v489_v57 = vsel %vm361_vm14, %v297_v38, %v425_v47  ;;  %vm362_vm0 = vcmp.ge.f32.partialorder %v298_v48, 0.0  ;;  %v494_v5 = vld [vmem:[%s3326_s3 + $0x8] sm:$0xff] }
  0x63   : > { %1709 = vmatprep.mubr.msk.f32.mxu0 %vm563_vm3, %v449_v6  ;;  %1757 = vmatprep.mubr.msk.f32.mxu1 %vm563_vm3, %v481_v10  ;;  %v395_v58 = vmul.f32 0.1, %v267_v49  ;;  %v427_v59 = vmul.f32 0.1, %v299_v50  ;;  %vm331_vm1 = vcmp.ge.f32.partialorder %v267_v49, 0.0  ;;  %vm363_vm2 = vcmp.ge.f32.partialorder %v299_v50, 0.0 }
  0x64   : > { %v458_v61 = vsel %vm330_vm15, %v266_v45, %v394_v54  ;;  %v490_v62 = vsel %vm362_vm0, %v298_v48, %v426_v55  ;;  %v396_v63 = vmul.f32 0.1, %v268_v56  ;;  %v428_v0 = vmul.f32 0.1, %v300_v60  ;;  %v526_v6 = vld [vmem:[%s3326_s3 + $0x108] sm:$0xff]  ;;  %v525_v10 = vld [vmem:[%s3326_s3 + $0x100] sm:$0xff] }
  0x65   : > { %v459_v1 = vsel %vm331_vm1, %v267_v49, %v395_v58  ;;  %v491_v2 = vsel %vm363_vm2, %v299_v50, %v427_v59  ;;  %vm332_vm4 = vcmp.ge.f32.partialorder %v268_v56, 0.0  ;;  %vm364_vm5 = vcmp.ge.f32.partialorder %v300_v60, 0.0  ;;  %v499_v45 = vld [vmem:[%s3326_s3 + $0x30] sm:$0xff]  ;;  %v533_v58 = vld [vmem:[%s3326_s3 + $0x140] sm:$0xff] }
  0x66   : > { %1710 = vmatmul.mubr.msk.f32.gmra.mxu0 %vm563_vm3, %v450_v15  ;;  %1758 = vmatmul.mubr.msk.f32.gmra.mxu1 %vm563_vm3, %v482_v17  ;;  %v460_v3 = vsel %vm332_vm4, %v268_v56, %v396_v63  ;;  %v492_v4 = vsel %vm364_vm5, %v300_v60, %v428_v0  ;;  %v496_v15 = vld [vmem:[%s3326_s3 + $0x18] sm:$0xff] }
  0x67   : > { %1712 = vmatprep.mubr.msk.f32.mxu0 %vm563_vm3, %v451_v18  ;;  %1760 = vmatprep.mubr.msk.f32.mxu1 %vm563_vm3, %v483_v22  ;;  %v527_v22 = vld [vmem:[%s3326_s3 + $0x110] sm:$0xff]  ;;  %v504_v63 = vld [vmem:[%s3326_s3 + $0x58] sm:$0xff] }
  0x68   : > { %v536_v0 = vld [vmem:[%s3326_s3 + $0x158] sm:$0xff] }
  0x6a   : > { %1713 = vmatmul.mubr.msk.f32.gmra.mxu0 %vm563_vm3, %v452_v27  ;;  %1761 = vmatmul.mubr.msk.f32.gmra.mxu1 %vm563_vm3, %v484_v29  ;;  %v498_v27 = vld [vmem:[%s3326_s3 + $0x28] sm:$0xff] }
  0x6b   : > { %1715 = vmatprep.mubr.msk.f32.mxu0 %vm563_vm3, %v453_v30  ;;  %1763 = vmatprep.mubr.msk.f32.mxu1 %vm563_vm3, %v485_v34  ;;  %v529_v34 = vld [vmem:[%s3326_s3 + $0x120] sm:$0xff] }
  0x6e   : > { %1716 = vmatmul.mubr.msk.f32.gmra.mxu0 %vm563_vm3, %v454_v39  ;;  %1764 = vmatmul.mubr.msk.f32.gmra.mxu1 %vm563_vm3, %v486_v41  ;;  %v500_v39 = vld [vmem:[%s3326_s3 + $0x38] sm:$0xff] }
  0x6f   : > { %1718 = vmatprep.mubr.msk.f32.mxu0 %vm563_vm3, %v455_v42  ;;  %1766 = vmatprep.mubr.msk.f32.mxu1 %vm563_vm3, %v487_v46  ;;  %v531_v46 = vld [vmem:[%s3326_s3 + $0x130] sm:$0xff] }
  0x72   : > { %1719 = vmatmul.mubr.msk.f32.gmra.mxu0 %vm563_vm3, %v456_v51  ;;  %1767 = vmatmul.mubr.msk.f32.gmra.mxu1 %vm563_vm3, %v488_v52  ;;  %v502_v51 = vld [vmem:[%s3326_s3 + $0x48] sm:$0xff] }
  0x73   : > { %1721 = vmatprep.mubr.msk.f32.mxu0 %vm563_vm3, %v457_v53  ;;  %1769 = vmatprep.mubr.msk.f32.mxu1 %vm563_vm3, %v489_v57  ;;  %v534_v52 = vld [vmem:[%s3326_s3 + $0x148] sm:$0xff]  ;;  %v501_v57 = vld [vmem:[%s3326_s3 + $0x40] sm:$0xff] }
  0x76   : > { %1722 = vmatmul.mubr.msk.f32.gmra.mxu0 %vm563_vm3, %v458_v61  ;;  %1770 = vmatmul.mubr.msk.f32.gmra.mxu1 %vm563_vm3, %v490_v62 }
  0x77   : > { %1724 = vmatprep.mubr.msk.f32.mxu0 %vm563_vm3, %v459_v1  ;;  %1772 = vmatprep.mubr.msk.f32.mxu1 %vm563_vm3, %v491_v2 }
  0x7a   : > { %1725 = vmatmul.mubr.msk.f32.gmra.mxu0 %vm563_vm3, %v460_v3  ;;  %1773 = vmatmul.mubr.msk.f32.gmra.mxu1 %vm563_vm3, %v492_v4 }
  0xfe   : > { %v1681_v7 = vpop.f32.mrf.mxu0  ;;  %v1729_v8 = vpop.f32.mrf.mxu1 }
  0xff   : > { %v1142_v11 = vadd.f32 %v1681_v7, %v494_v5  ;;  %v1174_v12 = vadd.f32 %v1729_v8, %v526_v6  ;;  %v503_v5 = vld [vmem:[%s3326_s3 + $0x50] sm:$0xff] }
 0x100   : > { %v822_v13 = vpop.f32.mrf.mxu0  ;;  %v982_v14 = vpop.f32.mrf.mxu1  ;;  %v535_v6 = vld [vmem:[%s3326_s3 + $0x150] sm:$0xff] }
 0x101   : > { %1206 = vst.msk [vmem:[%s3326_s3 + $0x8] sm:$0xff] %vm563_vm3, %v1142_v11  ;;  %1238 = vst.msk [vmem:[%s3326_s3 + $0x108] sm:$0xff] %vm563_vm3, %v1174_v12  ;;  %v1141_v17 = vadd.f32 %v822_v13, %v493_v9  ;;  %v1173_v18 = vadd.f32 %v982_v14, %v525_v10  ;;  %v506_v11 = vld [vmem:[%s3326_s3 + $0x68] sm:$0xff] }
 0x102   : > { %v1684_v19 = vpop.f32.mrf.mxu0  ;;  %v1732_v20 = vpop.f32.mrf.mxu1  ;;  %v538_v12 = vld [vmem:[%s3326_s3 + $0x168] sm:$0xff] }
 0x103   : > { %1205 = vst.msk [vmem:[%s3326_s3] sm:$0xff] %vm563_vm3, %v1141_v17  ;;  %1237 = vst.msk [vmem:[%s3326_s3 + $0x100] sm:$0xff] %vm563_vm3, %v1173_v18  ;;  %v1144_v23 = vadd.f32 %v1684_v19, %v496_v15  ;;  %v1176_v24 = vadd.f32 %v1732_v20, %v528_v16  ;;  %v505_v17 = vld [vmem:[%s3326_s3 + $0x60] sm:$0xff] }
 0x104   : > { %v832_v25 = vpop.f32.mrf.mxu0  ;;  %v992_v26 = vpop.f32.mrf.mxu1  ;;  %v537_v18 = vld [vmem:[%s3326_s3 + $0x160] sm:$0xff] }
 0x105   : > { %1208 = vst.msk [vmem:[%s3326_s3 + $0x18] sm:$0xff] %vm563_vm3, %v1144_v23  ;;  %1240 = vst.msk [vmem:[%s3326_s3 + $0x118] sm:$0xff] %vm563_vm3, %v1176_v24  ;;  %v1143_v29 = vadd.f32 %v832_v25, %v495_v21  ;;  %v1175_v30 = vadd.f32 %v992_v26, %v527_v22  ;;  %v508_v23 = vld [vmem:[%s3326_s3 + $0x78] sm:$0xff] }
 0x106   : > { %v1687_v31 = vpop.f32.mrf.mxu0  ;;  %v1735_v32 = vpop.f32.mrf.mxu1  ;;  %v540_v24 = vld [vmem:[%s3326_s3 + $0x178] sm:$0xff] }
 0x107   : > { %1207 = vst.msk [vmem:[%s3326_s3 + $0x10] sm:$0xff] %vm563_vm3, %v1143_v29  ;;  %1239 = vst.msk [vmem:[%s3326_s3 + $0x110] sm:$0xff] %vm563_vm3, %v1175_v30  ;;  %v1146_v35 = vadd.f32 %v1687_v31, %v498_v27  ;;  %v1178_v36 = vadd.f32 %v1735_v32, %v530_v28  ;;  %v507_v29 = vld [vmem:[%s3326_s3 + $0x70] sm:$0xff] }
 0x108   : > { %v842_v37 = vpop.f32.mrf.mxu0  ;;  %v1002_v38 = vpop.f32.mrf.mxu1  ;;  %v539_v30 = vld [vmem:[%s3326_s3 + $0x170] sm:$0xff] }
 0x109   : > { %1210 = vst.msk [vmem:[%s3326_s3 + $0x28] sm:$0xff] %vm563_vm3, %v1146_v35  ;;  %1242 = vst.msk [vmem:[%s3326_s3 + $0x128] sm:$0xff] %vm563_vm3, %v1178_v36  ;;  %v1145_v41 = vadd.f32 %v842_v37, %v497_v33  ;;  %v1177_v42 = vadd.f32 %v1002_v38, %v529_v34  ;;  %v510_v35 = vld [vmem:[%s3326_s3 + $0x88] sm:$0xff] }
 0x10a   : > { %v1690_v43 = vpop.f32.mrf.mxu0  ;;  %v1738_v44 = vpop.f32.mrf.mxu1  ;;  %v542_v36 = vld [vmem:[%s3326_s3 + $0x188] sm:$0xff] }
 0x10b   : > { %1209 = vst.msk [vmem:[%s3326_s3 + $0x20] sm:$0xff] %vm563_vm3, %v1145_v41  ;;  %1241 = vst.msk [vmem:[%s3326_s3 + $0x120] sm:$0xff] %vm563_vm3, %v1177_v42  ;;  %v1148_v47 = vadd.f32 %v1690_v43, %v500_v39  ;;  %v1180_v48 = vadd.f32 %v1738_v44, %v532_v40  ;;  %v509_v41 = vld [vmem:[%s3326_s3 + $0x80] sm:$0xff] }
 0x10c   : > { %v852_v49 = vpop.f32.mrf.mxu0  ;;  %v1012_v50 = vpop.f32.mrf.mxu1  ;;  %v541_v42 = vld [vmem:[%s3326_s3 + $0x180] sm:$0xff] }
 0x10d   : > { %1212 = vst.msk [vmem:[%s3326_s3 + $0x38] sm:$0xff] %vm563_vm3, %v1148_v47  ;;  %1244 = vst.msk [vmem:[%s3326_s3 + $0x138] sm:$0xff] %vm563_vm3, %v1180_v48  ;;  %v1147_v53 = vadd.f32 %v852_v49, %v499_v45  ;;  %v1179_v54 = vadd.f32 %v1012_v50, %v531_v46  ;;  %v512_v47 = vld [vmem:[%s3326_s3 + $0x98] sm:$0xff] }
 0x10e   : > { %v1693_v55 = vpop.f32.mrf.mxu0  ;;  %v1741_v56 = vpop.f32.mrf.mxu1  ;;  %v544_v48 = vld [vmem:[%s3326_s3 + $0x198] sm:$0xff] }
 0x10f   : > { %1211 = vst.msk [vmem:[%s3326_s3 + $0x30] sm:$0xff] %vm563_vm3, %v1147_v53  ;;  %1243 = vst.msk [vmem:[%s3326_s3 + $0x130] sm:$0xff] %vm563_vm3, %v1179_v54  ;;  %v1150_v59 = vadd.f32 %v1693_v55, %v502_v51  ;;  %v1182_v60 = vadd.f32 %v1741_v56, %v534_v52  ;;  %v511_v53 = vld [vmem:[%s3326_s3 + $0x90] sm:$0xff] }
 0x110   : > { %v862_v61 = vpop.f32.mrf.mxu0  ;;  %v1022_v62 = vpop.f32.mrf.mxu1  ;;  %v543_v54 = vld [vmem:[%s3326_s3 + $0x190] sm:$0xff] }
 0x111   : > { %1214 = vst.msk [vmem:[%s3326_s3 + $0x48] sm:$0xff] %vm563_vm3, %v1150_v59  ;;  %1246 = vst.msk [vmem:[%s3326_s3 + $0x148] sm:$0xff] %vm563_vm3, %v1182_v60  ;;  %v1149_v1 = vadd.f32 %v862_v61, %v501_v57  ;;  %v1181_v2 = vadd.f32 %v1022_v62, %v533_v58  ;;  %v514_v59 = vld [vmem:[%s3326_s3 + $0xa8] sm:$0xff] }
 0x112   : > { %v1696_v3 = vpop.f32.mrf.mxu0  ;;  %v1744_v4 = vpop.f32.mrf.mxu1  ;;  %v546_v60 = vld [vmem:[%s3326_s3 + $0x1a8] sm:$0xff] }
 0x113   : > { %1213 = vst.msk [vmem:[%s3326_s3 + $0x40] sm:$0xff] %vm563_vm3, %v1149_v1  ;;  %1245 = vst.msk [vmem:[%s3326_s3 + $0x140] sm:$0xff] %vm563_vm3, %v1181_v2  ;;  %v1152_v7 = vadd.f32 %v1696_v3, %v504_v63  ;;  %v1184_v8 = vadd.f32 %v1744_v4, %v536_v0  ;;  %v513_v1 = vld [vmem:[%s3326_s3 + $0xa0] sm:$0xff] }
 0x114   : > { %v872_v9 = vpop.f32.mrf.mxu0  ;;  %v1032_v10 = vpop.f32.mrf.mxu1  ;;  %v545_v2 = vld [vmem:[%s3326_s3 + $0x1a0] sm:$0xff] }
 0x115   : > { %1216 = vst.msk [vmem:[%s3326_s3 + $0x58] sm:$0xff] %vm563_vm3, %v1152_v7  ;;  %1248 = vst.msk [vmem:[%s3326_s3 + $0x158] sm:$0xff] %vm563_vm3, %v1184_v8  ;;  %v1151_v13 = vadd.f32 %v872_v9, %v503_v5  ;;  %v1183_v14 = vadd.f32 %v1032_v10, %v535_v6  ;;  %v516_v7 = vld [vmem:[%s3326_s3 + $0xb8] sm:$0xff] }
 0x116   : > { %v1699_v15 = vpop.f32.mrf.mxu0  ;;  %v1747_v16 = vpop.f32.mrf.mxu1  ;;  %v548_v8 = vld [vmem:[%s3326_s3 + $0x1b8] sm:$0xff] }
 0x117   : > { %1215 = vst.msk [vmem:[%s3326_s3 + $0x50] sm:$0xff] %vm563_vm3, %v1151_v13  ;;  %1247 = vst.msk [vmem:[%s3326_s3 + $0x150] sm:$0xff] %vm563_vm3, %v1183_v14  ;;  %v1154_v19 = vadd.f32 %v1699_v15, %v506_v11  ;;  %v1186_v20 = vadd.f32 %v1747_v16, %v538_v12  ;;  %v515_v13 = vld [vmem:[%s3326_s3 + $0xb0] sm:$0xff] }
 0x118   : > { %v882_v21 = vpop.f32.mrf.mxu0  ;;  %v1042_v22 = vpop.f32.mrf.mxu1  ;;  %v547_v14 = vld [vmem:[%s3326_s3 + $0x1b0] sm:$0xff] }
 0x119   : > { %1218 = vst.msk [vmem:[%s3326_s3 + $0x68] sm:$0xff] %vm563_vm3, %v1154_v19  ;;  %1250 = vst.msk [vmem:[%s3326_s3 + $0x168] sm:$0xff] %vm563_vm3, %v1186_v20  ;;  %v1153_v25 = vadd.f32 %v882_v21, %v505_v17  ;;  %v1185_v26 = vadd.f32 %v1042_v22, %v537_v18  ;;  %v518_v19 = vld [vmem:[%s3326_s3 + $0xc8] sm:$0xff] }
 0x11a   : > { %v1702_v27 = vpop.f32.mrf.mxu0  ;;  %v1750_v28 = vpop.f32.mrf.mxu1  ;;  %v550_v20 = vld [vmem:[%s3326_s3 + $0x1c8] sm:$0xff] }
 0x11b   : > { %1217 = vst.msk [vmem:[%s3326_s3 + $0x60] sm:$0xff] %vm563_vm3, %v1153_v25  ;;  %1249 = vst.msk [vmem:[%s3326_s3 + $0x160] sm:$0xff] %vm563_vm3, %v1185_v26  ;;  %v1156_v31 = vadd.f32 %v1702_v27, %v508_v23  ;;  %v1188_v32 = vadd.f32 %v1750_v28, %v540_v24  ;;  %v517_v25 = vld [vmem:[%s3326_s3 + $0xc0] sm:$0xff] }
 0x11c   : > { %v892_v33 = vpop.f32.mrf.mxu0  ;;  %v1052_v34 = vpop.f32.mrf.mxu1  ;;  %v549_v26 = vld [vmem:[%s3326_s3 + $0x1c0] sm:$0xff] }
 0x11d   : > { %1220 = vst.msk [vmem:[%s3326_s3 + $0x78] sm:$0xff] %vm563_vm3, %v1156_v31  ;;  %1252 = vst.msk [vmem:[%s3326_s3 + $0x178] sm:$0xff] %vm563_vm3, %v1188_v32  ;;  %v1155_v37 = vadd.f32 %v892_v33, %v507_v29  ;;  %v1187_v38 = vadd.f32 %v1052_v34, %v539_v30  ;;  %v520_v31 = vld [vmem:[%s3326_s3 + $0xd8] sm:$0xff] }
 0x11e   : > { %v1705_v39 = vpop.f32.mrf.mxu0  ;;  %v1753_v40 = vpop.f32.mrf.mxu1  ;;  %v552_v32 = vld [vmem:[%s3326_s3 + $0x1d8] sm:$0xff] }
 0x11f   : > { %1219 = vst.msk [vmem:[%s3326_s3 + $0x70] sm:$0xff] %vm563_vm3, %v1155_v37  ;;  %1251 = vst.msk [vmem:[%s3326_s3 + $0x170] sm:$0xff] %vm563_vm3, %v1187_v38  ;;  %v1158_v43 = vadd.f32 %v1705_v39, %v510_v35  ;;  %v1190_v44 = vadd.f32 %v1753_v40, %v542_v36  ;;  %v519_v37 = vld [vmem:[%s3326_s3 + $0xd0] sm:$0xff] }
 0x120   : > { %v902_v45 = vpop.f32.mrf.mxu0  ;;  %v1062_v46 = vpop.f32.mrf.mxu1  ;;  %v551_v38 = vld [vmem:[%s3326_s3 + $0x1d0] sm:$0xff] }
 0x121   : > { %1222 = vst.msk [vmem:[%s3326_s3 + $0x88] sm:$0xff] %vm563_vm3, %v1158_v43  ;;  %1254 = vst.msk [vmem:[%s3326_s3 + $0x188] sm:$0xff] %vm563_vm3, %v1190_v44  ;;  %v1157_v49 = vadd.f32 %v902_v45, %v509_v41  ;;  %v1189_v50 = vadd.f32 %v1062_v46, %v541_v42  ;;  %v522_v43 = vld [vmem:[%s3326_s3 + $0xe8] sm:$0xff] }
 0x122   : > { %v1708_v51 = vpop.f32.mrf.mxu0  ;;  %v1756_v52 = vpop.f32.mrf.mxu1  ;;  %v554_v44 = vld [vmem:[%s3326_s3 + $0x1e8] sm:$0xff] }
 0x123   : > { %1221 = vst.msk [vmem:[%s3326_s3 + $0x80] sm:$0xff] %vm563_vm3, %v1157_v49  ;;  %1253 = vst.msk [vmem:[%s3326_s3 + $0x180] sm:$0xff] %vm563_vm3, %v1189_v50  ;;  %v1160_v55 = vadd.f32 %v1708_v51, %v512_v47  ;;  %v1192_v56 = vadd.f32 %v1756_v52, %v544_v48  ;;  %v521_v49 = vld [vmem:[%s3326_s3 + $0xe0] sm:$0xff] }
 0x124   : > { %v912_v57 = vpop.f32.mrf.mxu0  ;;  %v1072_v58 = vpop.f32.mrf.mxu1  ;;  %v553_v50 = vld [vmem:[%s3326_s3 + $0x1e0] sm:$0xff] }
 0x125   : > { %1224 = vst.msk [vmem:[%s3326_s3 + $0x98] sm:$0xff] %vm563_vm3, %v1160_v55  ;;  %1256 = vst.msk [vmem:[%s3326_s3 + $0x198] sm:$0xff] %vm563_vm3, %v1192_v56  ;;  %v1159_v61 = vadd.f32 %v912_v57, %v511_v53  ;;  %v1191_v62 = vadd.f32 %v1072_v58, %v543_v54  ;;  %v524_v55 = vld [vmem:[%s3326_s3 + $0xf8] sm:$0xff] }
 0x126   : > { %v1711_v63 = vpop.f32.mrf.mxu0  ;;  %v1759_v0 = vpop.f32.mrf.mxu1  ;;  %v556_v56 = vld [vmem:[%s3326_s3 + $0x1f8] sm:$0xff] }
 0x127   : > { %1223 = vst.msk [vmem:[%s3326_s3 + $0x90] sm:$0xff] %vm563_vm3, %v1159_v61  ;;  %1255 = vst.msk [vmem:[%s3326_s3 + $0x190] sm:$0xff] %vm563_vm3, %v1191_v62  ;;  %v1162_v3 = vadd.f32 %v1711_v63, %v514_v59  ;;  %v1194_v4 = vadd.f32 %v1759_v0, %v546_v60  ;;  %v523_v61 = vld [vmem:[%s3326_s3 + $0xf0] sm:$0xff] }
 0x128   : > { %v922_v5 = vpop.f32.mrf.mxu0  ;;  %v1082_v6 = vpop.f32.mrf.mxu1  ;;  %v555_v62 = vld [vmem:[%s3326_s3 + $0x1f0] sm:$0xff] }
 0x129   : > { %1226 = vst.msk [vmem:[%s3326_s3 + $0xa8] sm:$0xff] %vm563_vm3, %v1162_v3  ;;  %1258 = vst.msk [vmem:[%s3326_s3 + $0x1a8] sm:$0xff] %vm563_vm3, %v1194_v4  ;;  %v1161_v9 = vadd.f32 %v922_v5, %v513_v1  ;;  %v1193_v10 = vadd.f32 %v1082_v6, %v545_v2 }
 0x12a   : > { %v1714_v11 = vpop.f32.mrf.mxu0  ;;  %v1762_v12 = vpop.f32.mrf.mxu1 }
 0x12b   : > { %1225 = vst.msk [vmem:[%s3326_s3 + $0xa0] sm:$0xff] %vm563_vm3, %v1161_v9  ;;  %1257 = vst.msk [vmem:[%s3326_s3 + $0x1a0] sm:$0xff] %vm563_vm3, %v1193_v10  ;;  %v1164_v15 = vadd.f32 %v1714_v11, %v516_v7  ;;  %v1196_v16 = vadd.f32 %v1762_v12, %v548_v8 }
 0x12c   : > { %v932_v17 = vpop.f32.mrf.mxu0  ;;  %v1092_v18 = vpop.f32.mrf.mxu1 }
 0x12d   : > { %1228 = vst.msk [vmem:[%s3326_s3 + $0xb8] sm:$0xff] %vm563_vm3, %v1164_v15  ;;  %1260 = vst.msk [vmem:[%s3326_s3 + $0x1b8] sm:$0xff] %vm563_vm3, %v1196_v16  ;;  %v1163_v21 = vadd.f32 %v932_v17, %v515_v13  ;;  %v1195_v22 = vadd.f32 %v1092_v18, %v547_v14 }
 0x12e   : > { %v1717_v23 = vpop.f32.mrf.mxu0  ;;  %v1765_v24 = vpop.f32.mrf.mxu1 }
 0x12f   : > { %1227 = vst.msk [vmem:[%s3326_s3 + $0xb0] sm:$0xff] %vm563_vm3, %v1163_v21  ;;  %1259 = vst.msk [vmem:[%s3326_s3 + $0x1b0] sm:$0xff] %vm563_vm3, %v1195_v22  ;;  %v1166_v27 = vadd.f32 %v1717_v23, %v518_v19  ;;  %v1198_v28 = vadd.f32 %v1765_v24, %v550_v20 }
 0x130   : > { %v942_v29 = vpop.f32.mrf.mxu0  ;;  %v1102_v30 = vpop.f32.mrf.mxu1 }
 0x131   : > { %1230 = vst.msk [vmem:[%s3326_s3 + $0xc8] sm:$0xff] %vm563_vm3, %v1166_v27  ;;  %1262 = vst.msk [vmem:[%s3326_s3 + $0x1c8] sm:$0xff] %vm563_vm3, %v1198_v28  ;;  %v1165_v33 = vadd.f32 %v942_v29, %v517_v25  ;;  %v1197_v34 = vadd.f32 %v1102_v30, %v549_v26 }
 0x132   : > { %v1720_v35 = vpop.f32.mrf.mxu0  ;;  %v1768_v36 = vpop.f32.mrf.mxu1 }
 0x133   : > { %1229 = vst.msk [vmem:[%s3326_s3 + $0xc0] sm:$0xff] %vm563_vm3, %v1165_v33  ;;  %1261 = vst.msk [vmem:[%s3326_s3 + $0x1c0] sm:$0xff] %vm563_vm3, %v1197_v34  ;;  %v1168_v39 = vadd.f32 %v1720_v35, %v520_v31  ;;  %v1200_v40 = vadd.f32 %v1768_v36, %v552_v32 }
 0x134   : > { %v952_v41 = vpop.f32.mrf.mxu0  ;;  %v1112_v42 = vpop.f32.mrf.mxu1 }
 0x135   : > { %1232 = vst.msk [vmem:[%s3326_s3 + $0xd8] sm:$0xff] %vm563_vm3, %v1168_v39  ;;  %1264 = vst.msk [vmem:[%s3326_s3 + $0x1d8] sm:$0xff] %vm563_vm3, %v1200_v40  ;;  %v1167_v45 = vadd.f32 %v952_v41, %v519_v37  ;;  %v1199_v46 = vadd.f32 %v1112_v42, %v551_v38 }
 0x136   : > { %v1723_v47 = vpop.f32.mrf.mxu0  ;;  %v1771_v48 = vpop.f32.mrf.mxu1 }
 0x137   : > { %1231 = vst.msk [vmem:[%s3326_s3 + $0xd0] sm:$0xff] %vm563_vm3, %v1167_v45  ;;  %1263 = vst.msk [vmem:[%s3326_s3 + $0x1d0] sm:$0xff] %vm563_vm3, %v1199_v46  ;;  %v1170_v51 = vadd.f32 %v1723_v47, %v522_v43  ;;  %v1202_v52 = vadd.f32 %v1771_v48, %v554_v44 }
 0x138   : > { %v962_v53 = vpop.f32.mrf.mxu0  ;;  %v1122_v54 = vpop.f32.mrf.mxu1 }
 0x139   : > { %1234 = vst.msk [vmem:[%s3326_s3 + $0xe8] sm:$0xff] %vm563_vm3, %v1170_v51  ;;  %1266 = vst.msk [vmem:[%s3326_s3 + $0x1e8] sm:$0xff] %vm563_vm3, %v1202_v52  ;;  %v1169_v57 = vadd.f32 %v962_v53, %v521_v49  ;;  %v1201_v58 = vadd.f32 %v1122_v54, %v553_v50 }
 0x13a   : > { %v1726_v59 = vpop.f32.mrf.mxu0  ;;  %v1774_v60 = vpop.f32.mrf.mxu1 }
 0x13b   : > { %1233 = vst.msk [vmem:[%s3326_s3 + $0xe0] sm:$0xff] %vm563_vm3, %v1169_v57  ;;  %1265 = vst.msk [vmem:[%s3326_s3 + $0x1e0] sm:$0xff] %vm563_vm3, %v1201_v58  ;;  %v1172_v63 = vadd.f32 %v1726_v59, %v524_v55  ;;  %v1204_v0 = vadd.f32 %v1774_v60, %v556_v56  ;;  %1272 = sbr.rel (%p1597_p5) target bundleno = 356 (0x164), region = 40 }
 0x13c   : > { %v972_v1 = vpop.f32.mrf.mxu0  ;;  %v1132_v2 = vpop.f32.mrf.mxu1 }
 0x13d   : > { %1236 = vst.msk [vmem:[%s3326_s3 + $0xf8] sm:$0xff] %vm563_vm3, %v1172_v63  ;;  %1268 = vst.msk [vmem:[%s3326_s3 + $0x1f8] sm:$0xff] %vm563_vm3, %v1204_v0  ;;  %v1171_v3 = vadd.f32 %v972_v1, %v523_v61  ;;  %v1203_v4 = vadd.f32 %v1132_v2, %v555_v62 }
 0x13f   : > { %1235 = vst.msk [vmem:[%s3326_s3 + $0xf0] sm:$0xff] %vm563_vm3, %v1171_v3  ;;  %1267 = vst.msk [vmem:[%s3326_s3 + $0x1f0] sm:$0xff] %vm563_vm3, %v1203_v4 }
 0x140   : > { %v1273_v5 = vld [vmem:[%s3326_s3] sm:$0xff]  ;;  %v1274_v7 = vld [vmem:[%s3326_s3 + $0x8] sm:$0xff]  ;;  %v1275_v10 = vld [vmem:[%s3326_s3 + $0x10] sm:$0xff] }
 0x141   : > { %v2803_v6 = vld [vmem:[%s3325_s2] ss:$0 sm:$0xff]  ;;  %v1276_v11 = vld [vmem:[%s3326_s3 + $0x18] sm:$0xff]  ;;  %v1278_v16 = vld [vmem:[%s3326_s3 + $0x28] sm:$0xff] }
 0x142   : > { %v1344_v8 = vadd.f32 %v2803_v6, %v1273_v5  ;;  %v1345_v9 = vadd.f32 %v2803_v6, %v1274_v7  ;;  %v1277_v12 = vld [vmem:[%s3326_s3 + $0x20] sm:$0xff]  ;;  %v1346_v13 = vadd.f32 %v2803_v6, %v1275_v10  ;;  %v1347_v14 = vadd.f32 %v2803_v6, %v1276_v11  ;;  %v1279_v17 = vld [vmem:[%s3326_s3 + $0x30] sm:$0xff]  ;;  %v1280_v18 = vld [vmem:[%s3326_s3 + $0x38] sm:$0xff] }
 0x143   : > { %v1348_v15 = vadd.f32 %v2803_v6, %v1277_v12  ;;  %v1349_v19 = vadd.f32 %v2803_v6, %v1278_v16  ;;  %v1350_v20 = vadd.f32 %v2803_v6, %v1279_v17  ;;  %v1351_v21 = vadd.f32 %v2803_v6, %v1280_v18  ;;  %v1281_v22 = vld [vmem:[%s3326_s3 + $0x40] sm:$0xff]  ;;  %v1282_v23 = vld [vmem:[%s3326_s3 + $0x48] sm:$0xff]  ;;  %v1283_v24 = vld [vmem:[%s3326_s3 + $0x50] sm:$0xff] }
 0x144   : > { %1408 = vst.msk [vmem:[%s3326_s3] sm:$0xff] %vm563_vm3, %v1344_v8  ;;  %1409 = vst.msk [vmem:[%s3326_s3 + $0x8] sm:$0xff] %vm563_vm3, %v1345_v9  ;;  %v1352_v25 = vadd.f32 %v2803_v6, %v1281_v22  ;;  %v1353_v26 = vadd.f32 %v2803_v6, %v1282_v23  ;;  %v1354_v27 = vadd.f32 %v2803_v6, %v1283_v24  ;;  %v1284_v28 = vld [vmem:[%s3326_s3 + $0x58] sm:$0xff]  ;;  %v1285_v29 = vld [vmem:[%s3326_s3 + $0x60] sm:$0xff] }
 0x145   : > { %1410 = vst.msk [vmem:[%s3326_s3 + $0x10] sm:$0xff] %vm563_vm3, %v1346_v13  ;;  %1411 = vst.msk [vmem:[%s3326_s3 + $0x18] sm:$0xff] %vm563_vm3, %v1347_v14  ;;  %v1286_v30 = vld [vmem:[%s3326_s3 + $0x68] sm:$0xff]  ;;  %v1355_v31 = vadd.f32 %v2803_v6, %v1284_v28  ;;  %v1356_v32 = vadd.f32 %v2803_v6, %v1285_v29  ;;  %v1287_v34 = vld [vmem:[%s3326_s3 + $0x70] sm:$0xff] }
 0x146   : > { %1412 = vst.msk [vmem:[%s3326_s3 + $0x20] sm:$0xff] %vm563_vm3, %v1348_v15  ;;  %1413 = vst.msk [vmem:[%s3326_s3 + $0x28] sm:$0xff] %vm563_vm3, %v1349_v19  ;;  %v1357_v33 = vadd.f32 %v2803_v6, %v1286_v30  ;;  %v1288_v35 = vld [vmem:[%s3326_s3 + $0x78] sm:$0xff]  ;;  %v1289_v36 = vld [vmem:[%s3326_s3 + $0x80] sm:$0xff]  ;;  %v1358_v37 = vadd.f32 %v2803_v6, %v1287_v34 }
 0x147   : > { %1414 = vst.msk [vmem:[%s3326_s3 + $0x30] sm:$0xff] %vm563_vm3, %v1350_v20  ;;  %1415 = vst.msk [vmem:[%s3326_s3 + $0x38] sm:$0xff] %vm563_vm3, %v1351_v21  ;;  %v1359_v38 = vadd.f32 %v2803_v6, %v1288_v35  ;;  %v1360_v39 = vadd.f32 %v2803_v6, %v1289_v36  ;;  %v1290_v40 = vld [vmem:[%s3326_s3 + $0x88] sm:$0xff]  ;;  %v1291_v41 = vld [vmem:[%s3326_s3 + $0x90] sm:$0xff] }
 0x148   : > { %1416 = vst.msk [vmem:[%s3326_s3 + $0x40] sm:$0xff] %vm563_vm3, %v1352_v25  ;;  %1417 = vst.msk [vmem:[%s3326_s3 + $0x48] sm:$0xff] %vm563_vm3, %v1353_v26  ;;  %v1292_v42 = vld [vmem:[%s3326_s3 + $0x98] sm:$0xff]  ;;  %v1361_v43 = vadd.f32 %v2803_v6, %v1290_v40  ;;  %v1362_v44 = vadd.f32 %v2803_v6, %v1291_v41  ;;  %v1293_v46 = vld [vmem:[%s3326_s3 + $0xa0] sm:$0xff] }
 0x149   : > { %1418 = vst.msk [vmem:[%s3326_s3 + $0x50] sm:$0xff] %vm563_vm3, %v1354_v27  ;;  %1419 = vst.msk [vmem:[%s3326_s3 + $0x58] sm:$0xff] %vm563_vm3, %v1355_v31  ;;  %v1363_v45 = vadd.f32 %v2803_v6, %v1292_v42  ;;  %v1294_v47 = vld [vmem:[%s3326_s3 + $0xa8] sm:$0xff]  ;;  %v1295_v48 = vld [vmem:[%s3326_s3 + $0xb0] sm:$0xff]  ;;  %v1364_v49 = vadd.f32 %v2803_v6, %v1293_v46 }
 0x14a   : > { %1420 = vst.msk [vmem:[%s3326_s3 + $0x60] sm:$0xff] %vm563_vm3, %v1356_v32  ;;  %1421 = vst.msk [vmem:[%s3326_s3 + $0x68] sm:$0xff] %vm563_vm3, %v1357_v33  ;;  %v1365_v50 = vadd.f32 %v2803_v6, %v1294_v47  ;;  %v1366_v51 = vadd.f32 %v2803_v6, %v1295_v48  ;;  %v1296_v52 = vld [vmem:[%s3326_s3 + $0xb8] sm:$0xff]  ;;  %v1297_v53 = vld [vmem:[%s3326_s3 + $0xc0] sm:$0xff] }
 0x14b   : > { %1422 = vst.msk [vmem:[%s3326_s3 + $0x70] sm:$0xff] %vm563_vm3, %v1358_v37  ;;  %1423 = vst.msk [vmem:[%s3326_s3 + $0x78] sm:$0xff] %vm563_vm3, %v1359_v38  ;;  %v1298_v54 = vld [vmem:[%s3326_s3 + $0xc8] sm:$0xff]  ;;  %v1367_v55 = vadd.f32 %v2803_v6, %v1296_v52  ;;  %v1368_v56 = vadd.f32 %v2803_v6, %v1297_v53  ;;  %v1299_v58 = vld [vmem:[%s3326_s3 + $0xd0] sm:$0xff] }
 0x14c   : > { %1424 = vst.msk [vmem:[%s3326_s3 + $0x80] sm:$0xff] %vm563_vm3, %v1360_v39  ;;  %1425 = vst.msk [vmem:[%s3326_s3 + $0x88] sm:$0xff] %vm563_vm3, %v1361_v43  ;;  %v1369_v57 = vadd.f32 %v2803_v6, %v1298_v54  ;;  %v1300_v59 = vld [vmem:[%s3326_s3 + $0xd8] sm:$0xff]  ;;  %v1301_v60 = vld [vmem:[%s3326_s3 + $0xe0] sm:$0xff]  ;;  %v1370_v61 = vadd.f32 %v2803_v6, %v1299_v58 }
 0x14d   : > { %1426 = vst.msk [vmem:[%s3326_s3 + $0x90] sm:$0xff] %vm563_vm3, %v1362_v44  ;;  %1427 = vst.msk [vmem:[%s3326_s3 + $0x98] sm:$0xff] %vm563_vm3, %v1363_v45  ;;  %v1371_v62 = vadd.f32 %v2803_v6, %v1300_v59  ;;  %v1372_v63 = vadd.f32 %v2803_v6, %v1301_v60  ;;  %v1302_v0 = vld [vmem:[%s3326_s3 + $0xe8] sm:$0xff]  ;;  %v1303_v1 = vld [vmem:[%s3326_s3 + $0xf0] sm:$0xff] }
 0x14e   : > { %1428 = vst.msk [vmem:[%s3326_s3 + $0xa0] sm:$0xff] %vm563_vm3, %v1364_v49  ;;  %1429 = vst.msk [vmem:[%s3326_s3 + $0xa8] sm:$0xff] %vm563_vm3, %v1365_v50  ;;  %v1304_v2 = vld [vmem:[%s3326_s3 + $0xf8] sm:$0xff]  ;;  %v1373_v3 = vadd.f32 %v2803_v6, %v1302_v0  ;;  %v1374_v4 = vadd.f32 %v2803_v6, %v1303_v1  ;;  %v1305_v7 = vld [vmem:[%s3326_s3 + $0x100] sm:$0xff] }
 0x14f   : > { %1430 = vst.msk [vmem:[%s3326_s3 + $0xb0] sm:$0xff] %vm563_vm3, %v1366_v51  ;;  %1431 = vst.msk [vmem:[%s3326_s3 + $0xb8] sm:$0xff] %vm563_vm3, %v1367_v55  ;;  %v1375_v5 = vadd.f32 %v2803_v6, %v1304_v2  ;;  %v1306_v8 = vld [vmem:[%s3326_s3 + $0x108] sm:$0xff]  ;;  %v1307_v9 = vld [vmem:[%s3326_s3 + $0x110] sm:$0xff]  ;;  %v1376_v10 = vadd.f32 %v2803_v6, %v1305_v7 }
 0x150   : > { %1432 = vst.msk [vmem:[%s3326_s3 + $0xc0] sm:$0xff] %vm563_vm3, %v1368_v56  ;;  %1433 = vst.msk [vmem:[%s3326_s3 + $0xc8] sm:$0xff] %vm563_vm3, %v1369_v57  ;;  %v1377_v11 = vadd.f32 %v2803_v6, %v1306_v8  ;;  %v1378_v12 = vadd.f32 %v2803_v6, %v1307_v9  ;;  %v1308_v13 = vld [vmem:[%s3326_s3 + $0x118] sm:$0xff]  ;;  %v1309_v14 = vld [vmem:[%s3326_s3 + $0x120] sm:$0xff] }
 0x151   : > { %1434 = vst.msk [vmem:[%s3326_s3 + $0xd0] sm:$0xff] %vm563_vm3, %v1370_v61  ;;  %1435 = vst.msk [vmem:[%s3326_s3 + $0xd8] sm:$0xff] %vm563_vm3, %v1371_v62  ;;  %v1310_v15 = vld [vmem:[%s3326_s3 + $0x128] sm:$0xff]  ;;  %v1379_v16 = vadd.f32 %v2803_v6, %v1308_v13  ;;  %v1380_v17 = vadd.f32 %v2803_v6, %v1309_v14  ;;  %v1311_v19 = vld [vmem:[%s3326_s3 + $0x130] sm:$0xff] }
 0x152   : > { %1436 = vst.msk [vmem:[%s3326_s3 + $0xe0] sm:$0xff] %vm563_vm3, %v1372_v63  ;;  %1437 = vst.msk [vmem:[%s3326_s3 + $0xe8] sm:$0xff] %vm563_vm3, %v1373_v3  ;;  %v1381_v18 = vadd.f32 %v2803_v6, %v1310_v15  ;;  %v1312_v20 = vld [vmem:[%s3326_s3 + $0x138] sm:$0xff]  ;;  %v1313_v21 = vld [vmem:[%s3326_s3 + $0x140] sm:$0xff]  ;;  %v1382_v22 = vadd.f32 %v2803_v6, %v1311_v19 }
 0x153   : > { %1438 = vst.msk [vmem:[%s3326_s3 + $0xf0] sm:$0xff] %vm563_vm3, %v1374_v4  ;;  %1439 = vst.msk [vmem:[%s3326_s3 + $0xf8] sm:$0xff] %vm563_vm3, %v1375_v5  ;;  %v1383_v23 = vadd.f32 %v2803_v6, %v1312_v20  ;;  %v1384_v24 = vadd.f32 %v2803_v6, %v1313_v21  ;;  %v1314_v25 = vld [vmem:[%s3326_s3 + $0x148] sm:$0xff]  ;;  %v1315_v26 = vld [vmem:[%s3326_s3 + $0x150] sm:$0xff] }
 0x154   : > { %1440 = vst.msk [vmem:[%s3326_s3 + $0x100] sm:$0xff] %vm563_vm3, %v1376_v10  ;;  %1441 = vst.msk [vmem:[%s3326_s3 + $0x108] sm:$0xff] %vm563_vm3, %v1377_v11  ;;  %v1316_v27 = vld [vmem:[%s3326_s3 + $0x158] sm:$0xff]  ;;  %v1385_v28 = vadd.f32 %v2803_v6, %v1314_v25  ;;  %v1386_v29 = vadd.f32 %v2803_v6, %v1315_v26  ;;  %v1317_v31 = vld [vmem:[%s3326_s3 + $0x160] sm:$0xff] }
 0x155   : > { %1442 = vst.msk [vmem:[%s3326_s3 + $0x110] sm:$0xff] %vm563_vm3, %v1378_v12  ;;  %1443 = vst.msk [vmem:[%s3326_s3 + $0x118] sm:$0xff] %vm563_vm3, %v1379_v16  ;;  %v1387_v30 = vadd.f32 %v2803_v6, %v1316_v27  ;;  %v1318_v32 = vld [vmem:[%s3326_s3 + $0x168] sm:$0xff]  ;;  %v1319_v33 = vld [vmem:[%s3326_s3 + $0x170] sm:$0xff]  ;;  %v1388_v34 = vadd.f32 %v2803_v6, %v1317_v31 }
 0x156   : > { %1444 = vst.msk [vmem:[%s3326_s3 + $0x120] sm:$0xff] %vm563_vm3, %v1380_v17  ;;  %1445 = vst.msk [vmem:[%s3326_s3 + $0x128] sm:$0xff] %vm563_vm3, %v1381_v18  ;;  %v1389_v35 = vadd.f32 %v2803_v6, %v1318_v32  ;;  %v1390_v36 = vadd.f32 %v2803_v6, %v1319_v33  ;;  %v1320_v37 = vld [vmem:[%s3326_s3 + $0x178] sm:$0xff]  ;;  %v1321_v38 = vld [vmem:[%s3326_s3 + $0x180] sm:$0xff] }
 0x157   : > { %1446 = vst.msk [vmem:[%s3326_s3 + $0x130] sm:$0xff] %vm563_vm3, %v1382_v22  ;;  %1447 = vst.msk [vmem:[%s3326_s3 + $0x138] sm:$0xff] %vm563_vm3, %v1383_v23  ;;  %v1322_v39 = vld [vmem:[%s3326_s3 + $0x188] sm:$0xff]  ;;  %v1391_v40 = vadd.f32 %v2803_v6, %v1320_v37  ;;  %v1392_v41 = vadd.f32 %v2803_v6, %v1321_v38  ;;  %v1323_v43 = vld [vmem:[%s3326_s3 + $0x190] sm:$0xff] }
 0x158   : > { %1448 = vst.msk [vmem:[%s3326_s3 + $0x140] sm:$0xff] %vm563_vm3, %v1384_v24  ;;  %1449 = vst.msk [vmem:[%s3326_s3 + $0x148] sm:$0xff] %vm563_vm3, %v1385_v28  ;;  %v1393_v42 = vadd.f32 %v2803_v6, %v1322_v39  ;;  %v1324_v44 = vld [vmem:[%s3326_s3 + $0x198] sm:$0xff]  ;;  %v1325_v45 = vld [vmem:[%s3326_s3 + $0x1a0] sm:$0xff]  ;;  %v1394_v46 = vadd.f32 %v2803_v6, %v1323_v43 }
 0x159   : > { %1450 = vst.msk [vmem:[%s3326_s3 + $0x150] sm:$0xff] %vm563_vm3, %v1386_v29  ;;  %1451 = vst.msk [vmem:[%s3326_s3 + $0x158] sm:$0xff] %vm563_vm3, %v1387_v30  ;;  %v1395_v47 = vadd.f32 %v2803_v6, %v1324_v44  ;;  %v1396_v48 = vadd.f32 %v2803_v6, %v1325_v45  ;;  %v1326_v49 = vld [vmem:[%s3326_s3 + $0x1a8] sm:$0xff]  ;;  %v1327_v50 = vld [vmem:[%s3326_s3 + $0x1b0] sm:$0xff] }
 0x15a   : > { %1452 = vst.msk [vmem:[%s3326_s3 + $0x160] sm:$0xff] %vm563_vm3, %v1388_v34  ;;  %1453 = vst.msk [vmem:[%s3326_s3 + $0x168] sm:$0xff] %vm563_vm3, %v1389_v35  ;;  %v1328_v51 = vld [vmem:[%s3326_s3 + $0x1b8] sm:$0xff]  ;;  %v1397_v52 = vadd.f32 %v2803_v6, %v1326_v49  ;;  %v1398_v53 = vadd.f32 %v2803_v6, %v1327_v50  ;;  %v1329_v55 = vld [vmem:[%s3326_s3 + $0x1c0] sm:$0xff] }
 0x15b   : > { %1454 = vst.msk [vmem:[%s3326_s3 + $0x170] sm:$0xff] %vm563_vm3, %v1390_v36  ;;  %1455 = vst.msk [vmem:[%s3326_s3 + $0x178] sm:$0xff] %vm563_vm3, %v1391_v40  ;;  %v1399_v54 = vadd.f32 %v2803_v6, %v1328_v51  ;;  %v1330_v56 = vld [vmem:[%s3326_s3 + $0x1c8] sm:$0xff]  ;;  %v1331_v57 = vld [vmem:[%s3326_s3 + $0x1d0] sm:$0xff]  ;;  %v1400_v58 = vadd.f32 %v2803_v6, %v1329_v55 }
 0x15c   : > { %1456 = vst.msk [vmem:[%s3326_s3 + $0x180] sm:$0xff] %vm563_vm3, %v1392_v41  ;;  %1457 = vst.msk [vmem:[%s3326_s3 + $0x188] sm:$0xff] %vm563_vm3, %v1393_v42  ;;  %v1401_v59 = vadd.f32 %v2803_v6, %v1330_v56  ;;  %v1402_v60 = vadd.f32 %v2803_v6, %v1331_v57  ;;  %v1332_v61 = vld [vmem:[%s3326_s3 + $0x1d8] sm:$0xff]  ;;  %v1333_v62 = vld [vmem:[%s3326_s3 + $0x1e0] sm:$0xff] }
 0x15d   : > { %1458 = vst.msk [vmem:[%s3326_s3 + $0x190] sm:$0xff] %vm563_vm3, %v1394_v46  ;;  %1459 = vst.msk [vmem:[%s3326_s3 + $0x198] sm:$0xff] %vm563_vm3, %v1395_v47  ;;  %v1334_v63 = vld [vmem:[%s3326_s3 + $0x1e8] sm:$0xff]  ;;  %v1403_v0 = vadd.f32 %v2803_v6, %v1332_v61  ;;  %v1404_v1 = vadd.f32 %v2803_v6, %v1333_v62  ;;  %v1335_v3 = vld [vmem:[%s3326_s3 + $0x1f0] sm:$0xff] }
 0x15e   : > { %1460 = vst.msk [vmem:[%s3326_s3 + $0x1a0] sm:$0xff] %vm563_vm3, %v1396_v48  ;;  %1461 = vst.msk [vmem:[%s3326_s3 + $0x1a8] sm:$0xff] %vm563_vm3, %v1397_v52  ;;  %v1405_v2 = vadd.f32 %v2803_v6, %v1334_v63  ;;  %v1336_v4 = vld [vmem:[%s3326_s3 + $0x1f8] sm:$0xff]  ;;  %v1406_v5 = vadd.f32 %v2803_v6, %v1335_v3 }
 0x15f   : > { %1462 = vst.msk [vmem:[%s3326_s3 + $0x1b0] sm:$0xff] %vm563_vm3, %v1398_v53  ;;  %1463 = vst.msk [vmem:[%s3326_s3 + $0x1b8] sm:$0xff] %vm563_vm3, %v1399_v54  ;;  %v1407_v7 = vadd.f32 %v2803_v6, %v1336_v4 }
 0x160   : > { %1464 = vst.msk [vmem:[%s3326_s3 + $0x1c0] sm:$0xff] %vm563_vm3, %v1400_v58  ;;  %1465 = vst.msk [vmem:[%s3326_s3 + $0x1c8] sm:$0xff] %vm563_vm3, %v1401_v59 }
 0x161   : > { %1466 = vst.msk [vmem:[%s3326_s3 + $0x1d0] sm:$0xff] %vm563_vm3, %v1402_v60  ;;  %1467 = vst.msk [vmem:[%s3326_s3 + $0x1d8] sm:$0xff] %vm563_vm3, %v1403_v0 }
 0x162   : > { %1468 = vst.msk [vmem:[%s3326_s3 + $0x1e0] sm:$0xff] %vm563_vm3, %v1404_v1  ;;  %1469 = vst.msk [vmem:[%s3326_s3 + $0x1e8] sm:$0xff] %vm563_vm3, %v1405_v2 }
 0x163   : > { %1470 = vst.msk [vmem:[%s3326_s3 + $0x1f0] sm:$0xff] %vm563_vm3, %v1406_v5  ;;  %1471 = vst.msk [vmem:[%s3326_s3 + $0x1f8] sm:$0xff] %vm563_vm3, %v1407_v7 }
 0x164 PF: > { %s13_s14 = sadd.s32 1, %s1830_s14   ;;  %s3327_s12 = smov %s1826_s13 }
 0x165   : > { %p10_p6 = scmp.ge.s32.totalorder %s13_s14, 5   ;;  %s3328_s13 = smov %s3330_s15 }
 0x167   :  { %12 = sbr.rel (!%p10_p6) target bundleno = 2 (0x2), region = 69 }

</bundles_post_ra>
